<compile_context>
chip_gen: v7x
topology: tpu7x:2x2x1
jax: 0.10.0
libtpu: 0.0.40
codegen_flags: <defaults>
</compile_context>

<pallas_src>
import jax
import jax.numpy as jnp
from jax import lax
from jax.experimental import pallas as pl
from jax.experimental.pallas import tpu as pltpu

NEIGH = 25   # 5x5 taps
GROUP = 5    # taps fused into one MXU matmul


def _round_up(x, m):
    return (x + m - 1) // m * m


# ---------------------------------------------------------------- kernel ----
def _vote_kernel(neg_wei_ref, idx_ref, feat_ref, stacked_ref, out_ref):
    Dp = feat_ref.shape[0]            # padded feature rows (multiple of 8)
    ncls = out_ref.shape[0]
    RCp = stacked_ref.shape[1]        # padded coarse-grid positions (mult of 128)
    TP = feat_ref.shape[1]            # query-position tile (multiple of 128)
    n_taps = idx_ref.shape[0]
    assert n_taps % GROUP == 0
    GTP = GROUP * TP

    feat = feat_ref[...]              # (Dp, TP)       f32 query features
    stacked = stacked_ref[...]        # (Dp+ncls, RCp) [upsampled feat ; labels]
    idx = idx_ref[...]                # (n_taps, TP)   int32 tap indices
    neg_wei = neg_wei_ref[0]          # scalar: -(wei / D)

    one = jnp.ones((), dtype=stacked.dtype)
    zero = jnp.zeros((), dtype=stacked.dtype)
    # hoisted once: row-id iota shared by all tap groups (value = RC row index)
    iota = lax.broadcasted_iota(jnp.int32, (RCp, GTP), 0)

    vote = jnp.zeros((ncls, TP), jnp.float32)
    dsum = jnp.zeros((1, TP), jnp.float32)

    for g in range(n_taps // GROUP):
        # GROUP tap-index rows laid side by side along lanes: (1, GROUP*TP).
        # Only ~GROUP*TP ints are copied here (not GROUP one-hot matrices).
        idx_wide = jnp.concatenate(
            [idx[g * GROUP + u][None, :] for u in range(GROUP)], axis=1)
        # GROUP one-hot gather matrices built on the fly (0/1 exact in bf16)
        oh = jnp.where(iota == idx_wide, one, zero)            # (RCp, GROUP*TP)
        # one MXU matmul gathers feature taps (rows [:Dp]) and label taps ([Dp:])
        gath = jnp.dot(stacked, oh, preferred_element_type=jnp.float32)
        for u in range(GROUP):
            gu = gath[:, u * TP:(u + 1) * TP]                  # (Dp+ncls, TP)
            diff = gu[:Dp] - feat
            ssq = jnp.sum(diff * diff, axis=0, keepdims=True)  # (1, TP)
            dist = jnp.exp(neg_wei * ssq)                      # EUP exp
            vote = vote + gu[Dp:] * dist
            dsum = dsum + dist

    inv = pl.reciprocal(jnp.maximum(dsum, 1e-15), approx=True)  # EUP recip
    out_ref[...] = vote * inv


# ---------------------------------------------------------------- glue ------
def _bilinear_matrix(out_size, in_size):
    """Row-interp matrix matching torch.nn.Upsample(bilinear, align_corners=False)."""
    scale = in_size / out_size
    dst = jnp.arange(out_size, dtype=jnp.float32)
    src = jnp.maximum((dst + 0.5) * scale - 0.5, 0.0)
    x0 = jnp.clip(jnp.floor(src).astype(jnp.int32), 0, in_size - 1)
    x1 = jnp.clip(x0 + 1, 0, in_size - 1)
    lam = src - x0.astype(jnp.float32)
    rows = jnp.arange(out_size)
    W = jnp.zeros((out_size, in_size), dtype=jnp.float32)
    W = W.at[rows, x0].add(1.0 - lam)
    W = W.at[rows, x1].add(lam)
    return W


def inter_feat_linear(grid_inte, grid, feat, lbs, wei, *,
                      tile_p=512, gather_dtype=jnp.bfloat16):
    # tile_p guidance: raise to 1024-2048 on v6e (128 MiB VMEM, 1 TC) for large
    # P; keep 256-384 on v7x (64 MiB VMEM, 2 TCs) when r*c is large.
    N, D, r_in, c_in = feat.shape
    _, r, c, _ = grid.shape
    ncls = lbs.shape[1]
    assert N == 1, "reference module's broadcasting only works for N == 1"
    assert r >= 3 and c >= 3, "grid spacing is read from grid[0,2,2]/[0,1,2]/[0,2,1]"
    P = r_in * c_in
    RC = r * c

    # grid spacing (scalars)
    gX = grid[0, 2, 2, 0] - grid[0, 1, 2, 0]
    gY = grid[0, 2, 2, 1] - grid[0, 2, 1, 1]

    # ---- hoisted bilinear upsample (plain XLA matmuls, NOT inside the kernel) -
    Wr = _bilinear_matrix(r, r_in)
    Wc = _bilinear_matrix(c, c_in)
    feat_grid = jnp.einsum('ap,dpq,bq->dab', Wr,
                           feat[0].astype(jnp.float32), Wc).reshape(D, RC)

    # ---- 25 int32 tap-index rows (replaces any one-hot HBM stream) -----------
    rp0 = jnp.floor(grid_inte[0, :, :, 0] / gX)
    rp1 = jnp.floor(grid_inte[0, :, :, 1] / gY)
    offs = jnp.arange(-2.0, 3.0, dtype=jnp.float32)                 # (5,)
    rows = jnp.clip(rp0[None] + offs[:, None, None], 0.0, r - 1)    # (5, r_in, c_in)
    cols = jnp.clip(rp1[None] + offs[:, None, None], 0.0, c - 1)    # (5, r_in, c_in)
    idx = (rows[:, None] * c + cols[None, :]).astype(jnp.int32)     # (5, 5, r_in, c_in)
    idx = idx.reshape(NEIGH, P)

    # ---- padding / tiling: lane-dense P, sublane-aligned D, lane-aligned RC --
    D_pad = _round_up(D, 8)
    RC_pad = _round_up(RC, 128)
    tile_p = max(128, _round_up(tile_p, 128))
    # aim for >=2 grid steps so ("parallel",) shards P tiles across both
    # TensorCores on v7x (harmless on single-TC v5e/v6e)
    half = _round_up(max(_round_up(P, 128) // 2, 128), 128)
    TP = min(tile_p, half)
    P_pad = _round_up(P, TP)
    grid_steps = P_pad // TP

    feat_flat = jnp.pad(feat.reshape(D, P).astype(jnp.float32),
                        ((0, D_pad - D), (0, P_pad - P)))           # (D_pad, P_pad) f32
    stacked = jnp.concatenate(
        [jnp.pad(feat_grid, ((0, D_pad - D), (0, RC_pad - RC))),
         jnp.pad(lbs.reshape(ncls, RC).astype(jnp.float32),
                 ((0, 0), (0, RC_pad - RC)))],
        axis=0).astype(gather_dtype)                                # (D_pad+ncls, RC_pad)
    idx_pad = jnp.pad(idx, ((0, 0), (0, P_pad - P)))                # (NEIGH, P_pad) int32
    neg_wei = (-jnp.asarray(wei, jnp.float32) / D).reshape(1)       # -(wei / D)

    def call(single_buffer_stacked):
        stacked_kwargs = {}
        if single_buffer_stacked:
            # grid-invariant block: fetch once, keep a single VMEM buffer
            stacked_kwargs["pipeline_mode"] = pl.Buffered(buffer_count=1)
        return pl.pallas_call(
            _vote_kernel,
            out_shape=jax.ShapeDtypeStruct((ncls, P_pad), jnp.float32),
            grid_spec=pltpu.PrefetchScalarGridSpec(
                num_scalar_prefetch=0,
                grid=(grid_steps,),
                in_specs=[
                    pl.BlockSpec(memory_space=pltpu.MemorySpace.SMEM),   # -(wei/D)
                    pl.BlockSpec((NEIGH, TP), lambda p: (0, p)),         # tap indices
                    pl.BlockSpec((D_pad, TP), lambda p: (0, p)),         # query feat
                    pl.BlockSpec((D_pad + ncls, RC_pad), lambda p: (0, 0),
                                 **stacked_kwargs),                      # feat_grid | lbs
                ],
                out_specs=pl.BlockSpec((ncls, TP), lambda p: (0, p)),
            ),
            compiler_params=pltpu.CompilerParams(
                dimension_semantics=("parallel",),        # megacore over P tiles
                vmem_limit_bytes=64 * 1024 * 1024,        # raise above 16/32 MiB defaults
            ),
        )(neg_wei, idx_pad, feat_flat, stacked)

    try:
        out = jax.block_until_ready(call(single_buffer_stacked=True))
    except Exception:
        # pipeline_mode=pl.Buffered(1) unsupported on this jax version:
        # fall back to the (correct, just double-buffered) default pipeline.
        out = call(single_buffer_stacked=False)

    return out[:, :P].reshape(N, ncls, r_in, c_in)


# ------------------------------------------------------- pure-JAX reference -
def _reference(grid_inte, grid, feat, lbs, wei):
    N, D, r_in, c_in = feat.shape
    _, r, c, _ = grid.shape
    ncls = lbs.shape[1]
    gX = grid[0, 2, 2, 0] - grid[0, 1, 2, 0]
    gY = grid[0, 2, 2, 1] - grid[0, 2, 1, 1]
    Wr = _bilinear_matrix(r, r_in)
    Wc = _bilinear_matrix(c, c_in)
    feat_grid = jnp.einsum('ap,ndpq,bq->ndab', Wr, feat, Wc).reshape(N, D, r * c)
    rp0 = jnp.floor(grid_inte[0, :, :, 0] / gX)
    rp1 = jnp.floor(grid_inte[0, :, :, 1] / gY)
    lbs_f = lbs.reshape(N, ncls, -1)
    feat_f = feat.reshape(N, D, -1)
    vote = jnp.zeros((N, ncls, r_in * c_in), jnp.float32)
    dsum = jnp.zeros((N, r_in * c_in), jnp.float32)
    for i in range(-2, 3):
        for j in range(-2, 3):
            idx = (jnp.clip(rp0 + i, 0.0, r - 1) * c
                   + jnp.clip(rp1 + j, 0.0, c - 1)).astype(jnp.int32).reshape(-1)
            fg = feat_grid[:, :, idx]
            lc = lbs_f[:, :, idx]
            dist = jnp.exp(-wei * jnp.mean((fg - feat_f) ** 2, axis=1))
            vote = vote + lc * dist[:, None, :]
            dsum = dsum + dist
    return (vote / jnp.maximum(dsum[:, None, :], 1e-15)).reshape(N, ncls, r_in, c_in)


# ---------------------------------------------------------------- main ------
if __name__ == "__main__":
    key = jax.random.PRNGKey(0)
    k1, k2, k3 = jax.random.split(key, 3)

    N, D, ncls = 1, 8, 4
    r_in, c_in = 8, 8      # query/intermediate resolution (feat, grid_inte)
    r, c = 16, 16          # coarse label/grid resolution (grid, lbs)

    feat = jax.random.normal(k1, (N, D, r_in, c_in), dtype=jnp.float32)
    lbs = jax.nn.softmax(
        jax.random.normal(k2, (N, ncls, r, c), dtype=jnp.float32), axis=1)

    # regular coarse grid: channel 0 varies along rows, channel 1 along cols
    ys = jnp.arange(r, dtype=jnp.float32)
    xs = jnp.arange(c, dtype=jnp.float32)
    grid = jnp.stack(jnp.meshgrid(ys, xs, indexing='ij'), axis=-1)[None]       # (1,r,c,2)

    # intermediate query positions spanning the same extent, with jitter
    yi = jnp.arange(r_in, dtype=jnp.float32) * (r / r_in)
    xi = jnp.arange(c_in, dtype=jnp.float32) * (c / c_in)
    grid_inte = jnp.stack(jnp.meshgrid(yi, xi, indexing='ij'), axis=-1)[None]  # (1,r_in,c_in,2)
    grid_inte = grid_inte + 0.3 * jax.random.uniform(k3, grid_inte.shape,
                                                     dtype=jnp.float32)
    wei = 0.5

    ref = _reference(grid_inte, grid, feat, lbs, wei)

    # exact-precision path: validates the gather / vote structure tightly
    # (tolerance only accounts for the approx EUP reciprocal + f32 MXU path)
    out_f32 = inter_feat_linear(grid_inte, grid, feat, lbs, wei,
                                gather_dtype=jnp.float32)
    out_f32 = jax.block_until_ready(out_f32)
    assert out_f32.shape == (N, ncls, r_in, c_in)
    assert bool(jnp.all(jnp.isfinite(out_f32)))
    err32 = float(jnp.max(jnp.abs(out_f32 - ref)))
    assert bool(jnp.allclose(out_f32, ref, atol=5e-3, rtol=5e-3)), err32

    # default fast path: bf16 one-hot gather (one-hots are exact; feat_grid /
    # labels carry ~2^-8 relative rounding -> relaxed tolerance)
    out = inter_feat_linear(grid_inte, grid, feat, lbs, wei)
    out = jax.block_until_ready(out)
    assert out.shape == (N, ncls, r_in, c_in)
    assert bool(jnp.all(jnp.isfinite(out)))
    errbf = float(jnp.max(jnp.abs(out - ref)))
    assert bool(jnp.allclose(out, ref, atol=2e-2, rtol=2e-2)), errbf

    print("KERNEL_OK")
</pallas_src>

<mosaic_0001>
module attributes {stable_mosaic.version = 11 : i64} {
  func.func @_vote_kernel(%arg0: i32, %arg1: memref<1xf32, #tpu.memory_space<smem>>, %arg2: memref<25x128xi32, #tpu.memory_space<vmem>>, %arg3: memref<8x128xf32, #tpu.memory_space<vmem>>, %arg4: memref<12x256xf32, #tpu.memory_space<vmem>>, %arg5: memref<4x128xf32, #tpu.memory_space<vmem>>) attributes {dimension_semantics = [#tpu.dimension_semantics<parallel>], iteration_bounds = array<i64: 1>, scalar_prefetch = 0 : i64, scratch_operands = 0 : i64, tpu.core_type = #tpu.core_type<tc>, window_params = [{transform_indices = @transform_0, window_bounds = array<i64: 1>}, {transform_indices = @transform_1, window_bounds = array<i64: 25, 128>}, {transform_indices = @transform_2, window_bounds = array<i64: 8, 128>}, {pipeline_mode = #tpu.pipeline_mode<synchronous>, transform_indices = @transform_3, window_bounds = array<i64: 12, 256>}, {transform_indices = @transform_4, window_bounds = array<i64: 4, 128>}]} {
    %c0 = arith.constant 0 : index
    %c0_0 = arith.constant 0 : index
    %0 = vector.load %arg3[%c0, %c0_0] : memref<8x128xf32, #tpu.memory_space<vmem>>, vector<8x128xf32>
    %c0_1 = arith.constant 0 : index
    %c0_2 = arith.constant 0 : index
    %1 = vector.load %arg4[%c0_1, %c0_2] : memref<12x256xf32, #tpu.memory_space<vmem>>, vector<12x256xf32>
    %c0_3 = arith.constant 0 : index
    %c0_4 = arith.constant 0 : index
    %2 = vector.load %arg2[%c0_3, %c0_4] : memref<25x128xi32, #tpu.memory_space<vmem>>, vector<25x128xi32>
    %c0_5 = arith.constant 0 : index
    %3 = memref.load %arg1[%c0_5] : memref<1xf32, #tpu.memory_space<smem>>
    %4 = tpu.iota {dimensions = array<i32: 0>} : vector<256x640xi32>
    %cst = arith.constant 0.000000e+00 : f32
    %5 = vector.broadcast %cst : f32 to vector<4x128xf32>
    %cst_6 = arith.constant 0.000000e+00 : f32
    %6 = vector.broadcast %cst_6 : f32 to vector<1x128xf32>
    %7 = vector.extract_strided_slice %2 {offsets = [0, 0], sizes = [1, 128], strides = [1, 1]} : vector<25x128xi32> to vector<1x128xi32>
    %8 = vector.shape_cast %7 : vector<1x128xi32> to vector<128xi32>
    %9 = vector.shape_cast %8 : vector<128xi32> to vector<1x128xi32>
    %10 = vector.extract_strided_slice %2 {offsets = [1, 0], sizes = [1, 128], strides = [1, 1]} : vector<25x128xi32> to vector<1x128xi32>
    %11 = vector.shape_cast %10 : vector<1x128xi32> to vector<128xi32>
    %12 = vector.shape_cast %11 : vector<128xi32> to vector<1x128xi32>
    %13 = vector.extract_strided_slice %2 {offsets = [2, 0], sizes = [1, 128], strides = [1, 1]} : vector<25x128xi32> to vector<1x128xi32>
    %14 = vector.shape_cast %13 : vector<1x128xi32> to vector<128xi32>
    %15 = vector.shape_cast %14 : vector<128xi32> to vector<1x128xi32>
    %16 = vector.extract_strided_slice %2 {offsets = [3, 0], sizes = [1, 128], strides = [1, 1]} : vector<25x128xi32> to vector<1x128xi32>
    %17 = vector.shape_cast %16 : vector<1x128xi32> to vector<128xi32>
    %18 = vector.shape_cast %17 : vector<128xi32> to vector<1x128xi32>
    %19 = vector.extract_strided_slice %2 {offsets = [4, 0], sizes = [1, 128], strides = [1, 1]} : vector<25x128xi32> to vector<1x128xi32>
    %20 = vector.shape_cast %19 : vector<1x128xi32> to vector<128xi32>
    %21 = vector.shape_cast %20 : vector<128xi32> to vector<1x128xi32>
    %22 = tpu.concatenate %9, %12, %15, %18, %21 in 1 : vector<1x128xi32>, vector<1x128xi32>, vector<1x128xi32>, vector<1x128xi32>, vector<1x128xi32> -> vector<1x640xi32>
    %23 = vector.broadcast %22 : vector<1x640xi32> to vector<256x640xi32>
    %24 = arith.cmpi eq, %4, %23 : vector<256x640xi32>
    %cst_7 = arith.constant 1.000000e+00 : f32
    %cst_8 = arith.constant 0.000000e+00 : f32
    %25 = vector.broadcast %cst_7 : f32 to vector<256x640xf32>
    %26 = vector.broadcast %cst_8 : f32 to vector<256x640xf32>
    %27 = arith.select %24, %25, %26 : vector<256x640xi1>, vector<256x640xf32>
    %cst_9 = arith.constant dense<0.000000e+00> : vector<12x640xf32>
    %28 = tpu.matmul %1, %27, %cst_9 {dimension_numbers = #tpu.dot_dimension_numbers<[1], [0], [0], [1], [0, 0, 1, 1], [], []>} : vector<12x256xf32>, vector<256x640xf32>, vector<12x640xf32> -> vector<12x640xf32>
    %29 = vector.extract_strided_slice %28 {offsets = [0, 0], sizes = [12, 128], strides = [1, 1]} : vector<12x640xf32> to vector<12x128xf32>
    %30 = vector.extract_strided_slice %29 {offsets = [0, 0], sizes = [8, 128], strides = [1, 1]} : vector<12x128xf32> to vector<8x128xf32>
    %31 = arith.subf %30, %0 : vector<8x128xf32>
    %32 = arith.mulf %31, %31 : vector<8x128xf32>
    %cst_10 = arith.constant dense<0.000000e+00> : vector<128xf32>
    %33 = vector.multi_reduction <add>, %32, %cst_10 [0] : vector<8x128xf32> to vector<128xf32>
    %34 = vector.shape_cast %33 : vector<128xf32> to vector<1x128xf32>
    %35 = vector.broadcast %3 : f32 to vector<1x128xf32>
    %36 = arith.mulf %35, %34 : vector<1x128xf32>
    %37 = math.exp %36 : vector<1x128xf32>
    %38 = vector.extract_strided_slice %29 {offsets = [8, 0], sizes = [4, 128], strides = [1, 1]} : vector<12x128xf32> to vector<4x128xf32>
    %39 = vector.broadcast %37 : vector<1x128xf32> to vector<4x128xf32>
    %40 = arith.mulf %38, %39 : vector<4x128xf32>
    %41 = arith.addf %5, %40 : vector<4x128xf32>
    %42 = arith.addf %6, %37 : vector<1x128xf32>
    %43 = vector.extract_strided_slice %28 {offsets = [0, 128], sizes = [12, 128], strides = [1, 1]} : vector<12x640xf32> to vector<12x128xf32>
    %44 = vector.extract_strided_slice %43 {offsets = [0, 0], sizes = [8, 128], strides = [1, 1]} : vector<12x128xf32> to vector<8x128xf32>
    %45 = arith.subf %44, %0 : vector<8x128xf32>
    %46 = arith.mulf %45, %45 : vector<8x128xf32>
    %cst_11 = arith.constant dense<0.000000e+00> : vector<128xf32>
    %47 = vector.multi_reduction <add>, %46, %cst_11 [0] : vector<8x128xf32> to vector<128xf32>
    %48 = vector.shape_cast %47 : vector<128xf32> to vector<1x128xf32>
    %49 = vector.broadcast %3 : f32 to vector<1x128xf32>
    %50 = arith.mulf %49, %48 : vector<1x128xf32>
    %51 = math.exp %50 : vector<1x128xf32>
    %52 = vector.extract_strided_slice %43 {offsets = [8, 0], sizes = [4, 128], strides = [1, 1]} : vector<12x128xf32> to vector<4x128xf32>
    %53 = vector.broadcast %51 : vector<1x128xf32> to vector<4x128xf32>
    %54 = arith.mulf %52, %53 : vector<4x128xf32>
    %55 = arith.addf %41, %54 : vector<4x128xf32>
    %56 = arith.addf %42, %51 : vector<1x128xf32>
    %57 = vector.extract_strided_slice %28 {offsets = [0, 256], sizes = [12, 128], strides = [1, 1]} : vector<12x640xf32> to vector<12x128xf32>
    %58 = vector.extract_strided_slice %57 {offsets = [0, 0], sizes = [8, 128], strides = [1, 1]} : vector<12x128xf32> to vector<8x128xf32>
    %59 = arith.subf %58, %0 : vector<8x128xf32>
    %60 = arith.mulf %59, %59 : vector<8x128xf32>
    %cst_12 = arith.constant dense<0.000000e+00> : vector<128xf32>
    %61 = vector.multi_reduction <add>, %60, %cst_12 [0] : vector<8x128xf32> to vector<128xf32>
    %62 = vector.shape_cast %61 : vector<128xf32> to vector<1x128xf32>
    %63 = vector.broadcast %3 : f32 to vector<1x128xf32>
    %64 = arith.mulf %63, %62 : vector<1x128xf32>
    %65 = math.exp %64 : vector<1x128xf32>
    %66 = vector.extract_strided_slice %57 {offsets = [8, 0], sizes = [4, 128], strides = [1, 1]} : vector<12x128xf32> to vector<4x128xf32>
    %67 = vector.broadcast %65 : vector<1x128xf32> to vector<4x128xf32>
    %68 = arith.mulf %66, %67 : vector<4x128xf32>
    %69 = arith.addf %55, %68 : vector<4x128xf32>
    %70 = arith.addf %56, %65 : vector<1x128xf32>
    %71 = vector.extract_strided_slice %28 {offsets = [0, 384], sizes = [12, 128], strides = [1, 1]} : vector<12x640xf32> to vector<12x128xf32>
    %72 = vector.extract_strided_slice %71 {offsets = [0, 0], sizes = [8, 128], strides = [1, 1]} : vector<12x128xf32> to vector<8x128xf32>
    %73 = arith.subf %72, %0 : vector<8x128xf32>
    %74 = arith.mulf %73, %73 : vector<8x128xf32>
    %cst_13 = arith.constant dense<0.000000e+00> : vector<128xf32>
    %75 = vector.multi_reduction <add>, %74, %cst_13 [0] : vector<8x128xf32> to vector<128xf32>
    %76 = vector.shape_cast %75 : vector<128xf32> to vector<1x128xf32>
    %77 = vector.broadcast %3 : f32 to vector<1x128xf32>
    %78 = arith.mulf %77, %76 : vector<1x128xf32>
    %79 = math.exp %78 : vector<1x128xf32>
    %80 = vector.extract_strided_slice %71 {offsets = [8, 0], sizes = [4, 128], strides = [1, 1]} : vector<12x128xf32> to vector<4x128xf32>
    %81 = vector.broadcast %79 : vector<1x128xf32> to vector<4x128xf32>
    %82 = arith.mulf %80, %81 : vector<4x128xf32>
    %83 = arith.addf %69, %82 : vector<4x128xf32>
    %84 = arith.addf %70, %79 : vector<1x128xf32>
    %85 = vector.extract_strided_slice %28 {offsets = [0, 512], sizes = [12, 128], strides = [1, 1]} : vector<12x640xf32> to vector<12x128xf32>
    %86 = vector.extract_strided_slice %85 {offsets = [0, 0], sizes = [8, 128], strides = [1, 1]} : vector<12x128xf32> to vector<8x128xf32>
    %87 = arith.subf %86, %0 : vector<8x128xf32>
    %88 = arith.mulf %87, %87 : vector<8x128xf32>
    %cst_14 = arith.constant dense<0.000000e+00> : vector<128xf32>
    %89 = vector.multi_reduction <add>, %88, %cst_14 [0] : vector<8x128xf32> to vector<128xf32>
    %90 = vector.shape_cast %89 : vector<128xf32> to vector<1x128xf32>
    %91 = vector.broadcast %3 : f32 to vector<1x128xf32>
    %92 = arith.mulf %91, %90 : vector<1x128xf32>
    %93 = math.exp %92 : vector<1x128xf32>
    %94 = vector.extract_strided_slice %85 {offsets = [8, 0], sizes = [4, 128], strides = [1, 1]} : vector<12x128xf32> to vector<4x128xf32>
    %95 = vector.broadcast %93 : vector<1x128xf32> to vector<4x128xf32>
    %96 = arith.mulf %94, %95 : vector<4x128xf32>
    %97 = arith.addf %83, %96 : vector<4x128xf32>
    %98 = arith.addf %84, %93 : vector<1x128xf32>
    %99 = vector.extract_strided_slice %2 {offsets = [5, 0], sizes = [1, 128], strides = [1, 1]} : vector<25x128xi32> to vector<1x128xi32>
    %100 = vector.shape_cast %99 : vector<1x128xi32> to vector<128xi32>
    %101 = vector.shape_cast %100 : vector<128xi32> to vector<1x128xi32>
    %102 = vector.extract_strided_slice %2 {offsets = [6, 0], sizes = [1, 128], strides = [1, 1]} : vector<25x128xi32> to vector<1x128xi32>
    %103 = vector.shape_cast %102 : vector<1x128xi32> to vector<128xi32>
    %104 = vector.shape_cast %103 : vector<128xi32> to vector<1x128xi32>
    %105 = vector.extract_strided_slice %2 {offsets = [7, 0], sizes = [1, 128], strides = [1, 1]} : vector<25x128xi32> to vector<1x128xi32>
    %106 = vector.shape_cast %105 : vector<1x128xi32> to vector<128xi32>
    %107 = vector.shape_cast %106 : vector<128xi32> to vector<1x128xi32>
    %108 = vector.extract_strided_slice %2 {offsets = [8, 0], sizes = [1, 128], strides = [1, 1]} : vector<25x128xi32> to vector<1x128xi32>
    %109 = vector.shape_cast %108 : vector<1x128xi32> to vector<128xi32>
    %110 = vector.shape_cast %109 : vector<128xi32> to vector<1x128xi32>
    %111 = vector.extract_strided_slice %2 {offsets = [9, 0], sizes = [1, 128], strides = [1, 1]} : vector<25x128xi32> to vector<1x128xi32>
    %112 = vector.shape_cast %111 : vector<1x128xi32> to vector<128xi32>
    %113 = vector.shape_cast %112 : vector<128xi32> to vector<1x128xi32>
    %114 = tpu.concatenate %101, %104, %107, %110, %113 in 1 : vector<1x128xi32>, vector<1x128xi32>, vector<1x128xi32>, vector<1x128xi32>, vector<1x128xi32> -> vector<1x640xi32>
    %115 = vector.broadcast %114 : vector<1x640xi32> to vector<256x640xi32>
    %116 = arith.cmpi eq, %4, %115 : vector<256x640xi32>
    %cst_15 = arith.constant 1.000000e+00 : f32
    %cst_16 = arith.constant 0.000000e+00 : f32
    %117 = vector.broadcast %cst_15 : f32 to vector<256x640xf32>
    %118 = vector.broadcast %cst_16 : f32 to vector<256x640xf32>
    %119 = arith.select %116, %117, %118 : vector<256x640xi1>, vector<256x640xf32>
    %cst_17 = arith.constant dense<0.000000e+00> : vector<12x640xf32>
    %120 = tpu.matmul %1, %119, %cst_17 {dimension_numbers = #tpu.dot_dimension_numbers<[1], [0], [0], [1], [0, 0, 1, 1], [], []>} : vector<12x256xf32>, vector<256x640xf32>, vector<12x640xf32> -> vector<12x640xf32>
    %121 = vector.extract_strided_slice %120 {offsets = [0, 0], sizes = [12, 128], strides = [1, 1]} : vector<12x640xf32> to vector<12x128xf32>
    %122 = vector.extract_strided_slice %121 {offsets = [0, 0], sizes = [8, 128], strides = [1, 1]} : vector<12x128xf32> to vector<8x128xf32>
    %123 = arith.subf %122, %0 : vector<8x128xf32>
    %124 = arith.mulf %123, %123 : vector<8x128xf32>
    %cst_18 = arith.constant dense<0.000000e+00> : vector<128xf32>
    %125 = vector.multi_reduction <add>, %124, %cst_18 [0] : vector<8x128xf32> to vector<128xf32>
    %126 = vector.shape_cast %125 : vector<128xf32> to vector<1x128xf32>
    %127 = vector.broadcast %3 : f32 to vector<1x128xf32>
    %128 = arith.mulf %127, %126 : vector<1x128xf32>
    %129 = math.exp %128 : vector<1x128xf32>
    %130 = vector.extract_strided_slice %121 {offsets = [8, 0], sizes = [4, 128], strides = [1, 1]} : vector<12x128xf32> to vector<4x128xf32>
    %131 = vector.broadcast %129 : vector<1x128xf32> to vector<4x128xf32>
    %132 = arith.mulf %130, %131 : vector<4x128xf32>
    %133 = arith.addf %97, %132 : vector<4x128xf32>
    %134 = arith.addf %98, %129 : vector<1x128xf32>
    %135 = vector.extract_strided_slice %120 {offsets = [0, 128], sizes = [12, 128], strides = [1, 1]} : vector<12x640xf32> to vector<12x128xf32>
    %136 = vector.extract_strided_slice %135 {offsets = [0, 0], sizes = [8, 128], strides = [1, 1]} : vector<12x128xf32> to vector<8x128xf32>
    %137 = arith.subf %136, %0 : vector<8x128xf32>
    %138 = arith.mulf %137, %137 : vector<8x128xf32>
    %cst_19 = arith.constant dense<0.000000e+00> : vector<128xf32>
    %139 = vector.multi_reduction <add>, %138, %cst_19 [0] : vector<8x128xf32> to vector<128xf32>
    %140 = vector.shape_cast %139 : vector<128xf32> to vector<1x128xf32>
    %141 = vector.broadcast %3 : f32 to vector<1x128xf32>
    %142 = arith.mulf %141, %140 : vector<1x128xf32>
    %143 = math.exp %142 : vector<1x128xf32>
    %144 = vector.extract_strided_slice %135 {offsets = [8, 0], sizes = [4, 128], strides = [1, 1]} : vector<12x128xf32> to vector<4x128xf32>
    %145 = vector.broadcast %143 : vector<1x128xf32> to vector<4x128xf32>
    %146 = arith.mulf %144, %145 : vector<4x128xf32>
    %147 = arith.addf %133, %146 : vector<4x128xf32>
    %148 = arith.addf %134, %143 : vector<1x128xf32>
    %149 = vector.extract_strided_slice %120 {offsets = [0, 256], sizes = [12, 128], strides = [1, 1]} : vector<12x640xf32> to vector<12x128xf32>
    %150 = vector.extract_strided_slice %149 {offsets = [0, 0], sizes = [8, 128], strides = [1, 1]} : vector<12x128xf32> to vector<8x128xf32>
    %151 = arith.subf %150, %0 : vector<8x128xf32>
    %152 = arith.mulf %151, %151 : vector<8x128xf32>
    %cst_20 = arith.constant dense<0.000000e+00> : vector<128xf32>
    %153 = vector.multi_reduction <add>, %152, %cst_20 [0] : vector<8x128xf32> to vector<128xf32>
    %154 = vector.shape_cast %153 : vector<128xf32> to vector<1x128xf32>
    %155 = vector.broadcast %3 : f32 to vector<1x128xf32>
    %156 = arith.mulf %155, %154 : vector<1x128xf32>
    %157 = math.exp %156 : vector<1x128xf32>
    %158 = vector.extract_strided_slice %149 {offsets = [8, 0], sizes = [4, 128], strides = [1, 1]} : vector<12x128xf32> to vector<4x128xf32>
    %159 = vector.broadcast %157 : vector<1x128xf32> to vector<4x128xf32>
    %160 = arith.mulf %158, %159 : vector<4x128xf32>
    %161 = arith.addf %147, %160 : vector<4x128xf32>
    %162 = arith.addf %148, %157 : vector<1x128xf32>
    %163 = vector.extract_strided_slice %120 {offsets = [0, 384], sizes = [12, 128], strides = [1, 1]} : vector<12x640xf32> to vector<12x128xf32>
    %164 = vector.extract_strided_slice %163 {offsets = [0, 0], sizes = [8, 128], strides = [1, 1]} : vector<12x128xf32> to vector<8x128xf32>
    %165 = arith.subf %164, %0 : vector<8x128xf32>
    %166 = arith.mulf %165, %165 : vector<8x128xf32>
    %cst_21 = arith.constant dense<0.000000e+00> : vector<128xf32>
    %167 = vector.multi_reduction <add>, %166, %cst_21 [0] : vector<8x128xf32> to vector<128xf32>
    %168 = vector.shape_cast %167 : vector<128xf32> to vector<1x128xf32>
    %169 = vector.broadcast %3 : f32 to vector<1x128xf32>
    %170 = arith.mulf %169, %168 : vector<1x128xf32>
    %171 = math.exp %170 : vector<1x128xf32>
    %172 = vector.extract_strided_slice %163 {offsets = [8, 0], sizes = [4, 128], strides = [1, 1]} : vector<12x128xf32> to vector<4x128xf32>
    %173 = vector.broadcast %171 : vector<1x128xf32> to vector<4x128xf32>
    %174 = arith.mulf %172, %173 : vector<4x128xf32>
    %175 = arith.addf %161, %174 : vector<4x128xf32>
    %176 = arith.addf %162, %171 : vector<1x128xf32>
    %177 = vector.extract_strided_slice %120 {offsets = [0, 512], sizes = [12, 128], strides = [1, 1]} : vector<12x640xf32> to vector<12x128xf32>
    %178 = vector.extract_strided_slice %177 {offsets = [0, 0], sizes = [8, 128], strides = [1, 1]} : vector<12x128xf32> to vector<8x128xf32>
    %179 = arith.subf %178, %0 : vector<8x128xf32>
    %180 = arith.mulf %179, %179 : vector<8x128xf32>
    %cst_22 = arith.constant dense<0.000000e+00> : vector<128xf32>
    %181 = vector.multi_reduction <add>, %180, %cst_22 [0] : vector<8x128xf32> to vector<128xf32>
    %182 = vector.shape_cast %181 : vector<128xf32> to vector<1x128xf32>
    %183 = vector.broadcast %3 : f32 to vector<1x128xf32>
    %184 = arith.mulf %183, %182 : vector<1x128xf32>
    %185 = math.exp %184 : vector<1x128xf32>
    %186 = vector.extract_strided_slice %177 {offsets = [8, 0], sizes = [4, 128], strides = [1, 1]} : vector<12x128xf32> to vector<4x128xf32>
    %187 = vector.broadcast %185 : vector<1x128xf32> to vector<4x128xf32>
    %188 = arith.mulf %186, %187 : vector<4x128xf32>
    %189 = arith.addf %175, %188 : vector<4x128xf32>
    %190 = arith.addf %176, %185 : vector<1x128xf32>
    %191 = vector.extract_strided_slice %2 {offsets = [10, 0], sizes = [1, 128], strides = [1, 1]} : vector<25x128xi32> to vector<1x128xi32>
    %192 = vector.shape_cast %191 : vector<1x128xi32> to vector<128xi32>
    %193 = vector.shape_cast %192 : vector<128xi32> to vector<1x128xi32>
    %194 = vector.extract_strided_slice %2 {offsets = [11, 0], sizes = [1, 128], strides = [1, 1]} : vector<25x128xi32> to vector<1x128xi32>
    %195 = vector.shape_cast %194 : vector<1x128xi32> to vector<128xi32>
    %196 = vector.shape_cast %195 : vector<128xi32> to vector<1x128xi32>
    %197 = vector.extract_strided_slice %2 {offsets = [12, 0], sizes = [1, 128], strides = [1, 1]} : vector<25x128xi32> to vector<1x128xi32>
    %198 = vector.shape_cast %197 : vector<1x128xi32> to vector<128xi32>
    %199 = vector.shape_cast %198 : vector<128xi32> to vector<1x128xi32>
    %200 = vector.extract_strided_slice %2 {offsets = [13, 0], sizes = [1, 128], strides = [1, 1]} : vector<25x128xi32> to vector<1x128xi32>
    %201 = vector.shape_cast %200 : vector<1x128xi32> to vector<128xi32>
    %202 = vector.shape_cast %201 : vector<128xi32> to vector<1x128xi32>
    %203 = vector.extract_strided_slice %2 {offsets = [14, 0], sizes = [1, 128], strides = [1, 1]} : vector<25x128xi32> to vector<1x128xi32>
    %204 = vector.shape_cast %203 : vector<1x128xi32> to vector<128xi32>
    %205 = vector.shape_cast %204 : vector<128xi32> to vector<1x128xi32>
    %206 = tpu.concatenate %193, %196, %199, %202, %205 in 1 : vector<1x128xi32>, vector<1x128xi32>, vector<1x128xi32>, vector<1x128xi32>, vector<1x128xi32> -> vector<1x640xi32>
    %207 = vector.broadcast %206 : vector<1x640xi32> to vector<256x640xi32>
    %208 = arith.cmpi eq, %4, %207 : vector<256x640xi32>
    %cst_23 = arith.constant 1.000000e+00 : f32
    %cst_24 = arith.constant 0.000000e+00 : f32
    %209 = vector.broadcast %cst_23 : f32 to vector<256x640xf32>
    %210 = vector.broadcast %cst_24 : f32 to vector<256x640xf32>
    %211 = arith.select %208, %209, %210 : vector<256x640xi1>, vector<256x640xf32>
    %cst_25 = arith.constant dense<0.000000e+00> : vector<12x640xf32>
    %212 = tpu.matmul %1, %211, %cst_25 {dimension_numbers = #tpu.dot_dimension_numbers<[1], [0], [0], [1], [0, 0, 1, 1], [], []>} : vector<12x256xf32>, vector<256x640xf32>, vector<12x640xf32> -> vector<12x640xf32>
    %213 = vector.extract_strided_slice %212 {offsets = [0, 0], sizes = [12, 128], strides = [1, 1]} : vector<12x640xf32> to vector<12x128xf32>
    %214 = vector.extract_strided_slice %213 {offsets = [0, 0], sizes = [8, 128], strides = [1, 1]} : vector<12x128xf32> to vector<8x128xf32>
    %215 = arith.subf %214, %0 : vector<8x128xf32>
    %216 = arith.mulf %215, %215 : vector<8x128xf32>
    %cst_26 = arith.constant dense<0.000000e+00> : vector<128xf32>
    %217 = vector.multi_reduction <add>, %216, %cst_26 [0] : vector<8x128xf32> to vector<128xf32>
    %218 = vector.shape_cast %217 : vector<128xf32> to vector<1x128xf32>
    %219 = vector.broadcast %3 : f32 to vector<1x128xf32>
    %220 = arith.mulf %219, %218 : vector<1x128xf32>
    %221 = math.exp %220 : vector<1x128xf32>
    %222 = vector.extract_strided_slice %213 {offsets = [8, 0], sizes = [4, 128], strides = [1, 1]} : vector<12x128xf32> to vector<4x128xf32>
    %223 = vector.broadcast %221 : vector<1x128xf32> to vector<4x128xf32>
    %224 = arith.mulf %222, %223 : vector<4x128xf32>
    %225 = arith.addf %189, %224 : vector<4x128xf32>
    %226 = arith.addf %190, %221 : vector<1x128xf32>
    %227 = vector.extract_strided_slice %212 {offsets = [0, 128], sizes = [12, 128], strides = [1, 1]} : vector<12x640xf32> to vector<12x128xf32>
    %228 = vector.extract_strided_slice %227 {offsets = [0, 0], sizes = [8, 128], strides = [1, 1]} : vector<12x128xf32> to vector<8x128xf32>
    %229 = arith.subf %228, %0 : vector<8x128xf32>
    %230 = arith.mulf %229, %229 : vector<8x128xf32>
    %cst_27 = arith.constant dense<0.000000e+00> : vector<128xf32>
    %231 = vector.multi_reduction <add>, %230, %cst_27 [0] : vector<8x128xf32> to vector<128xf32>
    %232 = vector.shape_cast %231 : vector<128xf32> to vector<1x128xf32>
    %233 = vector.broadcast %3 : f32 to vector<1x128xf32>
    %234 = arith.mulf %233, %232 : vector<1x128xf32>
    %235 = math.exp %234 : vector<1x128xf32>
    %236 = vector.extract_strided_slice %227 {offsets = [8, 0], sizes = [4, 128], strides = [1, 1]} : vector<12x128xf32> to vector<4x128xf32>
    %237 = vector.broadcast %235 : vector<1x128xf32> to vector<4x128xf32>
    %238 = arith.mulf %236, %237 : vector<4x128xf32>
    %239 = arith.addf %225, %238 : vector<4x128xf32>
    %240 = arith.addf %226, %235 : vector<1x128xf32>
    %241 = vector.extract_strided_slice %212 {offsets = [0, 256], sizes = [12, 128], strides = [1, 1]} : vector<12x640xf32> to vector<12x128xf32>
    %242 = vector.extract_strided_slice %241 {offsets = [0, 0], sizes = [8, 128], strides = [1, 1]} : vector<12x128xf32> to vector<8x128xf32>
    %243 = arith.subf %242, %0 : vector<8x128xf32>
    %244 = arith.mulf %243, %243 : vector<8x128xf32>
    %cst_28 = arith.constant dense<0.000000e+00> : vector<128xf32>
    %245 = vector.multi_reduction <add>, %244, %cst_28 [0] : vector<8x128xf32> to vector<128xf32>
    %246 = vector.shape_cast %245 : vector<128xf32> to vector<1x128xf32>
    %247 = vector.broadcast %3 : f32 to vector<1x128xf32>
    %248 = arith.mulf %247, %246 : vector<1x128xf32>
    %249 = math.exp %248 : vector<1x128xf32>
    %250 = vector.extract_strided_slice %241 {offsets = [8, 0], sizes = [4, 128], strides = [1, 1]} : vector<12x128xf32> to vector<4x128xf32>
    %251 = vector.broadcast %249 : vector<1x128xf32> to vector<4x128xf32>
    %252 = arith.mulf %250, %251 : vector<4x128xf32>
    %253 = arith.addf %239, %252 : vector<4x128xf32>
    %254 = arith.addf %240, %249 : vector<1x128xf32>
    %255 = vector.extract_strided_slice %212 {offsets = [0, 384], sizes = [12, 128], strides = [1, 1]} : vector<12x640xf32> to vector<12x128xf32>
    %256 = vector.extract_strided_slice %255 {offsets = [0, 0], sizes = [8, 128], strides = [1, 1]} : vector<12x128xf32> to vector<8x128xf32>
    %257 = arith.subf %256, %0 : vector<8x128xf32>
    %258 = arith.mulf %257, %257 : vector<8x128xf32>
    %cst_29 = arith.constant dense<0.000000e+00> : vector<128xf32>
    %259 = vector.multi_reduction <add>, %258, %cst_29 [0] : vector<8x128xf32> to vector<128xf32>
    %260 = vector.shape_cast %259 : vector<128xf32> to vector<1x128xf32>
    %261 = vector.broadcast %3 : f32 to vector<1x128xf32>
    %262 = arith.mulf %261, %260 : vector<1x128xf32>
    %263 = math.exp %262 : vector<1x128xf32>
    %264 = vector.extract_strided_slice %255 {offsets = [8, 0], sizes = [4, 128], strides = [1, 1]} : vector<12x128xf32> to vector<4x128xf32>
    %265 = vector.broadcast %263 : vector<1x128xf32> to vector<4x128xf32>
    %266 = arith.mulf %264, %265 : vector<4x128xf32>
    %267 = arith.addf %253, %266 : vector<4x128xf32>
    %268 = arith.addf %254, %263 : vector<1x128xf32>
    %269 = vector.extract_strided_slice %212 {offsets = [0, 512], sizes = [12, 128], strides = [1, 1]} : vector<12x640xf32> to vector<12x128xf32>
    %270 = vector.extract_strided_slice %269 {offsets = [0, 0], sizes = [8, 128], strides = [1, 1]} : vector<12x128xf32> to vector<8x128xf32>
    %271 = arith.subf %270, %0 : vector<8x128xf32>
    %272 = arith.mulf %271, %271 : vector<8x128xf32>
    %cst_30 = arith.constant dense<0.000000e+00> : vector<128xf32>
    %273 = vector.multi_reduction <add>, %272, %cst_30 [0] : vector<8x128xf32> to vector<128xf32>
    %274 = vector.shape_cast %273 : vector<128xf32> to vector<1x128xf32>
    %275 = vector.broadcast %3 : f32 to vector<1x128xf32>
    %276 = arith.mulf %275, %274 : vector<1x128xf32>
    %277 = math.exp %276 : vector<1x128xf32>
    %278 = vector.extract_strided_slice %269 {offsets = [8, 0], sizes = [4, 128], strides = [1, 1]} : vector<12x128xf32> to vector<4x128xf32>
    %279 = vector.broadcast %277 : vector<1x128xf32> to vector<4x128xf32>
    %280 = arith.mulf %278, %279 : vector<4x128xf32>
    %281 = arith.addf %267, %280 : vector<4x128xf32>
    %282 = arith.addf %268, %277 : vector<1x128xf32>
    %283 = vector.extract_strided_slice %2 {offsets = [15, 0], sizes = [1, 128], strides = [1, 1]} : vector<25x128xi32> to vector<1x128xi32>
    %284 = vector.shape_cast %283 : vector<1x128xi32> to vector<128xi32>
    %285 = vector.shape_cast %284 : vector<128xi32> to vector<1x128xi32>
    %286 = vector.extract_strided_slice %2 {offsets = [16, 0], sizes = [1, 128], strides = [1, 1]} : vector<25x128xi32> to vector<1x128xi32>
    %287 = vector.shape_cast %286 : vector<1x128xi32> to vector<128xi32>
    %288 = vector.shape_cast %287 : vector<128xi32> to vector<1x128xi32>
    %289 = vector.extract_strided_slice %2 {offsets = [17, 0], sizes = [1, 128], strides = [1, 1]} : vector<25x128xi32> to vector<1x128xi32>
    %290 = vector.shape_cast %289 : vector<1x128xi32> to vector<128xi32>
    %291 = vector.shape_cast %290 : vector<128xi32> to vector<1x128xi32>
    %292 = vector.extract_strided_slice %2 {offsets = [18, 0], sizes = [1, 128], strides = [1, 1]} : vector<25x128xi32> to vector<1x128xi32>
    %293 = vector.shape_cast %292 : vector<1x128xi32> to vector<128xi32>
    %294 = vector.shape_cast %293 : vector<128xi32> to vector<1x128xi32>
    %295 = vector.extract_strided_slice %2 {offsets = [19, 0], sizes = [1, 128], strides = [1, 1]} : vector<25x128xi32> to vector<1x128xi32>
    %296 = vector.shape_cast %295 : vector<1x128xi32> to vector<128xi32>
    %297 = vector.shape_cast %296 : vector<128xi32> to vector<1x128xi32>
    %298 = tpu.concatenate %285, %288, %291, %294, %297 in 1 : vector<1x128xi32>, vector<1x128xi32>, vector<1x128xi32>, vector<1x128xi32>, vector<1x128xi32> -> vector<1x640xi32>
    %299 = vector.broadcast %298 : vector<1x640xi32> to vector<256x640xi32>
    %300 = arith.cmpi eq, %4, %299 : vector<256x640xi32>
    %cst_31 = arith.constant 1.000000e+00 : f32
    %cst_32 = arith.constant 0.000000e+00 : f32
    %301 = vector.broadcast %cst_31 : f32 to vector<256x640xf32>
    %302 = vector.broadcast %cst_32 : f32 to vector<256x640xf32>
    %303 = arith.select %300, %301, %302 : vector<256x640xi1>, vector<256x640xf32>
    %cst_33 = arith.constant dense<0.000000e+00> : vector<12x640xf32>
    %304 = tpu.matmul %1, %303, %cst_33 {dimension_numbers = #tpu.dot_dimension_numbers<[1], [0], [0], [1], [0, 0, 1, 1], [], []>} : vector<12x256xf32>, vector<256x640xf32>, vector<12x640xf32> -> vector<12x640xf32>
    %305 = vector.extract_strided_slice %304 {offsets = [0, 0], sizes = [12, 128], strides = [1, 1]} : vector<12x640xf32> to vector<12x128xf32>
    %306 = vector.extract_strided_slice %305 {offsets = [0, 0], sizes = [8, 128], strides = [1, 1]} : vector<12x128xf32> to vector<8x128xf32>
    %307 = arith.subf %306, %0 : vector<8x128xf32>
    %308 = arith.mulf %307, %307 : vector<8x128xf32>
    %cst_34 = arith.constant dense<0.000000e+00> : vector<128xf32>
    %309 = vector.multi_reduction <add>, %308, %cst_34 [0] : vector<8x128xf32> to vector<128xf32>
    %310 = vector.shape_cast %309 : vector<128xf32> to vector<1x128xf32>
    %311 = vector.broadcast %3 : f32 to vector<1x128xf32>
    %312 = arith.mulf %311, %310 : vector<1x128xf32>
    %313 = math.exp %312 : vector<1x128xf32>
    %314 = vector.extract_strided_slice %305 {offsets = [8, 0], sizes = [4, 128], strides = [1, 1]} : vector<12x128xf32> to vector<4x128xf32>
    %315 = vector.broadcast %313 : vector<1x128xf32> to vector<4x128xf32>
    %316 = arith.mulf %314, %315 : vector<4x128xf32>
    %317 = arith.addf %281, %316 : vector<4x128xf32>
    %318 = arith.addf %282, %313 : vector<1x128xf32>
    %319 = vector.extract_strided_slice %304 {offsets = [0, 128], sizes = [12, 128], strides = [1, 1]} : vector<12x640xf32> to vector<12x128xf32>
    %320 = vector.extract_strided_slice %319 {offsets = [0, 0], sizes = [8, 128], strides = [1, 1]} : vector<12x128xf32> to vector<8x128xf32>
    %321 = arith.subf %320, %0 : vector<8x128xf32>
    %322 = arith.mulf %321, %321 : vector<8x128xf32>
    %cst_35 = arith.constant dense<0.000000e+00> : vector<128xf32>
    %323 = vector.multi_reduction <add>, %322, %cst_35 [0] : vector<8x128xf32> to vector<128xf32>
    %324 = vector.shape_cast %323 : vector<128xf32> to vector<1x128xf32>
    %325 = vector.broadcast %3 : f32 to vector<1x128xf32>
    %326 = arith.mulf %325, %324 : vector<1x128xf32>
    %327 = math.exp %326 : vector<1x128xf32>
    %328 = vector.extract_strided_slice %319 {offsets = [8, 0], sizes = [4, 128], strides = [1, 1]} : vector<12x128xf32> to vector<4x128xf32>
    %329 = vector.broadcast %327 : vector<1x128xf32> to vector<4x128xf32>
    %330 = arith.mulf %328, %329 : vector<4x128xf32>
    %331 = arith.addf %317, %330 : vector<4x128xf32>
    %332 = arith.addf %318, %327 : vector<1x128xf32>
    %333 = vector.extract_strided_slice %304 {offsets = [0, 256], sizes = [12, 128], strides = [1, 1]} : vector<12x640xf32> to vector<12x128xf32>
    %334 = vector.extract_strided_slice %333 {offsets = [0, 0], sizes = [8, 128], strides = [1, 1]} : vector<12x128xf32> to vector<8x128xf32>
    %335 = arith.subf %334, %0 : vector<8x128xf32>
    %336 = arith.mulf %335, %335 : vector<8x128xf32>
    %cst_36 = arith.constant dense<0.000000e+00> : vector<128xf32>
    %337 = vector.multi_reduction <add>, %336, %cst_36 [0] : vector<8x128xf32> to vector<128xf32>
    %338 = vector.shape_cast %337 : vector<128xf32> to vector<1x128xf32>
    %339 = vector.broadcast %3 : f32 to vector<1x128xf32>
    %340 = arith.mulf %339, %338 : vector<1x128xf32>
    %341 = math.exp %340 : vector<1x128xf32>
    %342 = vector.extract_strided_slice %333 {offsets = [8, 0], sizes = [4, 128], strides = [1, 1]} : vector<12x128xf32> to vector<4x128xf32>
    %343 = vector.broadcast %341 : vector<1x128xf32> to vector<4x128xf32>
    %344 = arith.mulf %342, %343 : vector<4x128xf32>
    %345 = arith.addf %331, %344 : vector<4x128xf32>
    %346 = arith.addf %332, %341 : vector<1x128xf32>
    %347 = vector.extract_strided_slice %304 {offsets = [0, 384], sizes = [12, 128], strides = [1, 1]} : vector<12x640xf32> to vector<12x128xf32>
    %348 = vector.extract_strided_slice %347 {offsets = [0, 0], sizes = [8, 128], strides = [1, 1]} : vector<12x128xf32> to vector<8x128xf32>
    %349 = arith.subf %348, %0 : vector<8x128xf32>
    %350 = arith.mulf %349, %349 : vector<8x128xf32>
    %cst_37 = arith.constant dense<0.000000e+00> : vector<128xf32>
    %351 = vector.multi_reduction <add>, %350, %cst_37 [0] : vector<8x128xf32> to vector<128xf32>
    %352 = vector.shape_cast %351 : vector<128xf32> to vector<1x128xf32>
    %353 = vector.broadcast %3 : f32 to vector<1x128xf32>
    %354 = arith.mulf %353, %352 : vector<1x128xf32>
    %355 = math.exp %354 : vector<1x128xf32>
    %356 = vector.extract_strided_slice %347 {offsets = [8, 0], sizes = [4, 128], strides = [1, 1]} : vector<12x128xf32> to vector<4x128xf32>
    %357 = vector.broadcast %355 : vector<1x128xf32> to vector<4x128xf32>
    %358 = arith.mulf %356, %357 : vector<4x128xf32>
    %359 = arith.addf %345, %358 : vector<4x128xf32>
    %360 = arith.addf %346, %355 : vector<1x128xf32>
    %361 = vector.extract_strided_slice %304 {offsets = [0, 512], sizes = [12, 128], strides = [1, 1]} : vector<12x640xf32> to vector<12x128xf32>
    %362 = vector.extract_strided_slice %361 {offsets = [0, 0], sizes = [8, 128], strides = [1, 1]} : vector<12x128xf32> to vector<8x128xf32>
    %363 = arith.subf %362, %0 : vector<8x128xf32>
    %364 = arith.mulf %363, %363 : vector<8x128xf32>
    %cst_38 = arith.constant dense<0.000000e+00> : vector<128xf32>
    %365 = vector.multi_reduction <add>, %364, %cst_38 [0] : vector<8x128xf32> to vector<128xf32>
    %366 = vector.shape_cast %365 : vector<128xf32> to vector<1x128xf32>
    %367 = vector.broadcast %3 : f32 to vector<1x128xf32>
    %368 = arith.mulf %367, %366 : vector<1x128xf32>
    %369 = math.exp %368 : vector<1x128xf32>
    %370 = vector.extract_strided_slice %361 {offsets = [8, 0], sizes = [4, 128], strides = [1, 1]} : vector<12x128xf32> to vector<4x128xf32>
    %371 = vector.broadcast %369 : vector<1x128xf32> to vector<4x128xf32>
    %372 = arith.mulf %370, %371 : vector<4x128xf32>
    %373 = arith.addf %359, %372 : vector<4x128xf32>
    %374 = arith.addf %360, %369 : vector<1x128xf32>
    %375 = vector.extract_strided_slice %2 {offsets = [20, 0], sizes = [1, 128], strides = [1, 1]} : vector<25x128xi32> to vector<1x128xi32>
    %376 = vector.shape_cast %375 : vector<1x128xi32> to vector<128xi32>
    %377 = vector.shape_cast %376 : vector<128xi32> to vector<1x128xi32>
    %378 = vector.extract_strided_slice %2 {offsets = [21, 0], sizes = [1, 128], strides = [1, 1]} : vector<25x128xi32> to vector<1x128xi32>
    %379 = vector.shape_cast %378 : vector<1x128xi32> to vector<128xi32>
    %380 = vector.shape_cast %379 : vector<128xi32> to vector<1x128xi32>
    %381 = vector.extract_strided_slice %2 {offsets = [22, 0], sizes = [1, 128], strides = [1, 1]} : vector<25x128xi32> to vector<1x128xi32>
    %382 = vector.shape_cast %381 : vector<1x128xi32> to vector<128xi32>
    %383 = vector.shape_cast %382 : vector<128xi32> to vector<1x128xi32>
    %384 = vector.extract_strided_slice %2 {offsets = [23, 0], sizes = [1, 128], strides = [1, 1]} : vector<25x128xi32> to vector<1x128xi32>
    %385 = vector.shape_cast %384 : vector<1x128xi32> to vector<128xi32>
    %386 = vector.shape_cast %385 : vector<128xi32> to vector<1x128xi32>
    %387 = vector.extract_strided_slice %2 {offsets = [24, 0], sizes = [1, 128], strides = [1, 1]} : vector<25x128xi32> to vector<1x128xi32>
    %388 = vector.shape_cast %387 : vector<1x128xi32> to vector<128xi32>
    %389 = vector.shape_cast %388 : vector<128xi32> to vector<1x128xi32>
    %390 = tpu.concatenate %377, %380, %383, %386, %389 in 1 : vector<1x128xi32>, vector<1x128xi32>, vector<1x128xi32>, vector<1x128xi32>, vector<1x128xi32> -> vector<1x640xi32>
    %391 = vector.broadcast %390 : vector<1x640xi32> to vector<256x640xi32>
    %392 = arith.cmpi eq, %4, %391 : vector<256x640xi32>
    %cst_39 = arith.constant 1.000000e+00 : f32
    %cst_40 = arith.constant 0.000000e+00 : f32
    %393 = vector.broadcast %cst_39 : f32 to vector<256x640xf32>
    %394 = vector.broadcast %cst_40 : f32 to vector<256x640xf32>
    %395 = arith.select %392, %393, %394 : vector<256x640xi1>, vector<256x640xf32>
    %cst_41 = arith.constant dense<0.000000e+00> : vector<12x640xf32>
    %396 = tpu.matmul %1, %395, %cst_41 {dimension_numbers = #tpu.dot_dimension_numbers<[1], [0], [0], [1], [0, 0, 1, 1], [], []>} : vector<12x256xf32>, vector<256x640xf32>, vector<12x640xf32> -> vector<12x640xf32>
    %397 = vector.extract_strided_slice %396 {offsets = [0, 0], sizes = [12, 128], strides = [1, 1]} : vector<12x640xf32> to vector<12x128xf32>
    %398 = vector.extract_strided_slice %397 {offsets = [0, 0], sizes = [8, 128], strides = [1, 1]} : vector<12x128xf32> to vector<8x128xf32>
    %399 = arith.subf %398, %0 : vector<8x128xf32>
    %400 = arith.mulf %399, %399 : vector<8x128xf32>
    %cst_42 = arith.constant dense<0.000000e+00> : vector<128xf32>
    %401 = vector.multi_reduction <add>, %400, %cst_42 [0] : vector<8x128xf32> to vector<128xf32>
    %402 = vector.shape_cast %401 : vector<128xf32> to vector<1x128xf32>
    %403 = vector.broadcast %3 : f32 to vector<1x128xf32>
    %404 = arith.mulf %403, %402 : vector<1x128xf32>
    %405 = math.exp %404 : vector<1x128xf32>
    %406 = vector.extract_strided_slice %397 {offsets = [8, 0], sizes = [4, 128], strides = [1, 1]} : vector<12x128xf32> to vector<4x128xf32>
    %407 = vector.broadcast %405 : vector<1x128xf32> to vector<4x128xf32>
    %408 = arith.mulf %406, %407 : vector<4x128xf32>
    %409 = arith.addf %373, %408 : vector<4x128xf32>
    %410 = arith.addf %374, %405 : vector<1x128xf32>
    %411 = vector.extract_strided_slice %396 {offsets = [0, 128], sizes = [12, 128], strides = [1, 1]} : vector<12x640xf32> to vector<12x128xf32>
    %412 = vector.extract_strided_slice %411 {offsets = [0, 0], sizes = [8, 128], strides = [1, 1]} : vector<12x128xf32> to vector<8x128xf32>
    %413 = arith.subf %412, %0 : vector<8x128xf32>
    %414 = arith.mulf %413, %413 : vector<8x128xf32>
    %cst_43 = arith.constant dense<0.000000e+00> : vector<128xf32>
    %415 = vector.multi_reduction <add>, %414, %cst_43 [0] : vector<8x128xf32> to vector<128xf32>
    %416 = vector.shape_cast %415 : vector<128xf32> to vector<1x128xf32>
    %417 = vector.broadcast %3 : f32 to vector<1x128xf32>
    %418 = arith.mulf %417, %416 : vector<1x128xf32>
    %419 = math.exp %418 : vector<1x128xf32>
    %420 = vector.extract_strided_slice %411 {offsets = [8, 0], sizes = [4, 128], strides = [1, 1]} : vector<12x128xf32> to vector<4x128xf32>
    %421 = vector.broadcast %419 : vector<1x128xf32> to vector<4x128xf32>
    %422 = arith.mulf %420, %421 : vector<4x128xf32>
    %423 = arith.addf %409, %422 : vector<4x128xf32>
    %424 = arith.addf %410, %419 : vector<1x128xf32>
    %425 = vector.extract_strided_slice %396 {offsets = [0, 256], sizes = [12, 128], strides = [1, 1]} : vector<12x640xf32> to vector<12x128xf32>
    %426 = vector.extract_strided_slice %425 {offsets = [0, 0], sizes = [8, 128], strides = [1, 1]} : vector<12x128xf32> to vector<8x128xf32>
    %427 = arith.subf %426, %0 : vector<8x128xf32>
    %428 = arith.mulf %427, %427 : vector<8x128xf32>
    %cst_44 = arith.constant dense<0.000000e+00> : vector<128xf32>
    %429 = vector.multi_reduction <add>, %428, %cst_44 [0] : vector<8x128xf32> to vector<128xf32>
    %430 = vector.shape_cast %429 : vector<128xf32> to vector<1x128xf32>
    %431 = vector.broadcast %3 : f32 to vector<1x128xf32>
    %432 = arith.mulf %431, %430 : vector<1x128xf32>
    %433 = math.exp %432 : vector<1x128xf32>
    %434 = vector.extract_strided_slice %425 {offsets = [8, 0], sizes = [4, 128], strides = [1, 1]} : vector<12x128xf32> to vector<4x128xf32>
    %435 = vector.broadcast %433 : vector<1x128xf32> to vector<4x128xf32>
    %436 = arith.mulf %434, %435 : vector<4x128xf32>
    %437 = arith.addf %423, %436 : vector<4x128xf32>
    %438 = arith.addf %424, %433 : vector<1x128xf32>
    %439 = vector.extract_strided_slice %396 {offsets = [0, 384], sizes = [12, 128], strides = [1, 1]} : vector<12x640xf32> to vector<12x128xf32>
    %440 = vector.extract_strided_slice %439 {offsets = [0, 0], sizes = [8, 128], strides = [1, 1]} : vector<12x128xf32> to vector<8x128xf32>
    %441 = arith.subf %440, %0 : vector<8x128xf32>
    %442 = arith.mulf %441, %441 : vector<8x128xf32>
    %cst_45 = arith.constant dense<0.000000e+00> : vector<128xf32>
    %443 = vector.multi_reduction <add>, %442, %cst_45 [0] : vector<8x128xf32> to vector<128xf32>
    %444 = vector.shape_cast %443 : vector<128xf32> to vector<1x128xf32>
    %445 = vector.broadcast %3 : f32 to vector<1x128xf32>
    %446 = arith.mulf %445, %444 : vector<1x128xf32>
    %447 = math.exp %446 : vector<1x128xf32>
    %448 = vector.extract_strided_slice %439 {offsets = [8, 0], sizes = [4, 128], strides = [1, 1]} : vector<12x128xf32> to vector<4x128xf32>
    %449 = vector.broadcast %447 : vector<1x128xf32> to vector<4x128xf32>
    %450 = arith.mulf %448, %449 : vector<4x128xf32>
    %451 = arith.addf %437, %450 : vector<4x128xf32>
    %452 = arith.addf %438, %447 : vector<1x128xf32>
    %453 = vector.extract_strided_slice %396 {offsets = [0, 512], sizes = [12, 128], strides = [1, 1]} : vector<12x640xf32> to vector<12x128xf32>
    %454 = vector.extract_strided_slice %453 {offsets = [0, 0], sizes = [8, 128], strides = [1, 1]} : vector<12x128xf32> to vector<8x128xf32>
    %455 = arith.subf %454, %0 : vector<8x128xf32>
    %456 = arith.mulf %455, %455 : vector<8x128xf32>
    %cst_46 = arith.constant dense<0.000000e+00> : vector<128xf32>
    %457 = vector.multi_reduction <add>, %456, %cst_46 [0] : vector<8x128xf32> to vector<128xf32>
    %458 = vector.shape_cast %457 : vector<128xf32> to vector<1x128xf32>
    %459 = vector.broadcast %3 : f32 to vector<1x128xf32>
    %460 = arith.mulf %459, %458 : vector<1x128xf32>
    %461 = math.exp %460 : vector<1x128xf32>
    %462 = vector.extract_strided_slice %453 {offsets = [8, 0], sizes = [4, 128], strides = [1, 1]} : vector<12x128xf32> to vector<4x128xf32>
    %463 = vector.broadcast %461 : vector<1x128xf32> to vector<4x128xf32>
    %464 = arith.mulf %462, %463 : vector<4x128xf32>
    %465 = arith.addf %451, %464 : vector<4x128xf32>
    %466 = arith.addf %452, %461 : vector<1x128xf32>
    %cst_47 = arith.constant 1.000000e-15 : f32
    %467 = vector.broadcast %cst_47 : f32 to vector<1x128xf32>
    %468 = arith.maximumf %466, %467 : vector<1x128xf32>
    %469 = tpu.reciprocal %468 {approx = true} : vector<1x128xf32> -> vector<1x128xf32>
    %470 = vector.broadcast %469 : vector<1x128xf32> to vector<4x128xf32>
    %471 = arith.mulf %465, %470 : vector<4x128xf32>
    %c0_48 = arith.constant 0 : index
    %c0_49 = arith.constant 0 : index
    %472 = vector.load %arg5[%c0_48, %c0_49] : memref<4x128xf32, #tpu.memory_space<vmem>>, vector<4x128xf32>
    tpu.vector_store %arg5[%c0_48, %c0_49], %471 {strides = array<i32>} : memref<4x128xf32, #tpu.memory_space<vmem>>, vector<4x128xf32>,
    return
  }
  func.func @transform_0(%arg0: i32) -> i32 {
    %c0_i32 = arith.constant 0 : i32
    %c0_i32_0 = arith.constant 0 : i32
    return %c0_i32 : i32
  }
  func.func @transform_1(%arg0: i32) -> (i32, i32) {
    %c0_i32 = arith.constant 0 : i32
    %c0_i32_0 = arith.constant 0 : i32
    return %c0_i32, %arg0 : i32, i32
  }
  func.func @transform_2(%arg0: i32) -> (i32, i32) {
    %c0_i32 = arith.constant 0 : i32
    %c0_i32_0 = arith.constant 0 : i32
    return %c0_i32, %arg0 : i32, i32
  }
  func.func @transform_3(%arg0: i32) -> (i32, i32) {
    %c0_i32 = arith.constant 0 : i32
    %c0_i32_0 = arith.constant 0 : i32
    %c0_i32_1 = arith.constant 0 : i32
    return %c0_i32, %c0_i32_0 : i32, i32
  }
  func.func @transform_4(%arg0: i32) -> (i32, i32) {
    %c0_i32 = arith.constant 0 : i32
    %c0_i32_0 = arith.constant 0 : i32
    return %c0_i32, %arg0 : i32, i32
  }
}

module attributes {stable_mosaic.version = 11 : i64} {
  func.func @_vote_kernel(%arg0: i32, %arg1: memref<1xf32, #tpu.memory_space<smem>>, %arg2: memref<25x128xi32, #tpu.memory_space<vmem>>, %arg3: memref<8x128xf32, #tpu.memory_space<vmem>>, %arg4: memref<12x256xf32, #tpu.memory_space<vmem>>, %arg5: memref<4x128xf32, #tpu.memory_space<vmem>>) attributes {dimension_semantics = [#tpu.dimension_semantics<parallel>], iteration_bounds = array<i64: 1>, scalar_prefetch = 0 : i64, scratch_operands = 0 : i64, tpu.core_type = #tpu.core_type<tc>, window_params = [{transform_indices = @transform_0, window_bounds = array<i64: 1>}, {transform_indices = @transform_1, window_bounds = array<i64: 25, 128>}, {transform_indices = @transform_2, window_bounds = array<i64: 8, 128>}, {pipeline_mode = #tpu.pipeline_mode<synchronous>, transform_indices = @transform_3, window_bounds = array<i64: 12, 256>}, {transform_indices = @transform_4, window_bounds = array<i64: 4, 128>}]} {
    %c0 = arith.constant 0 : index
    %c0_0 = arith.constant 0 : index
    %0 = vector.load %arg3[%c0, %c0_0] : memref<8x128xf32, #tpu.memory_space<vmem>>, vector<8x128xf32>
    %c0_1 = arith.constant 0 : index
    %c0_2 = arith.constant 0 : index
    %1 = vector.load %arg4[%c0_1, %c0_2] : memref<12x256xf32, #tpu.memory_space<vmem>>, vector<12x256xf32>
    %c0_3 = arith.constant 0 : index
    %c0_4 = arith.constant 0 : index
    %2 = vector.load %arg2[%c0_3, %c0_4] : memref<25x128xi32, #tpu.memory_space<vmem>>, vector<25x128xi32>
    %c0_5 = arith.constant 0 : index
    %3 = memref.load %arg1[%c0_5] : memref<1xf32, #tpu.memory_space<smem>>
    %4 = tpu.iota {dimensions = array<i32: 0>} : vector<256x640xi32>
    %cst = arith.constant 0.000000e+00 : f32
    %5 = vector.broadcast %cst : f32 to vector<4x128xf32>
    %cst_6 = arith.constant 0.000000e+00 : f32
    %6 = vector.broadcast %cst_6 : f32 to vector<1x128xf32>
    %7 = vector.extract_strided_slice %2 {offsets = [0, 0], sizes = [1, 128], strides = [1, 1]} : vector<25x128xi32> to vector<1x128xi32>
    %8 = vector.shape_cast %7 : vector<1x128xi32> to vector<128xi32>
    %9 = vector.shape_cast %8 : vector<128xi32> to vector<1x128xi32>
    %10 = vector.extract_strided_slice %2 {offsets = [1, 0], sizes = [1, 128], strides = [1, 1]} : vector<25x128xi32> to vector<1x128xi32>
    %11 = vector.shape_cast %10 : vector<1x128xi32> to vector<128xi32>
    %12 = vector.shape_cast %11 : vector<128xi32> to vector<1x128xi32>
    %13 = vector.extract_strided_slice %2 {offsets = [2, 0], sizes = [1, 128], strides = [1, 1]} : vector<25x128xi32> to vector<1x128xi32>
    %14 = vector.shape_cast %13 : vector<1x128xi32> to vector<128xi32>
    %15 = vector.shape_cast %14 : vector<128xi32> to vector<1x128xi32>
    %16 = vector.extract_strided_slice %2 {offsets = [3, 0], sizes = [1, 128], strides = [1, 1]} : vector<25x128xi32> to vector<1x128xi32>
    %17 = vector.shape_cast %16 : vector<1x128xi32> to vector<128xi32>
    %18 = vector.shape_cast %17 : vector<128xi32> to vector<1x128xi32>
    %19 = vector.extract_strided_slice %2 {offsets = [4, 0], sizes = [1, 128], strides = [1, 1]} : vector<25x128xi32> to vector<1x128xi32>
    %20 = vector.shape_cast %19 : vector<1x128xi32> to vector<128xi32>
    %21 = vector.shape_cast %20 : vector<128xi32> to vector<1x128xi32>
    %22 = tpu.concatenate %9, %12, %15, %18, %21 in 1 : vector<1x128xi32>, vector<1x128xi32>, vector<1x128xi32>, vector<1x128xi32>, vector<1x128xi32> -> vector<1x640xi32>
    %23 = vector.broadcast %22 : vector<1x640xi32> to vector<256x640xi32>
    %24 = arith.cmpi eq, %4, %23 : vector<256x640xi32>
    %cst_7 = arith.constant 1.000000e+00 : f32
    %cst_8 = arith.constant 0.000000e+00 : f32
    %25 = vector.broadcast %cst_7 : f32 to vector<256x640xf32>
    %26 = vector.broadcast %cst_8 : f32 to vector<256x640xf32>
    %27 = arith.select %24, %25, %26 : vector<256x640xi1>, vector<256x640xf32>
    %cst_9 = arith.constant dense<0.000000e+00> : vector<12x640xf32>
    %28 = tpu.matmul %1, %27, %cst_9 {dimension_numbers = #tpu.dot_dimension_numbers<[1], [0], [0], [1], [0, 0, 1, 1], [], []>} : vector<12x256xf32>, vector<256x640xf32>, vector<12x640xf32> -> vector<12x640xf32>
    %29 = vector.extract_strided_slice %28 {offsets = [0, 0], sizes = [12, 128], strides = [1, 1]} : vector<12x640xf32> to vector<12x128xf32>
    %30 = vector.extract_strided_slice %29 {offsets = [0, 0], sizes = [8, 128], strides = [1, 1]} : vector<12x128xf32> to vector<8x128xf32>
    %31 = arith.subf %30, %0 : vector<8x128xf32>
    %32 = arith.mulf %31, %31 : vector<8x128xf32>
    %cst_10 = arith.constant dense<0.000000e+00> : vector<128xf32>
    %33 = vector.multi_reduction <add>, %32, %cst_10 [0] : vector<8x128xf32> to vector<128xf32>
    %34 = vector.shape_cast %33 : vector<128xf32> to vector<1x128xf32>
    %35 = vector.broadcast %3 : f32 to vector<1x128xf32>
    %36 = arith.mulf %35, %34 : vector<1x128xf32>
    %37 = math.exp %36 : vector<1x128xf32>
    %38 = vector.extract_strided_slice %29 {offsets = [8, 0], sizes = [4, 128], strides = [1, 1]} : vector<12x128xf32> to vector<4x128xf32>
    %39 = vector.broadcast %37 : vector<1x128xf32> to vector<4x128xf32>
    %40 = arith.mulf %38, %39 : vector<4x128xf32>
    %41 = arith.addf %5, %40 : vector<4x128xf32>
    %42 = arith.addf %6, %37 : vector<1x128xf32>
    %43 = vector.extract_strided_slice %28 {offsets = [0, 128], sizes = [12, 128], strides = [1, 1]} : vector<12x640xf32> to vector<12x128xf32>
    %44 = vector.extract_strided_slice %43 {offsets = [0, 0], sizes = [8, 128], strides = [1, 1]} : vector<12x128xf32> to vector<8x128xf32>
    %45 = arith.subf %44, %0 : vector<8x128xf32>
    %46 = arith.mulf %45, %45 : vector<8x128xf32>
    %cst_11 = arith.constant dense<0.000000e+00> : vector<128xf32>
    %47 = vector.multi_reduction <add>, %46, %cst_11 [0] : vector<8x128xf32> to vector<128xf32>
    %48 = vector.shape_cast %47 : vector<128xf32> to vector<1x128xf32>
    %49 = vector.broadcast %3 : f32 to vector<1x128xf32>
    %50 = arith.mulf %49, %48 : vector<1x128xf32>
    %51 = math.exp %50 : vector<1x128xf32>
    %52 = vector.extract_strided_slice %43 {offsets = [8, 0], sizes = [4, 128], strides = [1, 1]} : vector<12x128xf32> to vector<4x128xf32>
    %53 = vector.broadcast %51 : vector<1x128xf32> to vector<4x128xf32>
    %54 = arith.mulf %52, %53 : vector<4x128xf32>
    %55 = arith.addf %41, %54 : vector<4x128xf32>
    %56 = arith.addf %42, %51 : vector<1x128xf32>
    %57 = vector.extract_strided_slice %28 {offsets = [0, 256], sizes = [12, 128], strides = [1, 1]} : vector<12x640xf32> to vector<12x128xf32>
    %58 = vector.extract_strided_slice %57 {offsets = [0, 0], sizes = [8, 128], strides = [1, 1]} : vector<12x128xf32> to vector<8x128xf32>
    %59 = arith.subf %58, %0 : vector<8x128xf32>
    %60 = arith.mulf %59, %59 : vector<8x128xf32>
    %cst_12 = arith.constant dense<0.000000e+00> : vector<128xf32>
    %61 = vector.multi_reduction <add>, %60, %cst_12 [0] : vector<8x128xf32> to vector<128xf32>
    %62 = vector.shape_cast %61 : vector<128xf32> to vector<1x128xf32>
    %63 = vector.broadcast %3 : f32 to vector<1x128xf32>
    %64 = arith.mulf %63, %62 : vector<1x128xf32>
    %65 = math.exp %64 : vector<1x128xf32>
    %66 = vector.extract_strided_slice %57 {offsets = [8, 0], sizes = [4, 128], strides = [1, 1]} : vector<12x128xf32> to vector<4x128xf32>
    %67 = vector.broadcast %65 : vector<1x128xf32> to vector<4x128xf32>
    %68 = arith.mulf %66, %67 : vector<4x128xf32>
    %69 = arith.addf %55, %68 : vector<4x128xf32>
    %70 = arith.addf %56, %65 : vector<1x128xf32>
    %71 = vector.extract_strided_slice %28 {offsets = [0, 384], sizes = [12, 128], strides = [1, 1]} : vector<12x640xf32> to vector<12x128xf32>
    %72 = vector.extract_strided_slice %71 {offsets = [0, 0], sizes = [8, 128], strides = [1, 1]} : vector<12x128xf32> to vector<8x128xf32>
    %73 = arith.subf %72, %0 : vector<8x128xf32>
    %74 = arith.mulf %73, %73 : vector<8x128xf32>
    %cst_13 = arith.constant dense<0.000000e+00> : vector<128xf32>
    %75 = vector.multi_reduction <add>, %74, %cst_13 [0] : vector<8x128xf32> to vector<128xf32>
    %76 = vector.shape_cast %75 : vector<128xf32> to vector<1x128xf32>
    %77 = vector.broadcast %3 : f32 to vector<1x128xf32>
    %78 = arith.mulf %77, %76 : vector<1x128xf32>
    %79 = math.exp %78 : vector<1x128xf32>
    %80 = vector.extract_strided_slice %71 {offsets = [8, 0], sizes = [4, 128], strides = [1, 1]} : vector<12x128xf32> to vector<4x128xf32>
    %81 = vector.broadcast %79 : vector<1x128xf32> to vector<4x128xf32>
    %82 = arith.mulf %80, %81 : vector<4x128xf32>
    %83 = arith.addf %69, %82 : vector<4x128xf32>
    %84 = arith.addf %70, %79 : vector<1x128xf32>
    %85 = vector.extract_strided_slice %28 {offsets = [0, 512], sizes = [12, 128], strides = [1, 1]} : vector<12x640xf32> to vector<12x128xf32>
    %86 = vector.extract_strided_slice %85 {offsets = [0, 0], sizes = [8, 128], strides = [1, 1]} : vector<12x128xf32> to vector<8x128xf32>
    %87 = arith.subf %86, %0 : vector<8x128xf32>
    %88 = arith.mulf %87, %87 : vector<8x128xf32>
    %cst_14 = arith.constant dense<0.000000e+00> : vector<128xf32>
    %89 = vector.multi_reduction <add>, %88, %cst_14 [0] : vector<8x128xf32> to vector<128xf32>
    %90 = vector.shape_cast %89 : vector<128xf32> to vector<1x128xf32>
    %91 = vector.broadcast %3 : f32 to vector<1x128xf32>
    %92 = arith.mulf %91, %90 : vector<1x128xf32>
    %93 = math.exp %92 : vector<1x128xf32>
    %94 = vector.extract_strided_slice %85 {offsets = [8, 0], sizes = [4, 128], strides = [1, 1]} : vector<12x128xf32> to vector<4x128xf32>
    %95 = vector.broadcast %93 : vector<1x128xf32> to vector<4x128xf32>
    %96 = arith.mulf %94, %95 : vector<4x128xf32>
    %97 = arith.addf %83, %96 : vector<4x128xf32>
    %98 = arith.addf %84, %93 : vector<1x128xf32>
    %99 = vector.extract_strided_slice %2 {offsets = [5, 0], sizes = [1, 128], strides = [1, 1]} : vector<25x128xi32> to vector<1x128xi32>
    %100 = vector.shape_cast %99 : vector<1x128xi32> to vector<128xi32>
    %101 = vector.shape_cast %100 : vector<128xi32> to vector<1x128xi32>
    %102 = vector.extract_strided_slice %2 {offsets = [6, 0], sizes = [1, 128], strides = [1, 1]} : vector<25x128xi32> to vector<1x128xi32>
    %103 = vector.shape_cast %102 : vector<1x128xi32> to vector<128xi32>
    %104 = vector.shape_cast %103 : vector<128xi32> to vector<1x128xi32>
    %105 = vector.extract_strided_slice %2 {offsets = [7, 0], sizes = [1, 128], strides = [1, 1]} : vector<25x128xi32> to vector<1x128xi32>
    %106 = vector.shape_cast %105 : vector<1x128xi32> to vector<128xi32>
    %107 = vector.shape_cast %106 : vector<128xi32> to vector<1x128xi32>
    %108 = vector.extract_strided_slice %2 {offsets = [8, 0], sizes = [1, 128], strides = [1, 1]} : vector<25x128xi32> to vector<1x128xi32>
    %109 = vector.shape_cast %108 : vector<1x128xi32> to vector<128xi32>
    %110 = vector.shape_cast %109 : vector<128xi32> to vector<1x128xi32>
    %111 = vector.extract_strided_slice %2 {offsets = [9, 0], sizes = [1, 128], strides = [1, 1]} : vector<25x128xi32> to vector<1x128xi32>
    %112 = vector.shape_cast %111 : vector<1x128xi32> to vector<128xi32>
    %113 = vector.shape_cast %112 : vector<128xi32> to vector<1x128xi32>
    %114 = tpu.concatenate %101, %104, %107, %110, %113 in 1 : vector<1x128xi32>, vector<1x128xi32>, vector<1x128xi32>, vector<1x128xi32>, vector<1x128xi32> -> vector<1x640xi32>
    %115 = vector.broadcast %114 : vector<1x640xi32> to vector<256x640xi32>
    %116 = arith.cmpi eq, %4, %115 : vector<256x640xi32>
    %cst_15 = arith.constant 1.000000e+00 : f32
    %cst_16 = arith.constant 0.000000e+00 : f32
    %117 = vector.broadcast %cst_15 : f32 to vector<256x640xf32>
    %118 = vector.broadcast %cst_16 : f32 to vector<256x640xf32>
    %119 = arith.select %116, %117, %118 : vector<256x640xi1>, vector<256x640xf32>
    %cst_17 = arith.constant dense<0.000000e+00> : vector<12x640xf32>
    %120 = tpu.matmul %1, %119, %cst_17 {dimension_numbers = #tpu.dot_dimension_numbers<[1], [0], [0], [1], [0, 0, 1, 1], [], []>} : vector<12x256xf32>, vector<256x640xf32>, vector<12x640xf32> -> vector<12x640xf32>
    %121 = vector.extract_strided_slice %120 {offsets = [0, 0], sizes = [12, 128], strides = [1, 1]} : vector<12x640xf32> to vector<12x128xf32>
    %122 = vector.extract_strided_slice %121 {offsets = [0, 0], sizes = [8, 128], strides = [1, 1]} : vector<12x128xf32> to vector<8x128xf32>
    %123 = arith.subf %122, %0 : vector<8x128xf32>
    %124 = arith.mulf %123, %123 : vector<8x128xf32>
    %cst_18 = arith.constant dense<0.000000e+00> : vector<128xf32>
    %125 = vector.multi_reduction <add>, %124, %cst_18 [0] : vector<8x128xf32> to vector<128xf32>
    %126 = vector.shape_cast %125 : vector<128xf32> to vector<1x128xf32>
    %127 = vector.broadcast %3 : f32 to vector<1x128xf32>
    %128 = arith.mulf %127, %126 : vector<1x128xf32>
    %129 = math.exp %128 : vector<1x128xf32>
    %130 = vector.extract_strided_slice %121 {offsets = [8, 0], sizes = [4, 128], strides = [1, 1]} : vector<12x128xf32> to vector<4x128xf32>
    %131 = vector.broadcast %129 : vector<1x128xf32> to vector<4x128xf32>
    %132 = arith.mulf %130, %131 : vector<4x128xf32>
    %133 = arith.addf %97, %132 : vector<4x128xf32>
    %134 = arith.addf %98, %129 : vector<1x128xf32>
    %135 = vector.extract_strided_slice %120 {offsets = [0, 128], sizes = [12, 128], strides = [1, 1]} : vector<12x640xf32> to vector<12x128xf32>
    %136 = vector.extract_strided_slice %135 {offsets = [0, 0], sizes = [8, 128], strides = [1, 1]} : vector<12x128xf32> to vector<8x128xf32>
    %137 = arith.subf %136, %0 : vector<8x128xf32>
    %138 = arith.mulf %137, %137 : vector<8x128xf32>
    %cst_19 = arith.constant dense<0.000000e+00> : vector<128xf32>
    %139 = vector.multi_reduction <add>, %138, %cst_19 [0] : vector<8x128xf32> to vector<128xf32>
    %140 = vector.shape_cast %139 : vector<128xf32> to vector<1x128xf32>
    %141 = vector.broadcast %3 : f32 to vector<1x128xf32>
    %142 = arith.mulf %141, %140 : vector<1x128xf32>
    %143 = math.exp %142 : vector<1x128xf32>
    %144 = vector.extract_strided_slice %135 {offsets = [8, 0], sizes = [4, 128], strides = [1, 1]} : vector<12x128xf32> to vector<4x128xf32>
    %145 = vector.broadcast %143 : vector<1x128xf32> to vector<4x128xf32>
    %146 = arith.mulf %144, %145 : vector<4x128xf32>
    %147 = arith.addf %133, %146 : vector<4x128xf32>
    %148 = arith.addf %134, %143 : vector<1x128xf32>
    %149 = vector.extract_strided_slice %120 {offsets = [0, 256], sizes = [12, 128], strides = [1, 1]} : vector<12x640xf32> to vector<12x128xf32>
    %150 = vector.extract_strided_slice %149 {offsets = [0, 0], sizes = [8, 128], strides = [1, 1]} : vector<12x128xf32> to vector<8x128xf32>
    %151 = arith.subf %150, %0 : vector<8x128xf32>
    %152 = arith.mulf %151, %151 : vector<8x128xf32>
    %cst_20 = arith.constant dense<0.000000e+00> : vector<128xf32>
    %153 = vector.multi_reduction <add>, %152, %cst_20 [0] : vector<8x128xf32> to vector<128xf32>
    %154 = vector.shape_cast %153 : vector<128xf32> to vector<1x128xf32>
    %155 = vector.broadcast %3 : f32 to vector<1x128xf32>
    %156 = arith.mulf %155, %154 : vector<1x128xf32>
    %157 = math.exp %156 : vector<1x128xf32>
    %158 = vector.extract_strided_slice %149 {offsets = [8, 0], sizes = [4, 128], strides = [1, 1]} : vector<12x128xf32> to vector<4x128xf32>
    %159 = vector.broadcast %157 : vector<1x128xf32> to vector<4x128xf32>
    %160 = arith.mulf %158, %159 : vector<4x128xf32>
    %161 = arith.addf %147, %160 : vector<4x128xf32>
    %162 = arith.addf %148, %157 : vector<1x128xf32>
    %163 = vector.extract_strided_slice %120 {offsets = [0, 384], sizes = [12, 128], strides = [1, 1]} : vector<12x640xf32> to vector<12x128xf32>
    %164 = vector.extract_strided_slice %163 {offsets = [0, 0], sizes = [8, 128], strides = [1, 1]} : vector<12x128xf32> to vector<8x128xf32>
    %165 = arith.subf %164, %0 : vector<8x128xf32>
    %166 = arith.mulf %165, %165 : vector<8x128xf32>
    %cst_21 = arith.constant dense<0.000000e+00> : vector<128xf32>
    %167 = vector.multi_reduction <add>, %166, %cst_21 [0] : vector<8x128xf32> to vector<128xf32>
    %168 = vector.shape_cast %167 : vector<128xf32> to vector<1x128xf32>
    %169 = vector.broadcast %3 : f32 to vector<1x128xf32>
    %170 = arith.mulf %169, %168 : vector<1x128xf32>
    %171 = math.exp %170 : vector<1x128xf32>
    %172 = vector.extract_strided_slice %163 {offsets = [8, 0], sizes = [4, 128], strides = [1, 1]} : vector<12x128xf32> to vector<4x128xf32>
    %173 = vector.broadcast %171 : vector<1x128xf32> to vector<4x128xf32>
    %174 = arith.mulf %172, %173 : vector<4x128xf32>
    %175 = arith.addf %161, %174 : vector<4x128xf32>
    %176 = arith.addf %162, %171 : vector<1x128xf32>
    %177 = vector.extract_strided_slice %120 {offsets = [0, 512], sizes = [12, 128], strides = [1, 1]} : vector<12x640xf32> to vector<12x128xf32>
    %178 = vector.extract_strided_slice %177 {offsets = [0, 0], sizes = [8, 128], strides = [1, 1]} : vector<12x128xf32> to vector<8x128xf32>
    %179 = arith.subf %178, %0 : vector<8x128xf32>
    %180 = arith.mulf %179, %179 : vector<8x128xf32>
    %cst_22 = arith.constant dense<0.000000e+00> : vector<128xf32>
    %181 = vector.multi_reduction <add>, %180, %cst_22 [0] : vector<8x128xf32> to vector<128xf32>
    %182 = vector.shape_cast %181 : vector<128xf32> to vector<1x128xf32>
    %183 = vector.broadcast %3 : f32 to vector<1x128xf32>
    %184 = arith.mulf %183, %182 : vector<1x128xf32>
    %185 = math.exp %184 : vector<1x128xf32>
    %186 = vector.extract_strided_slice %177 {offsets = [8, 0], sizes = [4, 128], strides = [1, 1]} : vector<12x128xf32> to vector<4x128xf32>
    %187 = vector.broadcast %185 : vector<1x128xf32> to vector<4x128xf32>
    %188 = arith.mulf %186, %187 : vector<4x128xf32>
    %189 = arith.addf %175, %188 : vector<4x128xf32>
    %190 = arith.addf %176, %185 : vector<1x128xf32>
    %191 = vector.extract_strided_slice %2 {offsets = [10, 0], sizes = [1, 128], strides = [1, 1]} : vector<25x128xi32> to vector<1x128xi32>
    %192 = vector.shape_cast %191 : vector<1x128xi32> to vector<128xi32>
    %193 = vector.shape_cast %192 : vector<128xi32> to vector<1x128xi32>
    %194 = vector.extract_strided_slice %2 {offsets = [11, 0], sizes = [1, 128], strides = [1, 1]} : vector<25x128xi32> to vector<1x128xi32>
    %195 = vector.shape_cast %194 : vector<1x128xi32> to vector<128xi32>
    %196 = vector.shape_cast %195 : vector<128xi32> to vector<1x128xi32>
    %197 = vector.extract_strided_slice %2 {offsets = [12, 0], sizes = [1, 128], strides = [1, 1]} : vector<25x128xi32> to vector<1x128xi32>
    %198 = vector.shape_cast %197 : vector<1x128xi32> to vector<128xi32>
    %199 = vector.shape_cast %198 : vector<128xi32> to vector<1x128xi32>
    %200 = vector.extract_strided_slice %2 {offsets = [13, 0], sizes = [1, 128], strides = [1, 1]} : vector<25x128xi32> to vector<1x128xi32>
    %201 = vector.shape_cast %200 : vector<1x128xi32> to vector<128xi32>
    %202 = vector.shape_cast %201 : vector<128xi32> to vector<1x128xi32>
    %203 = vector.extract_strided_slice %2 {offsets = [14, 0], sizes = [1, 128], strides = [1, 1]} : vector<25x128xi32> to vector<1x128xi32>
    %204 = vector.shape_cast %203 : vector<1x128xi32> to vector<128xi32>
    %205 = vector.shape_cast %204 : vector<128xi32> to vector<1x128xi32>
    %206 = tpu.concatenate %193, %196, %199, %202, %205 in 1 : vector<1x128xi32>, vector<1x128xi32>, vector<1x128xi32>, vector<1x128xi32>, vector<1x128xi32> -> vector<1x640xi32>
    %207 = vector.broadcast %206 : vector<1x640xi32> to vector<256x640xi32>
    %208 = arith.cmpi eq, %4, %207 : vector<256x640xi32>
    %cst_23 = arith.constant 1.000000e+00 : f32
    %cst_24 = arith.constant 0.000000e+00 : f32
    %209 = vector.broadcast %cst_23 : f32 to vector<256x640xf32>
    %210 = vector.broadcast %cst_24 : f32 to vector<256x640xf32>
    %211 = arith.select %208, %209, %210 : vector<256x640xi1>, vector<256x640xf32>
    %cst_25 = arith.constant dense<0.000000e+00> : vector<12x640xf32>
    %212 = tpu.matmul %1, %211, %cst_25 {dimension_numbers = #tpu.dot_dimension_numbers<[1], [0], [0], [1], [0, 0, 1, 1], [], []>} : vector<12x256xf32>, vector<256x640xf32>, vector<12x640xf32> -> vector<12x640xf32>
    %213 = vector.extract_strided_slice %212 {offsets = [0, 0], sizes = [12, 128], strides = [1, 1]} : vector<12x640xf32> to vector<12x128xf32>
    %214 = vector.extract_strided_slice %213 {offsets = [0, 0], sizes = [8, 128], strides = [1, 1]} : vector<12x128xf32> to vector<8x128xf32>
    %215 = arith.subf %214, %0 : vector<8x128xf32>
    %216 = arith.mulf %215, %215 : vector<8x128xf32>
    %cst_26 = arith.constant dense<0.000000e+00> : vector<128xf32>
    %217 = vector.multi_reduction <add>, %216, %cst_26 [0] : vector<8x128xf32> to vector<128xf32>
    %218 = vector.shape_cast %217 : vector<128xf32> to vector<1x128xf32>
    %219 = vector.broadcast %3 : f32 to vector<1x128xf32>
    %220 = arith.mulf %219, %218 : vector<1x128xf32>
    %221 = math.exp %220 : vector<1x128xf32>
    %222 = vector.extract_strided_slice %213 {offsets = [8, 0], sizes = [4, 128], strides = [1, 1]} : vector<12x128xf32> to vector<4x128xf32>
    %223 = vector.broadcast %221 : vector<1x128xf32> to vector<4x128xf32>
    %224 = arith.mulf %222, %223 : vector<4x128xf32>
    %225 = arith.addf %189, %224 : vector<4x128xf32>
    %226 = arith.addf %190, %221 : vector<1x128xf32>
    %227 = vector.extract_strided_slice %212 {offsets = [0, 128], sizes = [12, 128], strides = [1, 1]} : vector<12x640xf32> to vector<12x128xf32>
    %228 = vector.extract_strided_slice %227 {offsets = [0, 0], sizes = [8, 128], strides = [1, 1]} : vector<12x128xf32> to vector<8x128xf32>
    %229 = arith.subf %228, %0 : vector<8x128xf32>
    %230 = arith.mulf %229, %229 : vector<8x128xf32>
    %cst_27 = arith.constant dense<0.000000e+00> : vector<128xf32>
    %231 = vector.multi_reduction <add>, %230, %cst_27 [0] : vector<8x128xf32> to vector<128xf32>
    %232 = vector.shape_cast %231 : vector<128xf32> to vector<1x128xf32>
    %233 = vector.broadcast %3 : f32 to vector<1x128xf32>
    %234 = arith.mulf %233, %232 : vector<1x128xf32>
    %235 = math.exp %234 : vector<1x128xf32>
    %236 = vector.extract_strided_slice %227 {offsets = [8, 0], sizes = [4, 128], strides = [1, 1]} : vector<12x128xf32> to vector<4x128xf32>
    %237 = vector.broadcast %235 : vector<1x128xf32> to vector<4x128xf32>
    %238 = arith.mulf %236, %237 : vector<4x128xf32>
    %239 = arith.addf %225, %238 : vector<4x128xf32>
    %240 = arith.addf %226, %235 : vector<1x128xf32>
    %241 = vector.extract_strided_slice %212 {offsets = [0, 256], sizes = [12, 128], strides = [1, 1]} : vector<12x640xf32> to vector<12x128xf32>
    %242 = vector.extract_strided_slice %241 {offsets = [0, 0], sizes = [8, 128], strides = [1, 1]} : vector<12x128xf32> to vector<8x128xf32>
    %243 = arith.subf %242, %0 : vector<8x128xf32>
    %244 = arith.mulf %243, %243 : vector<8x128xf32>
    %cst_28 = arith.constant dense<0.000000e+00> : vector<128xf32>
    %245 = vector.multi_reduction <add>, %244, %cst_28 [0] : vector<8x128xf32> to vector<128xf32>
    %246 = vector.shape_cast %245 : vector<128xf32> to vector<1x128xf32>
    %247 = vector.broadcast %3 : f32 to vector<1x128xf32>
    %248 = arith.mulf %247, %246 : vector<1x128xf32>
    %249 = math.exp %248 : vector<1x128xf32>
    %250 = vector.extract_strided_slice %241 {offsets = [8, 0], sizes = [4, 128], strides = [1, 1]} : vector<12x128xf32> to vector<4x128xf32>
    %251 = vector.broadcast %249 : vector<1x128xf32> to vector<4x128xf32>
    %252 = arith.mulf %250, %251 : vector<4x128xf32>
    %253 = arith.addf %239, %252 : vector<4x128xf32>
    %254 = arith.addf %240, %249 : vector<1x128xf32>
    %255 = vector.extract_strided_slice %212 {offsets = [0, 384], sizes = [12, 128], strides = [1, 1]} : vector<12x640xf32> to vector<12x128xf32>
    %256 = vector.extract_strided_slice %255 {offsets = [0, 0], sizes = [8, 128], strides = [1, 1]} : vector<12x128xf32> to vector<8x128xf32>
    %257 = arith.subf %256, %0 : vector<8x128xf32>
    %258 = arith.mulf %257, %257 : vector<8x128xf32>
    %cst_29 = arith.constant dense<0.000000e+00> : vector<128xf32>
    %259 = vector.multi_reduction <add>, %258, %cst_29 [0] : vector<8x128xf32> to vector<128xf32>
    %260 = vector.shape_cast %259 : vector<128xf32> to vector<1x128xf32>
    %261 = vector.broadcast %3 : f32 to vector<1x128xf32>
    %262 = arith.mulf %261, %260 : vector<1x128xf32>
    %263 = math.exp %262 : vector<1x128xf32>
    %264 = vector.extract_strided_slice %255 {offsets = [8, 0], sizes = [4, 128], strides = [1, 1]} : vector<12x128xf32> to vector<4x128xf32>
    %265 = vector.broadcast %263 : vector<1x128xf32> to vector<4x128xf32>
    %266 = arith.mulf %264, %265 : vector<4x128xf32>
    %267 = arith.addf %253, %266 : vector<4x128xf32>
    %268 = arith.addf %254, %263 : vector<1x128xf32>
    %269 = vector.extract_strided_slice %212 {offsets = [0, 512], sizes = [12, 128], strides = [1, 1]} : vector<12x640xf32> to vector<12x128xf32>
    %270 = vector.extract_strided_slice %269 {offsets = [0, 0], sizes = [8, 128], strides = [1, 1]} : vector<12x128xf32> to vector<8x128xf32>
    %271 = arith.subf %270, %0 : vector<8x128xf32>
    %272 = arith.mulf %271, %271 : vector<8x128xf32>
    %cst_30 = arith.constant dense<0.000000e+00> : vector<128xf32>
    %273 = vector.multi_reduction <add>, %272, %cst_30 [0] : vector<8x128xf32> to vector<128xf32>
    %274 = vector.shape_cast %273 : vector<128xf32> to vector<1x128xf32>
    %275 = vector.broadcast %3 : f32 to vector<1x128xf32>
    %276 = arith.mulf %275, %274 : vector<1x128xf32>
    %277 = math.exp %276 : vector<1x128xf32>
    %278 = vector.extract_strided_slice %269 {offsets = [8, 0], sizes = [4, 128], strides = [1, 1]} : vector<12x128xf32> to vector<4x128xf32>
    %279 = vector.broadcast %277 : vector<1x128xf32> to vector<4x128xf32>
    %280 = arith.mulf %278, %279 : vector<4x128xf32>
    %281 = arith.addf %267, %280 : vector<4x128xf32>
    %282 = arith.addf %268, %277 : vector<1x128xf32>
    %283 = vector.extract_strided_slice %2 {offsets = [15, 0], sizes = [1, 128], strides = [1, 1]} : vector<25x128xi32> to vector<1x128xi32>
    %284 = vector.shape_cast %283 : vector<1x128xi32> to vector<128xi32>
    %285 = vector.shape_cast %284 : vector<128xi32> to vector<1x128xi32>
    %286 = vector.extract_strided_slice %2 {offsets = [16, 0], sizes = [1, 128], strides = [1, 1]} : vector<25x128xi32> to vector<1x128xi32>
    %287 = vector.shape_cast %286 : vector<1x128xi32> to vector<128xi32>
    %288 = vector.shape_cast %287 : vector<128xi32> to vector<1x128xi32>
    %289 = vector.extract_strided_slice %2 {offsets = [17, 0], sizes = [1, 128], strides = [1, 1]} : vector<25x128xi32> to vector<1x128xi32>
    %290 = vector.shape_cast %289 : vector<1x128xi32> to vector<128xi32>
    %291 = vector.shape_cast %290 : vector<128xi32> to vector<1x128xi32>
    %292 = vector.extract_strided_slice %2 {offsets = [18, 0], sizes = [1, 128], strides = [1, 1]} : vector<25x128xi32> to vector<1x128xi32>
    %293 = vector.shape_cast %292 : vector<1x128xi32> to vector<128xi32>
    %294 = vector.shape_cast %293 : vector<128xi32> to vector<1x128xi32>
    %295 = vector.extract_strided_slice %2 {offsets = [19, 0], sizes = [1, 128], strides = [1, 1]} : vector<25x128xi32> to vector<1x128xi32>
    %296 = vector.shape_cast %295 : vector<1x128xi32> to vector<128xi32>
    %297 = vector.shape_cast %296 : vector<128xi32> to vector<1x128xi32>
    %298 = tpu.concatenate %285, %288, %291, %294, %297 in 1 : vector<1x128xi32>, vector<1x128xi32>, vector<1x128xi32>, vector<1x128xi32>, vector<1x128xi32> -> vector<1x640xi32>
    %299 = vector.broadcast %298 : vector<1x640xi32> to vector<256x640xi32>
    %300 = arith.cmpi eq, %4, %299 : vector<256x640xi32>
    %cst_31 = arith.constant 1.000000e+00 : f32
    %cst_32 = arith.constant 0.000000e+00 : f32
    %301 = vector.broadcast %cst_31 : f32 to vector<256x640xf32>
    %302 = vector.broadcast %cst_32 : f32 to vector<256x640xf32>
    %303 = arith.select %300, %301, %302 : vector<256x640xi1>, vector<256x640xf32>
    %cst_33 = arith.constant dense<0.000000e+00> : vector<12x640xf32>
    %304 = tpu.matmul %1, %303, %cst_33 {dimension_numbers = #tpu.dot_dimension_numbers<[1], [0], [0], [1], [0, 0, 1, 1], [], []>} : vector<12x256xf32>, vector<256x640xf32>, vector<12x640xf32> -> vector<12x640xf32>
    %305 = vector.extract_strided_slice %304 {offsets = [0, 0], sizes = [12, 128], strides = [1, 1]} : vector<12x640xf32> to vector<12x128xf32>
    %306 = vector.extract_strided_slice %305 {offsets = [0, 0], sizes = [8, 128], strides = [1, 1]} : vector<12x128xf32> to vector<8x128xf32>
    %307 = arith.subf %306, %0 : vector<8x128xf32>
    %308 = arith.mulf %307, %307 : vector<8x128xf32>
    %cst_34 = arith.constant dense<0.000000e+00> : vector<128xf32>
    %309 = vector.multi_reduction <add>, %308, %cst_34 [0] : vector<8x128xf32> to vector<128xf32>
    %310 = vector.shape_cast %309 : vector<128xf32> to vector<1x128xf32>
    %311 = vector.broadcast %3 : f32 to vector<1x128xf32>
    %312 = arith.mulf %311, %310 : vector<1x128xf32>
    %313 = math.exp %312 : vector<1x128xf32>
    %314 = vector.extract_strided_slice %305 {offsets = [8, 0], sizes = [4, 128], strides = [1, 1]} : vector<12x128xf32> to vector<4x128xf32>
    %315 = vector.broadcast %313 : vector<1x128xf32> to vector<4x128xf32>
    %316 = arith.mulf %314, %315 : vector<4x128xf32>
    %317 = arith.addf %281, %316 : vector<4x128xf32>
    %318 = arith.addf %282, %313 : vector<1x128xf32>
    %319 = vector.extract_strided_slice %304 {offsets = [0, 128], sizes = [12, 128], strides = [1, 1]} : vector<12x640xf32> to vector<12x128xf32>
    %320 = vector.extract_strided_slice %319 {offsets = [0, 0], sizes = [8, 128], strides = [1, 1]} : vector<12x128xf32> to vector<8x128xf32>
    %321 = arith.subf %320, %0 : vector<8x128xf32>
    %322 = arith.mulf %321, %321 : vector<8x128xf32>
    %cst_35 = arith.constant dense<0.000000e+00> : vector<128xf32>
    %323 = vector.multi_reduction <add>, %322, %cst_35 [0] : vector<8x128xf32> to vector<128xf32>
    %324 = vector.shape_cast %323 : vector<128xf32> to vector<1x128xf32>
    %325 = vector.broadcast %3 : f32 to vector<1x128xf32>
    %326 = arith.mulf %325, %324 : vector<1x128xf32>
    %327 = math.exp %326 : vector<1x128xf32>
    %328 = vector.extract_strided_slice %319 {offsets = [8, 0], sizes = [4, 128], strides = [1, 1]} : vector<12x128xf32> to vector<4x128xf32>
    %329 = vector.broadcast %327 : vector<1x128xf32> to vector<4x128xf32>
    %330 = arith.mulf %328, %329 : vector<4x128xf32>
    %331 = arith.addf %317, %330 : vector<4x128xf32>
    %332 = arith.addf %318, %327 : vector<1x128xf32>
    %333 = vector.extract_strided_slice %304 {offsets = [0, 256], sizes = [12, 128], strides = [1, 1]} : vector<12x640xf32> to vector<12x128xf32>
    %334 = vector.extract_strided_slice %333 {offsets = [0, 0], sizes = [8, 128], strides = [1, 1]} : vector<12x128xf32> to vector<8x128xf32>
    %335 = arith.subf %334, %0 : vector<8x128xf32>
    %336 = arith.mulf %335, %335 : vector<8x128xf32>
    %cst_36 = arith.constant dense<0.000000e+00> : vector<128xf32>
    %337 = vector.multi_reduction <add>, %336, %cst_36 [0] : vector<8x128xf32> to vector<128xf32>
    %338 = vector.shape_cast %337 : vector<128xf32> to vector<1x128xf32>
    %339 = vector.broadcast %3 : f32 to vector<1x128xf32>
    %340 = arith.mulf %339, %338 : vector<1x128xf32>
    %341 = math.exp %340 : vector<1x128xf32>
    %342 = vector.extract_strided_slice %333 {offsets = [8, 0], sizes = [4, 128], strides = [1, 1]} : vector<12x128xf32> to vector<4x128xf32>
    %343 = vector.broadcast %341 : vector<1x128xf32> to vector<4x128xf32>
    %344 = arith.mulf %342, %343 : vector<4x128xf32>
    %345 = arith.addf %331, %344 : vector<4x128xf32>
    %346 = arith.addf %332, %341 : vector<1x128xf32>
    %347 = vector.extract_strided_slice %304 {offsets = [0, 384], sizes = [12, 128], strides = [1, 1]} : vector<12x640xf32> to vector<12x128xf32>
    %348 = vector.extract_strided_slice %347 {offsets = [0, 0], sizes = [8, 128], strides = [1, 1]} : vector<12x128xf32> to vector<8x128xf32>
    %349 = arith.subf %348, %0 : vector<8x128xf32>
    %350 = arith.mulf %349, %349 : vector<8x128xf32>
    %cst_37 = arith.constant dense<0.000000e+00> : vector<128xf32>
    %351 = vector.multi_reduction <add>, %350, %cst_37 [0] : vector<8x128xf32> to vector<128xf32>
    %352 = vector.shape_cast %351 : vector<128xf32> to vector<1x128xf32>
    %353 = vector.broadcast %3 : f32 to vector<1x128xf32>
    %354 = arith.mulf %353, %352 : vector<1x128xf32>
    %355 = math.exp %354 : vector<1x128xf32>
    %356 = vector.extract_strided_slice %347 {offsets = [8, 0], sizes = [4, 128], strides = [1, 1]} : vector<12x128xf32> to vector<4x128xf32>
    %357 = vector.broadcast %355 : vector<1x128xf32> to vector<4x128xf32>
    %358 = arith.mulf %356, %357 : vector<4x128xf32>
    %359 = arith.addf %345, %358 : vector<4x128xf32>
    %360 = arith.addf %346, %355 : vector<1x128xf32>
    %361 = vector.extract_strided_slice %304 {offsets = [0, 512], sizes = [12, 128], strides = [1, 1]} : vector<12x640xf32> to vector<12x128xf32>
    %362 = vector.extract_strided_slice %361 {offsets = [0, 0], sizes = [8, 128], strides = [1, 1]} : vector<12x128xf32> to vector<8x128xf32>
    %363 = arith.subf %362, %0 : vector<8x128xf32>
    %364 = arith.mulf %363, %363 : vector<8x128xf32>
    %cst_38 = arith.constant dense<0.000000e+00> : vector<128xf32>
    %365 = vector.multi_reduction <add>, %364, %cst_38 [0] : vector<8x128xf32> to vector<128xf32>
    %366 = vector.shape_cast %365 : vector<128xf32> to vector<1x128xf32>
    %367 = vector.broadcast %3 : f32 to vector<1x128xf32>
    %368 = arith.mulf %367, %366 : vector<1x128xf32>
    %369 = math.exp %368 : vector<1x128xf32>
    %370 = vector.extract_strided_slice %361 {offsets = [8, 0], sizes = [4, 128], strides = [1, 1]} : vector<12x128xf32> to vector<4x128xf32>
    %371 = vector.broadcast %369 : vector<1x128xf32> to vector<4x128xf32>
    %372 = arith.mulf %370, %371 : vector<4x128xf32>
    %373 = arith.addf %359, %372 : vector<4x128xf32>
    %374 = arith.addf %360, %369 : vector<1x128xf32>
    %375 = vector.extract_strided_slice %2 {offsets = [20, 0], sizes = [1, 128], strides = [1, 1]} : vector<25x128xi32> to vector<1x128xi32>
    %376 = vector.shape_cast %375 : vector<1x128xi32> to vector<128xi32>
    %377 = vector.shape_cast %376 : vector<128xi32> to vector<1x128xi32>
    %378 = vector.extract_strided_slice %2 {offsets = [21, 0], sizes = [1, 128], strides = [1, 1]} : vector<25x128xi32> to vector<1x128xi32>
    %379 = vector.shape_cast %378 : vector<1x128xi32> to vector<128xi32>
    %380 = vector.shape_cast %379 : vector<128xi32> to vector<1x128xi32>
    %381 = vector.extract_strided_slice %2 {offsets = [22, 0], sizes = [1, 128], strides = [1, 1]} : vector<25x128xi32> to vector<1x128xi32>
    %382 = vector.shape_cast %381 : vector<1x128xi32> to vector<128xi32>
    %383 = vector.shape_cast %382 : vector<128xi32> to vector<1x128xi32>
    %384 = vector.extract_strided_slice %2 {offsets = [23, 0], sizes = [1, 128], strides = [1, 1]} : vector<25x128xi32> to vector<1x128xi32>
    %385 = vector.shape_cast %384 : vector<1x128xi32> to vector<128xi32>
    %386 = vector.shape_cast %385 : vector<128xi32> to vector<1x128xi32>
    %387 = vector.extract_strided_slice %2 {offsets = [24, 0], sizes = [1, 128], strides = [1, 1]} : vector<25x128xi32> to vector<1x128xi32>
    %388 = vector.shape_cast %387 : vector<1x128xi32> to vector<128xi32>
    %389 = vector.shape_cast %388 : vector<128xi32> to vector<1x128xi32>
    %390 = tpu.concatenate %377, %380, %383, %386, %389 in 1 : vector<1x128xi32>, vector<1x128xi32>, vector<1x128xi32>, vector<1x128xi32>, vector<1x128xi32> -> vector<1x640xi32>
    %391 = vector.broadcast %390 : vector<1x640xi32> to vector<256x640xi32>
    %392 = arith.cmpi eq, %4, %391 : vector<256x640xi32>
    %cst_39 = arith.constant 1.000000e+00 : f32
    %cst_40 = arith.constant 0.000000e+00 : f32
    %393 = vector.broadcast %cst_39 : f32 to vector<256x640xf32>
    %394 = vector.broadcast %cst_40 : f32 to vector<256x640xf32>
    %395 = arith.select %392, %393, %394 : vector<256x640xi1>, vector<256x640xf32>
    %cst_41 = arith.constant dense<0.000000e+00> : vector<12x640xf32>
    %396 = tpu.matmul %1, %395, %cst_41 {dimension_numbers = #tpu.dot_dimension_numbers<[1], [0], [0], [1], [0, 0, 1, 1], [], []>} : vector<12x256xf32>, vector<256x640xf32>, vector<12x640xf32> -> vector<12x640xf32>
    %397 = vector.extract_strided_slice %396 {offsets = [0, 0], sizes = [12, 128], strides = [1, 1]} : vector<12x640xf32> to vector<12x128xf32>
    %398 = vector.extract_strided_slice %397 {offsets = [0, 0], sizes = [8, 128], strides = [1, 1]} : vector<12x128xf32> to vector<8x128xf32>
    %399 = arith.subf %398, %0 : vector<8x128xf32>
    %400 = arith.mulf %399, %399 : vector<8x128xf32>
    %cst_42 = arith.constant dense<0.000000e+00> : vector<128xf32>
    %401 = vector.multi_reduction <add>, %400, %cst_42 [0] : vector<8x128xf32> to vector<128xf32>
    %402 = vector.shape_cast %401 : vector<128xf32> to vector<1x128xf32>
    %403 = vector.broadcast %3 : f32 to vector<1x128xf32>
    %404 = arith.mulf %403, %402 : vector<1x128xf32>
    %405 = math.exp %404 : vector<1x128xf32>
    %406 = vector.extract_strided_slice %397 {offsets = [8, 0], sizes = [4, 128], strides = [1, 1]} : vector<12x128xf32> to vector<4x128xf32>
    %407 = vector.broadcast %405 : vector<1x128xf32> to vector<4x128xf32>
    %408 = arith.mulf %406, %407 : vector<4x128xf32>
    %409 = arith.addf %373, %408 : vector<4x128xf32>
    %410 = arith.addf %374, %405 : vector<1x128xf32>
    %411 = vector.extract_strided_slice %396 {offsets = [0, 128], sizes = [12, 128], strides = [1, 1]} : vector<12x640xf32> to vector<12x128xf32>
    %412 = vector.extract_strided_slice %411 {offsets = [0, 0], sizes = [8, 128], strides = [1, 1]} : vector<12x128xf32> to vector<8x128xf32>
    %413 = arith.subf %412, %0 : vector<8x128xf32>
    %414 = arith.mulf %413, %413 : vector<8x128xf32>
    %cst_43 = arith.constant dense<0.000000e+00> : vector<128xf32>
    %415 = vector.multi_reduction <add>, %414, %cst_43 [0] : vector<8x128xf32> to vector<128xf32>
    %416 = vector.shape_cast %415 : vector<128xf32> to vector<1x128xf32>
    %417 = vector.broadcast %3 : f32 to vector<1x128xf32>
    %418 = arith.mulf %417, %416 : vector<1x128xf32>
    %419 = math.exp %418 : vector<1x128xf32>
    %420 = vector.extract_strided_slice %411 {offsets = [8, 0], sizes = [4, 128], strides = [1, 1]} : vector<12x128xf32> to vector<4x128xf32>
    %421 = vector.broadcast %419 : vector<1x128xf32> to vector<4x128xf32>
    %422 = arith.mulf %420, %421 : vector<4x128xf32>
    %423 = arith.addf %409, %422 : vector<4x128xf32>
    %424 = arith.addf %410, %419 : vector<1x128xf32>
    %425 = vector.extract_strided_slice %396 {offsets = [0, 256], sizes = [12, 128], strides = [1, 1]} : vector<12x640xf32> to vector<12x128xf32>
    %426 = vector.extract_strided_slice %425 {offsets = [0, 0], sizes = [8, 128], strides = [1, 1]} : vector<12x128xf32> to vector<8x128xf32>
    %427 = arith.subf %426, %0 : vector<8x128xf32>
    %428 = arith.mulf %427, %427 : vector<8x128xf32>
    %cst_44 = arith.constant dense<0.000000e+00> : vector<128xf32>
    %429 = vector.multi_reduction <add>, %428, %cst_44 [0] : vector<8x128xf32> to vector<128xf32>
    %430 = vector.shape_cast %429 : vector<128xf32> to vector<1x128xf32>
    %431 = vector.broadcast %3 : f32 to vector<1x128xf32>
    %432 = arith.mulf %431, %430 : vector<1x128xf32>
    %433 = math.exp %432 : vector<1x128xf32>
    %434 = vector.extract_strided_slice %425 {offsets = [8, 0], sizes = [4, 128], strides = [1, 1]} : vector<12x128xf32> to vector<4x128xf32>
    %435 = vector.broadcast %433 : vector<1x128xf32> to vector<4x128xf32>
    %436 = arith.mulf %434, %435 : vector<4x128xf32>
    %437 = arith.addf %423, %436 : vector<4x128xf32>
    %438 = arith.addf %424, %433 : vector<1x128xf32>
    %439 = vector.extract_strided_slice %396 {offsets = [0, 384], sizes = [12, 128], strides = [1, 1]} : vector<12x640xf32> to vector<12x128xf32>
    %440 = vector.extract_strided_slice %439 {offsets = [0, 0], sizes = [8, 128], strides = [1, 1]} : vector<12x128xf32> to vector<8x128xf32>
    %441 = arith.subf %440, %0 : vector<8x128xf32>
    %442 = arith.mulf %441, %441 : vector<8x128xf32>
    %cst_45 = arith.constant dense<0.000000e+00> : vector<128xf32>
    %443 = vector.multi_reduction <add>, %442, %cst_45 [0] : vector<8x128xf32> to vector<128xf32>
    %444 = vector.shape_cast %443 : vector<128xf32> to vector<1x128xf32>
    %445 = vector.broadcast %3 : f32 to vector<1x128xf32>
    %446 = arith.mulf %445, %444 : vector<1x128xf32>
    %447 = math.exp %446 : vector<1x128xf32>
    %448 = vector.extract_strided_slice %439 {offsets = [8, 0], sizes = [4, 128], strides = [1, 1]} : vector<12x128xf32> to vector<4x128xf32>
    %449 = vector.broadcast %447 : vector<1x128xf32> to vector<4x128xf32>
    %450 = arith.mulf %448, %449 : vector<4x128xf32>
    %451 = arith.addf %437, %450 : vector<4x128xf32>
    %452 = arith.addf %438, %447 : vector<1x128xf32>
    %453 = vector.extract_strided_slice %396 {offsets = [0, 512], sizes = [12, 128], strides = [1, 1]} : vector<12x640xf32> to vector<12x128xf32>
    %454 = vector.extract_strided_slice %453 {offsets = [0, 0], sizes = [8, 128], strides = [1, 1]} : vector<12x128xf32> to vector<8x128xf32>
    %455 = arith.subf %454, %0 : vector<8x128xf32>
    %456 = arith.mulf %455, %455 : vector<8x128xf32>
    %cst_46 = arith.constant dense<0.000000e+00> : vector<128xf32>
    %457 = vector.multi_reduction <add>, %456, %cst_46 [0] : vector<8x128xf32> to vector<128xf32>
    %458 = vector.shape_cast %457 : vector<128xf32> to vector<1x128xf32>
    %459 = vector.broadcast %3 : f32 to vector<1x128xf32>
    %460 = arith.mulf %459, %458 : vector<1x128xf32>
    %461 = math.exp %460 : vector<1x128xf32>
    %462 = vector.extract_strided_slice %453 {offsets = [8, 0], sizes = [4, 128], strides = [1, 1]} : vector<12x128xf32> to vector<4x128xf32>
    %463 = vector.broadcast %461 : vector<1x128xf32> to vector<4x128xf32>
    %464 = arith.mulf %462, %463 : vector<4x128xf32>
    %465 = arith.addf %451, %464 : vector<4x128xf32>
    %466 = arith.addf %452, %461 : vector<1x128xf32>
    %cst_47 = arith.constant 1.000000e-15 : f32
    %467 = vector.broadcast %cst_47 : f32 to vector<1x128xf32>
    %468 = arith.maximumf %466, %467 : vector<1x128xf32>
    %469 = tpu.reciprocal %468 {approx = true} : vector<1x128xf32> -> vector<1x128xf32>
    %470 = vector.broadcast %469 : vector<1x128xf32> to vector<4x128xf32>
    %471 = arith.mulf %465, %470 : vector<4x128xf32>
    %c0_48 = arith.constant 0 : index
    %c0_49 = arith.constant 0 : index
    %472 = vector.load %arg5[%c0_48, %c0_49] : memref<4x128xf32, #tpu.memory_space<vmem>>, vector<4x128xf32>
    tpu.vector_store %arg5[%c0_48, %c0_49], %471 {strides = array<i32>} : memref<4x128xf32, #tpu.memory_space<vmem>>, vector<4x128xf32>,
    return
  }
  func.func @transform_0(%arg0: i32) -> i32 {
    %c0_i32 = arith.constant 0 : i32
    %c0_i32_0 = arith.constant 0 : i32
    return %c0_i32 : i32
  }
  func.func @transform_1(%arg0: i32) -> (i32, i32) {
    %c0_i32 = arith.constant 0 : i32
    %c0_i32_0 = arith.constant 0 : i32
    return %c0_i32, %arg0 : i32, i32
  }
  func.func @transform_2(%arg0: i32) -> (i32, i32) {
    %c0_i32 = arith.constant 0 : i32
    %c0_i32_0 = arith.constant 0 : i32
    return %c0_i32, %arg0 : i32, i32
  }
  func.func @transform_3(%arg0: i32) -> (i32, i32) {
    %c0_i32 = arith.constant 0 : i32
    %c0_i32_0 = arith.constant 0 : i32
    %c0_i32_1 = arith.constant 0 : i32
    return %c0_i32, %c0_i32_0 : i32, i32
  }
  func.func @transform_4(%arg0: i32) -> (i32, i32) {
    %c0_i32 = arith.constant 0 : i32
    %c0_i32_0 = arith.constant 0 : i32
    return %c0_i32, %arg0 : i32, i32
  }
}

</mosaic_0001>

<bundles_post_ra>
// kernel: tpu_custom_call.1
= control target key start
LH: loop header
LB: loop body
LE: loop exit
PB: predicated region body
PF: predicated region fallthrough
CT: control target
= control target key end

     0   :  { %10 = vsyncpa [#allocation4], 0  ;;  %s8441_s0 = inlined_call_operand.<no memory space> [shape: f32[1], index: 0, kind: input, shape index: {}]   ;;  %s8442_s1 = inlined_call_operand.hbm [shape: s32[25,128], index: 1, kind: input, shape index: {}]   ;;  %s8443_s2 = inlined_call_operand.hbm [shape: f32[8,128], index: 2, kind: input, shape index: {}]   ;;  %s8444_s3 = inlined_call_operand.hbm [shape: f32[12,256], index: 3, kind: input, shape index: {}]   ;;  %s8445_s4 = inlined_call_operand.hbm [shape: f32[4,128], index: 4, kind: output, shape index: {}]  }
   0x1   :  { %11 = vsyncpa [#allocation7], 0 }
   0x2   :  { %12 = vsyncpa [#allocation5], 0  ;;  %s5303_s15 = smov [#allocation6]   ;;  %s5304_s17 = smov [#allocation3]  }
   0x3   :  { %s33_s16 = sshll.u32 %s5303_s15, 4  ;;  %s20_s18 = sshll.u32 %s5304_s17, 4  ;;  %s34_s16 = int_to_ptr.vmem [resolvable:$true] %s33_s16  ;;  %s5337_s18 = int_to_ptr.vmem [resolvable:$true] %s20_s18 }
   0x4   :  { %s5209_s21 = scalar_lea.hbm %s8443_s2, 128 }
   0x5   :  { %p5210_p0 = scmp.ne.s32.totalorder %s8443_s2, %s5209_s21  ;;  %p5213_p1 = scmp.lt.u32.totalorder %s5209_s21, %s8443_s2 }
   0x7   :  { %p5215_p2 = pnand %p5213_p1, %p5210_p0 }
   0x9   :  { %5218 = shalt.err (!%p5215_p2)
}
   0xa   :  { %s5219_s26 = scalar_lea.vmem %s34_s16, 128  ;;  %p5224_p4 = scmp.lt.s32.totalorder %s34_s16, %s34_s16 }
   0xb   :  { %p5220_p3 = scmp.ne.s32.totalorder %s34_s16, %s5219_s26  ;;  %p5225_p5 = scmp.lt.s32.totalorder %s5219_s26, %s5219_s26 }
   0xd   :  { %p5226_p6 = por %p5225_p5, %p5224_p4 }
   0xf   :  { %p5227_p7 = pnand %p5226_p6, %p5220_p3 }
  0x11   :  { %5230 = shalt.err (!%p5227_p7)
}
  0x12   :  { %36 = dma.hbm_to_vmem [thread:$0]  %s8443_s2, 128, %s34_s16, [#allocation7]  }
  0x13   :  { %s5231_s5 = scalar_lea.hbm %s8442_s1, 512 }
  0x14   :  { %p5232_p8 = scmp.ne.s32.totalorder %s8442_s1, %s5231_s5  ;;  %p5235_p9 = scmp.lt.u32.totalorder %s5231_s5, %s8442_s1 }
  0x16   :  { %p5237_p10 = pnand %p5235_p9, %p5232_p8 }
  0x18   :  { %5240 = shalt.err (!%p5237_p10)
}
  0x19   :  { %s5241_s10 = scalar_lea.vmem %s5337_s18, 512  ;;  %p5246_p12 = scmp.lt.s32.totalorder %s5337_s18, %s5337_s18 }
  0x1a   :  { %p5242_p11 = scmp.ne.s32.totalorder %s5337_s18, %s5241_s10  ;;  %p5247_p13 = scmp.lt.s32.totalorder %s5241_s10, %s5241_s10 }
  0x1c   :  { %p5248_p0 = por %p5247_p13, %p5246_p12 }
  0x1e   :  { %p5249_p1 = pnand %p5248_p0, %p5242_p11 }
  0x20   :  { %5252 = shalt.err (!%p5249_p1)
}
  0x21   :  { %s5305_s2 = smov 128   ;;  %s5306_s11 = smov 8  }
  0x22   :  { %26 = dma.hbm_to_vmem [thread:$0]  %s8442_s1, 512, %s5337_s18, [#allocation4], %s5305_s2, %s5305_s2, %s5306_s11  }
  0x23   :  { %s5307_s14 = smov [#allocation8]   ;;  %s5253_s19 = scalar_lea.hbm %s8444_s3, 512 }
  0x24   :  { %s42_s15 = sshll.u32 %s5307_s14, 4  ;;  %p5254_p2 = scmp.ne.s32.totalorder %s8444_s3, %s5253_s19  ;;  %s43_s15 = int_to_ptr.vmem [resolvable:$true] %s42_s15 }
  0x25   :  { %p5257_p3 = scmp.lt.u32.totalorder %s5253_s19, %s8444_s3 }
  0x27   :  { %p5259_p4 = pnand %p5257_p3, %p5254_p2 }
  0x29   :  { %5262 = shalt.err (!%p5259_p4)
}
  0x2a   :  { %s5263_s24 = scalar_lea.vmem %s43_s15, 512  ;;  %p5268_p6 = scmp.lt.s32.totalorder %s43_s15, %s43_s15 }
  0x2b   :  { %p5264_p5 = scmp.ne.s32.totalorder %s43_s15, %s5263_s24  ;;  %p5269_p7 = scmp.lt.s32.totalorder %s5263_s24, %s5263_s24 }
  0x2d   :  { %p5270_p8 = por %p5269_p7, %p5268_p6 }
  0x2f   :  { %p5271_p9 = pnand %p5270_p8, %p5264_p5 }
  0x31   :  { %5274 = shalt.err (!%p5271_p9)
}
  0x32   :  { %s5308_s1 = smov 256   ;;  %s5309_s18 = smov 16  }
  0x33   :  { %48 = dma.hbm_to_vmem [thread:$0]  %s8444_s3, 512, %s43_s15, [#allocation7], %s5308_s1, %s5308_s1, %s5309_s18  }
  0x34   :  { %5297 = dma.done.wait [#allocation4], 512  }
  0x35   :  { %5298 = vsyncadd [#allocation4], 4294966784 }
  0x36   :  { %5299 = dma.done.wait [#allocation7], 640  }
  0x37   :  { %5300 = vsyncadd [#allocation7], 4294966656  ;;  %v68_v0 = vlaneseq  ;;  %v5382_v2 = vld [vmem:[#allocation3] sm:$0xff]  ;;  %v5387_v6 = vld [vmem:[#allocation8 + $0x8] sm:$0xff]  ;;  %v5310_v27 = vmov 1.0|1.0  }
  0x38   :  { %v104_v3 = vrot.slane %v5382_v2, 4  ;;  %v101_v5 = vrot.slane %v5382_v2, 1  ;;  %v5389_v7 = vld [vmem:[#allocation3 + $0x8] sm:$0xff]  ;;  %v103_v8 = vrot.slane %v5382_v2, 3  ;;  %509 = vmatprep.mubr.f32.mxu0 %v5387_v6  ;;  %v102_v10 = vrot.slane %v5382_v2, 2  ;;  %586 = vmatprep.mubr.f32.mxu1 %v5387_v6  ;;  %v65_v13 = vld [vmem:[#allocation3 + $0x10] sm:$0xff] }
  0x39   :  { %v5380_v1 = vshrl.u32 %v68_v0, 7  ;;  %v746_v11 = vrot.slane %v5389_v7, 4  ;;  %v2030_v19 = vrot.slane %v65_v13, 4  ;;  %v5857_v57 = vld [vmem:[#allocation8] sm:$0xff]  ;;  %v5873_v58 = vld [vmem:[#allocation8 + $0x18] sm:$0xf] }
  0x3a   :  { %v5887_v59 = vld [vmem:[#allocation8 + $0x10] sm:$0xf]  ;;  %v745_v60 = vrot.slane %v5389_v7, 3  ;;  %v6271_v0 = vld [vmem:[#allocation8 + $0x8] sm:$0xff]  ;;  %v6770_v13 = vld [vmem:[#allocation8] sm:$0xff] }
  0x3b   :  { %v107_v4 = vsub.s32 0, %v5380_v1  ;;  %v5398_v12 = vsub.s32 2, %v5380_v1  ;;  %v5411_v16 = vadd.s32 8, %v5380_v1  ;;  %v5419_v20 = vsub.s32 7, %v5380_v1 }
  0x3c   :  { %v5426_v22 = vadd.s32 16, %v5380_v1  ;;  %v5429_v23 = vadd.s32 24, %v5380_v1  ;;  %v5439_v25 = vadd.s32 32, %v5380_v1  ;;  %v5442_v26 = vadd.s32 40, %v5380_v1 }
  0x3d   :  { %v5392_v9 = vrot.slane %v104_v3, %v107_v4  ;;  %v5403_v14 = vrot.slane %v101_v5, %v107_v4  ;;  %v5408_v15 = vrot.slane %v746_v11, %v5398_v12  ;;  %v5414_v17 = vrot.slane %v5382_v2, %v107_v4 }
  0x3e   :  { %v5416_v18 = vrot.slane %v103_v8, %v107_v4  ;;  %v5423_v21 = vrot.slane %v102_v10, %v107_v4  ;;  %v5432_v24 = vrot.slane %v2030_v19, %v5419_v20  ;;  %v5482_v28 = vadd.s32 48, %v5380_v1 }
  0x3f   :  { %vm126_vm0 = vcmp.eq.s32.totalorder %v5380_v1, %v5403_v14  ;;  %vm131_vm1 = vcmp.eq.s32.totalorder %v5411_v16, %v5403_v14  ;;  %vm125_vm5 = vcmp.eq.s32.totalorder %v5380_v1, %v5414_v17  ;;  %vm130_vm6 = vcmp.eq.s32.totalorder %v5411_v16, %v5414_v17 }
  0x40   :  { %vm4320_vm2 = vmpackc.low %vm131_vm1, %vm126_vm0  ;;  %vm128_vm3 = vcmp.eq.s32.totalorder %v5380_v1, %v5416_v18  ;;  %vm133_vm4 = vcmp.eq.s32.totalorder %v5411_v16, %v5416_v18  ;;  %vm127_vm8 = vcmp.eq.s32.totalorder %v5380_v1, %v5423_v21  ;;  %vm132_vm9 = vcmp.eq.s32.totalorder %v5411_v16, %v5423_v21 }
  0x41   :  { %4321 = vmatprep.subr.msk.bf16.mxu0 %vm4320_vm2, %v5310_v27  ;;  %vm4384_vm7 = vmpackc.low %vm133_vm4, %vm128_vm3  ;;  %vm136_vm10 = vcmp.eq.s32.totalorder %v5426_v22, %v5403_v14  ;;  %vm141_vm11 = vcmp.eq.s32.totalorder %v5429_v23, %v5403_v14  ;;  %vm138_vm13 = vcmp.eq.s32.totalorder %v5426_v22, %v5416_v18  ;;  %vm143_vm14 = vcmp.eq.s32.totalorder %v5429_v23, %v5416_v18 }
  0x42   :  { %4385 = vmatprep.subr.msk.bf16.mxu1 %vm4384_vm7, %v5310_v27  ;;  %vm4322_vm12 = vmpackc.low %vm130_vm6, %vm125_vm5  ;;  %vm135_vm0 = vcmp.eq.s32.totalorder %v5426_v22, %v5414_v17  ;;  %vm140_vm1 = vcmp.eq.s32.totalorder %v5429_v23, %v5414_v17  ;;  %vm137_vm3 = vcmp.eq.s32.totalorder %v5426_v22, %v5423_v21  ;;  %vm142_vm4 = vcmp.eq.s32.totalorder %v5429_v23, %v5423_v21 }
  0x43   :  { %4323 = vmatpush1.bf16.msk.msra.mxu0 %vm4322_vm12, %v5310_v27  ;;  %vm4386_vm15 = vmpackc.low %vm132_vm9, %vm127_vm8  ;;  %vm146_vm6 = vcmp.eq.s32.totalorder %v5439_v25, %v5403_v14  ;;  %vm151_vm7 = vcmp.eq.s32.totalorder %v5442_v26, %v5403_v14  ;;  %v5485_v29 = vadd.s32 56, %v5380_v1  ;;  %vm148_vm9 = vcmp.eq.s32.totalorder %v5439_v25, %v5416_v18 }
  0x44   :  { %4387 = vmatpush1.bf16.msk.msra.mxu1 %vm4386_vm15, %v5310_v27  ;;  %vm4324_vm2 = vmpackc.low %vm141_vm11, %vm136_vm10  ;;  %vm153_vm10 = vcmp.eq.s32.totalorder %v5442_v26, %v5416_v18  ;;  %vm145_vm12 = vcmp.eq.s32.totalorder %v5439_v25, %v5414_v17  ;;  %vm147_vm15 = vcmp.eq.s32.totalorder %v5439_v25, %v5423_v21  ;;  %v5508_v30 = vadd.s32 64, %v5380_v1 }
  0x45   :  { %4325 = vmatprep.subr.msk.bf16.mxu0 %vm4324_vm2, %v5310_v27  ;;  %vm4388_vm5 = vmpackc.low %vm143_vm14, %vm138_vm13  ;;  %vm150_vm13 = vcmp.eq.s32.totalorder %v5442_v26, %v5414_v17  ;;  %vm156_vm2 = vcmp.eq.s32.totalorder %v5482_v28, %v5403_v14  ;;  %v5511_v31 = vadd.s32 72, %v5380_v1  ;;  %v5534_v32 = vadd.s32 80, %v5380_v1 }
  0x46   :  { %4389 = vmatprep.subr.msk.bf16.mxu1 %vm4388_vm5, %v5310_v27  ;;  %vm4326_vm8 = vmpackc.low %vm140_vm1, %vm135_vm0  ;;  %vm152_vm0 = vcmp.eq.s32.totalorder %v5442_v26, %v5423_v21  ;;  %vm158_vm5 = vcmp.eq.s32.totalorder %v5482_v28, %v5416_v18  ;;  %v5537_v33 = vadd.s32 88, %v5380_v1  ;;  %v5560_v34 = vadd.s32 96, %v5380_v1 }
  0x47   :  { %4327 = vmatpush1.bf16.msk.msra.mxu0 %vm4326_vm8, %v5310_v27  ;;  %vm4390_vm11 = vmpackc.low %vm142_vm4, %vm137_vm3  ;;  %vm161_vm3 = vcmp.eq.s32.totalorder %v5485_v29, %v5403_v14  ;;  %vm155_vm8 = vcmp.eq.s32.totalorder %v5482_v28, %v5414_v17  ;;  %v5563_v35 = vadd.s32 104, %v5380_v1  ;;  %v5586_v36 = vadd.s32 112, %v5380_v1 }
  0x48   :  { %4391 = vmatpush1.bf16.msk.msra.mxu1 %vm4390_vm11, %v5310_v27  ;;  %vm4328_vm14 = vmpackc.low %vm151_vm7, %vm146_vm6  ;;  %vm163_vm6 = vcmp.eq.s32.totalorder %v5485_v29, %v5416_v18  ;;  %vm157_vm11 = vcmp.eq.s32.totalorder %v5482_v28, %v5423_v21  ;;  %v5589_v37 = vadd.s32 120, %v5380_v1  ;;  %v5612_v38 = vadd.s32 128, %v5380_v1 }
  0x49   :  { %4329 = vmatprep.subr.msk.bf16.mxu0 %vm4328_vm14, %v5310_v27  ;;  %vm4392_vm1 = vmpackc.low %vm153_vm10, %vm148_vm9  ;;  %vm160_vm9 = vcmp.eq.s32.totalorder %v5485_v29, %v5414_v17  ;;  %vm166_vm14 = vcmp.eq.s32.totalorder %v5508_v30, %v5403_v14  ;;  %v5615_v39 = vadd.s32 136, %v5380_v1  ;;  %v5638_v40 = vadd.s32 144, %v5380_v1 }
  0x4a   :  { %4393 = vmatprep.subr.msk.bf16.mxu1 %vm4392_vm1, %v5310_v27  ;;  %vm4330_vm4 = vmpackc.low %vm150_vm13, %vm145_vm12  ;;  %vm162_vm12 = vcmp.eq.s32.totalorder %v5485_v29, %v5423_v21  ;;  %vm168_vm1 = vcmp.eq.s32.totalorder %v5508_v30, %v5416_v18  ;;  %v5641_v41 = vadd.s32 152, %v5380_v1  ;;  %v5664_v42 = vadd.s32 160, %v5380_v1 }
  0x4b   :  { %4331 = vmatpush1.bf16.msk.msra.mxu0 %vm4330_vm4, %v5310_v27  ;;  %vm4394_vm7 = vmpackc.low %vm152_vm0, %vm147_vm15  ;;  %vm171_vm15 = vcmp.eq.s32.totalorder %v5511_v31, %v5403_v14  ;;  %vm165_vm4 = vcmp.eq.s32.totalorder %v5508_v30, %v5414_v17  ;;  %v5667_v43 = vadd.s32 168, %v5380_v1  ;;  %v5690_v44 = vadd.s32 176, %v5380_v1 }
  0x4c   :  { %4395 = vmatpush1.bf16.msk.msra.mxu1 %vm4394_vm7, %v5310_v27  ;;  %vm4332_vm10 = vmpackc.low %vm161_vm3, %vm156_vm2  ;;  %vm173_vm2 = vcmp.eq.s32.totalorder %v5511_v31, %v5416_v18  ;;  %vm167_vm7 = vcmp.eq.s32.totalorder %v5508_v30, %v5423_v21  ;;  %v5693_v45 = vadd.s32 184, %v5380_v1  ;;  %v5716_v46 = vadd.s32 192, %v5380_v1 }
  0x4d   :  { %4333 = vmatprep.subr.msk.bf16.mxu0 %vm4332_vm10, %v5310_v27  ;;  %vm4396_vm13 = vmpackc.low %vm163_vm6, %vm158_vm5  ;;  %vm170_vm5 = vcmp.eq.s32.totalorder %v5511_v31, %v5414_v17  ;;  %vm176_vm10 = vcmp.eq.s32.totalorder %v5534_v32, %v5403_v14  ;;  %v5719_v47 = vadd.s32 200, %v5380_v1  ;;  %v5742_v48 = vadd.s32 208, %v5380_v1 }
  0x4e   :  { %4397 = vmatprep.subr.msk.bf16.mxu1 %vm4396_vm13, %v5310_v27  ;;  %vm4334_vm0 = vmpackc.low %vm160_vm9, %vm155_vm8  ;;  %vm172_vm8 = vcmp.eq.s32.totalorder %v5511_v31, %v5423_v21  ;;  %vm178_vm13 = vcmp.eq.s32.totalorder %v5534_v32, %v5416_v18  ;;  %v5745_v49 = vadd.s32 216, %v5380_v1  ;;  %v5768_v50 = vadd.s32 224, %v5380_v1 }
  0x4f   :  { %4335 = vmatpush1.bf16.msk.msra.mxu0 %vm4334_vm0, %v5310_v27  ;;  %vm4398_vm3 = vmpackc.low %vm162_vm12, %vm157_vm11  ;;  %vm181_vm11 = vcmp.eq.s32.totalorder %v5537_v33, %v5403_v14  ;;  %vm175_vm0 = vcmp.eq.s32.totalorder %v5534_v32, %v5414_v17  ;;  %v5771_v51 = vadd.s32 232, %v5380_v1  ;;  %v5794_v52 = vadd.s32 240, %v5380_v1 }
  0x50   :  { %4399 = vmatpush1.bf16.msk.msra.mxu1 %vm4398_vm3, %v5310_v27  ;;  %vm4336_vm6 = vmpackc.low %vm171_vm15, %vm166_vm14  ;;  %vm183_vm14 = vcmp.eq.s32.totalorder %v5537_v33, %v5416_v18  ;;  %vm177_vm3 = vcmp.eq.s32.totalorder %v5534_v32, %v5423_v21  ;;  %v5797_v53 = vadd.s32 248, %v5380_v1  ;;  %v5800_v54 = vsub.s32 5, %v5380_v1 }
  0x51   :  { %4337 = vmatprep.subr.msk.bf16.mxu0 %vm4336_vm6, %v5310_v27  ;;  %vm4400_vm9 = vmpackc.low %vm173_vm2, %vm168_vm1  ;;  %vm180_vm1 = vcmp.eq.s32.totalorder %v5537_v33, %v5414_v17  ;;  %vm186_vm6 = vcmp.eq.s32.totalorder %v5560_v34, %v5403_v14 }
  0x52   :  { %4401 = vmatprep.subr.msk.bf16.mxu1 %vm4400_vm9, %v5310_v27  ;;  %vm4338_vm12 = vmpackc.low %vm170_vm5, %vm165_vm4  ;;  %vm182_vm4 = vcmp.eq.s32.totalorder %v5537_v33, %v5423_v21  ;;  %vm188_vm9 = vcmp.eq.s32.totalorder %v5560_v34, %v5416_v18  ;;  %v5825_v55 = vrot.slane %v101_v5, %v5800_v54  ;;  %v5839_v56 = vrot.slane %v5382_v2, %v5800_v54  ;;  %v6332_v2 = vld [vmem:[#allocation3 + $0x8] sm:$0xff] }
  0x53   :  { %4339 = vmatpush1.bf16.msk.msra.mxu0 %vm4338_vm12, %v5310_v27  ;;  %vm4402_vm15 = vmpackc.low %vm172_vm8, %vm167_vm7  ;;  %vm191_vm7 = vcmp.eq.s32.totalorder %v5563_v35, %v5403_v14  ;;  %vm185_vm12 = vcmp.eq.s32.totalorder %v5560_v34, %v5414_v17  ;;  %v6012_v61 = vrot.slane %v745_v60, %v5800_v54  ;;  %v6027_v62 = vrot.slane %v102_v10, %v5800_v54 }
  0x54   :  { %4403 = vmatpush1.bf16.msk.msra.mxu1 %vm4402_vm15, %v5310_v27  ;;  %vm4340_vm2 = vmpackc.low %vm181_vm11, %vm176_vm10  ;;  %vm193_vm10 = vcmp.eq.s32.totalorder %v5563_v35, %v5416_v18  ;;  %vm187_vm15 = vcmp.eq.s32.totalorder %v5560_v34, %v5423_v21  ;;  %v6186_v63 = vrot.slane %v746_v11, %v5800_v54  ;;  %v1386_v3 = vrot.slane %v6332_v2, 1 }
  0x55   :  { %4341 = vmatprep.subr.msk.bf16.mxu0 %vm4340_vm2, %v5310_v27  ;;  %vm4404_vm5 = vmpackc.low %vm183_vm14, %vm178_vm13  ;;  %vm190_vm13 = vcmp.eq.s32.totalorder %v5563_v35, %v5414_v17  ;;  %vm196_vm2 = vcmp.eq.s32.totalorder %v5586_v36, %v5403_v14  ;;  %v1387_v4 = vrot.slane %v6332_v2, 2  ;;  %v6379_v8 = vrot.slane %v6332_v2, %v5398_v12 }
  0x56   :  { %4405 = vmatprep.subr.msk.bf16.mxu1 %vm4404_vm5, %v5310_v27  ;;  %vm4342_vm8 = vmpackc.low %vm180_vm1, %vm175_vm0  ;;  %vm192_vm0 = vcmp.eq.s32.totalorder %v5563_v35, %v5423_v21  ;;  %vm198_vm5 = vcmp.eq.s32.totalorder %v5586_v36, %v5416_v18  ;;  %v6357_v5 = vrot.slane %v1386_v3, %v5398_v12 }
  0x57   :  { %4343 = vmatpush1.bf16.msk.msra.mxu0 %vm4342_vm8, %v5310_v27  ;;  %vm4406_vm11 = vmpackc.low %vm182_vm4, %vm177_vm3  ;;  %vm201_vm3 = vcmp.eq.s32.totalorder %v5589_v37, %v5403_v14  ;;  %vm195_vm8 = vcmp.eq.s32.totalorder %v5586_v36, %v5414_v17  ;;  %v6386_v7 = vrot.slane %v1387_v4, %v5398_v12 }
  0x58   :  { %4407 = vmatpush1.bf16.msk.msra.mxu1 %vm4406_vm11, %v5310_v27  ;;  %vm4344_vm14 = vmpackc.low %vm191_vm7, %vm186_vm6  ;;  %vm203_vm6 = vcmp.eq.s32.totalorder %v5589_v37, %v5416_v18  ;;  %vm197_vm11 = vcmp.eq.s32.totalorder %v5586_v36, %v5423_v21 }
  0x59   :  { %4345 = vmatprep.subr.msk.bf16.mxu0 %vm4344_vm14, %v5310_v27  ;;  %vm4408_vm1 = vmpackc.low %vm193_vm10, %vm188_vm9  ;;  %vm200_vm9 = vcmp.eq.s32.totalorder %v5589_v37, %v5414_v17  ;;  %vm206_vm14 = vcmp.eq.s32.totalorder %v5612_v38, %v5403_v14 }
  0x5a   :  { %4409 = vmatprep.subr.msk.bf16.mxu1 %vm4408_vm1, %v5310_v27  ;;  %vm4346_vm4 = vmpackc.low %vm190_vm13, %vm185_vm12  ;;  %vm202_vm12 = vcmp.eq.s32.totalorder %v5589_v37, %v5423_v21  ;;  %vm208_vm1 = vcmp.eq.s32.totalorder %v5612_v38, %v5416_v18 }
  0x5b   :  { %4347 = vmatpush1.bf16.msk.msra.mxu0 %vm4346_vm4, %v5310_v27  ;;  %vm4410_vm7 = vmpackc.low %vm192_vm0, %vm187_vm15  ;;  %vm211_vm15 = vcmp.eq.s32.totalorder %v5615_v39, %v5403_v14  ;;  %vm205_vm4 = vcmp.eq.s32.totalorder %v5612_v38, %v5414_v17 }
  0x5c   :  { %4411 = vmatpush1.bf16.msk.msra.mxu1 %vm4410_vm7, %v5310_v27  ;;  %vm4348_vm10 = vmpackc.low %vm201_vm3, %vm196_vm2  ;;  %vm213_vm2 = vcmp.eq.s32.totalorder %v5615_v39, %v5416_v18  ;;  %vm207_vm7 = vcmp.eq.s32.totalorder %v5612_v38, %v5423_v21 }
  0x5d   :  { %4349 = vmatprep.subr.msk.bf16.mxu0 %vm4348_vm10, %v5310_v27  ;;  %vm4412_vm13 = vmpackc.low %vm203_vm6, %vm198_vm5  ;;  %vm210_vm5 = vcmp.eq.s32.totalorder %v5615_v39, %v5414_v17  ;;  %vm216_vm10 = vcmp.eq.s32.totalorder %v5638_v40, %v5403_v14 }
  0x5e   :  { %4413 = vmatprep.subr.msk.bf16.mxu1 %vm4412_vm13, %v5310_v27  ;;  %vm4350_vm0 = vmpackc.low %vm200_vm9, %vm195_vm8  ;;  %vm212_vm8 = vcmp.eq.s32.totalorder %v5615_v39, %v5423_v21  ;;  %vm218_vm13 = vcmp.eq.s32.totalorder %v5638_v40, %v5416_v18 }
  0x5f   :  { %4351 = vmatpush1.bf16.msk.msra.mxu0 %vm4350_vm0, %v5310_v27  ;;  %vm4414_vm3 = vmpackc.low %vm202_vm12, %vm197_vm11  ;;  %vm221_vm11 = vcmp.eq.s32.totalorder %v5641_v41, %v5403_v14  ;;  %vm215_vm0 = vcmp.eq.s32.totalorder %v5638_v40, %v5414_v17 }
  0x60   :  { %4415 = vmatpush1.bf16.msk.msra.mxu1 %vm4414_vm3, %v5310_v27  ;;  %vm4352_vm6 = vmpackc.low %vm211_vm15, %vm206_vm14  ;;  %vm223_vm14 = vcmp.eq.s32.totalorder %v5641_v41, %v5416_v18  ;;  %vm217_vm3 = vcmp.eq.s32.totalorder %v5638_v40, %v5423_v21 }
  0x61   :  { %4353 = vmatprep.subr.msk.bf16.mxu0 %vm4352_vm6, %v5310_v27  ;;  %vm4416_vm9 = vmpackc.low %vm213_vm2, %vm208_vm1  ;;  %vm220_vm1 = vcmp.eq.s32.totalorder %v5641_v41, %v5414_v17  ;;  %vm226_vm6 = vcmp.eq.s32.totalorder %v5664_v42, %v5403_v14 }
  0x62   :  { %4417 = vmatprep.subr.msk.bf16.mxu1 %vm4416_vm9, %v5310_v27  ;;  %vm4354_vm12 = vmpackc.low %vm210_vm5, %vm205_vm4  ;;  %vm222_vm4 = vcmp.eq.s32.totalorder %v5641_v41, %v5423_v21  ;;  %vm228_vm9 = vcmp.eq.s32.totalorder %v5664_v42, %v5416_v18 }
  0x63   :  { %4355 = vmatpush1.bf16.msk.msra.mxu0 %vm4354_vm12, %v5310_v27  ;;  %vm4418_vm15 = vmpackc.low %vm212_vm8, %vm207_vm7  ;;  %vm231_vm7 = vcmp.eq.s32.totalorder %v5667_v43, %v5403_v14  ;;  %vm225_vm12 = vcmp.eq.s32.totalorder %v5664_v42, %v5414_v17 }
  0x64   :  { %4419 = vmatpush1.bf16.msk.msra.mxu1 %vm4418_vm15, %v5310_v27  ;;  %vm4356_vm2 = vmpackc.low %vm221_vm11, %vm216_vm10  ;;  %vm233_vm10 = vcmp.eq.s32.totalorder %v5667_v43, %v5416_v18  ;;  %vm227_vm15 = vcmp.eq.s32.totalorder %v5664_v42, %v5423_v21 }
  0x65   :  { %4357 = vmatprep.subr.msk.bf16.mxu0 %vm4356_vm2, %v5310_v27  ;;  %vm4420_vm5 = vmpackc.low %vm223_vm14, %vm218_vm13  ;;  %vm230_vm13 = vcmp.eq.s32.totalorder %v5667_v43, %v5414_v17  ;;  %vm236_vm2 = vcmp.eq.s32.totalorder %v5690_v44, %v5403_v14 }
  0x66   :  { %4421 = vmatprep.subr.msk.bf16.mxu1 %vm4420_vm5, %v5310_v27  ;;  %vm4358_vm8 = vmpackc.low %vm220_vm1, %vm215_vm0  ;;  %vm232_vm0 = vcmp.eq.s32.totalorder %v5667_v43, %v5423_v21  ;;  %vm238_vm5 = vcmp.eq.s32.totalorder %v5690_v44, %v5416_v18 }
  0x67   :  { %4359 = vmatpush1.bf16.msk.msra.mxu0 %vm4358_vm8, %v5310_v27  ;;  %vm4422_vm11 = vmpackc.low %vm222_vm4, %vm217_vm3  ;;  %vm241_vm3 = vcmp.eq.s32.totalorder %v5693_v45, %v5403_v14  ;;  %vm235_vm8 = vcmp.eq.s32.totalorder %v5690_v44, %v5414_v17 }
  0x68   :  { %4423 = vmatpush1.bf16.msk.msra.mxu1 %vm4422_vm11, %v5310_v27  ;;  %vm4360_vm14 = vmpackc.low %vm231_vm7, %vm226_vm6  ;;  %vm243_vm6 = vcmp.eq.s32.totalorder %v5693_v45, %v5416_v18  ;;  %vm237_vm11 = vcmp.eq.s32.totalorder %v5690_v44, %v5423_v21 }
  0x69   :  { %4361 = vmatprep.subr.msk.bf16.mxu0 %vm4360_vm14, %v5310_v27  ;;  %vm4424_vm1 = vmpackc.low %vm233_vm10, %vm228_vm9  ;;  %vm240_vm9 = vcmp.eq.s32.totalorder %v5693_v45, %v5414_v17  ;;  %vm246_vm14 = vcmp.eq.s32.totalorder %v5716_v46, %v5403_v14 }
  0x6a   :  { %4425 = vmatprep.subr.msk.bf16.mxu1 %vm4424_vm1, %v5310_v27  ;;  %vm4362_vm4 = vmpackc.low %vm230_vm13, %vm225_vm12  ;;  %vm242_vm12 = vcmp.eq.s32.totalorder %v5693_v45, %v5423_v21  ;;  %vm248_vm1 = vcmp.eq.s32.totalorder %v5716_v46, %v5416_v18 }
  0x6b   :  { %4363 = vmatpush1.bf16.msk.msra.mxu0 %vm4362_vm4, %v5310_v27  ;;  %vm4426_vm7 = vmpackc.low %vm232_vm0, %vm227_vm15  ;;  %vm251_vm15 = vcmp.eq.s32.totalorder %v5719_v47, %v5403_v14  ;;  %vm245_vm4 = vcmp.eq.s32.totalorder %v5716_v46, %v5414_v17 }
  0x6c   :  { %4427 = vmatpush1.bf16.msk.msra.mxu1 %vm4426_vm7, %v5310_v27  ;;  %vm4364_vm10 = vmpackc.low %vm241_vm3, %vm236_vm2  ;;  %vm253_vm2 = vcmp.eq.s32.totalorder %v5719_v47, %v5416_v18  ;;  %vm247_vm7 = vcmp.eq.s32.totalorder %v5716_v46, %v5423_v21 }
  0x6d   :  { %4365 = vmatprep.subr.msk.bf16.mxu0 %vm4364_vm10, %v5310_v27  ;;  %vm4428_vm13 = vmpackc.low %vm243_vm6, %vm238_vm5  ;;  %vm250_vm5 = vcmp.eq.s32.totalorder %v5719_v47, %v5414_v17  ;;  %vm256_vm10 = vcmp.eq.s32.totalorder %v5742_v48, %v5403_v14 }
  0x6e   :  { %4429 = vmatprep.subr.msk.bf16.mxu1 %vm4428_vm13, %v5310_v27  ;;  %vm4366_vm0 = vmpackc.low %vm240_vm9, %vm235_vm8  ;;  %vm252_vm8 = vcmp.eq.s32.totalorder %v5719_v47, %v5423_v21  ;;  %vm258_vm13 = vcmp.eq.s32.totalorder %v5742_v48, %v5416_v18 }
  0x6f   :  { %4367 = vmatpush1.bf16.msk.msra.mxu0 %vm4366_vm0, %v5310_v27  ;;  %vm4430_vm3 = vmpackc.low %vm242_vm12, %vm237_vm11  ;;  %vm261_vm11 = vcmp.eq.s32.totalorder %v5745_v49, %v5403_v14  ;;  %vm255_vm0 = vcmp.eq.s32.totalorder %v5742_v48, %v5414_v17 }
  0x70   :  { %4431 = vmatpush1.bf16.msk.msra.mxu1 %vm4430_vm3, %v5310_v27  ;;  %vm4368_vm6 = vmpackc.low %vm251_vm15, %vm246_vm14  ;;  %vm263_vm14 = vcmp.eq.s32.totalorder %v5745_v49, %v5416_v18  ;;  %vm257_vm3 = vcmp.eq.s32.totalorder %v5742_v48, %v5423_v21 }
  0x71   :  { %4369 = vmatprep.subr.msk.bf16.mxu0 %vm4368_vm6, %v5310_v27  ;;  %vm4432_vm9 = vmpackc.low %vm253_vm2, %vm248_vm1  ;;  %vm260_vm1 = vcmp.eq.s32.totalorder %v5745_v49, %v5414_v17  ;;  %vm266_vm6 = vcmp.eq.s32.totalorder %v5768_v50, %v5403_v14 }
  0x72   :  { %4433 = vmatprep.subr.msk.bf16.mxu1 %vm4432_vm9, %v5310_v27  ;;  %vm4370_vm12 = vmpackc.low %vm250_vm5, %vm245_vm4  ;;  %vm262_vm4 = vcmp.eq.s32.totalorder %v5745_v49, %v5423_v21  ;;  %vm268_vm9 = vcmp.eq.s32.totalorder %v5768_v50, %v5416_v18 }
  0x73   :  { %4371 = vmatpush1.bf16.msk.msra.mxu0 %vm4370_vm12, %v5310_v27  ;;  %vm4434_vm15 = vmpackc.low %vm252_vm8, %vm247_vm7  ;;  %vm271_vm7 = vcmp.eq.s32.totalorder %v5771_v51, %v5403_v14  ;;  %vm265_vm12 = vcmp.eq.s32.totalorder %v5768_v50, %v5414_v17 }
  0x74   :  { %4435 = vmatpush1.bf16.msk.msra.mxu1 %vm4434_vm15, %v5310_v27  ;;  %vm4372_vm2 = vmpackc.low %vm261_vm11, %vm256_vm10  ;;  %vm273_vm10 = vcmp.eq.s32.totalorder %v5771_v51, %v5416_v18  ;;  %vm267_vm15 = vcmp.eq.s32.totalorder %v5768_v50, %v5423_v21 }
  0x75   :  { %4373 = vmatprep.subr.msk.bf16.mxu0 %vm4372_vm2, %v5310_v27  ;;  %vm4436_vm5 = vmpackc.low %vm263_vm14, %vm258_vm13  ;;  %vm270_vm13 = vcmp.eq.s32.totalorder %v5771_v51, %v5414_v17  ;;  %vm276_vm2 = vcmp.eq.s32.totalorder %v5794_v52, %v5403_v14 }
  0x76   :  { %4437 = vmatprep.subr.msk.bf16.mxu1 %vm4436_vm5, %v5310_v27  ;;  %vm4374_vm8 = vmpackc.low %vm260_vm1, %vm255_vm0  ;;  %vm272_vm0 = vcmp.eq.s32.totalorder %v5771_v51, %v5423_v21  ;;  %vm278_vm5 = vcmp.eq.s32.totalorder %v5794_v52, %v5416_v18 }
  0x77   :  { %4375 = vmatpush1.bf16.msk.msra.mxu0 %vm4374_vm8, %v5310_v27  ;;  %vm4438_vm11 = vmpackc.low %vm262_vm4, %vm257_vm3  ;;  %vm281_vm3 = vcmp.eq.s32.totalorder %v5797_v53, %v5403_v14  ;;  %vm275_vm8 = vcmp.eq.s32.totalorder %v5794_v52, %v5414_v17  ;;  %v6789_v14 = vld [vmem:[#allocation8 + $0x18] sm:$0xf] }
  0x78   :  { %4439 = vmatpush1.bf16.msk.msra.mxu1 %vm4438_vm11, %v5310_v27  ;;  %vm4376_vm14 = vmpackc.low %vm271_vm7, %vm266_vm6  ;;  %vm283_vm6 = vcmp.eq.s32.totalorder %v5797_v53, %v5416_v18  ;;  %vm277_vm11 = vcmp.eq.s32.totalorder %v5794_v52, %v5423_v21 }
  0x79   :  { %4377 = vmatprep.subr.msk.bf16.mxu0 %vm4376_vm14, %v5310_v27  ;;  %vm4440_vm1 = vmpackc.low %vm273_vm10, %vm268_vm9  ;;  %vm280_vm9 = vcmp.eq.s32.totalorder %v5797_v53, %v5414_v17  ;;  %vm209_vm14 = vcmp.eq.s32.totalorder %v5612_v38, %v5392_v9  ;;  %v6802_v17 = vld [vmem:[#allocation8 + $0x10] sm:$0xf] }
  0x7a   :  { %4441 = vmatprep.subr.msk.bf16.mxu1 %vm4440_vm1, %v5310_v27  ;;  %vm4378_vm4 = vmpackc.low %vm270_vm13, %vm265_vm12  ;;  %vm282_vm12 = vcmp.eq.s32.totalorder %v5797_v53, %v5423_v21  ;;  %vm768_vm1 = vcmp.eq.s32.totalorder %v5380_v1, %v5825_v55 }
  0x7b   :  { %4379 = vmatpush1.bf16.msk.msra.mxu0 %vm4378_vm4, %v5310_v27  ;;  %vm4442_vm7 = vmpackc.low %vm272_vm0, %vm267_vm15  ;;  %vm214_vm15 = vcmp.eq.s32.totalorder %v5615_v39, %v5392_v9  ;;  %vm129_vm4 = vcmp.eq.s32.totalorder %v5380_v1, %v5392_v9 }
  0x7c   :  { %4443 = vmatpush1.bf16.msk.msra.mxu1 %vm4442_vm7, %v5310_v27  ;;  %vm4380_vm10 = vmpackc.low %vm281_vm3, %vm276_vm2  ;;  %vm773_vm2 = vcmp.eq.s32.totalorder %v5411_v16, %v5825_v55  ;;  %vm767_vm7 = vcmp.eq.s32.totalorder %v5380_v1, %v5839_v56 }
  0x7d   :  { %4381 = vmatprep.subr.msk.bf16.mxu0 %vm4380_vm10, %v5310_v27  ;;  %vm4444_vm13 = vmpackc.low %vm283_vm6, %vm278_vm5  ;;  %vm134_vm5 = vcmp.eq.s32.totalorder %v5411_v16, %v5392_v9  ;;  %vm219_vm10 = vcmp.eq.s32.totalorder %v5638_v40, %v5392_v9 }
  0x7e   :  { %4445 = vmatprep.subr.msk.bf16.mxu1 %vm4444_vm13, %v5310_v27  ;;  %vm4382_vm0 = vmpackc.low %vm280_vm9, %vm275_vm8  ;;  %vm772_vm8 = vcmp.eq.s32.totalorder %v5411_v16, %v5839_v56  ;;  %vm778_vm13 = vcmp.eq.s32.totalorder %v5426_v22, %v5825_v55 }
  0x7f   :  { %4383 = vmatpush1.bf16.msk.msra.mxu0 %vm4382_vm0, %v5310_v27  ;;  %vm4446_vm3 = vmpackc.low %vm282_vm12, %vm277_vm11  ;;  %vm224_vm11 = vcmp.eq.s32.totalorder %v5641_v41, %v5392_v9  ;;  %vm139_vm0 = vcmp.eq.s32.totalorder %v5426_v22, %v5392_v9 }
  0x80   :  { %4447 = vmatpush1.bf16.msk.msra.mxu1 %vm4446_vm3, %v5310_v27  ;;  %vm4448_vm6 = vmpackc.low %vm214_vm15, %vm209_vm14  ;;  %vm783_vm14 = vcmp.eq.s32.totalorder %v5429_v23, %v5825_v55  ;;  %vm777_vm3 = vcmp.eq.s32.totalorder %v5426_v22, %v5839_v56 }
  0x81   :  { %4449 = vmatprep.subr.msk.bf16.mxu0 %vm4448_vm6, %v5310_v27  ;;  %vm4480_vm9 = vmpackc.low %vm773_vm2, %vm768_vm1  ;;  %vm144_vm1 = vcmp.eq.s32.totalorder %v5429_v23, %v5392_v9  ;;  %vm229_vm6 = vcmp.eq.s32.totalorder %v5664_v42, %v5392_v9 }
  0x82   :  { %510 = vmatmul.mubr.f32.vlgmr.msra.gmra.mrb[0].mxu0 %v5857_v57  ;;  %4481 = vmatprep.subr.msk.bf16.mxu1 %vm4480_vm9, %v5310_v27  ;;  %vm4450_vm12 = vmpackc.low %vm134_vm5, %vm129_vm4  ;;  %vm782_vm4 = vcmp.eq.s32.totalorder %v5429_v23, %v5839_v56  ;;  %vm788_vm9 = vcmp.eq.s32.totalorder %v5439_v25, %v5825_v55 }
  0x83   :  { %587 = vmatmul.mubr.f32.vlgmr.msra.gmra.mrb[0].mxu1 %v5857_v57  ;;  %4451 = vmatpush3.bf16.msk.msra.mxu0 %vm4450_vm12, %v5310_v27  ;;  %vm4482_vm15 = vmpackc.low %vm772_vm8, %vm767_vm7  ;;  %vm234_vm7 = vcmp.eq.s32.totalorder %v5667_v43, %v5392_v9  ;;  %vm149_vm12 = vcmp.eq.s32.totalorder %v5439_v25, %v5392_v9 }
  0x84   :  { %4483 = vmatpush1.bf16.msk.msra.mxu1 %vm4482_vm15, %v5310_v27  ;;  %vm4452_vm2 = vmpackc.low %vm224_vm11, %vm219_vm10  ;;  %515 = vmatprep.mubr.f32.mxu0 %v5873_v58  ;;  %vm793_vm10 = vcmp.eq.s32.totalorder %v5442_v26, %v5825_v55  ;;  %vm787_vm15 = vcmp.eq.s32.totalorder %v5439_v25, %v5839_v56 }
  0x85   :  { %4453 = vmatprep.subr.msk.bf16.mxu0 %vm4452_vm2, %v5310_v27  ;;  %vm4484_vm5 = vmpackc.low %vm783_vm14, %vm778_vm13  ;;  %592 = vmatprep.mubr.f32.mxu1 %v5873_v58  ;;  %vm154_vm13 = vcmp.eq.s32.totalorder %v5442_v26, %v5392_v9  ;;  %vm239_vm2 = vcmp.eq.s32.totalorder %v5690_v44, %v5392_v9 }
  0x86   :  { %4485 = vmatprep.subr.msk.bf16.mxu1 %vm4484_vm5, %v5310_v27  ;;  %vm4454_vm8 = vmpackc.low %vm144_vm1, %vm139_vm0  ;;  %516 = vmatmul.mubr.f32.gmra.mrb[2].mxu0 %v5887_v59  ;;  %vm792_vm0 = vcmp.eq.s32.totalorder %v5442_v26, %v5839_v56  ;;  %vm798_vm5 = vcmp.eq.s32.totalorder %v5482_v28, %v5825_v55 }
  0x87   :  { %4455 = vmatpush3.bf16.msk.msra.mxu0 %vm4454_vm8, %v5310_v27  ;;  %vm4486_vm11 = vmpackc.low %vm782_vm4, %vm777_vm3  ;;  %663 = vmatprep.mubr.f32.mxu0 %v5387_v6  ;;  %vm244_vm3 = vcmp.eq.s32.totalorder %v5693_v45, %v5392_v9  ;;  %vm159_vm8 = vcmp.eq.s32.totalorder %v5482_v28, %v5392_v9 }
  0x88   :  { %4487 = vmatpush1.bf16.msk.msra.mxu1 %vm4486_vm11, %v5310_v27  ;;  %vm4456_vm14 = vmpackc.low %vm234_vm7, %vm229_vm6  ;;  %vm803_vm6 = vcmp.eq.s32.totalorder %v5485_v29, %v5825_v55  ;;  %vm797_vm11 = vcmp.eq.s32.totalorder %v5482_v28, %v5839_v56 }
  0x89   :  { %4457 = vmatprep.subr.msk.bf16.mxu0 %vm4456_vm14, %v5310_v27  ;;  %vm4488_vm1 = vmpackc.low %vm793_vm10, %vm788_vm9  ;;  %593 = vmatmul.mubr.f32.gmra.mrb[2].mxu1 %v5887_v59  ;;  %vm164_vm9 = vcmp.eq.s32.totalorder %v5485_v29, %v5392_v9  ;;  %vm249_vm14 = vcmp.eq.s32.totalorder %v5716_v46, %v5392_v9 }
  0x8a   :  { %4489 = vmatprep.subr.msk.bf16.mxu1 %vm4488_vm1, %v5310_v27  ;;  %vm4458_vm4 = vmpackc.low %vm154_vm13, %vm149_vm12  ;;  %1151 = vmatprep.mubr.f32.mxu1 %v5387_v6  ;;  %vm802_vm12 = vcmp.eq.s32.totalorder %v5485_v29, %v5839_v56  ;;  %vm808_vm1 = vcmp.eq.s32.totalorder %v5508_v30, %v5825_v55 }
  0x8b   :  { %4459 = vmatpush3.bf16.msk.msra.mxu0 %vm4458_vm4, %v5310_v27  ;;  %vm4490_vm7 = vmpackc.low %vm792_vm0, %vm787_vm15  ;;  %vm254_vm15 = vcmp.eq.s32.totalorder %v5719_v47, %v5392_v9  ;;  %vm169_vm4 = vcmp.eq.s32.totalorder %v5508_v30, %v5392_v9 }
  0x8c   :  { %4491 = vmatpush1.bf16.msk.msra.mxu1 %vm4490_vm7, %v5310_v27  ;;  %vm4460_vm10 = vmpackc.low %vm244_vm3, %vm239_vm2  ;;  %vm813_vm2 = vcmp.eq.s32.totalorder %v5511_v31, %v5825_v55  ;;  %vm807_vm7 = vcmp.eq.s32.totalorder %v5508_v30, %v5839_v56 }
  0x8d   :  { %4461 = vmatprep.subr.msk.bf16.mxu0 %vm4460_vm10, %v5310_v27  ;;  %vm4492_vm13 = vmpackc.low %vm803_vm6, %vm798_vm5  ;;  %vm174_vm5 = vcmp.eq.s32.totalorder %v5511_v31, %v5392_v9  ;;  %vm259_vm10 = vcmp.eq.s32.totalorder %v5742_v48, %v5392_v9 }
  0x8e   :  { %4493 = vmatprep.subr.msk.bf16.mxu1 %vm4492_vm13, %v5310_v27  ;;  %vm4462_vm0 = vmpackc.low %vm164_vm9, %vm159_vm8  ;;  %vm812_vm8 = vcmp.eq.s32.totalorder %v5511_v31, %v5839_v56  ;;  %vm818_vm13 = vcmp.eq.s32.totalorder %v5534_v32, %v5825_v55 }
  0x8f   :  { %4463 = vmatpush3.bf16.msk.msra.mxu0 %vm4462_vm0, %v5310_v27  ;;  %vm4494_vm3 = vmpackc.low %vm802_vm12, %vm797_vm11  ;;  %vm264_vm11 = vcmp.eq.s32.totalorder %v5745_v49, %v5392_v9  ;;  %vm179_vm0 = vcmp.eq.s32.totalorder %v5534_v32, %v5392_v9 }
  0x90   :  { %4495 = vmatpush1.bf16.msk.msra.mxu1 %vm4494_vm3, %v5310_v27  ;;  %vm4464_vm6 = vmpackc.low %vm254_vm15, %vm249_vm14  ;;  %vm823_vm14 = vcmp.eq.s32.totalorder %v5537_v33, %v5825_v55  ;;  %vm817_vm3 = vcmp.eq.s32.totalorder %v5534_v32, %v5839_v56 }
  0x91   :  { %4465 = vmatprep.subr.msk.bf16.mxu0 %vm4464_vm6, %v5310_v27  ;;  %vm4496_vm9 = vmpackc.low %vm813_vm2, %vm808_vm1  ;;  %vm184_vm1 = vcmp.eq.s32.totalorder %v5537_v33, %v5392_v9  ;;  %vm269_vm6 = vcmp.eq.s32.totalorder %v5768_v50, %v5392_v9 }
  0x92   :  { %4497 = vmatprep.subr.msk.bf16.mxu1 %vm4496_vm9, %v5310_v27  ;;  %vm4466_vm12 = vmpackc.low %vm174_vm5, %vm169_vm4  ;;  %vm822_vm4 = vcmp.eq.s32.totalorder %v5537_v33, %v5839_v56  ;;  %vm828_vm9 = vcmp.eq.s32.totalorder %v5560_v34, %v5825_v55 }
  0x93   :  { %4467 = vmatpush3.bf16.msk.msra.mxu0 %vm4466_vm12, %v5310_v27  ;;  %vm4498_vm15 = vmpackc.low %vm812_vm8, %vm807_vm7  ;;  %vm274_vm7 = vcmp.eq.s32.totalorder %v5771_v51, %v5392_v9  ;;  %vm189_vm12 = vcmp.eq.s32.totalorder %v5560_v34, %v5392_v9 }
  0x94   :  { %4499 = vmatpush1.bf16.msk.msra.mxu1 %vm4498_vm15, %v5310_v27  ;;  %vm4468_vm2 = vmpackc.low %vm264_vm11, %vm259_vm10  ;;  %vm833_vm10 = vcmp.eq.s32.totalorder %v5563_v35, %v5825_v55  ;;  %vm827_vm15 = vcmp.eq.s32.totalorder %v5560_v34, %v5839_v56 }
  0x95   :  { %4469 = vmatprep.subr.msk.bf16.mxu0 %vm4468_vm2, %v5310_v27  ;;  %vm4500_vm5 = vmpackc.low %vm823_vm14, %vm818_vm13  ;;  %vm194_vm13 = vcmp.eq.s32.totalorder %v5563_v35, %v5392_v9  ;;  %vm279_vm2 = vcmp.eq.s32.totalorder %v5794_v52, %v5392_v9 }
  0x96   :  { %4501 = vmatprep.subr.msk.bf16.mxu1 %vm4500_vm5, %v5310_v27  ;;  %vm4470_vm8 = vmpackc.low %vm184_vm1, %vm179_vm0  ;;  %vm832_vm0 = vcmp.eq.s32.totalorder %v5563_v35, %v5839_v56  ;;  %vm838_vm5 = vcmp.eq.s32.totalorder %v5586_v36, %v5825_v55 }
  0x97   :  { %4471 = vmatpush3.bf16.msk.msra.mxu0 %vm4470_vm8, %v5310_v27  ;;  %vm4502_vm11 = vmpackc.low %vm822_vm4, %vm817_vm3  ;;  %vm284_vm3 = vcmp.eq.s32.totalorder %v5797_v53, %v5392_v9  ;;  %vm199_vm8 = vcmp.eq.s32.totalorder %v5586_v36, %v5392_v9 }
  0x98   :  { %4503 = vmatpush1.bf16.msk.msra.mxu1 %vm4502_vm11, %v5310_v27  ;;  %vm4472_vm14 = vmpackc.low %vm274_vm7, %vm269_vm6  ;;  %vm843_vm6 = vcmp.eq.s32.totalorder %v5589_v37, %v5825_v55  ;;  %vm837_vm11 = vcmp.eq.s32.totalorder %v5586_v36, %v5839_v56 }
  0x99   :  { %4473 = vmatprep.subr.msk.bf16.mxu0 %vm4472_vm14, %v5310_v27  ;;  %vm4504_vm1 = vmpackc.low %vm833_vm10, %vm828_vm9  ;;  %vm204_vm9 = vcmp.eq.s32.totalorder %v5589_v37, %v5392_v9  ;;  %vm848_vm14 = vcmp.eq.s32.totalorder %v5612_v38, %v5825_v55  ;;  %v6693_v9 = vld [vmem:[#allocation3 + $0x10] sm:$0xff] }
  0x9a   :  { %4505 = vmatprep.subr.msk.bf16.mxu1 %vm4504_vm1, %v5310_v27  ;;  %vm4474_vm4 = vmpackc.low %vm194_vm13, %vm189_vm12  ;;  %vm842_vm12 = vcmp.eq.s32.totalorder %v5589_v37, %v5839_v56  ;;  %vm770_vm1 = vcmp.eq.s32.totalorder %v5380_v1, %v6012_v61  ;;  %v2027_v10 = vrot.slane %v6693_v9, 1  ;;  %v2029_v18 = vrot.slane %v6693_v9, 3 }
  0x9b   :  { %4475 = vmatpush3.bf16.msk.msra.mxu0 %vm4474_vm4, %v5310_v27  ;;  %vm4506_vm7 = vmpackc.low %vm832_vm0, %vm827_vm15  ;;  %vm853_vm15 = vcmp.eq.s32.totalorder %v5615_v39, %v5825_v55  ;;  %vm847_vm4 = vcmp.eq.s32.totalorder %v5612_v38, %v5839_v56  ;;  %v2028_v19 = vrot.slane %v6693_v9, 2 }
  0x9c   :  { %4507 = vmatpush1.bf16.msk.msra.mxu1 %vm4506_vm7, %v5310_v27  ;;  %vm4476_vm10 = vmpackc.low %vm284_vm3, %vm279_vm2  ;;  %vm775_vm2 = vcmp.eq.s32.totalorder %v5411_v16, %v6012_v61  ;;  %vm769_vm7 = vcmp.eq.s32.totalorder %v5380_v1, %v6027_v62  ;;  %v6719_v11 = vrot.slane %v2027_v10, %v5419_v20  ;;  %v6919_v21 = vrot.slane %v2029_v18, %v5419_v20 }
  0x9d   :  { %4477 = vmatprep.subr.msk.bf16.mxu0 %vm4476_vm10, %v5310_v27  ;;  %vm4508_vm13 = vmpackc.low %vm843_vm6, %vm838_vm5  ;;  %vm852_vm5 = vcmp.eq.s32.totalorder %v5615_v39, %v5839_v56  ;;  %vm858_vm10 = vcmp.eq.s32.totalorder %v5638_v40, %v5825_v55  ;;  %v6933_v54 = vrot.slane %v2028_v19, %v5419_v20 }
  0x9e   :  { %4509 = vmatprep.subr.msk.bf16.mxu1 %vm4508_vm13, %v5310_v27  ;;  %vm4478_vm0 = vmpackc.low %vm204_vm9, %vm199_vm8  ;;  %vm774_vm8 = vcmp.eq.s32.totalorder %v5411_v16, %v6027_v62  ;;  %vm780_vm13 = vcmp.eq.s32.totalorder %v5426_v22, %v6012_v61 }
  0x9f   :  { %4479 = vmatpush3.bf16.msk.msra.mxu0 %vm4478_vm0, %v5310_v27  ;;  %vm4510_vm3 = vmpackc.low %vm842_vm12, %vm837_vm11  ;;  %vm863_vm11 = vcmp.eq.s32.totalorder %v5641_v41, %v5825_v55  ;;  %vm857_vm0 = vcmp.eq.s32.totalorder %v5638_v40, %v5839_v56 }
  0xa0   :  { %4511 = vmatpush1.bf16.msk.msra.mxu1 %vm4510_vm3, %v5310_v27  ;;  %vm4512_vm6 = vmpackc.low %vm853_vm15, %vm848_vm14  ;;  %vm785_vm14 = vcmp.eq.s32.totalorder %v5429_v23, %v6012_v61  ;;  %vm779_vm3 = vcmp.eq.s32.totalorder %v5426_v22, %v6027_v62 }
  0xa1   :  { %4513 = vmatprep.subr.msk.bf16.mxu1 %vm4512_vm6, %v5310_v27  ;;  %vm4544_vm9 = vmpackc.low %vm775_vm2, %vm770_vm1  ;;  %vm862_vm1 = vcmp.eq.s32.totalorder %v5641_v41, %v5839_v56  ;;  %vm868_vm6 = vcmp.eq.s32.totalorder %v5664_v42, %v5825_v55 }
  0xa2   :  { %664 = vmatmul.mubr.f32.vlgmr.msra.gmra.mrb[4].mxu0 %v5857_v57  ;;  %4545 = vmatprep.subr.msk.bf16.mxu0 %vm4544_vm9, %v5310_v27  ;;  %vm4514_vm12 = vmpackc.low %vm852_vm5, %vm847_vm4  ;;  %vm784_vm4 = vcmp.eq.s32.totalorder %v5429_v23, %v6027_v62  ;;  %vm790_vm9 = vcmp.eq.s32.totalorder %v5439_v25, %v6012_v61 }
  0xa3   :  { %vm4546_vm15 = vmpackc.low %vm774_vm8, %vm769_vm7  ;;  %668 = vmatprep.mubr.f32.mxu0 %v5873_v58  ;;  %vm873_vm7 = vcmp.eq.s32.totalorder %v5667_v43, %v5825_v55 }
  0xa4   :  { %4515 = vmatpush1.bf16.msk.msra.mxu1 %vm4514_vm12, %v5310_v27  ;;  %4547 = vmatpush1.bf16.msk.msra.mxu0 %vm4546_vm15, %v5310_v27  ;;  %vm4516_vm2 = vmpackc.low %vm863_vm11, %vm858_vm10  ;;  %vm795_vm10 = vcmp.eq.s32.totalorder %v5442_v26, %v6012_v61  ;;  %vm867_vm12 = vcmp.eq.s32.totalorder %v5664_v42, %v5839_v56  ;;  %vm789_vm15 = vcmp.eq.s32.totalorder %v5439_v25, %v6027_v62 }
  0xa5   :  { %4517 = vmatprep.subr.msk.bf16.mxu1 %vm4516_vm2, %v5310_v27  ;;  %vm4548_vm5 = vmpackc.low %vm785_vm14, %vm780_vm13  ;;  %vm872_vm13 = vcmp.eq.s32.totalorder %v5667_v43, %v5839_v56  ;;  %vm878_vm2 = vcmp.eq.s32.totalorder %v5690_v44, %v5825_v55 }
  0xa6   :  { %4549 = vmatprep.subr.msk.bf16.mxu0 %vm4548_vm5, %v5310_v27  ;;  %vm4518_vm8 = vmpackc.low %vm862_vm1, %vm857_vm0  ;;  %669 = vmatmul.mubr.f32.gmra.mrb[6].mxu0 %v5887_v59  ;;  %vm794_vm0 = vcmp.eq.s32.totalorder %v5442_v26, %v6027_v62  ;;  %vm800_vm5 = vcmp.eq.s32.totalorder %v5482_v28, %v6012_v61 }
  0xa7   :  { %vm4550_vm11 = vmpackc.low %vm784_vm4, %vm779_vm3  ;;  %1228 = vmatprep.mubr.f32.mxu0 %v5387_v6  ;;  %vm883_vm3 = vcmp.eq.s32.totalorder %v5693_v45, %v5825_v55  ;;  %v6367_v6 = vrot.slane %v745_v60, %v5398_v12  ;;  %v6732_v12 = vrot.slane %v6332_v2, %v5419_v20  ;;  %v7060_v20 = vld [vmem:[#allocation6] sm:$0xff] }
  0xa8   :  { %4519 = vmatpush1.bf16.msk.msra.mxu1 %vm4518_vm8, %v5310_v27  ;;  %4551 = vmatpush1.bf16.msk.msra.mxu0 %vm4550_vm11, %v5310_v27  ;;  %vm4520_vm14 = vmpackc.low %vm873_vm7, %vm868_vm6  ;;  %vm805_vm6 = vcmp.eq.s32.totalorder %v5485_v29, %v6012_v61  ;;  %vm877_vm8 = vcmp.eq.s32.totalorder %v5690_v44, %v5839_v56  ;;  %vm799_vm11 = vcmp.eq.s32.totalorder %v5482_v28, %v6027_v62 }
  0xa9   :  { %4521 = vmatprep.subr.msk.bf16.mxu1 %vm4520_vm14, %v5310_v27  ;;  %vm4552_vm1 = vmpackc.low %vm795_vm10, %vm790_vm9  ;;  %vm882_vm9 = vcmp.eq.s32.totalorder %v5693_v45, %v5839_v56  ;;  %vm888_vm14 = vcmp.eq.s32.totalorder %v5716_v46, %v5825_v55 }
  0xaa   :  { %4553 = vmatprep.subr.msk.bf16.mxu0 %vm4552_vm1, %v5310_v27  ;;  %vm4522_vm4 = vmpackc.low %vm872_vm13, %vm867_vm12  ;;  %vm804_vm12 = vcmp.eq.s32.totalorder %v5485_v29, %v6027_v62  ;;  %vm810_vm1 = vcmp.eq.s32.totalorder %v5508_v30, %v6012_v61 }
  0xab   :  { %vm4554_vm7 = vmpackc.low %vm794_vm0, %vm789_vm15  ;;  %vm893_vm15 = vcmp.eq.s32.totalorder %v5719_v47, %v5825_v55 }
  0xac   :  { %4523 = vmatpush1.bf16.msk.msra.mxu1 %vm4522_vm4, %v5310_v27  ;;  %4555 = vmatpush1.bf16.msk.msra.mxu0 %vm4554_vm7, %v5310_v27  ;;  %vm4524_vm10 = vmpackc.low %vm883_vm3, %vm878_vm2  ;;  %vm815_vm2 = vcmp.eq.s32.totalorder %v5511_v31, %v6012_v61  ;;  %vm887_vm4 = vcmp.eq.s32.totalorder %v5716_v46, %v5839_v56  ;;  %vm809_vm7 = vcmp.eq.s32.totalorder %v5508_v30, %v6027_v62 }
  0xad   :  { %4525 = vmatprep.subr.msk.bf16.mxu1 %vm4524_vm10, %v5310_v27  ;;  %vm4556_vm13 = vmpackc.low %vm805_vm6, %vm800_vm5  ;;  %vm892_vm5 = vcmp.eq.s32.totalorder %v5719_v47, %v5839_v56  ;;  %vm898_vm10 = vcmp.eq.s32.totalorder %v5742_v48, %v5825_v55 }
  0xae   :  { %4557 = vmatprep.subr.msk.bf16.mxu0 %vm4556_vm13, %v5310_v27  ;;  %vm4526_vm0 = vmpackc.low %vm882_vm9, %vm877_vm8  ;;  %vm814_vm8 = vcmp.eq.s32.totalorder %v5511_v31, %v6027_v62  ;;  %vm820_vm13 = vcmp.eq.s32.totalorder %v5534_v32, %v6012_v61 }
  0xaf   :  { %vm4558_vm3 = vmpackc.low %vm804_vm12, %vm799_vm11  ;;  %vm903_vm11 = vcmp.eq.s32.totalorder %v5745_v49, %v5825_v55 }
  0xb0   :  { %4527 = vmatpush1.bf16.msk.msra.mxu1 %vm4526_vm0, %v5310_v27  ;;  %4559 = vmatpush1.bf16.msk.msra.mxu0 %vm4558_vm3, %v5310_v27  ;;  %vm4528_vm6 = vmpackc.low %vm893_vm15, %vm888_vm14  ;;  %vm825_vm14 = vcmp.eq.s32.totalorder %v5537_v33, %v6012_v61  ;;  %vm897_vm0 = vcmp.eq.s32.totalorder %v5742_v48, %v5839_v56  ;;  %vm819_vm3 = vcmp.eq.s32.totalorder %v5534_v32, %v6027_v62 }
  0xb1   :  { %4529 = vmatprep.subr.msk.bf16.mxu1 %vm4528_vm6, %v5310_v27  ;;  %vm4560_vm9 = vmpackc.low %vm815_vm2, %vm810_vm1  ;;  %vm902_vm1 = vcmp.eq.s32.totalorder %v5745_v49, %v5839_v56  ;;  %vm908_vm6 = vcmp.eq.s32.totalorder %v5768_v50, %v5825_v55 }
  0xb2   :  { %4561 = vmatprep.subr.msk.bf16.mxu0 %vm4560_vm9, %v5310_v27  ;;  %vm4530_vm12 = vmpackc.low %vm892_vm5, %vm887_vm4  ;;  %vm824_vm4 = vcmp.eq.s32.totalorder %v5537_v33, %v6027_v62  ;;  %vm830_vm9 = vcmp.eq.s32.totalorder %v5560_v34, %v6012_v61 }
  0xb3   :  { %vm4562_vm15 = vmpackc.low %vm814_vm8, %vm809_vm7  ;;  %vm913_vm7 = vcmp.eq.s32.totalorder %v5771_v51, %v5825_v55 }
  0xb4   :  { %4531 = vmatpush1.bf16.msk.msra.mxu1 %vm4530_vm12, %v5310_v27  ;;  %4563 = vmatpush1.bf16.msk.msra.mxu0 %vm4562_vm15, %v5310_v27  ;;  %vm4532_vm2 = vmpackc.low %vm903_vm11, %vm898_vm10  ;;  %vm835_vm10 = vcmp.eq.s32.totalorder %v5563_v35, %v6012_v61  ;;  %vm907_vm12 = vcmp.eq.s32.totalorder %v5768_v50, %v5839_v56  ;;  %vm829_vm15 = vcmp.eq.s32.totalorder %v5560_v34, %v6027_v62 }
  0xb5   :  { %4533 = vmatprep.subr.msk.bf16.mxu1 %vm4532_vm2, %v5310_v27  ;;  %vm4564_vm5 = vmpackc.low %vm825_vm14, %vm820_vm13  ;;  %vm912_vm13 = vcmp.eq.s32.totalorder %v5771_v51, %v5839_v56  ;;  %vm918_vm2 = vcmp.eq.s32.totalorder %v5794_v52, %v5825_v55 }
  0xb6   :  { %4565 = vmatprep.subr.msk.bf16.mxu0 %vm4564_vm5, %v5310_v27  ;;  %vm4534_vm8 = vmpackc.low %vm902_vm1, %vm897_vm0  ;;  %vm834_vm0 = vcmp.eq.s32.totalorder %v5563_v35, %v6027_v62  ;;  %vm840_vm5 = vcmp.eq.s32.totalorder %v5586_v36, %v6012_v61 }
  0xb7   :  { %vm4566_vm11 = vmpackc.low %vm824_vm4, %vm819_vm3  ;;  %vm923_vm3 = vcmp.eq.s32.totalorder %v5797_v53, %v5825_v55 }
  0xb8   :  { %4535 = vmatpush1.bf16.msk.msra.mxu1 %vm4534_vm8, %v5310_v27  ;;  %4567 = vmatpush1.bf16.msk.msra.mxu0 %vm4566_vm11, %v5310_v27  ;;  %vm4536_vm14 = vmpackc.low %vm913_vm7, %vm908_vm6  ;;  %vm845_vm6 = vcmp.eq.s32.totalorder %v5589_v37, %v6012_v61  ;;  %vm917_vm8 = vcmp.eq.s32.totalorder %v5794_v52, %v5839_v56  ;;  %vm839_vm11 = vcmp.eq.s32.totalorder %v5586_v36, %v6027_v62 }
  0xb9   :  { %4537 = vmatprep.subr.msk.bf16.mxu1 %vm4536_vm14, %v5310_v27  ;;  %vm4568_vm1 = vmpackc.low %vm835_vm10, %vm830_vm9  ;;  %vm922_vm9 = vcmp.eq.s32.totalorder %v5797_v53, %v5839_v56  ;;  %vm850_vm14 = vcmp.eq.s32.totalorder %v5612_v38, %v6012_v61 }
  0xba   :  { %4569 = vmatprep.subr.msk.bf16.mxu0 %vm4568_vm1, %v5310_v27  ;;  %vm4538_vm4 = vmpackc.low %vm912_vm13, %vm907_vm12  ;;  %vm844_vm12 = vcmp.eq.s32.totalorder %v5589_v37, %v6027_v62  ;;  %vm851_vm1 = vcmp.eq.s32.totalorder %v5612_v38, %v6186_v63 }
  0xbb   :  { %vm4570_vm7 = vmpackc.low %vm834_vm0, %vm829_vm15  ;;  %vm855_vm15 = vcmp.eq.s32.totalorder %v5615_v39, %v6012_v61 }
  0xbc   :  { %4539 = vmatpush1.bf16.msk.msra.mxu1 %vm4538_vm4, %v5310_v27  ;;  %4571 = vmatpush1.bf16.msk.msra.mxu0 %vm4570_vm7, %v5310_v27  ;;  %vm4540_vm10 = vmpackc.low %vm923_vm3, %vm918_vm2  ;;  %vm856_vm2 = vcmp.eq.s32.totalorder %v5615_v39, %v6186_v63  ;;  %vm849_vm4 = vcmp.eq.s32.totalorder %v5612_v38, %v6027_v62  ;;  %vm771_vm7 = vcmp.eq.s32.totalorder %v5380_v1, %v6186_v63 }
  0xbd   :  { %4541 = vmatprep.subr.msk.bf16.mxu1 %vm4540_vm10, %v5310_v27  ;;  %vm4572_vm13 = vmpackc.low %vm845_vm6, %vm840_vm5  ;;  %vm854_vm5 = vcmp.eq.s32.totalorder %v5615_v39, %v6027_v62  ;;  %vm860_vm10 = vcmp.eq.s32.totalorder %v5638_v40, %v6012_v61 }
  0xbe   :  { %4573 = vmatprep.subr.msk.bf16.mxu0 %vm4572_vm13, %v5310_v27  ;;  %vm4542_vm0 = vmpackc.low %vm922_vm9, %vm917_vm8  ;;  %vm776_vm8 = vcmp.eq.s32.totalorder %v5411_v16, %v6186_v63  ;;  %vm861_vm13 = vcmp.eq.s32.totalorder %v5638_v40, %v6186_v63 }
  0xbf   :  { %vm4574_vm3 = vmpackc.low %vm844_vm12, %vm839_vm11  ;;  %vm865_vm11 = vcmp.eq.s32.totalorder %v5641_v41, %v6012_v61 }
  0xc0   :  { %4543 = vmatpush1.bf16.msk.msra.mxu1 %vm4542_vm0, %v5310_v27  ;;  %4575 = vmatpush1.bf16.msk.msra.mxu0 %vm4574_vm3, %v5310_v27  ;;  %vm4576_vm6 = vmpackc.low %vm855_vm15, %vm850_vm14  ;;  %vm866_vm14 = vcmp.eq.s32.totalorder %v5641_v41, %v6186_v63  ;;  %vm859_vm0 = vcmp.eq.s32.totalorder %v5638_v40, %v6027_v62  ;;  %vm781_vm3 = vcmp.eq.s32.totalorder %v5426_v22, %v6186_v63 }
  0xc1   :  { %4577 = vmatprep.subr.msk.bf16.mxu0 %vm4576_vm6, %v5310_v27  ;;  %vm4608_vm9 = vmpackc.low %vm856_vm2, %vm851_vm1  ;;  %vm864_vm1 = vcmp.eq.s32.totalorder %v5641_v41, %v6027_v62  ;;  %vm870_vm6 = vcmp.eq.s32.totalorder %v5664_v42, %v6012_v61 }
  0xc2   :  { %4609 = vmatprep.subr.msk.bf16.mxu1 %vm4608_vm9, %v5310_v27  ;;  %vm4578_vm12 = vmpackc.low %vm854_vm5, %vm849_vm4  ;;  %vm786_vm4 = vcmp.eq.s32.totalorder %v5429_v23, %v6186_v63  ;;  %vm871_vm9 = vcmp.eq.s32.totalorder %v5664_v42, %v6186_v63 }
  0xc3   :  { %1152 = vmatmul.mubr.f32.vlgmr.msra.gmra.mrb[4].mxu1 %v5857_v57  ;;  %vm4610_vm15 = vmpackc.low %vm776_vm8, %vm771_vm7  ;;  %vm875_vm7 = vcmp.eq.s32.totalorder %v5667_v43, %v6012_v61 }
  0xc4   :  { %4579 = vmatpush1.bf16.msk.msra.mxu0 %vm4578_vm12, %v5310_v27  ;;  %4611 = vmatpush3.bf16.msk.msra.mxu1 %vm4610_vm15, %v5310_v27  ;;  %vm4580_vm2 = vmpackc.low %vm865_vm11, %vm860_vm10  ;;  %vm876_vm10 = vcmp.eq.s32.totalorder %v5667_v43, %v6186_v63  ;;  %vm869_vm12 = vcmp.eq.s32.totalorder %v5664_v42, %v6027_v62  ;;  %vm791_vm15 = vcmp.eq.s32.totalorder %v5439_v25, %v6186_v63 }
  0xc5   :  { %4581 = vmatprep.subr.msk.bf16.mxu0 %vm4580_vm2, %v5310_v27  ;;  %vm4612_vm5 = vmpackc.low %vm866_vm14, %vm861_vm13  ;;  %1157 = vmatprep.mubr.f32.mxu1 %v5873_v58  ;;  %vm874_vm13 = vcmp.eq.s32.totalorder %v5667_v43, %v6027_v62  ;;  %vm880_vm2 = vcmp.eq.s32.totalorder %v5690_v44, %v6012_v61 }
  0xc6   :  { %4613 = vmatprep.subr.msk.bf16.mxu1 %vm4612_vm5, %v5310_v27  ;;  %vm4582_vm8 = vmpackc.low %vm864_vm1, %vm859_vm0  ;;  %vm796_vm0 = vcmp.eq.s32.totalorder %v5442_v26, %v6186_v63  ;;  %vm881_vm5 = vcmp.eq.s32.totalorder %v5690_v44, %v6186_v63 }
  0xc7   :  { %vm4614_vm11 = vmpackc.low %vm786_vm4, %vm781_vm3  ;;  %1158 = vmatmul.mubr.f32.gmra.mrb[6].mxu1 %v5887_v59  ;;  %vm885_vm3 = vcmp.eq.s32.totalorder %v5693_v45, %v6012_v61 }
  0xc8   :  { %4583 = vmatpush1.bf16.msk.msra.mxu0 %vm4582_vm8, %v5310_v27  ;;  %4615 = vmatpush3.bf16.msk.msra.mxu1 %vm4614_vm11, %v5310_v27  ;;  %vm4584_vm14 = vmpackc.low %vm875_vm7, %vm870_vm6  ;;  %vm886_vm6 = vcmp.eq.s32.totalorder %v5693_v45, %v6186_v63  ;;  %vm879_vm8 = vcmp.eq.s32.totalorder %v5690_v44, %v6027_v62  ;;  %vm801_vm11 = vcmp.eq.s32.totalorder %v5482_v28, %v6186_v63 }
  0xc9   :  { %4585 = vmatprep.subr.msk.bf16.mxu0 %vm4584_vm14, %v5310_v27  ;;  %vm4616_vm1 = vmpackc.low %vm876_vm10, %vm871_vm9  ;;  %1305 = vmatprep.mubr.f32.mxu1 %v6271_v0  ;;  %vm884_vm9 = vcmp.eq.s32.totalorder %v5693_v45, %v6027_v62  ;;  %vm890_vm14 = vcmp.eq.s32.totalorder %v5716_v46, %v6012_v61 }
  0xca   :  { %4617 = vmatprep.subr.msk.bf16.mxu1 %vm4616_vm1, %v5310_v27  ;;  %vm4586_vm4 = vmpackc.low %vm874_vm13, %vm869_vm12  ;;  %vm806_vm12 = vcmp.eq.s32.totalorder %v5485_v29, %v6186_v63  ;;  %vm891_vm1 = vcmp.eq.s32.totalorder %v5716_v46, %v6186_v63 }
  0xcb   :  { %vm4618_vm7 = vmpackc.low %vm796_vm0, %vm791_vm15  ;;  %vm895_vm15 = vcmp.eq.s32.totalorder %v5719_v47, %v6012_v61 }
  0xcc   :  { %4587 = vmatpush1.bf16.msk.msra.mxu0 %vm4586_vm4, %v5310_v27  ;;  %4619 = vmatpush3.bf16.msk.msra.mxu1 %vm4618_vm7, %v5310_v27  ;;  %vm4588_vm10 = vmpackc.low %vm885_vm3, %vm880_vm2  ;;  %vm896_vm2 = vcmp.eq.s32.totalorder %v5719_v47, %v6186_v63  ;;  %vm889_vm4 = vcmp.eq.s32.totalorder %v5716_v46, %v6027_v62  ;;  %vm811_vm7 = vcmp.eq.s32.totalorder %v5508_v30, %v6186_v63 }
  0xcd   :  { %4589 = vmatprep.subr.msk.bf16.mxu0 %vm4588_vm10, %v5310_v27  ;;  %vm4620_vm13 = vmpackc.low %vm886_vm6, %vm881_vm5  ;;  %vm894_vm5 = vcmp.eq.s32.totalorder %v5719_v47, %v6027_v62  ;;  %vm900_vm10 = vcmp.eq.s32.totalorder %v5742_v48, %v6012_v61 }
  0xce   :  { %4621 = vmatprep.subr.msk.bf16.mxu1 %vm4620_vm13, %v5310_v27  ;;  %vm4590_vm0 = vmpackc.low %vm884_vm9, %vm879_vm8  ;;  %vm816_vm8 = vcmp.eq.s32.totalorder %v5511_v31, %v6186_v63  ;;  %vm901_vm13 = vcmp.eq.s32.totalorder %v5742_v48, %v6186_v63 }
  0xcf   :  { %vm4622_vm3 = vmpackc.low %vm806_vm12, %vm801_vm11  ;;  %vm905_vm11 = vcmp.eq.s32.totalorder %v5745_v49, %v6012_v61 }
  0xd0   :  { %4591 = vmatpush1.bf16.msk.msra.mxu0 %vm4590_vm0, %v5310_v27  ;;  %4623 = vmatpush3.bf16.msk.msra.mxu1 %vm4622_vm3, %v5310_v27  ;;  %vm4592_vm6 = vmpackc.low %vm895_vm15, %vm890_vm14  ;;  %vm906_vm14 = vcmp.eq.s32.totalorder %v5745_v49, %v6186_v63  ;;  %vm899_vm0 = vcmp.eq.s32.totalorder %v5742_v48, %v6027_v62  ;;  %vm821_vm3 = vcmp.eq.s32.totalorder %v5534_v32, %v6186_v63 }
  0xd1   :  { %4593 = vmatprep.subr.msk.bf16.mxu0 %vm4592_vm6, %v5310_v27  ;;  %vm4624_vm9 = vmpackc.low %vm896_vm2, %vm891_vm1  ;;  %vm904_vm1 = vcmp.eq.s32.totalorder %v5745_v49, %v6027_v62  ;;  %vm910_vm6 = vcmp.eq.s32.totalorder %v5768_v50, %v6012_v61 }
  0xd2   :  { %4625 = vmatprep.subr.msk.bf16.mxu1 %vm4624_vm9, %v5310_v27  ;;  %vm4594_vm12 = vmpackc.low %vm894_vm5, %vm889_vm4  ;;  %vm826_vm4 = vcmp.eq.s32.totalorder %v5537_v33, %v6186_v63  ;;  %vm911_vm9 = vcmp.eq.s32.totalorder %v5768_v50, %v6186_v63 }
  0xd3   :  { %vm4626_vm15 = vmpackc.low %vm816_vm8, %vm811_vm7  ;;  %vm915_vm7 = vcmp.eq.s32.totalorder %v5771_v51, %v6012_v61 }
  0xd4   :  { %4595 = vmatpush1.bf16.msk.msra.mxu0 %vm4594_vm12, %v5310_v27  ;;  %4627 = vmatpush3.bf16.msk.msra.mxu1 %vm4626_vm15, %v5310_v27  ;;  %vm4596_vm2 = vmpackc.low %vm905_vm11, %vm900_vm10  ;;  %vm916_vm10 = vcmp.eq.s32.totalorder %v5771_v51, %v6186_v63  ;;  %vm909_vm12 = vcmp.eq.s32.totalorder %v5768_v50, %v6027_v62  ;;  %vm831_vm15 = vcmp.eq.s32.totalorder %v5560_v34, %v6186_v63 }
  0xd5   :  { %4597 = vmatprep.subr.msk.bf16.mxu0 %vm4596_vm2, %v5310_v27  ;;  %vm4628_vm5 = vmpackc.low %vm906_vm14, %vm901_vm13  ;;  %vm914_vm13 = vcmp.eq.s32.totalorder %v5771_v51, %v6027_v62  ;;  %vm920_vm2 = vcmp.eq.s32.totalorder %v5794_v52, %v6012_v61 }
  0xd6   :  { %4629 = vmatprep.subr.msk.bf16.mxu1 %vm4628_vm5, %v5310_v27  ;;  %vm4598_vm8 = vmpackc.low %vm904_vm1, %vm899_vm0  ;;  %vm836_vm0 = vcmp.eq.s32.totalorder %v5563_v35, %v6186_v63  ;;  %vm921_vm5 = vcmp.eq.s32.totalorder %v5794_v52, %v6186_v63 }
  0xd7   :  { %vm4630_vm11 = vmpackc.low %vm826_vm4, %vm821_vm3  ;;  %vm925_vm3 = vcmp.eq.s32.totalorder %v5797_v53, %v6012_v61 }
  0xd8   :  { %4599 = vmatpush1.bf16.msk.msra.mxu0 %vm4598_vm8, %v5310_v27  ;;  %4631 = vmatpush3.bf16.msk.msra.mxu1 %vm4630_vm11, %v5310_v27  ;;  %vm4600_vm14 = vmpackc.low %vm915_vm7, %vm910_vm6  ;;  %vm926_vm6 = vcmp.eq.s32.totalorder %v5797_v53, %v6186_v63  ;;  %vm919_vm8 = vcmp.eq.s32.totalorder %v5794_v52, %v6027_v62  ;;  %vm841_vm11 = vcmp.eq.s32.totalorder %v5586_v36, %v6186_v63 }
  0xd9   :  { %4601 = vmatprep.subr.msk.bf16.mxu0 %vm4600_vm14, %v5310_v27  ;;  %vm4632_vm1 = vmpackc.low %vm916_vm10, %vm911_vm9  ;;  %vm924_vm9 = vcmp.eq.s32.totalorder %v5797_v53, %v6027_v62  ;;  %vm1409_vm14 = vcmp.eq.s32.totalorder %v5380_v1, %v6357_v5 }
  0xda   :  { %4633 = vmatprep.subr.msk.bf16.mxu1 %vm4632_vm1, %v5310_v27  ;;  %vm4602_vm4 = vmpackc.low %vm914_vm13, %vm909_vm12  ;;  %vm846_vm12 = vcmp.eq.s32.totalorder %v5589_v37, %v6186_v63  ;;  %vm1411_vm1 = vcmp.eq.s32.totalorder %v5380_v1, %v6367_v6 }
  0xdb   :  { %vm4634_vm7 = vmpackc.low %vm836_vm0, %vm831_vm15  ;;  %vm1414_vm15 = vcmp.eq.s32.totalorder %v5411_v16, %v6357_v5 }
  0xdc   :  { %4603 = vmatpush1.bf16.msk.msra.mxu0 %vm4602_vm4, %v5310_v27  ;;  %4635 = vmatpush3.bf16.msk.msra.mxu1 %vm4634_vm7, %v5310_v27  ;;  %vm4604_vm10 = vmpackc.low %vm925_vm3, %vm920_vm2  ;;  %vm1416_vm2 = vcmp.eq.s32.totalorder %v5411_v16, %v6367_v6  ;;  %vm1408_vm4 = vcmp.eq.s32.totalorder %v5380_v1, %v6379_v8  ;;  %vm1410_vm7 = vcmp.eq.s32.totalorder %v5380_v1, %v6386_v7 }
  0xdd   :  { %4605 = vmatprep.subr.msk.bf16.mxu0 %vm4604_vm10, %v5310_v27  ;;  %vm4636_vm13 = vmpackc.low %vm926_vm6, %vm921_vm5  ;;  %vm1413_vm5 = vcmp.eq.s32.totalorder %v5411_v16, %v6379_v8  ;;  %vm1419_vm10 = vcmp.eq.s32.totalorder %v5426_v22, %v6357_v5 }
  0xde   :  { %4637 = vmatprep.subr.msk.bf16.mxu1 %vm4636_vm13, %v5310_v27  ;;  %vm4606_vm0 = vmpackc.low %vm924_vm9, %vm919_vm8  ;;  %vm1415_vm8 = vcmp.eq.s32.totalorder %v5411_v16, %v6386_v7  ;;  %vm1421_vm13 = vcmp.eq.s32.totalorder %v5426_v22, %v6367_v6 }
  0xdf   :  { %vm4638_vm3 = vmpackc.low %vm846_vm12, %vm841_vm11  ;;  %vm1424_vm11 = vcmp.eq.s32.totalorder %v5429_v23, %v6357_v5 }
  0xe0   :  { %4607 = vmatpush1.bf16.msk.msra.mxu0 %vm4606_vm0, %v5310_v27  ;;  %4639 = vmatpush3.bf16.msk.msra.mxu1 %vm4638_vm3, %v5310_v27  ;;  %vm4640_vm6 = vmpackc.low %vm1414_vm15, %vm1409_vm14  ;;  %vm1426_vm14 = vcmp.eq.s32.totalorder %v5429_v23, %v6367_v6  ;;  %vm1418_vm0 = vcmp.eq.s32.totalorder %v5426_v22, %v6379_v8  ;;  %vm1420_vm3 = vcmp.eq.s32.totalorder %v5426_v22, %v6386_v7 }
  0xe1   :  { %4641 = vmatprep.subr.msk.bf16.mxu0 %vm4640_vm6, %v5310_v27  ;;  %vm4704_vm9 = vmpackc.low %vm1416_vm2, %vm1411_vm1  ;;  %vm1423_vm1 = vcmp.eq.s32.totalorder %v5429_v23, %v6379_v8  ;;  %vm1429_vm6 = vcmp.eq.s32.totalorder %v5439_v25, %v6357_v5 }
  0xe2   :  { %4705 = vmatprep.subr.msk.bf16.mxu1 %vm4704_vm9, %v5310_v27  ;;  %vm4642_vm12 = vmpackc.low %vm1413_vm5, %vm1408_vm4  ;;  %vm1425_vm4 = vcmp.eq.s32.totalorder %v5429_v23, %v6386_v7  ;;  %vm1431_vm9 = vcmp.eq.s32.totalorder %v5439_v25, %v6367_v6 }
  0xe3   :  { %1229 = vmatmul.mubr.f32.vlgmr.msra.gmra.mrb[8].mxu0 %v5857_v57  ;;  %1306 = vmatmul.mubr.f32.vlgmr.msra.gmra.mrb[8].mxu1 %v5857_v57  ;;  %vm4706_vm15 = vmpackc.low %vm1415_vm8, %vm1410_vm7  ;;  %vm1434_vm7 = vcmp.eq.s32.totalorder %v5442_v26, %v6357_v5 }
  0xe4   :  { %4643 = vmatpush1.bf16.msk.msra.mxu0 %vm4642_vm12, %v5310_v27  ;;  %4707 = vmatpush1.bf16.msk.msra.mxu1 %vm4706_vm15, %v5310_v27  ;;  %vm4644_vm2 = vmpackc.low %vm1424_vm11, %vm1419_vm10  ;;  %vm1436_vm10 = vcmp.eq.s32.totalorder %v5442_v26, %v6367_v6  ;;  %vm1428_vm12 = vcmp.eq.s32.totalorder %v5439_v25, %v6379_v8  ;;  %vm1430_vm15 = vcmp.eq.s32.totalorder %v5439_v25, %v6386_v7 }
  0xe5   :  { %4645 = vmatprep.subr.msk.bf16.mxu0 %vm4644_vm2, %v5310_v27  ;;  %vm4708_vm5 = vmpackc.low %vm1426_vm14, %vm1421_vm13  ;;  %1234 = vmatprep.mubr.f32.mxu0 %v5873_v58  ;;  %vm1433_vm13 = vcmp.eq.s32.totalorder %v5442_v26, %v6379_v8  ;;  %vm1439_vm2 = vcmp.eq.s32.totalorder %v5482_v28, %v6357_v5 }
  0xe6   :  { %4709 = vmatprep.subr.msk.bf16.mxu1 %vm4708_vm5, %v5310_v27  ;;  %vm4646_vm8 = vmpackc.low %vm1423_vm1, %vm1418_vm0  ;;  %1310 = vmatprep.mubr.f32.mxu1 %v5873_v58  ;;  %vm1435_vm0 = vcmp.eq.s32.totalorder %v5442_v26, %v6386_v7  ;;  %vm1441_vm5 = vcmp.eq.s32.totalorder %v5482_v28, %v6367_v6 }
  0xe7   :  { %vm4710_vm11 = vmpackc.low %vm1425_vm4, %vm1420_vm3  ;;  %1235 = vmatmul.mubr.f32.gmra.mrb[10].mxu0 %v5887_v59  ;;  %1311 = vmatmul.mubr.f32.gmra.mrb[10].mxu1 %v5887_v59  ;;  %vm1444_vm3 = vcmp.eq.s32.totalorder %v5485_v29, %v6357_v5 }
  0xe8   :  { %4647 = vmatpush1.bf16.msk.msra.mxu0 %vm4646_vm8, %v5310_v27  ;;  %4711 = vmatpush1.bf16.msk.msra.mxu1 %vm4710_vm11, %v5310_v27  ;;  %vm4648_vm14 = vmpackc.low %vm1434_vm7, %vm1429_vm6  ;;  %vm1446_vm6 = vcmp.eq.s32.totalorder %v5485_v29, %v6367_v6  ;;  %vm1438_vm8 = vcmp.eq.s32.totalorder %v5482_v28, %v6379_v8  ;;  %vm1440_vm11 = vcmp.eq.s32.totalorder %v5482_v28, %v6386_v7 }
  0xe9   :  { %4649 = vmatprep.subr.msk.bf16.mxu0 %vm4648_vm14, %v5310_v27  ;;  %vm4712_vm1 = vmpackc.low %vm1436_vm10, %vm1431_vm9  ;;  %1792 = vmatprep.mubr.f32.mxu0 %v6271_v0  ;;  %vm1443_vm9 = vcmp.eq.s32.totalorder %v5485_v29, %v6379_v8  ;;  %vm1449_vm14 = vcmp.eq.s32.totalorder %v5508_v30, %v6357_v5 }
  0xea   :  { %4713 = vmatprep.subr.msk.bf16.mxu1 %vm4712_vm1, %v5310_v27  ;;  %vm4650_vm4 = vmpackc.low %vm1433_vm13, %vm1428_vm12  ;;  %1869 = vmatprep.mubr.f32.mxu1 %v6271_v0  ;;  %vm1445_vm12 = vcmp.eq.s32.totalorder %v5485_v29, %v6386_v7  ;;  %vm1451_vm1 = vcmp.eq.s32.totalorder %v5508_v30, %v6367_v6 }
  0xeb   :  { %vm4714_vm7 = vmpackc.low %vm1435_vm0, %vm1430_vm15  ;;  %vm1454_vm15 = vcmp.eq.s32.totalorder %v5511_v31, %v6357_v5 }
  0xec   :  { %4651 = vmatpush1.bf16.msk.msra.mxu0 %vm4650_vm4, %v5310_v27  ;;  %4715 = vmatpush1.bf16.msk.msra.mxu1 %vm4714_vm7, %v5310_v27  ;;  %vm4652_vm10 = vmpackc.low %vm1444_vm3, %vm1439_vm2  ;;  %vm1456_vm2 = vcmp.eq.s32.totalorder %v5511_v31, %v6367_v6  ;;  %vm1448_vm4 = vcmp.eq.s32.totalorder %v5508_v30, %v6379_v8  ;;  %vm1450_vm7 = vcmp.eq.s32.totalorder %v5508_v30, %v6386_v7 }
  0xed   :  { %4653 = vmatprep.subr.msk.bf16.mxu0 %vm4652_vm10, %v5310_v27  ;;  %vm4716_vm13 = vmpackc.low %vm1446_vm6, %vm1441_vm5  ;;  %vm1453_vm5 = vcmp.eq.s32.totalorder %v5511_v31, %v6379_v8  ;;  %vm1459_vm10 = vcmp.eq.s32.totalorder %v5534_v32, %v6357_v5 }
  0xee   :  { %4717 = vmatprep.subr.msk.bf16.mxu1 %vm4716_vm13, %v5310_v27  ;;  %vm4654_vm0 = vmpackc.low %vm1443_vm9, %vm1438_vm8  ;;  %vm1455_vm8 = vcmp.eq.s32.totalorder %v5511_v31, %v6386_v7  ;;  %vm1461_vm13 = vcmp.eq.s32.totalorder %v5534_v32, %v6367_v6 }
  0xef   :  { %vm4718_vm3 = vmpackc.low %vm1445_vm12, %vm1440_vm11  ;;  %vm1464_vm11 = vcmp.eq.s32.totalorder %v5537_v33, %v6357_v5 }
  0xf0   :  { %4655 = vmatpush1.bf16.msk.msra.mxu0 %vm4654_vm0, %v5310_v27  ;;  %4719 = vmatpush1.bf16.msk.msra.mxu1 %vm4718_vm3, %v5310_v27  ;;  %vm4656_vm6 = vmpackc.low %vm1454_vm15, %vm1449_vm14  ;;  %vm1466_vm14 = vcmp.eq.s32.totalorder %v5537_v33, %v6367_v6  ;;  %vm1458_vm0 = vcmp.eq.s32.totalorder %v5534_v32, %v6379_v8  ;;  %vm1460_vm3 = vcmp.eq.s32.totalorder %v5534_v32, %v6386_v7 }
  0xf1   :  { %4657 = vmatprep.subr.msk.bf16.mxu0 %vm4656_vm6, %v5310_v27  ;;  %vm4720_vm9 = vmpackc.low %vm1456_vm2, %vm1451_vm1  ;;  %vm1463_vm1 = vcmp.eq.s32.totalorder %v5537_v33, %v6379_v8  ;;  %vm1469_vm6 = vcmp.eq.s32.totalorder %v5560_v34, %v6357_v5 }
  0xf2   :  { %4721 = vmatprep.subr.msk.bf16.mxu1 %vm4720_vm9, %v5310_v27  ;;  %vm4658_vm12 = vmpackc.low %vm1453_vm5, %vm1448_vm4  ;;  %vm1465_vm4 = vcmp.eq.s32.totalorder %v5537_v33, %v6386_v7  ;;  %vm1471_vm9 = vcmp.eq.s32.totalorder %v5560_v34, %v6367_v6 }
  0xf3   :  { %vm4722_vm15 = vmpackc.low %vm1455_vm8, %vm1450_vm7  ;;  %vm1474_vm7 = vcmp.eq.s32.totalorder %v5563_v35, %v6357_v5 }
  0xf4   :  { %4659 = vmatpush1.bf16.msk.msra.mxu0 %vm4658_vm12, %v5310_v27  ;;  %4723 = vmatpush1.bf16.msk.msra.mxu1 %vm4722_vm15, %v5310_v27  ;;  %vm4660_vm2 = vmpackc.low %vm1464_vm11, %vm1459_vm10  ;;  %vm1476_vm10 = vcmp.eq.s32.totalorder %v5563_v35, %v6367_v6  ;;  %vm1468_vm12 = vcmp.eq.s32.totalorder %v5560_v34, %v6379_v8  ;;  %vm1470_vm15 = vcmp.eq.s32.totalorder %v5560_v34, %v6386_v7 }
  0xf5   :  { %4661 = vmatprep.subr.msk.bf16.mxu0 %vm4660_vm2, %v5310_v27  ;;  %vm4724_vm5 = vmpackc.low %vm1466_vm14, %vm1461_vm13  ;;  %vm1473_vm13 = vcmp.eq.s32.totalorder %v5563_v35, %v6379_v8  ;;  %vm1479_vm2 = vcmp.eq.s32.totalorder %v5586_v36, %v6357_v5 }
  0xf6   :  { %4725 = vmatprep.subr.msk.bf16.mxu1 %vm4724_vm5, %v5310_v27  ;;  %vm4662_vm8 = vmpackc.low %vm1463_vm1, %vm1458_vm0  ;;  %vm1475_vm0 = vcmp.eq.s32.totalorder %v5563_v35, %v6386_v7  ;;  %vm1481_vm5 = vcmp.eq.s32.totalorder %v5586_v36, %v6367_v6 }
  0xf7   :  { %vm4726_vm11 = vmpackc.low %vm1465_vm4, %vm1460_vm3  ;;  %vm1484_vm3 = vcmp.eq.s32.totalorder %v5589_v37, %v6357_v5 }
  0xf8   :  { %4663 = vmatpush1.bf16.msk.msra.mxu0 %vm4662_vm8, %v5310_v27  ;;  %4727 = vmatpush1.bf16.msk.msra.mxu1 %vm4726_vm11, %v5310_v27  ;;  %vm4664_vm14 = vmpackc.low %vm1474_vm7, %vm1469_vm6  ;;  %vm1486_vm6 = vcmp.eq.s32.totalorder %v5589_v37, %v6367_v6  ;;  %vm1478_vm8 = vcmp.eq.s32.totalorder %v5586_v36, %v6379_v8  ;;  %vm1480_vm11 = vcmp.eq.s32.totalorder %v5586_v36, %v6386_v7 }
  0xf9   :  { %4665 = vmatprep.subr.msk.bf16.mxu0 %vm4664_vm14, %v5310_v27  ;;  %vm4728_vm1 = vmpackc.low %vm1476_vm10, %vm1471_vm9  ;;  %vm1483_vm9 = vcmp.eq.s32.totalorder %v5589_v37, %v6379_v8  ;;  %vm1489_vm14 = vcmp.eq.s32.totalorder %v5612_v38, %v6357_v5 }
  0xfa   :  { %4729 = vmatprep.subr.msk.bf16.mxu1 %vm4728_vm1, %v5310_v27  ;;  %vm4666_vm4 = vmpackc.low %vm1473_vm13, %vm1468_vm12  ;;  %vm1485_vm12 = vcmp.eq.s32.totalorder %v5589_v37, %v6386_v7  ;;  %vm1491_vm1 = vcmp.eq.s32.totalorder %v5612_v38, %v6367_v6 }
  0xfb   :  { %vm4730_vm7 = vmpackc.low %vm1475_vm0, %vm1470_vm15  ;;  %vm1494_vm15 = vcmp.eq.s32.totalorder %v5615_v39, %v6357_v5 }
  0xfc   :  { %4667 = vmatpush1.bf16.msk.msra.mxu0 %vm4666_vm4, %v5310_v27  ;;  %4731 = vmatpush1.bf16.msk.msra.mxu1 %vm4730_vm7, %v5310_v27  ;;  %vm4668_vm10 = vmpackc.low %vm1484_vm3, %vm1479_vm2  ;;  %vm1496_vm2 = vcmp.eq.s32.totalorder %v5615_v39, %v6367_v6  ;;  %vm1488_vm4 = vcmp.eq.s32.totalorder %v5612_v38, %v6379_v8  ;;  %vm1490_vm7 = vcmp.eq.s32.totalorder %v5612_v38, %v6386_v7 }
  0xfd   :  { %4669 = vmatprep.subr.msk.bf16.mxu0 %vm4668_vm10, %v5310_v27  ;;  %vm4732_vm13 = vmpackc.low %vm1486_vm6, %vm1481_vm5  ;;  %vm1493_vm5 = vcmp.eq.s32.totalorder %v5615_v39, %v6379_v8  ;;  %vm1499_vm10 = vcmp.eq.s32.totalorder %v5638_v40, %v6357_v5 }
  0xfe   :  { %4733 = vmatprep.subr.msk.bf16.mxu1 %vm4732_vm13, %v5310_v27  ;;  %vm4670_vm0 = vmpackc.low %vm1483_vm9, %vm1478_vm8  ;;  %vm1495_vm8 = vcmp.eq.s32.totalorder %v5615_v39, %v6386_v7  ;;  %vm1501_vm13 = vcmp.eq.s32.totalorder %v5638_v40, %v6367_v6 }
  0xff   :  { %vm4734_vm3 = vmpackc.low %vm1485_vm12, %vm1480_vm11  ;;  %vm1504_vm11 = vcmp.eq.s32.totalorder %v5641_v41, %v6357_v5 }
 0x100   :  { %4671 = vmatpush1.bf16.msk.msra.mxu0 %vm4670_vm0, %v5310_v27  ;;  %4735 = vmatpush1.bf16.msk.msra.mxu1 %vm4734_vm3, %v5310_v27  ;;  %vm4672_vm6 = vmpackc.low %vm1494_vm15, %vm1489_vm14  ;;  %vm1506_vm14 = vcmp.eq.s32.totalorder %v5641_v41, %v6367_v6  ;;  %vm1498_vm0 = vcmp.eq.s32.totalorder %v5638_v40, %v6379_v8  ;;  %vm1500_vm3 = vcmp.eq.s32.totalorder %v5638_v40, %v6386_v7 }
 0x101   :  { %4673 = vmatprep.subr.msk.bf16.mxu0 %vm4672_vm6, %v5310_v27  ;;  %vm4736_vm9 = vmpackc.low %vm1496_vm2, %vm1491_vm1  ;;  %vm1503_vm1 = vcmp.eq.s32.totalorder %v5641_v41, %v6379_v8  ;;  %vm1509_vm6 = vcmp.eq.s32.totalorder %v5664_v42, %v6357_v5 }
 0x102   :  { %4737 = vmatprep.subr.msk.bf16.mxu1 %vm4736_vm9, %v5310_v27  ;;  %vm4674_vm12 = vmpackc.low %vm1493_vm5, %vm1488_vm4  ;;  %vm1505_vm4 = vcmp.eq.s32.totalorder %v5641_v41, %v6386_v7  ;;  %vm1511_vm9 = vcmp.eq.s32.totalorder %v5664_v42, %v6367_v6 }
 0x103   :  { %vm4738_vm15 = vmpackc.low %vm1495_vm8, %vm1490_vm7  ;;  %vm1514_vm7 = vcmp.eq.s32.totalorder %v5667_v43, %v6357_v5 }
 0x104   :  { %4675 = vmatpush1.bf16.msk.msra.mxu0 %vm4674_vm12, %v5310_v27  ;;  %4739 = vmatpush1.bf16.msk.msra.mxu1 %vm4738_vm15, %v5310_v27  ;;  %vm4676_vm2 = vmpackc.low %vm1504_vm11, %vm1499_vm10  ;;  %vm1516_vm10 = vcmp.eq.s32.totalorder %v5667_v43, %v6367_v6  ;;  %vm1508_vm12 = vcmp.eq.s32.totalorder %v5664_v42, %v6379_v8  ;;  %vm1510_vm15 = vcmp.eq.s32.totalorder %v5664_v42, %v6386_v7 }
 0x105   :  { %4677 = vmatprep.subr.msk.bf16.mxu0 %vm4676_vm2, %v5310_v27  ;;  %vm4740_vm5 = vmpackc.low %vm1506_vm14, %vm1501_vm13  ;;  %vm1513_vm13 = vcmp.eq.s32.totalorder %v5667_v43, %v6379_v8  ;;  %vm1519_vm2 = vcmp.eq.s32.totalorder %v5690_v44, %v6357_v5 }
 0x106   :  { %4741 = vmatprep.subr.msk.bf16.mxu1 %vm4740_vm5, %v5310_v27  ;;  %vm4678_vm8 = vmpackc.low %vm1503_vm1, %vm1498_vm0  ;;  %vm1515_vm0 = vcmp.eq.s32.totalorder %v5667_v43, %v6386_v7  ;;  %vm1521_vm5 = vcmp.eq.s32.totalorder %v5690_v44, %v6367_v6 }
 0x107   :  { %vm4742_vm11 = vmpackc.low %vm1505_vm4, %vm1500_vm3  ;;  %vm1524_vm3 = vcmp.eq.s32.totalorder %v5693_v45, %v6357_v5 }
 0x108   :  { %4679 = vmatpush1.bf16.msk.msra.mxu0 %vm4678_vm8, %v5310_v27  ;;  %4743 = vmatpush1.bf16.msk.msra.mxu1 %vm4742_vm11, %v5310_v27  ;;  %vm4680_vm14 = vmpackc.low %vm1514_vm7, %vm1509_vm6  ;;  %vm1526_vm6 = vcmp.eq.s32.totalorder %v5693_v45, %v6367_v6  ;;  %vm1518_vm8 = vcmp.eq.s32.totalorder %v5690_v44, %v6379_v8  ;;  %vm1520_vm11 = vcmp.eq.s32.totalorder %v5690_v44, %v6386_v7 }
 0x109   :  { %4681 = vmatprep.subr.msk.bf16.mxu0 %vm4680_vm14, %v5310_v27  ;;  %vm4744_vm1 = vmpackc.low %vm1516_vm10, %vm1511_vm9  ;;  %vm1523_vm9 = vcmp.eq.s32.totalorder %v5693_v45, %v6379_v8  ;;  %vm1529_vm14 = vcmp.eq.s32.totalorder %v5716_v46, %v6357_v5 }
 0x10a   :  { %4745 = vmatprep.subr.msk.bf16.mxu1 %vm4744_vm1, %v5310_v27  ;;  %vm4682_vm4 = vmpackc.low %vm1513_vm13, %vm1508_vm12  ;;  %vm1525_vm12 = vcmp.eq.s32.totalorder %v5693_v45, %v6386_v7  ;;  %vm1531_vm1 = vcmp.eq.s32.totalorder %v5716_v46, %v6367_v6 }
 0x10b   :  { %vm4746_vm7 = vmpackc.low %vm1515_vm0, %vm1510_vm15  ;;  %vm1534_vm15 = vcmp.eq.s32.totalorder %v5719_v47, %v6357_v5 }
 0x10c   :  { %4683 = vmatpush1.bf16.msk.msra.mxu0 %vm4682_vm4, %v5310_v27  ;;  %4747 = vmatpush1.bf16.msk.msra.mxu1 %vm4746_vm7, %v5310_v27  ;;  %vm4684_vm10 = vmpackc.low %vm1524_vm3, %vm1519_vm2  ;;  %vm1536_vm2 = vcmp.eq.s32.totalorder %v5719_v47, %v6367_v6  ;;  %vm1528_vm4 = vcmp.eq.s32.totalorder %v5716_v46, %v6379_v8  ;;  %vm1530_vm7 = vcmp.eq.s32.totalorder %v5716_v46, %v6386_v7 }
 0x10d   :  { %4685 = vmatprep.subr.msk.bf16.mxu0 %vm4684_vm10, %v5310_v27  ;;  %vm4748_vm13 = vmpackc.low %vm1526_vm6, %vm1521_vm5  ;;  %vm1533_vm5 = vcmp.eq.s32.totalorder %v5719_v47, %v6379_v8  ;;  %vm1539_vm10 = vcmp.eq.s32.totalorder %v5742_v48, %v6357_v5 }
 0x10e   :  { %4749 = vmatprep.subr.msk.bf16.mxu1 %vm4748_vm13, %v5310_v27  ;;  %vm4686_vm0 = vmpackc.low %vm1523_vm9, %vm1518_vm8  ;;  %vm1535_vm8 = vcmp.eq.s32.totalorder %v5719_v47, %v6386_v7  ;;  %vm1541_vm13 = vcmp.eq.s32.totalorder %v5742_v48, %v6367_v6 }
 0x10f   :  { %vm4750_vm3 = vmpackc.low %vm1525_vm12, %vm1520_vm11  ;;  %vm1544_vm11 = vcmp.eq.s32.totalorder %v5745_v49, %v6357_v5 }
 0x110   :  { %4687 = vmatpush1.bf16.msk.msra.mxu0 %vm4686_vm0, %v5310_v27  ;;  %4751 = vmatpush1.bf16.msk.msra.mxu1 %vm4750_vm3, %v5310_v27  ;;  %vm4688_vm6 = vmpackc.low %vm1534_vm15, %vm1529_vm14  ;;  %vm1546_vm14 = vcmp.eq.s32.totalorder %v5745_v49, %v6367_v6  ;;  %vm1538_vm0 = vcmp.eq.s32.totalorder %v5742_v48, %v6379_v8  ;;  %vm1540_vm3 = vcmp.eq.s32.totalorder %v5742_v48, %v6386_v7 }
 0x111   :  { %4689 = vmatprep.subr.msk.bf16.mxu0 %vm4688_vm6, %v5310_v27  ;;  %vm4752_vm9 = vmpackc.low %vm1536_vm2, %vm1531_vm1  ;;  %vm1543_vm1 = vcmp.eq.s32.totalorder %v5745_v49, %v6379_v8  ;;  %vm1549_vm6 = vcmp.eq.s32.totalorder %v5768_v50, %v6357_v5 }
 0x112   :  { %4753 = vmatprep.subr.msk.bf16.mxu1 %vm4752_vm9, %v5310_v27  ;;  %vm4690_vm12 = vmpackc.low %vm1533_vm5, %vm1528_vm4  ;;  %vm1545_vm4 = vcmp.eq.s32.totalorder %v5745_v49, %v6386_v7  ;;  %vm1551_vm9 = vcmp.eq.s32.totalorder %v5768_v50, %v6367_v6 }
 0x113   :  { %vm4754_vm15 = vmpackc.low %vm1535_vm8, %vm1530_vm7  ;;  %vm1554_vm7 = vcmp.eq.s32.totalorder %v5771_v51, %v6357_v5 }
 0x114   :  { %4691 = vmatpush1.bf16.msk.msra.mxu0 %vm4690_vm12, %v5310_v27  ;;  %4755 = vmatpush1.bf16.msk.msra.mxu1 %vm4754_vm15, %v5310_v27  ;;  %vm4692_vm2 = vmpackc.low %vm1544_vm11, %vm1539_vm10  ;;  %vm1556_vm10 = vcmp.eq.s32.totalorder %v5771_v51, %v6367_v6  ;;  %vm1548_vm12 = vcmp.eq.s32.totalorder %v5768_v50, %v6379_v8  ;;  %vm1550_vm15 = vcmp.eq.s32.totalorder %v5768_v50, %v6386_v7 }
 0x115   :  { %4693 = vmatprep.subr.msk.bf16.mxu0 %vm4692_vm2, %v5310_v27  ;;  %vm4756_vm5 = vmpackc.low %vm1546_vm14, %vm1541_vm13  ;;  %vm1553_vm13 = vcmp.eq.s32.totalorder %v5771_v51, %v6379_v8  ;;  %vm1559_vm2 = vcmp.eq.s32.totalorder %v5794_v52, %v6357_v5 }
 0x116   :  { %4757 = vmatprep.subr.msk.bf16.mxu1 %vm4756_vm5, %v5310_v27  ;;  %vm4694_vm8 = vmpackc.low %vm1543_vm1, %vm1538_vm0  ;;  %vm1555_vm0 = vcmp.eq.s32.totalorder %v5771_v51, %v6386_v7  ;;  %vm1561_vm5 = vcmp.eq.s32.totalorder %v5794_v52, %v6367_v6 }
 0x117   :  { %vm4758_vm11 = vmpackc.low %vm1545_vm4, %vm1540_vm3  ;;  %vm1564_vm3 = vcmp.eq.s32.totalorder %v5797_v53, %v6357_v5 }
 0x118   :  { %4695 = vmatpush1.bf16.msk.msra.mxu0 %vm4694_vm8, %v5310_v27  ;;  %4759 = vmatpush1.bf16.msk.msra.mxu1 %vm4758_vm11, %v5310_v27  ;;  %vm4696_vm14 = vmpackc.low %vm1554_vm7, %vm1549_vm6  ;;  %vm1566_vm6 = vcmp.eq.s32.totalorder %v5797_v53, %v6367_v6  ;;  %vm1558_vm8 = vcmp.eq.s32.totalorder %v5794_v52, %v6379_v8  ;;  %vm1560_vm11 = vcmp.eq.s32.totalorder %v5794_v52, %v6386_v7 }
 0x119   :  { %4697 = vmatprep.subr.msk.bf16.mxu0 %vm4696_vm14, %v5310_v27  ;;  %vm4760_vm1 = vmpackc.low %vm1556_vm10, %vm1551_vm9  ;;  %vm1563_vm9 = vcmp.eq.s32.totalorder %v5797_v53, %v6379_v8  ;;  %vm1492_vm14 = vcmp.eq.s32.totalorder %v5612_v38, %v5408_v15 }
 0x11a   :  { %4761 = vmatprep.subr.msk.bf16.mxu1 %vm4760_vm1, %v5310_v27  ;;  %vm4698_vm4 = vmpackc.low %vm1553_vm13, %vm1548_vm12  ;;  %vm1565_vm12 = vcmp.eq.s32.totalorder %v5797_v53, %v6386_v7  ;;  %vm2052_vm1 = vcmp.eq.s32.totalorder %v5380_v1, %v6719_v11 }
 0x11b   :  { %vm4762_vm7 = vmpackc.low %vm1555_vm0, %vm1550_vm15  ;;  %vm1497_vm15 = vcmp.eq.s32.totalorder %v5615_v39, %v5408_v15 }
 0x11c   :  { %4699 = vmatpush1.bf16.msk.msra.mxu0 %vm4698_vm4, %v5310_v27  ;;  %4763 = vmatpush1.bf16.msk.msra.mxu1 %vm4762_vm7, %v5310_v27  ;;  %vm4700_vm10 = vmpackc.low %vm1564_vm3, %vm1559_vm2  ;;  %vm2057_vm2 = vcmp.eq.s32.totalorder %v5411_v16, %v6719_v11  ;;  %vm1412_vm4 = vcmp.eq.s32.totalorder %v5380_v1, %v5408_v15  ;;  %vm2051_vm7 = vcmp.eq.s32.totalorder %v5380_v1, %v6732_v12 }
 0x11d   :  { %4701 = vmatprep.subr.msk.bf16.mxu0 %vm4700_vm10, %v5310_v27  ;;  %vm4764_vm13 = vmpackc.low %vm1566_vm6, %vm1561_vm5  ;;  %vm1417_vm5 = vcmp.eq.s32.totalorder %v5411_v16, %v5408_v15  ;;  %vm1502_vm10 = vcmp.eq.s32.totalorder %v5638_v40, %v5408_v15 }
 0x11e   :  { %4765 = vmatprep.subr.msk.bf16.mxu1 %vm4764_vm13, %v5310_v27  ;;  %vm4702_vm0 = vmpackc.low %vm1563_vm9, %vm1558_vm8  ;;  %vm2056_vm8 = vcmp.eq.s32.totalorder %v5411_v16, %v6732_v12  ;;  %vm2062_vm13 = vcmp.eq.s32.totalorder %v5426_v22, %v6719_v11 }
 0x11f   :  { %vm4766_vm3 = vmpackc.low %vm1565_vm12, %vm1560_vm11  ;;  %vm1507_vm11 = vcmp.eq.s32.totalorder %v5641_v41, %v5408_v15 }
 0x120   :  { %4703 = vmatpush1.bf16.msk.msra.mxu0 %vm4702_vm0, %v5310_v27  ;;  %4767 = vmatpush1.bf16.msk.msra.mxu1 %vm4766_vm3, %v5310_v27  ;;  %vm4768_vm6 = vmpackc.low %vm1497_vm15, %vm1492_vm14  ;;  %vm2067_vm14 = vcmp.eq.s32.totalorder %v5429_v23, %v6719_v11  ;;  %vm1422_vm0 = vcmp.eq.s32.totalorder %v5426_v22, %v5408_v15  ;;  %vm2061_vm3 = vcmp.eq.s32.totalorder %v5426_v22, %v6732_v12 }
 0x121   :  { %4769 = vmatprep.subr.msk.bf16.mxu0 %vm4768_vm6, %v5310_v27  ;;  %vm4800_vm9 = vmpackc.low %vm2057_vm2, %vm2052_vm1  ;;  %vm1427_vm1 = vcmp.eq.s32.totalorder %v5429_v23, %v5408_v15  ;;  %vm1512_vm6 = vcmp.eq.s32.totalorder %v5664_v42, %v5408_v15 }
 0x122   :  { %4801 = vmatprep.subr.msk.bf16.mxu1 %vm4800_vm9, %v5310_v27  ;;  %vm4770_vm12 = vmpackc.low %vm1417_vm5, %vm1412_vm4  ;;  %vm2066_vm4 = vcmp.eq.s32.totalorder %v5429_v23, %v6732_v12  ;;  %vm2072_vm9 = vcmp.eq.s32.totalorder %v5439_v25, %v6719_v11 }
 0x123   :  { %1793 = vmatmul.mubr.f32.vlgmr.msra.gmra.mrb[12].mxu0 %v6770_v13  ;;  %1870 = vmatmul.mubr.f32.vlgmr.msra.gmra.mrb[12].mxu1 %v6770_v13  ;;  %vm4802_vm15 = vmpackc.low %vm2056_vm8, %vm2051_vm7  ;;  %vm1517_vm7 = vcmp.eq.s32.totalorder %v5667_v43, %v5408_v15 }
 0x124   :  { %4771 = vmatpush3.bf16.msk.msra.mxu0 %vm4770_vm12, %v5310_v27  ;;  %4803 = vmatpush1.bf16.msk.msra.mxu1 %vm4802_vm15, %v5310_v27  ;;  %vm4772_vm2 = vmpackc.low %vm1507_vm11, %vm1502_vm10  ;;  %vm2077_vm10 = vcmp.eq.s32.totalorder %v5442_v26, %v6719_v11  ;;  %vm1432_vm12 = vcmp.eq.s32.totalorder %v5439_v25, %v5408_v15  ;;  %vm2071_vm15 = vcmp.eq.s32.totalorder %v5439_v25, %v6732_v12 }
 0x125   :  { %4773 = vmatprep.subr.msk.bf16.mxu0 %vm4772_vm2, %v5310_v27  ;;  %vm4804_vm5 = vmpackc.low %vm2067_vm14, %vm2062_vm13  ;;  %1798 = vmatprep.mubr.f32.mxu0 %v6789_v14  ;;  %vm1437_vm13 = vcmp.eq.s32.totalorder %v5442_v26, %v5408_v15  ;;  %vm1522_vm2 = vcmp.eq.s32.totalorder %v5690_v44, %v5408_v15 }
 0x126   :  { %4805 = vmatprep.subr.msk.bf16.mxu1 %vm4804_vm5, %v5310_v27  ;;  %vm4774_vm8 = vmpackc.low %vm1427_vm1, %vm1422_vm0  ;;  %1875 = vmatprep.mubr.f32.mxu1 %v6789_v14  ;;  %vm2076_vm0 = vcmp.eq.s32.totalorder %v5442_v26, %v6732_v12  ;;  %vm2082_vm5 = vcmp.eq.s32.totalorder %v5482_v28, %v6719_v11 }
 0x127   :  { %vm4806_vm11 = vmpackc.low %vm2066_vm4, %vm2061_vm3  ;;  %1799 = vmatmul.mubr.f32.gmra.mrb[14].mxu0 %v6802_v17  ;;  %1876 = vmatmul.mubr.f32.gmra.mrb[14].mxu1 %v6802_v17  ;;  %vm1527_vm3 = vcmp.eq.s32.totalorder %v5693_v45, %v5408_v15 }
 0x128   :  { %4775 = vmatpush3.bf16.msk.msra.mxu0 %vm4774_vm8, %v5310_v27  ;;  %4807 = vmatpush1.bf16.msk.msra.mxu1 %vm4806_vm11, %v5310_v27  ;;  %vm4776_vm14 = vmpackc.low %vm1517_vm7, %vm1512_vm6  ;;  %vm2087_vm6 = vcmp.eq.s32.totalorder %v5485_v29, %v6719_v11  ;;  %vm1442_vm8 = vcmp.eq.s32.totalorder %v5482_v28, %v5408_v15  ;;  %vm2081_vm11 = vcmp.eq.s32.totalorder %v5482_v28, %v6732_v12 }
 0x129   :  { %4777 = vmatprep.subr.msk.bf16.mxu0 %vm4776_vm14, %v5310_v27  ;;  %vm4808_vm1 = vmpackc.low %vm2077_vm10, %vm2072_vm9  ;;  %1946 = vmatprep.mubr.f32.mxu0 %v6271_v0  ;;  %vm1447_vm9 = vcmp.eq.s32.totalorder %v5485_v29, %v5408_v15  ;;  %vm1532_vm14 = vcmp.eq.s32.totalorder %v5716_v46, %v5408_v15 }
 0x12a   :  { %4809 = vmatprep.subr.msk.bf16.mxu1 %vm4808_vm1, %v5310_v27  ;;  %vm4778_vm4 = vmpackc.low %vm1437_vm13, %vm1432_vm12  ;;  %2435 = vmatprep.mubr.f32.mxu1 %v6271_v0  ;;  %vm2086_vm12 = vcmp.eq.s32.totalorder %v5485_v29, %v6732_v12  ;;  %vm2092_vm1 = vcmp.eq.s32.totalorder %v5508_v30, %v6719_v11 }
 0x12b   :  { %vm4810_vm7 = vmpackc.low %vm2076_vm0, %vm2071_vm15  ;;  %vm1537_vm15 = vcmp.eq.s32.totalorder %v5719_v47, %v5408_v15 }
 0x12c   :  { %4779 = vmatpush3.bf16.msk.msra.mxu0 %vm4778_vm4, %v5310_v27  ;;  %4811 = vmatpush1.bf16.msk.msra.mxu1 %vm4810_vm7, %v5310_v27  ;;  %vm4780_vm10 = vmpackc.low %vm1527_vm3, %vm1522_vm2  ;;  %vm2097_vm2 = vcmp.eq.s32.totalorder %v5511_v31, %v6719_v11  ;;  %vm1452_vm4 = vcmp.eq.s32.totalorder %v5508_v30, %v5408_v15  ;;  %vm2091_vm7 = vcmp.eq.s32.totalorder %v5508_v30, %v6732_v12 }
 0x12d   :  { %4781 = vmatprep.subr.msk.bf16.mxu0 %vm4780_vm10, %v5310_v27  ;;  %vm4812_vm13 = vmpackc.low %vm2087_vm6, %vm2082_vm5  ;;  %vm1457_vm5 = vcmp.eq.s32.totalorder %v5511_v31, %v5408_v15  ;;  %vm1542_vm10 = vcmp.eq.s32.totalorder %v5742_v48, %v5408_v15 }
 0x12e   :  { %4813 = vmatprep.subr.msk.bf16.mxu1 %vm4812_vm13, %v5310_v27  ;;  %vm4782_vm0 = vmpackc.low %vm1447_vm9, %vm1442_vm8  ;;  %vm2096_vm8 = vcmp.eq.s32.totalorder %v5511_v31, %v6732_v12  ;;  %vm2102_vm13 = vcmp.eq.s32.totalorder %v5534_v32, %v6719_v11 }
 0x12f   :  { %vm4814_vm3 = vmpackc.low %vm2086_vm12, %vm2081_vm11  ;;  %vm1547_vm11 = vcmp.eq.s32.totalorder %v5745_v49, %v5408_v15 }
 0x130   :  { %4783 = vmatpush3.bf16.msk.msra.mxu0 %vm4782_vm0, %v5310_v27  ;;  %4815 = vmatpush1.bf16.msk.msra.mxu1 %vm4814_vm3, %v5310_v27  ;;  %vm4784_vm6 = vmpackc.low %vm1537_vm15, %vm1532_vm14  ;;  %vm2107_vm14 = vcmp.eq.s32.totalorder %v5537_v33, %v6719_v11  ;;  %vm1462_vm0 = vcmp.eq.s32.totalorder %v5534_v32, %v5408_v15  ;;  %vm2101_vm3 = vcmp.eq.s32.totalorder %v5534_v32, %v6732_v12 }
 0x131   :  { %4785 = vmatprep.subr.msk.bf16.mxu0 %vm4784_vm6, %v5310_v27  ;;  %vm4816_vm9 = vmpackc.low %vm2097_vm2, %vm2092_vm1  ;;  %vm1467_vm1 = vcmp.eq.s32.totalorder %v5537_v33, %v5408_v15  ;;  %vm1552_vm6 = vcmp.eq.s32.totalorder %v5768_v50, %v5408_v15 }
 0x132   :  { %4817 = vmatprep.subr.msk.bf16.mxu1 %vm4816_vm9, %v5310_v27  ;;  %vm4786_vm12 = vmpackc.low %vm1457_vm5, %vm1452_vm4  ;;  %vm2106_vm4 = vcmp.eq.s32.totalorder %v5537_v33, %v6732_v12  ;;  %vm2112_vm9 = vcmp.eq.s32.totalorder %v5560_v34, %v6719_v11 }
 0x133   :  { %vm4818_vm15 = vmpackc.low %vm2096_vm8, %vm2091_vm7  ;;  %vm1557_vm7 = vcmp.eq.s32.totalorder %v5771_v51, %v5408_v15 }
 0x134   :  { %4787 = vmatpush3.bf16.msk.msra.mxu0 %vm4786_vm12, %v5310_v27  ;;  %4819 = vmatpush1.bf16.msk.msra.mxu1 %vm4818_vm15, %v5310_v27  ;;  %vm4788_vm2 = vmpackc.low %vm1547_vm11, %vm1542_vm10  ;;  %vm2117_vm10 = vcmp.eq.s32.totalorder %v5563_v35, %v6719_v11  ;;  %vm1472_vm12 = vcmp.eq.s32.totalorder %v5560_v34, %v5408_v15  ;;  %vm2111_vm15 = vcmp.eq.s32.totalorder %v5560_v34, %v6732_v12 }
 0x135   :  { %4789 = vmatprep.subr.msk.bf16.mxu0 %vm4788_vm2, %v5310_v27  ;;  %vm4820_vm5 = vmpackc.low %vm2107_vm14, %vm2102_vm13  ;;  %vm1477_vm13 = vcmp.eq.s32.totalorder %v5563_v35, %v5408_v15  ;;  %vm1562_vm2 = vcmp.eq.s32.totalorder %v5794_v52, %v5408_v15 }
 0x136   :  { %4821 = vmatprep.subr.msk.bf16.mxu1 %vm4820_vm5, %v5310_v27  ;;  %vm4790_vm8 = vmpackc.low %vm1467_vm1, %vm1462_vm0  ;;  %vm2116_vm0 = vcmp.eq.s32.totalorder %v5563_v35, %v6732_v12  ;;  %vm2122_vm5 = vcmp.eq.s32.totalorder %v5586_v36, %v6719_v11 }
 0x137   :  { %vm4822_vm11 = vmpackc.low %vm2106_vm4, %vm2101_vm3  ;;  %vm1567_vm3 = vcmp.eq.s32.totalorder %v5797_v53, %v5408_v15 }
 0x138   :  { %4791 = vmatpush3.bf16.msk.msra.mxu0 %vm4790_vm8, %v5310_v27  ;;  %4823 = vmatpush1.bf16.msk.msra.mxu1 %vm4822_vm11, %v5310_v27  ;;  %vm4792_vm14 = vmpackc.low %vm1557_vm7, %vm1552_vm6  ;;  %vm2127_vm6 = vcmp.eq.s32.totalorder %v5589_v37, %v6719_v11  ;;  %vm1482_vm8 = vcmp.eq.s32.totalorder %v5586_v36, %v5408_v15  ;;  %vm2121_vm11 = vcmp.eq.s32.totalorder %v5586_v36, %v6732_v12 }
 0x139   :  { %4793 = vmatprep.subr.msk.bf16.mxu0 %vm4792_vm14, %v5310_v27  ;;  %vm4824_vm1 = vmpackc.low %vm2117_vm10, %vm2112_vm9  ;;  %vm1487_vm9 = vcmp.eq.s32.totalorder %v5589_v37, %v5408_v15  ;;  %vm2132_vm14 = vcmp.eq.s32.totalorder %v5612_v38, %v6719_v11  ;;  %v7009_v15 = vld [vmem:[#allocation8 + $0x8] sm:$0xff] }
 0x13a   :  { %4825 = vmatprep.subr.msk.bf16.mxu1 %vm4824_vm1, %v5310_v27  ;;  %vm4794_vm4 = vmpackc.low %vm1477_vm13, %vm1472_vm12  ;;  %vm2126_vm12 = vcmp.eq.s32.totalorder %v5589_v37, %v6732_v12  ;;  %vm2054_vm1 = vcmp.eq.s32.totalorder %v5380_v1, %v6919_v21 }
 0x13b   :  { %vm4826_vm7 = vmpackc.low %vm2116_vm0, %vm2111_vm15  ;;  %vm2137_vm15 = vcmp.eq.s32.totalorder %v5615_v39, %v6719_v11 }
 0x13c   :  { %4795 = vmatpush3.bf16.msk.msra.mxu0 %vm4794_vm4, %v5310_v27  ;;  %4827 = vmatpush1.bf16.msk.msra.mxu1 %vm4826_vm7, %v5310_v27  ;;  %vm4796_vm10 = vmpackc.low %vm1567_vm3, %vm1562_vm2  ;;  %vm2059_vm2 = vcmp.eq.s32.totalorder %v5411_v16, %v6919_v21  ;;  %vm2131_vm4 = vcmp.eq.s32.totalorder %v5612_v38, %v6732_v12  ;;  %vm2053_vm7 = vcmp.eq.s32.totalorder %v5380_v1, %v6933_v54 }
 0x13d   :  { %4797 = vmatprep.subr.msk.bf16.mxu0 %vm4796_vm10, %v5310_v27  ;;  %vm4828_vm13 = vmpackc.low %vm2127_vm6, %vm2122_vm5  ;;  %vm2136_vm5 = vcmp.eq.s32.totalorder %v5615_v39, %v6732_v12  ;;  %vm2142_vm10 = vcmp.eq.s32.totalorder %v5638_v40, %v6719_v11 }
 0x13e   :  { %4829 = vmatprep.subr.msk.bf16.mxu1 %vm4828_vm13, %v5310_v27  ;;  %vm4798_vm0 = vmpackc.low %vm1487_vm9, %vm1482_vm8  ;;  %vm2058_vm8 = vcmp.eq.s32.totalorder %v5411_v16, %v6933_v54  ;;  %vm2064_vm13 = vcmp.eq.s32.totalorder %v5426_v22, %v6919_v21 }
 0x13f   :  { %vm4830_vm3 = vmpackc.low %vm2126_vm12, %vm2121_vm11  ;;  %vm2147_vm11 = vcmp.eq.s32.totalorder %v5641_v41, %v6719_v11 }
 0x140   :  { %4799 = vmatpush3.bf16.msk.msra.mxu0 %vm4798_vm0, %v5310_v27  ;;  %4831 = vmatpush1.bf16.msk.msra.mxu1 %vm4830_vm3, %v5310_v27  ;;  %vm4832_vm6 = vmpackc.low %vm2137_vm15, %vm2132_vm14  ;;  %vm2069_vm14 = vcmp.eq.s32.totalorder %v5429_v23, %v6919_v21  ;;  %vm2141_vm0 = vcmp.eq.s32.totalorder %v5638_v40, %v6732_v12  ;;  %vm2063_vm3 = vcmp.eq.s32.totalorder %v5426_v22, %v6933_v54 }
 0x141   :  { %4833 = vmatprep.subr.msk.bf16.mxu1 %vm4832_vm6, %v5310_v27  ;;  %vm4864_vm9 = vmpackc.low %vm2059_vm2, %vm2054_vm1  ;;  %vm2146_vm1 = vcmp.eq.s32.totalorder %v5641_v41, %v6732_v12  ;;  %vm2152_vm6 = vcmp.eq.s32.totalorder %v5664_v42, %v6719_v11 }
 0x142   :  { %4865 = vmatprep.subr.msk.bf16.mxu0 %vm4864_vm9, %v5310_v27  ;;  %vm4834_vm12 = vmpackc.low %vm2136_vm5, %vm2131_vm4  ;;  %vm2068_vm4 = vcmp.eq.s32.totalorder %v5429_v23, %v6933_v54  ;;  %vm2074_vm9 = vcmp.eq.s32.totalorder %v5439_v25, %v6919_v21 }
 0x143   :  { %1947 = vmatmul.mubr.f32.vlgmr.msra.gmra.mrb[16].mxu0 %v6770_v13  ;;  %vm4866_vm15 = vmpackc.low %vm2058_vm8, %vm2053_vm7  ;;  %vm2157_vm7 = vcmp.eq.s32.totalorder %v5667_v43, %v6719_v11 }
 0x144   :  { %4835 = vmatpush1.bf16.msk.msra.mxu1 %vm4834_vm12, %v5310_v27  ;;  %4867 = vmatpush1.bf16.msk.msra.mxu0 %vm4866_vm15, %v5310_v27  ;;  %vm4836_vm2 = vmpackc.low %vm2147_vm11, %vm2142_vm10  ;;  %vm2079_vm10 = vcmp.eq.s32.totalorder %v5442_v26, %v6919_v21  ;;  %vm2151_vm12 = vcmp.eq.s32.totalorder %v5664_v42, %v6732_v12  ;;  %vm2073_vm15 = vcmp.eq.s32.totalorder %v5439_v25, %v6933_v54 }
 0x145   :  { %4837 = vmatprep.subr.msk.bf16.mxu1 %vm4836_vm2, %v5310_v27  ;;  %vm4868_vm5 = vmpackc.low %vm2069_vm14, %vm2064_vm13  ;;  %1951 = vmatprep.mubr.f32.mxu0 %v6789_v14  ;;  %vm2156_vm13 = vcmp.eq.s32.totalorder %v5667_v43, %v6732_v12  ;;  %vm2162_vm2 = vcmp.eq.s32.totalorder %v5690_v44, %v6719_v11 }
 0x146   :  { %4869 = vmatprep.subr.msk.bf16.mxu0 %vm4868_vm5, %v5310_v27  ;;  %vm4838_vm8 = vmpackc.low %vm2146_vm1, %vm2141_vm0  ;;  %vm2078_vm0 = vcmp.eq.s32.totalorder %v5442_v26, %v6933_v54  ;;  %vm2084_vm5 = vcmp.eq.s32.totalorder %v5482_v28, %v6919_v21 }
 0x147   :  { %vm4870_vm11 = vmpackc.low %vm2068_vm4, %vm2063_vm3  ;;  %1952 = vmatmul.mubr.f32.gmra.mrb[18].mxu0 %v6802_v17  ;;  %vm2167_vm3 = vcmp.eq.s32.totalorder %v5693_v45, %v6719_v11 }
 0x148   :  { %4839 = vmatpush1.bf16.msk.msra.mxu1 %vm4838_vm8, %v5310_v27  ;;  %4871 = vmatpush1.bf16.msk.msra.mxu0 %vm4870_vm11, %v5310_v27  ;;  %vm4840_vm14 = vmpackc.low %vm2157_vm7, %vm2152_vm6  ;;  %vm2089_vm6 = vcmp.eq.s32.totalorder %v5485_v29, %v6919_v21  ;;  %vm2161_vm8 = vcmp.eq.s32.totalorder %v5690_v44, %v6732_v12  ;;  %vm2083_vm11 = vcmp.eq.s32.totalorder %v5482_v28, %v6933_v54 }
 0x149   :  { %4841 = vmatprep.subr.msk.bf16.mxu1 %vm4840_vm14, %v5310_v27  ;;  %vm4872_vm1 = vmpackc.low %vm2079_vm10, %vm2074_vm9  ;;  %2512 = vmatprep.mubr.f32.mxu0 %v7009_v15  ;;  %vm2166_vm9 = vcmp.eq.s32.totalorder %v5693_v45, %v6732_v12  ;;  %vm2172_vm14 = vcmp.eq.s32.totalorder %v5716_v46, %v6719_v11 }
 0x14a   :  { %4873 = vmatprep.subr.msk.bf16.mxu0 %vm4872_vm1, %v5310_v27  ;;  %vm4842_vm4 = vmpackc.low %vm2156_vm13, %vm2151_vm12  ;;  %vm2088_vm12 = vcmp.eq.s32.totalorder %v5485_v29, %v6933_v54  ;;  %vm2094_vm1 = vcmp.eq.s32.totalorder %v5508_v30, %v6919_v21 }
 0x14b   :  { %vm4874_vm7 = vmpackc.low %vm2078_vm0, %vm2073_vm15  ;;  %vm2177_vm15 = vcmp.eq.s32.totalorder %v5719_v47, %v6719_v11 }
 0x14c   :  { %4843 = vmatpush1.bf16.msk.msra.mxu1 %vm4842_vm4, %v5310_v27  ;;  %4875 = vmatpush1.bf16.msk.msra.mxu0 %vm4874_vm7, %v5310_v27  ;;  %vm4844_vm10 = vmpackc.low %vm2167_vm3, %vm2162_vm2  ;;  %vm2099_vm2 = vcmp.eq.s32.totalorder %v5511_v31, %v6919_v21  ;;  %vm2171_vm4 = vcmp.eq.s32.totalorder %v5716_v46, %v6732_v12  ;;  %vm2093_vm7 = vcmp.eq.s32.totalorder %v5508_v30, %v6933_v54 }
 0x14d   :  { %4845 = vmatprep.subr.msk.bf16.mxu1 %vm4844_vm10, %v5310_v27  ;;  %vm4876_vm13 = vmpackc.low %vm2089_vm6, %vm2084_vm5  ;;  %vm2176_vm5 = vcmp.eq.s32.totalorder %v5719_v47, %v6732_v12  ;;  %vm2182_vm10 = vcmp.eq.s32.totalorder %v5742_v48, %v6719_v11 }
 0x14e   :  { %4877 = vmatprep.subr.msk.bf16.mxu0 %vm4876_vm13, %v5310_v27  ;;  %vm4846_vm0 = vmpackc.low %vm2166_vm9, %vm2161_vm8  ;;  %vm2098_vm8 = vcmp.eq.s32.totalorder %v5511_v31, %v6933_v54  ;;  %vm2104_vm13 = vcmp.eq.s32.totalorder %v5534_v32, %v6919_v21 }
 0x14f   :  { %vm4878_vm3 = vmpackc.low %vm2088_vm12, %vm2083_vm11  ;;  %vm2187_vm11 = vcmp.eq.s32.totalorder %v5745_v49, %v6719_v11 }
 0x150   :  { %4847 = vmatpush1.bf16.msk.msra.mxu1 %vm4846_vm0, %v5310_v27  ;;  %4879 = vmatpush1.bf16.msk.msra.mxu0 %vm4878_vm3, %v5310_v27  ;;  %vm4848_vm6 = vmpackc.low %vm2177_vm15, %vm2172_vm14  ;;  %vm2109_vm14 = vcmp.eq.s32.totalorder %v5537_v33, %v6919_v21  ;;  %vm2181_vm0 = vcmp.eq.s32.totalorder %v5742_v48, %v6732_v12  ;;  %vm2103_vm3 = vcmp.eq.s32.totalorder %v5534_v32, %v6933_v54 }
 0x151   :  { %4849 = vmatprep.subr.msk.bf16.mxu1 %vm4848_vm6, %v5310_v27  ;;  %vm4880_vm9 = vmpackc.low %vm2099_vm2, %vm2094_vm1  ;;  %vm2186_vm1 = vcmp.eq.s32.totalorder %v5745_v49, %v6732_v12 }
 0x152   :  { %4881 = vmatprep.subr.msk.bf16.mxu0 %vm4880_vm9, %v5310_v27  ;;  %vm4850_vm12 = vmpackc.low %vm2176_vm5, %vm2171_vm4  ;;  %vm2108_vm4 = vcmp.eq.s32.totalorder %v5537_v33, %v6933_v54  ;;  %vm2192_vm5 = vcmp.eq.s32.totalorder %v5768_v50, %v6719_v11  ;;  %vm2119_vm9 = vcmp.eq.s32.totalorder %v5563_v35, %v6919_v21 }
 0x153   :  { %vm4882_vm15 = vmpackc.low %vm2098_vm8, %vm2093_vm7  ;;  %vm2197_vm7 = vcmp.eq.s32.totalorder %v5771_v51, %v6719_v11  ;;  %vm2114_vm8 = vcmp.eq.s32.totalorder %v5560_v34, %v6919_v21 }
 0x154   :  { %4851 = vmatpush1.bf16.msk.msra.mxu1 %vm4850_vm12, %v5310_v27  ;;  %4883 = vmatpush1.bf16.msk.msra.mxu0 %vm4882_vm15, %v5310_v27  ;;  %vm4852_vm2 = vmpackc.low %vm2187_vm11, %vm2182_vm10  ;;  %vm2191_vm10 = vcmp.eq.s32.totalorder %v5768_v50, %v6732_v12  ;;  %vm2196_vm12 = vcmp.eq.s32.totalorder %v5771_v51, %v6732_v12 }
 0x155   :  { %v511_v55 = vpop.f32.mrb[0].mxu0  ;;  %4853 = vmatprep.subr.msk.bf16.mxu1 %vm4852_vm2, %v5310_v27  ;;  %vm4884_vm6 = vmpackc.low %vm2109_vm14, %vm2104_vm13  ;;  %vm2113_vm13 = vcmp.eq.s32.totalorder %v5560_v34, %v6933_v54  ;;  %vm2118_vm14 = vcmp.eq.s32.totalorder %v5563_v35, %v6933_v54 }
 0x156   :  { %v674_v56 = vsub.f32 %v511_v55, %v7060_v20  ;;  %v513_v57 = vpop.f32.mrb[1].mxu0  ;;  %4885 = vmatprep.subr.msk.bf16.mxu0 %vm4884_vm6, %v5310_v27  ;;  %vm4854_vm11 = vmpackc.low %vm2186_vm1, %vm2181_vm0  ;;  %v588_v58 = vpop.f32.mrb[0].mxu1  ;;  %vm2202_vm0 = vcmp.eq.s32.totalorder %v5794_v52, %v6719_v11  ;;  %vm2207_vm1 = vcmp.eq.s32.totalorder %v5797_v53, %v6719_v11  ;;  %vm2129_vm6 = vcmp.eq.s32.totalorder %v5589_v37, %v6919_v21 }
 0x157   :  { %v689_v59 = vsub.f32 %v513_v57, %v7060_v20  ;;  %vm4886_vm15 = vmpackc.low %vm2108_vm4, %vm2103_vm3  ;;  %v703_v60 = vsub.f32 %v588_v58, %v7060_v20  ;;  %v590_v61 = vpop.f32.mrb[1].mxu1  ;;  %vm2124_vm3 = vcmp.eq.s32.totalorder %v5586_v36, %v6919_v21 }
 0x158   :  { %v675_v62 = vmul.f32 %v674_v56, %v674_v56  ;;  %4855 = vmatpush1.bf16.msk.msra.mxu1 %vm4854_vm11, %v5310_v27  ;;  %4887 = vmatpush1.bf16.msk.msra.mxu0 %vm4886_vm15, %v5310_v27  ;;  %v717_v63 = vsub.f32 %v590_v61, %v7060_v20  ;;  %vm4856_vm2 = vmpackc.low %vm2197_vm7, %vm2192_vm5  ;;  %vm2201_vm5 = vcmp.eq.s32.totalorder %v5794_v52, %v6732_v12 }
 0x159   :  { %v690_v0 = vmul.f32 %v689_v59, %v689_v59  ;;  %v704_v2 = vmul.f32 %v703_v60, %v703_v60  ;;  %4857 = vmatprep.subr.msk.bf16.mxu1 %vm4856_vm2, %v5310_v27  ;;  %vm4888_vm4 = vmpackc.low %vm2119_vm9, %vm2114_vm8  ;;  %v7131_v3 = vpop.f32.mrb[2].mxu0  ;;  %vm2206_vm8 = vcmp.eq.s32.totalorder %v5797_v53, %v6732_v12  ;;  %vm2123_vm9 = vcmp.eq.s32.totalorder %v5586_v36, %v6933_v54 }
 0x15a   :  { %v676_v4 = vrot.slane %v675_v62, 4  ;;  %v718_v5 = vmul.f32 %v717_v63, %v717_v63  ;;  %4889 = vmatprep.subr.msk.bf16.mxu0 %vm4888_vm4, %v5310_v27  ;;  %vm4858_vm7 = vmpackc.low %vm2196_vm12, %vm2191_vm10  ;;  %v7144_v6 = vpop.f32.mrb[3].mxu0  ;;  %vm2128_vm10 = vcmp.eq.s32.totalorder %v5589_v37, %v6933_v54  ;;  %vm2134_vm12 = vcmp.eq.s32.totalorder %v5612_v38, %v6919_v21 }
 0x15b   :  { %v691_v8 = vrot.slane %v690_v0, 4  ;;  %v705_v7 = vrot.slane %v704_v2, 4  ;;  %vm4890_vm11 = vmpackc.low %vm2118_vm14, %vm2113_vm13  ;;  %vm2139_vm13 = vcmp.eq.s32.totalorder %v5615_v39, %v6919_v21  ;;  %vm2133_vm14 = vcmp.eq.s32.totalorder %v5612_v38, %v6933_v54 }
 0x15c   :  { %v677_v55 = vadd.f32 %v676_v4, %v675_v62  ;;  %v719_v56 = vrot.slane %v718_v5, 4  ;;  %4859 = vmatpush1.bf16.msk.msra.mxu1 %vm4858_vm7, %v5310_v27  ;;  %4891 = vmatpush1.bf16.msk.msra.mxu0 %vm4890_vm11, %v5310_v27  ;;  %vm4860_vm15 = vmpackc.low %vm2207_vm1, %vm2202_vm0  ;;  %v7168_v57 = vpop.f32.mrb[2].mxu1  ;;  %vm2138_vm0 = vcmp.eq.s32.totalorder %v5615_v39, %v6933_v54  ;;  %vm2135_vm1 = vcmp.eq.s32.totalorder %v5612_v38, %v5432_v24 }
 0x15d   :  { %v692_v58 = vadd.f32 %v691_v8, %v690_v0  ;;  %v706_v59 = vadd.f32 %v705_v7, %v704_v2  ;;  %4861 = vmatprep.subr.msk.bf16.mxu1 %vm4860_vm15, %v5310_v27  ;;  %vm4892_vm2 = vmpackc.low %vm2129_vm6, %vm2124_vm3  ;;  %v7181_v11 = vpop.f32.mrb[3].mxu1  ;;  %vm2140_vm3 = vcmp.eq.s32.totalorder %v5615_v39, %v5432_v24  ;;  %vm2055_vm6 = vcmp.eq.s32.totalorder %v5380_v1, %v5432_v24 }
 0x15e   :  { %v678_v60 = vrot.slane %v677_v55, 2  ;;  %v720_v61 = vadd.f32 %v719_v56, %v718_v5  ;;  %4893 = vmatprep.subr.msk.bf16.mxu0 %vm4892_vm2, %v5310_v27  ;;  %vm4862_vm4 = vmpackc.low %vm2206_vm8, %vm2201_vm5  ;;  %v7197_v62 = vstv %s8441_s0  ;;  %vm2060_vm7 = vcmp.eq.s32.totalorder %v5411_v16, %v5432_v24  ;;  %s5311_s0 = smov [#allocation9]  }
 0x15f   :  { %v693_v63 = vrot.slane %v692_v58, 2  ;;  %v707_v0 = vrot.slane %v706_v59, 2  ;;  %vm4894_vm5 = vmpackc.low %vm2128_vm10, %vm2123_vm9  ;;  %vm2144_vm11 = vcmp.eq.s32.totalorder %v5638_v40, %v6919_v21  ;;  %vm2149_vm9 = vcmp.eq.s32.totalorder %v5641_v41, %v6919_v21  ;;  %s3320_s28 = sshll.u32 %s5311_s0, 4  ;;  %s3321_s28 = int_to_ptr.vmem [resolvable:$true] %s3320_s28 }
 0x160   :  { %v679_v12 = vadd.f32 %v678_v60, %v677_v55  ;;  %v721_v2 = vrot.slane %v720_v61, 2  ;;  %4863 = vmatpush1.bf16.msk.msra.mxu1 %vm4862_vm4, %v5310_v27  ;;  %4895 = vmatpush1.bf16.msk.msra.mxu0 %vm4894_vm5, %v5310_v27  ;;  %vm4896_vm8 = vmpackc.low %vm2139_vm13, %vm2134_vm12  ;;  %vm2143_vm12 = vcmp.eq.s32.totalorder %v5638_v40, %v6933_v54  ;;  %vm2148_vm15 = vcmp.eq.s32.totalorder %v5641_v41, %v6933_v54  ;;  %s5275_s29 = scalar_lea.vmem %s3321_s28, 64  ;;  %p5280_p11 = scmp.lt.s32.totalorder %s3321_s28, %s3321_s28 }
 0x161   :  { %v694_v4 = vadd.f32 %v693_v63, %v692_v58  ;;  %v708_v5 = vadd.f32 %v707_v0, %v706_v59  ;;  %4897 = vmatprep.subr.msk.bf16.mxu0 %vm4896_vm8, %v5310_v27  ;;  %vm7226_vm10 = vmpackc.low %vm2138_vm0, %vm2133_vm14  ;;  %vm2145_vm14 = vcmp.eq.s32.totalorder %v5638_v40, %v5432_v24  ;;  %vm2150_vm2 = vcmp.eq.s32.totalorder %v5641_v41, %v5432_v24  ;;  %p5276_p10 = scmp.ne.s32.totalorder %s3321_s28, %s5275_s29  ;;  %p5281_p12 = scmp.lt.s32.totalorder %s5275_s29, %s5275_s29 }
 0x162   :  { %v680_v7 = vrot.slane %v679_v12, 1  ;;  %v722_v55 = vadd.f32 %v721_v2, %v720_v61  ;;  %vm4928_vm13 = vmpackc.low %vm2140_vm3, %vm2135_vm1  ;;  %vm2065_vm1 = vcmp.eq.s32.totalorder %v5426_v22, %v5432_v24  ;;  %vm2070_vm4 = vcmp.eq.s32.totalorder %v5429_v23, %v5432_v24 }
 0x163   :  { %v695_v56 = vrot.slane %v694_v4, 1  ;;  %v709_v58 = vrot.slane %v708_v5, 1  ;;  %2436 = vmatmul.mubr.f32.vlgmr.msra.gmra.mrb[16].mxu1 %v6770_v13  ;;  %4929 = vmatprep.subr.msk.bf16.mxu1 %vm4928_vm13, %v5310_v27  ;;  %vm4930_vm0 = vmpackc.low %vm2060_vm7, %vm2055_vm6  ;;  %vm2154_vm6 = vcmp.eq.s32.totalorder %v5664_v42, %v6919_v21  ;;  %vm2159_vm5 = vcmp.eq.s32.totalorder %v5667_v43, %v6919_v21  ;;  %p5282_p13 = por %p5281_p12, %p5280_p11 }
 0x164   :  { %v681_v59 = vadd.f32 %v680_v7, %v679_v12  ;;  %v723_v60 = vrot.slane %v722_v55, 1  ;;  %4899 = vmatpush1.bf16.msk.msra.mxu0 %vm7226_vm10, %v5310_v27  ;;  %4931 = vmatpush3.bf16.msk.msra.mxu1 %vm4930_vm0, %v5310_v27  ;;  %vm4900_vm3 = vmpackc.low %vm2149_vm9, %vm2144_vm11  ;;  %vm2153_vm8 = vcmp.eq.s32.totalorder %v5664_v42, %v6933_v54  ;;  %vm2158_vm9 = vcmp.eq.s32.totalorder %v5667_v43, %v6933_v54 }
 0x165   :  { %v696_v61 = vadd.f32 %v695_v56, %v694_v4  ;;  %v710_v63 = vadd.f32 %v709_v58, %v708_v5  ;;  %4901 = vmatprep.subr.msk.bf16.mxu0 %vm4900_vm3, %v5310_v27  ;;  %vm7277_vm7 = vmpackc.low %vm2148_vm15, %vm2143_vm12  ;;  %2441 = vmatprep.mubr.f32.mxu1 %v6789_v14  ;;  %vm2155_vm10 = vcmp.eq.s32.totalorder %v5664_v42, %v5432_v24  ;;  %p5283_p0 = pnand %p5282_p13, %p5276_p10 }
 0x166   :  { %v683_v12 = vmul.f32 %v7197_v62, %v681_v59  ;;  %v724_v2 = vadd.f32 %v723_v60, %v722_v55  ;;  %vm4932_vm11 = vmpackc.low %vm2150_vm2, %vm2145_vm14  ;;  %vm2160_vm15 = vcmp.eq.s32.totalorder %v5667_v43, %v5432_v24  ;;  %vm2075_vm14 = vcmp.eq.s32.totalorder %v5439_v25, %v5432_v24 }
 0x167   :  { %v697_v4 = vmul.f32 %v696_v61, %v7197_v62  ;;  %v711_v5 = vmul.f32 %v710_v63, %v7197_v62  ;;  %4933 = vmatprep.subr.msk.bf16.mxu1 %vm4932_vm11, %v5310_v27  ;;  %vm4934_vm12 = vmpackc.low %vm2070_vm4, %vm2065_vm1  ;;  %2442 = vmatmul.mubr.f32.gmra.mrb[18].mxu1 %v6802_v17  ;;  %vm2080_vm2 = vcmp.eq.s32.totalorder %v5442_v26, %v5432_v24  ;;  %v7380_v59 = vsub.s32 4, %v5380_v1 }
 0x168   :  { %v684_v8 = vmul.f32 1.442695, %v683_v12  ;;  %v725_v7 = vmul.f32 %v724_v2, %v7197_v62  ;;  %4903 = vmatpush1.bf16.msk.msra.mxu0 %vm7277_vm7, %v5310_v27  ;;  %4935 = vmatpush3.bf16.msk.msra.mxu1 %vm4934_vm12, %v5310_v27  ;;  %vm4904_vm13 = vmpackc.low %vm2159_vm5, %vm2154_vm6  ;;  %vm2164_vm1 = vcmp.eq.s32.totalorder %v5690_v44, %v6919_v21  ;;  %vm2169_vm4 = vcmp.eq.s32.totalorder %v5693_v45, %v6919_v21 }
 0x169   :  { %v698_v55 = vmul.f32 1.442695, %v697_v4  ;;  %v712_v56 = vmul.f32 1.442695, %v711_v5  ;;  %4905 = vmatprep.subr.msk.bf16.mxu0 %vm4904_vm13, %v5310_v27  ;;  %vm4906_vm0 = vmpackc.low %vm2158_vm9, %vm2153_vm8  ;;  %2589 = vmatprep.mubr.f32.mxu1 %v7009_v15  ;;  %vm2163_vm6 = vcmp.eq.s32.totalorder %v5690_v44, %v6933_v54  ;;  %vm2168_vm5 = vcmp.eq.s32.totalorder %v5693_v45, %v6933_v54 }
 0x16a   :  { %5145 = vpow2.f32 %v684_v8  ;;  %v726_v58 = vmul.f32 1.442695, %v725_v7  ;;  %vm4936_vm3 = vmpackc.low %vm2160_vm15, %vm2155_vm10  ;;  %vm2165_vm8 = vcmp.eq.s32.totalorder %v5690_v44, %v5432_v24  ;;  %vm2170_vm11 = vcmp.eq.s32.totalorder %v5693_v45, %v5432_v24 }
 0x16b   :  { %5147 = vpow2.f32 %v698_v55  ;;  %4937 = vmatprep.subr.msk.bf16.mxu1 %vm4936_vm3, %v5310_v27  ;;  %vm4938_vm7 = vmpackc.low %vm2080_vm2, %vm2075_vm14  ;;  %vm2085_vm10 = vcmp.eq.s32.totalorder %v5482_v28, %v5432_v24  ;;  %vm2090_vm12 = vcmp.eq.s32.totalorder %v5485_v29, %v5432_v24  ;;  %vm2174_vm13 = vcmp.eq.s32.totalorder %v5716_v46, %v6919_v21 }
 0x16c   :  { %5149 = vpow2.f32 %v712_v56  ;;  %4907 = vmatpush1.bf16.msk.msra.mxu0 %vm4906_vm0, %v5310_v27  ;;  %4939 = vmatpush3.bf16.msk.msra.mxu1 %vm4938_vm7, %v5310_v27  ;;  %vm4908_vm9 = vmpackc.low %vm2169_vm4, %vm2164_vm1  ;;  %vm2179_vm14 = vcmp.eq.s32.totalorder %v5719_v47, %v6919_v21  ;;  %vm2173_vm0 = vcmp.eq.s32.totalorder %v5716_v46, %v6933_v54  ;;  %vm2178_vm1 = vcmp.eq.s32.totalorder %v5719_v47, %v6933_v54 }
 0x16d   :  { %5151 = vpow2.f32 %v726_v58  ;;  %4909 = vmatprep.subr.msk.bf16.mxu0 %vm4908_vm9, %v5310_v27  ;;  %vm4910_vm15 = vmpackc.low %vm2168_vm5, %vm2163_vm6  ;;  %vm2175_vm3 = vcmp.eq.s32.totalorder %v5716_v46, %v5432_v24  ;;  %vm2180_vm6 = vcmp.eq.s32.totalorder %v5719_v47, %v5432_v24  ;;  %vm2095_vm7 = vcmp.eq.s32.totalorder %v5508_v30, %v5432_v24 }
 0x16e   :  { %vm4940_vm2 = vmpackc.low %vm2170_vm11, %vm2165_vm8  ;;  %vm2100_vm8 = vcmp.eq.s32.totalorder %v5511_v31, %v5432_v24  ;;  %vm2184_vm9 = vcmp.eq.s32.totalorder %v5742_v48, %v6919_v21  ;;  %v7404_v60 = vrot.slane %v6693_v9, %v7380_v59  ;;  %v7409_v61 = vrot.slane %v2027_v10, %v7380_v59 }
 0x16f   :  { %4941 = vmatprep.subr.msk.bf16.mxu1 %vm4940_vm2, %v5310_v27  ;;  %vm4942_vm4 = vmpackc.low %vm2090_vm12, %vm2085_vm10  ;;  %vm2189_vm10 = vcmp.eq.s32.totalorder %v5745_v49, %v6919_v21  ;;  %vm2185_vm2 = vcmp.eq.s32.totalorder %v5742_v48, %v5432_v24 }
 0x170   :  { %4911 = vmatpush1.bf16.msk.msra.mxu0 %vm4910_vm15, %v5310_v27  ;;  %4943 = vmatpush3.bf16.msk.msra.mxu1 %vm4942_vm4, %v5310_v27  ;;  %vm4912_vm5 = vmpackc.low %vm2179_vm14, %vm2174_vm13  ;;  %vm2183_vm15 = vcmp.eq.s32.totalorder %v5742_v48, %v6933_v54  ;;  %vm2188_vm13 = vcmp.eq.s32.totalorder %v5745_v49, %v6933_v54  ;;  %vm2105_vm4 = vcmp.eq.s32.totalorder %v5534_v32, %v5432_v24 }
 0x171   :  { %4913 = vmatprep.subr.msk.bf16.mxu0 %vm4912_vm5, %v5310_v27  ;;  %vm4914_vm11 = vmpackc.low %vm2178_vm1, %vm2173_vm0  ;;  %vm2190_vm0 = vcmp.eq.s32.totalorder %v5745_v49, %v5432_v24 }
 0x172   :  { %vm4944_vm12 = vmpackc.low %vm2180_vm6, %vm2175_vm3  ;;  %vm2110_vm3 = vcmp.eq.s32.totalorder %v5537_v33, %v5432_v24  ;;  %vm2194_vm6 = vcmp.eq.s32.totalorder %v5768_v50, %v6919_v21 }
 0x173   :  { %4945 = vmatprep.subr.msk.bf16.mxu1 %vm4944_vm12, %v5310_v27  ;;  %vm4946_vm14 = vmpackc.low %vm2100_vm8, %vm2095_vm7  ;;  %vm2199_vm7 = vcmp.eq.s32.totalorder %v5771_v51, %v6919_v21  ;;  %vm2193_vm8 = vcmp.eq.s32.totalorder %v5768_v50, %v6933_v54  ;;  %vm2200_vm12 = vcmp.eq.s32.totalorder %v5771_v51, %v5432_v24 }
 0x174   :  { %v5146_v63 = vpop.eup %5145  ;;  %4915 = vmatpush1.bf16.msk.msra.mxu0 %vm4914_vm11, %v5310_v27  ;;  %4947 = vmatpush3.bf16.msk.msra.mxu1 %vm4946_vm14, %v5310_v27  ;;  %vm4916_vm1 = vmpackc.low %vm2189_vm10, %vm2184_vm9  ;;  %vm2198_vm11 = vcmp.eq.s32.totalorder %v5771_v51, %v6933_v54  ;;  %vm2195_vm10 = vcmp.eq.s32.totalorder %v5768_v50, %v5432_v24  ;;  %vm2120_vm14 = vcmp.eq.s32.totalorder %v5563_v35, %v5432_v24 }
 0x175   :  { %v5148_v10 = vpop.eup %5147  ;;  %v686_v0 = vmul.f32 %v5146_v63, %v7131_v3  ;;  %v4162_v12 = vpop.f32.mrb[4].mxu0  ;;  %4917 = vmatprep.subr.msk.bf16.mxu0 %vm4916_vm1, %v5310_v27  ;;  %vm7432_vm5 = vmpackc.low %vm2188_vm13, %vm2183_vm15  ;;  %vm2115_vm13 = vcmp.eq.s32.totalorder %v5560_v34, %v5432_v24  ;;  %vm2204_vm1 = vcmp.eq.s32.totalorder %v5794_v52, %v6919_v21 }
 0x176   :  { %v5150_v3 = vpop.eup %5149  ;;  %v702_v4 = vadd.f32 %v5148_v10, %v5146_v63  ;;  %v700_v5 = vmul.f32 %v5148_v10, %v7144_v6  ;;  %v4163_v8 = vpop.f32.mrb[5].mxu0  ;;  %vm4948_vm9 = vmpackc.low %vm2190_vm0, %vm2185_vm2  ;;  %v7479_v63 = vrot.slane %v2029_v18, %v7380_v59 }
 0x177   :  { %v5152_v7 = vpop.eup %5151  ;;  %v4164_v55 = vadd.f32 %v4163_v8, %v4162_v12  ;;  %v714_v56 = vmul.f32 %v5150_v3, %v7168_v57  ;;  %4949 = vmatprep.subr.msk.bf16.mxu1 %vm4948_vm9, %v5310_v27  ;;  %vm4950_vm15 = vmpackc.low %vm2110_vm3, %vm2105_vm4  ;;  %vm2209_vm4 = vcmp.eq.s32.totalorder %v5797_v53, %v6919_v21  ;;  %v7552_v21 = vrot.slane %v2028_v19, %v7380_v59 }
 0x178   :  { %v716_v6 = vadd.f32 %v5150_v3, %v702_v4  ;;  %v701_v58 = vadd.f32 %v700_v5, %v686_v0  ;;  %4919 = vmatpush1.bf16.msk.msra.mxu0 %vm7432_vm5, %v5310_v27  ;;  %4951 = vmatpush3.bf16.msk.msra.mxu1 %vm4950_vm15, %v5310_v27  ;;  %v728_v57 = vmul.f32 %v5152_v7, %v7181_v11  ;;  %vm4920_vm2 = vmpackc.low %vm2199_vm7, %vm2194_vm6 }
 0x179   :  { %v731_v10 = vsub.f32 %v4164_v55, %v7060_v20  ;;  %4921 = vmatprep.subr.msk.bf16.mxu0 %vm4920_vm2, %v5310_v27  ;;  %vm7489_vm0 = vmpackc.low %vm2198_vm11, %vm2193_vm8  ;;  %v4165_v18 = vpop.f32.mrb[6].mxu0  ;;  %vm2203_vm6 = vcmp.eq.s32.totalorder %v5794_v52, %v6933_v54  ;;  %vm2208_vm5 = vcmp.eq.s32.totalorder %v5797_v53, %v6933_v54  ;;  %vm2205_vm8 = vcmp.eq.s32.totalorder %v5794_v52, %v5432_v24 }
 0x17a   :  { %v7497_v0 = vadd.f32 %v5152_v7, %v716_v6  ;;  %v715_v12 = vadd.f32 %v714_v56, %v701_v58  ;;  %vm4952_vm3 = vmpackc.low %vm2200_vm12, %vm2195_vm10  ;;  %v4166_v2 = vpop.f32.mrb[7].mxu0  ;;  %vm2210_vm11 = vcmp.eq.s32.totalorder %v5797_v53, %v5432_v24  ;;  %vm2125_vm10 = vcmp.eq.s32.totalorder %v5586_v36, %v5432_v24 }
 0x17b   :  { %v732_v3 = vmul.f32 %v731_v10, %v731_v10  ;;  %4953 = vmatprep.subr.msk.bf16.mxu1 %vm4952_vm3, %v5310_v27  ;;  %vm4954_vm7 = vmpackc.low %vm2120_vm14, %vm2115_vm13  ;;  %v7520_v4 = vadd.f32 %v4166_v2, %v4165_v18  ;;  %vm2130_vm12 = vcmp.eq.s32.totalorder %v5589_v37, %v5432_v24  ;;  %vm2692_vm13 = vcmp.eq.s32.totalorder %v5380_v1, %v7409_v61 }
 0x17c   :  { %v7522_v5 = vadd.f32 %v728_v57, %v715_v12  ;;  %4923 = vmatpush1.bf16.msk.msra.mxu0 %vm7489_vm0, %v5310_v27  ;;  %4955 = vmatpush3.bf16.msk.msra.mxu1 %vm4954_vm7, %v5310_v27  ;;  %vm4924_vm9 = vmpackc.low %vm2209_vm4, %vm2204_vm1  ;;  %vm2697_vm14 = vcmp.eq.s32.totalorder %v5411_v16, %v7409_v61  ;;  %vm2691_vm0 = vcmp.eq.s32.totalorder %v5380_v1, %v7404_v60 }
 0x17d   :  { %v733_v8 = vrot.slane %v732_v3, 4  ;;  %4925 = vmatprep.subr.msk.bf16.mxu0 %vm4924_vm9, %v5310_v27  ;;  %vm4926_vm15 = vmpackc.low %vm2208_vm5, %vm2203_vm6  ;;  %vm2696_vm1 = vcmp.eq.s32.totalorder %v5411_v16, %v7404_v60  ;;  %vm2702_vm3 = vcmp.eq.s32.totalorder %v5426_v22, %v7409_v61  ;;  %vm2707_vm6 = vcmp.eq.s32.totalorder %v5429_v23, %v7409_v61 }
 0x17e   :  { %vm4956_vm2 = vmpackc.low %vm2210_vm11, %vm2205_vm8  ;;  %vm2694_vm7 = vcmp.eq.s32.totalorder %v5380_v1, %v7479_v63  ;;  %vm2699_vm8 = vcmp.eq.s32.totalorder %v5411_v16, %v7479_v63  ;;  %vm2701_vm9 = vcmp.eq.s32.totalorder %v5426_v22, %v7404_v60 }
 0x17f   :  { %v734_v54 = vadd.f32 %v733_v8, %v732_v3  ;;  %4957 = vmatprep.subr.msk.bf16.mxu1 %vm4956_vm2, %v5310_v27  ;;  %vm4958_vm4 = vmpackc.low %vm2130_vm12, %vm2125_vm10  ;;  %vm2706_vm10 = vcmp.eq.s32.totalorder %v5429_v23, %v7404_v60  ;;  %vm2712_vm2 = vcmp.eq.s32.totalorder %v5439_v25, %v7409_v61 }
 0x180   :  { %4927 = vmatpush1.bf16.msk.msra.mxu0 %vm4926_vm15, %v5310_v27  ;;  %4959 = vmatpush3.bf16.msk.msra.mxu1 %vm4958_vm4, %v5310_v27  ;;  %vm4960_vm5 = vmpackc.low %vm2697_vm14, %vm2692_vm13  ;;  %vm2693_vm15 = vcmp.eq.s32.totalorder %v5380_v1, %v7552_v21  ;;  %vm2698_vm13 = vcmp.eq.s32.totalorder %v5411_v16, %v7552_v21  ;;  %vm2704_vm4 = vcmp.eq.s32.totalorder %v5426_v22, %v7479_v63 }
 0x181   :  { %v735_v24 = vrot.slane %v734_v54, 2  ;;  %4961 = vmatprep.subr.msk.bf16.mxu0 %vm4960_vm5, %v5310_v27  ;;  %vm4962_vm11 = vmpackc.low %vm2696_vm1, %vm2691_vm0  ;;  %vm2717_vm0 = vcmp.eq.s32.totalorder %v5442_v26, %v7409_v61  ;;  %vm2711_vm5 = vcmp.eq.s32.totalorder %v5439_v25, %v7404_v60 }
 0x182   :  { %vm4964_vm12 = vmpackc.low %vm2707_vm6, %vm2702_vm3  ;;  %vm2709_vm3 = vcmp.eq.s32.totalorder %v5429_v23, %v7479_v63 }
 0x183   :  { %v736_v9 = vadd.f32 %v735_v24, %v734_v54  ;;  %2513 = vmatmul.mubr.f32.vlgmr.msra.gmra.mrb[20].mxu0 %v6770_v13  ;;  %2590 = vmatmul.mubr.f32.vlgmr.msra.gmra.mrb[20].mxu1 %v6770_v13  ;;  %vm5024_vm14 = vmpackc.low %vm2699_vm8, %vm2694_vm7  ;;  %vm2716_vm7 = vcmp.eq.s32.totalorder %v5442_v26, %v7404_v60 }
 0x184   :  { %4963 = vmatpush1.bf16.msk.msra.mxu0 %vm4962_vm11, %v5310_v27  ;;  %5025 = vmatprep.subr.msk.bf16.mxu1 %vm5024_vm14, %v5310_v27  ;;  %vm7589_vm1 = vmpackc.low %vm2706_vm10, %vm2701_vm9  ;;  %vm2703_vm11 = vcmp.eq.s32.totalorder %v5426_v22, %v7552_v21  ;;  %vm2708_vm9 = vcmp.eq.s32.totalorder %v5429_v23, %v7552_v21  ;;  %vm2714_vm14 = vcmp.eq.s32.totalorder %v5439_v25, %v7479_v63 }
 0x185   :  { %v737_v13 = vrot.slane %v736_v9, 1  ;;  %4965 = vmatprep.subr.msk.bf16.mxu0 %vm4964_vm12, %v5310_v27  ;;  %vm5026_vm6 = vmpackc.low %vm2698_vm13, %vm2693_vm15  ;;  %2518 = vmatprep.mubr.f32.mxu0 %v6789_v14  ;;  %vm2722_vm12 = vcmp.eq.s32.totalorder %v5482_v28, %v7409_v61  ;;  %vm2727_vm15 = vcmp.eq.s32.totalorder %v5485_v29, %v7409_v61 }
 0x186   :  { %5027 = vmatpush1.bf16.msk.msra.mxu1 %vm5026_vm6, %v5310_v27  ;;  %vm7607_vm8 = vmpackc.low %vm2717_vm0, %vm2712_vm2  ;;  %2594 = vmatprep.mubr.f32.mxu1 %v6789_v14  ;;  %vm2719_vm2 = vcmp.eq.s32.totalorder %v5442_v26, %v7479_v63  ;;  %vm2713_vm6 = vcmp.eq.s32.totalorder %v5439_v25, %v7552_v21 }
 0x187   :  { %v738_v55 = vadd.f32 %v737_v13, %v736_v9  ;;  %vm5028_vm10 = vmpackc.low %vm2709_vm3, %vm2704_vm4  ;;  %2519 = vmatmul.mubr.f32.gmra.mrb[22].mxu0 %v6802_v17  ;;  %2595 = vmatmul.mubr.f32.gmra.mrb[22].mxu1 %v6802_v17  ;;  %vm2726_vm4 = vcmp.eq.s32.totalorder %v5485_v29, %v7404_v60 }
 0x188   :  { %4967 = vmatpush1.bf16.msk.msra.mxu0 %vm7589_vm1, %v5310_v27  ;;  %5029 = vmatprep.subr.msk.bf16.mxu1 %vm5028_vm10, %v5310_v27  ;;  %vm7632_vm13 = vmpackc.low %vm2716_vm7, %vm2711_vm5  ;;  %vm2721_vm1 = vcmp.eq.s32.totalorder %v5482_v28, %v7404_v60  ;;  %vm2718_vm5 = vcmp.eq.s32.totalorder %v5442_v26, %v7552_v21  ;;  %vm2724_vm10 = vcmp.eq.s32.totalorder %v5482_v28, %v7479_v63 }
 0x189   :  { %v739_v17 = vmul.f32 %v738_v55, %v7197_v62  ;;  %4969 = vmatprep.subr.msk.bf16.mxu0 %vm7607_vm8, %v5310_v27  ;;  %vm5030_vm0 = vmpackc.low %vm2708_vm9, %vm2703_vm11  ;;  %3075 = vmatprep.mubr.f32.mxu0 %v7009_v15  ;;  %vm2732_vm8 = vcmp.eq.s32.totalorder %v5508_v30, %v7409_v61  ;;  %vm2737_vm11 = vcmp.eq.s32.totalorder %v5511_v31, %v7409_v61 }
 0x18a   :  { %5031 = vmatpush1.bf16.msk.msra.mxu1 %vm5030_vm0, %v5310_v27  ;;  %vm4972_vm3 = vmpackc.low %vm2727_vm15, %vm2722_vm12  ;;  %3152 = vmatprep.mubr.f32.mxu1 %v7009_v15  ;;  %vm2729_vm12 = vcmp.eq.s32.totalorder %v5485_v29, %v7479_v63  ;;  %vm2723_vm0 = vcmp.eq.s32.totalorder %v5482_v28, %v7552_v21 }
 0x18b   :  { %v740_v56 = vmul.f32 1.442695, %v739_v17  ;;  %vm5032_vm7 = vmpackc.low %vm2719_vm2, %vm2714_vm14  ;;  %vm2731_vm14 = vcmp.eq.s32.totalorder %v5508_v30, %v7404_v60  ;;  %vm2736_vm2 = vcmp.eq.s32.totalorder %v5511_v31, %v7404_v60 }
 0x18c   :  { %4971 = vmatpush1.bf16.msk.msra.mxu0 %vm7632_vm13, %v5310_v27  ;;  %5033 = vmatprep.subr.msk.bf16.mxu1 %vm5032_vm7, %v5310_v27  ;;  %vm4974_vm9 = vmpackc.low %vm2726_vm4, %vm2721_vm1  ;;  %vm2728_vm1 = vcmp.eq.s32.totalorder %v5485_v29, %v7552_v21  ;;  %vm2734_vm7 = vcmp.eq.s32.totalorder %v5508_v30, %v7479_v63 }
 0x18d   :  { %5153 = vpow2.f32 %v740_v56  ;;  %4973 = vmatprep.subr.msk.bf16.mxu0 %vm4972_vm3, %v5310_v27  ;;  %vm5034_vm15 = vmpackc.low %vm2718_vm5, %vm2713_vm6  ;;  %vm2742_vm3 = vcmp.eq.s32.totalorder %v5534_v32, %v7409_v61  ;;  %vm2747_vm6 = vcmp.eq.s32.totalorder %v5537_v33, %v7409_v61 }
 0x18e   :  { %5035 = vmatpush1.bf16.msk.msra.mxu1 %vm5034_vm15, %v5310_v27  ;;  %vm4976_vm13 = vmpackc.low %vm2737_vm11, %vm2732_vm8  ;;  %vm2739_vm8 = vcmp.eq.s32.totalorder %v5511_v31, %v7479_v63  ;;  %vm2733_vm15 = vcmp.eq.s32.totalorder %v5508_v30, %v7552_v21 }
 0x18f   :  { %vm5036_vm4 = vmpackc.low %vm2729_vm12, %vm2724_vm10  ;;  %vm2741_vm10 = vcmp.eq.s32.totalorder %v5534_v32, %v7404_v60  ;;  %vm2746_vm12 = vcmp.eq.s32.totalorder %v5537_v33, %v7404_v60 }
 0x190   :  { %4975 = vmatpush1.bf16.msk.msra.mxu0 %vm4974_vm9, %v5310_v27  ;;  %5037 = vmatprep.subr.msk.bf16.mxu1 %vm5036_vm4, %v5310_v27  ;;  %vm4978_vm5 = vmpackc.low %vm2736_vm2, %vm2731_vm14  ;;  %vm2738_vm14 = vcmp.eq.s32.totalorder %v5511_v31, %v7552_v21  ;;  %vm2744_vm4 = vcmp.eq.s32.totalorder %v5534_v32, %v7479_v63 }
 0x191   :  { %4977 = vmatprep.subr.msk.bf16.mxu0 %vm4976_vm13, %v5310_v27  ;;  %vm5038_vm11 = vmpackc.low %vm2728_vm1, %vm2723_vm0  ;;  %vm2752_vm13 = vcmp.eq.s32.totalorder %v5560_v34, %v7409_v61  ;;  %vm2757_vm0 = vcmp.eq.s32.totalorder %v5563_v35, %v7409_v61 }
 0x192   :  { %5039 = vmatpush1.bf16.msk.msra.mxu1 %vm5038_vm11, %v5310_v27  ;;  %vm4980_vm9 = vmpackc.low %vm2747_vm6, %vm2742_vm3  ;;  %vm2749_vm3 = vcmp.eq.s32.totalorder %v5537_v33, %v7479_v63  ;;  %vm2743_vm11 = vcmp.eq.s32.totalorder %v5534_v32, %v7552_v21 }
 0x193   :  { %vm5040_vm2 = vmpackc.low %vm2739_vm8, %vm2734_vm7  ;;  %vm2751_vm7 = vcmp.eq.s32.totalorder %v5560_v34, %v7404_v60 }
 0x194   :  { %4979 = vmatpush1.bf16.msk.msra.mxu0 %vm4978_vm5, %v5310_v27  ;;  %5041 = vmatprep.subr.msk.bf16.mxu1 %vm5040_vm2, %v5310_v27  ;;  %vm7715_vm1 = vmpackc.low %vm2746_vm12, %vm2741_vm10  ;;  %vm2756_vm5 = vcmp.eq.s32.totalorder %v5563_v35, %v7404_v60  ;;  %vm2748_vm10 = vcmp.eq.s32.totalorder %v5537_v33, %v7552_v21  ;;  %vm2762_vm12 = vcmp.eq.s32.totalorder %v5586_v36, %v7409_v61 }
 0x195   :  { %4981 = vmatprep.subr.msk.bf16.mxu0 %vm4980_vm9, %v5310_v27  ;;  %vm5042_vm6 = vmpackc.low %vm2738_vm14, %vm2733_vm15  ;;  %vm2767_vm15 = vcmp.eq.s32.totalorder %v5589_v37, %v7409_v61  ;;  %vm2754_vm14 = vcmp.eq.s32.totalorder %v5560_v34, %v7479_v63  ;;  %vm2759_vm2 = vcmp.eq.s32.totalorder %v5563_v35, %v7479_v63 }
 0x196   :  { %v1153_v6 = vpop.f32.mrb[4].mxu1  ;;  %5043 = vmatpush1.bf16.msk.msra.mxu1 %vm5042_vm6, %v5310_v27  ;;  %vm7729_vm8 = vmpackc.low %vm2757_vm0, %vm2752_vm13  ;;  %vm2753_vm6 = vcmp.eq.s32.totalorder %v5560_v34, %v7552_v21 }
 0x197   :  { %v5154_v57 = vpop.eup %5153  ;;  %v1316_v10 = vsub.f32 %v1153_v6, %v7060_v20  ;;  %v1155_v11 = vpop.f32.mrb[5].mxu1  ;;  %vm5044_vm9 = vmpackc.low %vm2749_vm3, %vm2744_vm4  ;;  %vm2766_vm4 = vcmp.eq.s32.totalorder %v5589_v37, %v7404_v60 }
 0x198   :  { %v742_v18 = vmul.f32 %v5154_v57, %v7520_v4  ;;  %v7751_v12 = vadd.f32 %v5154_v57, %v7497_v0  ;;  %v1330_v2 = vsub.f32 %v1155_v11, %v7060_v20  ;;  %4983 = vmatpush1.bf16.msk.msra.mxu0 %vm7715_vm1, %v5310_v27  ;;  %5045 = vmatprep.subr.msk.bf16.mxu1 %vm5044_vm9, %v5310_v27  ;;  %vm7764_vm13 = vmpackc.low %vm2756_vm5, %vm2751_vm7  ;;  %v66_v4 = vld [vmem:[#allocation3 + $0x18] sm:$0x1] }
 0x199   :  { %v1317_v0 = vmul.f32 %v1316_v10, %v1316_v10  ;;  %4985 = vmatprep.subr.msk.bf16.mxu0 %vm7729_vm8, %v5310_v27  ;;  %vm5046_vm0 = vmpackc.low %vm2748_vm10, %vm2743_vm11  ;;  %vm2761_vm1 = vcmp.eq.s32.totalorder %v5586_v36, %v7404_v60  ;;  %vm2758_vm7 = vcmp.eq.s32.totalorder %v5563_v35, %v7552_v21  ;;  %vm2772_vm8 = vcmp.eq.s32.totalorder %v5612_v38, %v7409_v61 }
 0x19a   :  { %v1331_v20 = vmul.f32 %v1330_v2, %v1330_v2  ;;  %5047 = vmatpush1.bf16.msk.msra.mxu1 %vm5046_vm0, %v5310_v27  ;;  %vm7788_vm3 = vmpackc.low %vm2767_vm15, %vm2762_vm12  ;;  %v7797_v8 = vadd.f32 %v742_v18, %v7522_v5  ;;  %v7799_v54 = vpop.f32.mrb[6].mxu1  ;;  %vm2777_vm11 = vcmp.eq.s32.totalorder %v5615_v39, %v7409_v61  ;;  %vm2764_vm12 = vcmp.eq.s32.totalorder %v5586_v36, %v7479_v63 }
 0x19b   :  { %v1318_v24 = vrot.slane %v1317_v0, 4  ;;  %vm5048_vm5 = vmpackc.low %vm2759_vm2, %vm2754_vm14  ;;  %v7811_v9 = vpop.f32.mrb[7].mxu1  ;;  %vm2769_vm9 = vcmp.eq.s32.totalorder %v5589_v37, %v7479_v63  ;;  %vm2771_vm14 = vcmp.eq.s32.totalorder %v5612_v38, %v7404_v60  ;;  %vm2776_vm2 = vcmp.eq.s32.totalorder %v5615_v39, %v7404_v60 }
 0x19c   :  { %v1332_v5 = vrot.slane %v1331_v20, 4  ;;  %4987 = vmatpush1.bf16.msk.msra.mxu0 %vm7764_vm13, %v5310_v27  ;;  %5049 = vmatprep.subr.msk.bf16.mxu1 %vm5048_vm5, %v5310_v27  ;;  %vm7823_vm10 = vmpackc.low %vm2766_vm4, %vm2761_vm1  ;;  %vm2763_vm0 = vcmp.eq.s32.totalorder %v5586_v36, %v7552_v21  ;;  %vm2768_vm1 = vcmp.eq.s32.totalorder %v5589_v37, %v7552_v21  ;;  %vm2774_vm5 = vcmp.eq.s32.totalorder %v5612_v38, %v7479_v63 }
 0x19d   :  { %v1319_v13 = vadd.f32 %v1318_v24, %v1317_v0  ;;  %4989 = vmatprep.subr.msk.bf16.mxu0 %vm7788_vm3, %v5310_v27  ;;  %vm5050_vm15 = vmpackc.low %vm2758_vm7, %vm2753_vm6  ;;  %vm2782_vm3 = vcmp.eq.s32.totalorder %v5638_v40, %v7409_v61  ;;  %vm2787_vm6 = vcmp.eq.s32.totalorder %v5641_v41, %v7409_v61  ;;  %v2670_v24 = vrot.slane %v66_v4, 4 }
 0x19e   :  { %v1333_v7 = vadd.f32 %v1332_v5, %v1331_v20  ;;  %5051 = vmatpush1.bf16.msk.msra.mxu1 %vm5050_vm15, %v5310_v27  ;;  %vm4992_vm13 = vmpackc.low %vm2777_vm11, %vm2772_vm8  ;;  %vm2779_vm8 = vcmp.eq.s32.totalorder %v5615_v39, %v7479_v63  ;;  %vm2773_vm15 = vcmp.eq.s32.totalorder %v5612_v38, %v7552_v21 }
 0x19f   :  { %v1320_v55 = vrot.slane %v1319_v13, 2  ;;  %vm5052_vm4 = vmpackc.low %vm2769_vm9, %vm2764_vm12  ;;  %vm2781_vm12 = vcmp.eq.s32.totalorder %v5638_v40, %v7404_v60  ;;  %v7990_v5 = vrot.slane %v2670_v24, %v7380_v59 }
 0x1a0   :  { %v1334_v14 = vrot.slane %v1333_v7, 2  ;;  %4991 = vmatpush1.bf16.msk.msra.mxu0 %vm7823_vm10, %v5310_v27  ;;  %5053 = vmatprep.subr.msk.bf16.mxu1 %vm5052_vm4, %v5310_v27  ;;  %vm7863_vm7 = vmpackc.low %vm2776_vm2, %vm2771_vm14  ;;  %vm2786_vm10 = vcmp.eq.s32.totalorder %v5641_v41, %v7404_v60  ;;  %vm2778_vm14 = vcmp.eq.s32.totalorder %v5615_v39, %v7552_v21  ;;  %vm2784_vm4 = vcmp.eq.s32.totalorder %v5638_v40, %v7479_v63 }
 0x1a1   :  { %v1321_v56 = vadd.f32 %v1320_v55, %v1319_v13  ;;  %4993 = vmatprep.subr.msk.bf16.mxu0 %vm4992_vm13, %v5310_v27  ;;  %vm5054_vm11 = vmpackc.low %vm2768_vm1, %vm2763_vm0  ;;  %vm2792_vm13 = vcmp.eq.s32.totalorder %v5664_v42, %v7409_v61  ;;  %vm2797_vm0 = vcmp.eq.s32.totalorder %v5667_v43, %v7409_v61 }
 0x1a2   :  { %v1335_v15 = vadd.f32 %v1334_v14, %v1333_v7  ;;  %5055 = vmatpush1.bf16.msk.msra.mxu1 %vm5054_vm11, %v5310_v27  ;;  %vm4996_vm9 = vmpackc.low %vm2787_vm6, %vm2782_vm3  ;;  %vm2789_vm3 = vcmp.eq.s32.totalorder %v5641_v41, %v7479_v63  ;;  %vm2783_vm11 = vcmp.eq.s32.totalorder %v5638_v40, %v7552_v21 }
 0x1a3   :  { %v1322_v6 = vrot.slane %v1321_v56, 1  ;;  %vm5056_vm2 = vmpackc.low %vm2779_vm8, %vm2774_vm5  ;;  %vm2791_vm5 = vcmp.eq.s32.totalorder %v5664_v42, %v7404_v60 }
 0x1a4   :  { %v1336_v58 = vrot.slane %v1335_v15, 1  ;;  %4995 = vmatpush1.bf16.msk.msra.mxu0 %vm7863_vm7, %v5310_v27  ;;  %5057 = vmatprep.subr.msk.bf16.mxu1 %vm5056_vm2, %v5310_v27  ;;  %vm7892_vm1 = vmpackc.low %vm2786_vm10, %vm2781_vm12  ;;  %vm2796_vm7 = vcmp.eq.s32.totalorder %v5667_v43, %v7404_v60  ;;  %vm2788_vm12 = vcmp.eq.s32.totalorder %v5641_v41, %v7552_v21  ;;  %vm2794_vm2 = vcmp.eq.s32.totalorder %v5664_v42, %v7479_v63 }
 0x1a5   :  { %v1323_v10 = vadd.f32 %v1322_v6, %v1321_v56  ;;  %4997 = vmatprep.subr.msk.bf16.mxu0 %vm4996_vm9, %v5310_v27  ;;  %vm5058_vm6 = vmpackc.low %vm2778_vm14, %vm2773_vm15  ;;  %vm2802_vm9 = vcmp.eq.s32.totalorder %v5690_v44, %v7409_v61  ;;  %vm2807_vm15 = vcmp.eq.s32.totalorder %v5693_v45, %v7409_v61 }
 0x1a6   :  { %v1337_v11 = vadd.f32 %v1336_v58, %v1335_v15  ;;  %5059 = vmatpush1.bf16.msk.msra.mxu1 %vm5058_vm6, %v5310_v27  ;;  %vm5000_vm8 = vmpackc.low %vm2797_vm0, %vm2792_vm13  ;;  %vm2799_vm13 = vcmp.eq.s32.totalorder %v5667_v43, %v7479_v63  ;;  %vm2793_vm6 = vcmp.eq.s32.totalorder %v5664_v42, %v7552_v21 }
 0x1a7   :  { %v1324_v18 = vmul.f32 %v1323_v10, %v7197_v62  ;;  %vm5060_vm10 = vmpackc.low %vm2789_vm3, %vm2784_vm4  ;;  %vm2801_vm4 = vcmp.eq.s32.totalorder %v5690_v44, %v7404_v60 }
 0x1a8   :  { %v1338_v2 = vmul.f32 %v1337_v11, %v7197_v62  ;;  %4999 = vmatpush1.bf16.msk.msra.mxu0 %vm7892_vm1, %v5310_v27  ;;  %5061 = vmatprep.subr.msk.bf16.mxu1 %vm5060_vm10, %v5310_v27  ;;  %vm7923_vm14 = vmpackc.low %vm2796_vm7, %vm2791_vm5  ;;  %vm2806_vm1 = vcmp.eq.s32.totalorder %v5693_v45, %v7404_v60  ;;  %vm2798_vm5 = vcmp.eq.s32.totalorder %v5667_v43, %v7552_v21 }
 0x1a9   :  { %v1325_v0 = vmul.f32 1.442695, %v1324_v18  ;;  %5001 = vmatprep.subr.msk.bf16.mxu0 %vm5000_vm8, %v5310_v27  ;;  %vm5062_vm0 = vmpackc.low %vm2788_vm12, %vm2783_vm11  ;;  %vm2812_vm8 = vcmp.eq.s32.totalorder %v5716_v46, %v7409_v61  ;;  %vm2817_vm11 = vcmp.eq.s32.totalorder %v5719_v47, %v7409_v61  ;;  %vm2804_vm10 = vcmp.eq.s32.totalorder %v5690_v44, %v7479_v63 }
 0x1aa   :  { %v1339_v20 = vmul.f32 1.442695, %v1338_v2  ;;  %5063 = vmatpush1.bf16.msk.msra.mxu1 %vm5062_vm0, %v5310_v27  ;;  %vm5004_vm3 = vmpackc.low %vm2807_vm15, %vm2802_vm9  ;;  %vm2809_vm9 = vcmp.eq.s32.totalorder %v5693_v45, %v7479_v63  ;;  %vm2803_vm0 = vcmp.eq.s32.totalorder %v5690_v44, %v7552_v21 }
 0x1ab   :  { %5155 = vpow2.f32 %v1325_v0  ;;  %vm5064_vm7 = vmpackc.low %vm2799_vm13, %vm2794_vm2  ;;  %vm2811_vm2 = vcmp.eq.s32.totalorder %v5716_v46, %v7404_v60 }
 0x1ac   :  { %5157 = vpow2.f32 %v1339_v20  ;;  %5003 = vmatpush1.bf16.msk.msra.mxu0 %vm7923_vm14, %v5310_v27  ;;  %5065 = vmatprep.subr.msk.bf16.mxu1 %vm5064_vm7, %v5310_v27  ;;  %vm5006_vm12 = vmpackc.low %vm2806_vm1, %vm2801_vm4  ;;  %vm2816_vm14 = vcmp.eq.s32.totalorder %v5719_v47, %v7404_v60  ;;  %vm2808_vm4 = vcmp.eq.s32.totalorder %v5693_v45, %v7552_v21  ;;  %vm2814_vm7 = vcmp.eq.s32.totalorder %v5716_v46, %v7479_v63  ;;  %v5208_v20 = vld [vmem:[#allocation8 + $0x8] sm:$0xff] }
 0x1ad   :  { %5005 = vmatprep.subr.msk.bf16.mxu0 %vm5004_vm3, %v5310_v27  ;;  %vm5066_vm15 = vmpackc.low %vm2798_vm5, %vm2793_vm6  ;;  %vm2822_vm3 = vcmp.eq.s32.totalorder %v5742_v48, %v7409_v61  ;;  %vm2827_vm6 = vcmp.eq.s32.totalorder %v5745_v49, %v7409_v61 }
 0x1ae   :  { %5067 = vmatpush1.bf16.msk.msra.mxu1 %vm5066_vm15, %v5310_v27  ;;  %vm5008_vm13 = vmpackc.low %vm2817_vm11, %vm2812_vm8  ;;  %vm2819_vm8 = vcmp.eq.s32.totalorder %v5719_v47, %v7479_v63  ;;  %vm2813_vm15 = vcmp.eq.s32.totalorder %v5716_v46, %v7552_v21 }
 0x1af   :  { %vm5068_vm1 = vmpackc.low %vm2809_vm9, %vm2804_vm10  ;;  %vm2821_vm10 = vcmp.eq.s32.totalorder %v5742_v48, %v7404_v60  ;;  %vm2826_vm9 = vcmp.eq.s32.totalorder %v5745_v49, %v7404_v60 }
 0x1b0   :  { %5007 = vmatpush1.bf16.msk.msra.mxu0 %vm5006_vm12, %v5310_v27  ;;  %5069 = vmatprep.subr.msk.bf16.mxu1 %vm5068_vm1, %v5310_v27  ;;  %vm5010_vm5 = vmpackc.low %vm2816_vm14, %vm2811_vm2  ;;  %vm2818_vm2 = vcmp.eq.s32.totalorder %v5719_v47, %v7552_v21  ;;  %vm2824_vm1 = vcmp.eq.s32.totalorder %v5742_v48, %v7479_v63 }
 0x1b1   :  { %5009 = vmatprep.subr.msk.bf16.mxu0 %vm5008_vm13, %v5310_v27  ;;  %vm5070_vm11 = vmpackc.low %vm2808_vm4, %vm2803_vm0  ;;  %vm2832_vm13 = vcmp.eq.s32.totalorder %v5768_v50, %v7409_v61  ;;  %vm2837_vm0 = vcmp.eq.s32.totalorder %v5771_v51, %v7409_v61 }
 0x1b2   :  { %5071 = vmatpush1.bf16.msk.msra.mxu1 %vm5070_vm11, %v5310_v27  ;;  %vm5012_vm12 = vmpackc.low %vm2827_vm6, %vm2822_vm3  ;;  %vm2829_vm3 = vcmp.eq.s32.totalorder %v5745_v49, %v7479_v63  ;;  %vm2831_vm6 = vcmp.eq.s32.totalorder %v5768_v50, %v7404_v60  ;;  %vm2828_vm11 = vcmp.eq.s32.totalorder %v5745_v49, %v7552_v21 }
 0x1b3   :  { %vm5072_vm14 = vmpackc.low %vm2819_vm8, %vm2814_vm7  ;;  %vm2823_vm8 = vcmp.eq.s32.totalorder %v5742_v48, %v7552_v21 }
 0x1b4   :  { %5011 = vmatpush1.bf16.msk.msra.mxu0 %vm5010_vm5, %v5310_v27  ;;  %5073 = vmatprep.subr.msk.bf16.mxu1 %vm5072_vm14, %v5310_v27  ;;  %vm7998_vm4 = vmpackc.low %vm2826_vm9, %vm2821_vm10  ;;  %vm2836_vm5 = vcmp.eq.s32.totalorder %v5771_v51, %v7404_v60  ;;  %vm2842_vm10 = vcmp.eq.s32.totalorder %v5794_v52, %v7409_v61  ;;  %vm2839_vm14 = vcmp.eq.s32.totalorder %v5771_v51, %v7479_v63 }
 0x1b5   :  { %v5156_v59 = vpop.eup %5155  ;;  %5013 = vmatprep.subr.msk.bf16.mxu0 %vm5012_vm12, %v5310_v27  ;;  %vm5074_vm7 = vmpackc.low %vm2818_vm2, %vm2813_vm15  ;;  %vm2847_vm12 = vcmp.eq.s32.totalorder %v5797_v53, %v7409_v61  ;;  %vm2834_vm15 = vcmp.eq.s32.totalorder %v5768_v50, %v7479_v63 }
 0x1b6   :  { %v5158_v13 = vpop.eup %5157  ;;  %v1329_v7 = vadd.f32 %v5156_v59, %v7751_v12  ;;  %v1327_v55 = vmul.f32 %v5156_v59, %v7799_v54  ;;  %v1230_v14 = vpop.f32.mrb[8].mxu0  ;;  %5075 = vmatpush1.bf16.msk.msra.mxu1 %vm5074_vm7, %v5310_v27  ;;  %vm8026_vm9 = vmpackc.low %vm2837_vm0, %vm2832_vm13  ;;  %v8035_v54 = vld [vmem:[#allocation6] sm:$0xff]  ;;  %vm2841_vm13 = vcmp.eq.s32.totalorder %v5794_v52, %v7404_v60  ;;  %vm2838_vm7 = vcmp.eq.s32.totalorder %v5771_v51, %v7552_v21 }
 0x1b7   :  { %v4200_v17 = vpop.f32.mrb[8].mxu1  ;;  %v1341_v12 = vmul.f32 %v5158_v13, %v7811_v9  ;;  %v1344_v15 = vsub.f32 %v1230_v14, %v8035_v54  ;;  %v1232_v6 = vpop.f32.mrb[9].mxu0  ;;  %vm5076_vm2 = vmpackc.low %vm2829_vm3, %vm2824_vm1  ;;  %vm2846_vm1 = vcmp.eq.s32.totalorder %v5797_v53, %v7404_v60  ;;  %vm2833_vm3 = vcmp.eq.s32.totalorder %v5768_v50, %v7552_v21 }
 0x1b8   :  { %v4201_v58 = vpop.f32.mrb[9].mxu1  ;;  %v8048_v9 = vadd.f32 %v5158_v13, %v1329_v7  ;;  %v1328_v57 = vadd.f32 %v1327_v55, %v7797_v8  ;;  %v1358_v10 = vsub.f32 %v1232_v6, %v8035_v54  ;;  %5015 = vmatpush1.bf16.msk.msra.mxu0 %vm7998_vm4, %v5310_v27  ;;  %vm8061_vm0 = vmpackc.low %vm2836_vm5, %vm2831_vm6  ;;  %5077 = vmatprep.subr.msk.bf16.mxu1 %vm5076_vm2, %v5310_v27  ;;  %v8193_v6 = vld [vmem:[#allocation8] sm:$0xff] }
 0x1b9   :  { %v4202_v11 = vadd.f32 %v4201_v58, %v4200_v17  ;;  %v1345_v2 = vmul.f32 %v1344_v15, %v1344_v15  ;;  %5017 = vmatprep.subr.msk.bf16.mxu0 %vm8026_vm9, %v5310_v27  ;;  %vm5078_vm4 = vmpackc.low %vm2828_vm11, %vm2823_vm8  ;;  %vm2844_vm8 = vcmp.eq.s32.totalorder %v5794_v52, %v7479_v63  ;;  %vm2849_vm11 = vcmp.eq.s32.totalorder %v5797_v53, %v7479_v63 }
 0x1ba   :  { %v8079_v8 = vadd.f32 %v1341_v12, %v1328_v57  ;;  %v1359_v3 = vmul.f32 %v1358_v10, %v1358_v10  ;;  %5079 = vmatpush1.bf16.msk.msra.mxu1 %vm5078_vm4, %v5310_v27  ;;  %vm8089_vm6 = vmpackc.low %vm2847_vm12, %vm2842_vm10  ;;  %v8095_v4 = vpop.f32.mrb[10].mxu0  ;;  %v4203_v24 = vpop.f32.mrb[10].mxu1  ;;  %vm2775_vm10 = vcmp.eq.s32.totalorder %v5612_v38, %v7990_v5  ;;  %vm2780_vm12 = vcmp.eq.s32.totalorder %v5615_v39, %v7990_v5  ;;  %v5206_v10 = vld [vmem:[#allocation8 + $0x18] sm:$0xf] }
 0x1bb   :  { %v1372_v0 = vsub.f32 %v4202_v11, %v8035_v54  ;;  %v1346_v19 = vrot.slane %v1345_v2, 4  ;;  %vm5080_vm5 = vmpackc.low %vm2839_vm14, %vm2834_vm15  ;;  %v8109_v61 = vpop.f32.mrb[11].mxu0  ;;  %v4204_v59 = vpop.f32.mrb[11].mxu1  ;;  %vm2843_vm2 = vcmp.eq.s32.totalorder %v5794_v52, %v7552_v21  ;;  %vm2848_vm14 = vcmp.eq.s32.totalorder %v5797_v53, %v7552_v21 }
 0x1bc   :  { %v1360_v13 = vrot.slane %v1359_v3, 4  ;;  %5019 = vmatpush1.bf16.msk.msra.mxu0 %vm8061_vm0, %v5310_v27  ;;  %5081 = vmatprep.subr.msk.bf16.mxu1 %vm5080_vm5, %v5310_v27  ;;  %vm8121_vm9 = vmpackc.low %vm2846_vm1, %vm2841_vm13  ;;  %v8127_v14 = vadd.f32 %v4204_v59, %v4203_v24  ;;  %vm2695_vm0 = vcmp.eq.s32.totalorder %v5380_v1, %v7990_v5  ;;  %vm2700_vm4 = vcmp.eq.s32.totalorder %v5411_v16, %v7990_v5 }
 0x1bd   :  { %v1373_v7 = vmul.f32 %v1372_v0, %v1372_v0  ;;  %v1347_v17 = vadd.f32 %v1346_v19, %v1345_v2  ;;  %5021 = vmatprep.subr.msk.bf16.mxu0 %vm8089_vm6, %v5310_v27  ;;  %vm5082_vm15 = vmpackc.low %vm2838_vm7, %vm2833_vm3  ;;  %vm2785_vm3 = vcmp.eq.s32.totalorder %v5638_v40, %v7990_v5  ;;  %vm2790_vm6 = vcmp.eq.s32.totalorder %v5641_v41, %v7990_v5 }
 0x1be   :  { %v1361_v60 = vadd.f32 %v1360_v13, %v1359_v3  ;;  %5083 = vmatpush1.bf16.msk.msra.mxu1 %vm5082_vm15, %v5310_v27  ;;  %vm5084_vm13 = vmpackc.low %vm2849_vm11, %vm2844_vm8  ;;  %vm2705_vm11 = vcmp.eq.s32.totalorder %v5426_v22, %v7990_v5 }
 0x1bf   :  { %v1374_v56 = vrot.slane %v1373_v7, 4  ;;  %v1348_v12 = vrot.slane %v1347_v17, 2  ;;  %5085 = vmatprep.subr.msk.bf16.mxu1 %vm5084_vm13, %v5310_v27  ;;  %vm8160_vm1 = vmpackc.low %vm2780_vm12, %vm2775_vm10  ;;  %vm2710_vm10 = vcmp.eq.s32.totalorder %v5429_v23, %v7990_v5  ;;  %vm2800_vm12 = vcmp.eq.s32.totalorder %v5667_v43, %v7990_v5  ;;  %v8236_v23 = vld [vmem:[#allocation8 + $0x10] sm:$0xf] }
 0x1c0   :  { %v1362_v1 = vrot.slane %v1361_v60, 2  ;;  %5023 = vmatpush1.bf16.msk.msra.mxu0 %vm8121_vm9, %v5310_v27  ;;  %vm5086_vm7 = vmpackc.low %vm2848_vm14, %vm2843_vm2  ;;  %vm2795_vm9 = vcmp.eq.s32.totalorder %v5664_v42, %v7990_v5  ;;  %vm2715_vm14 = vcmp.eq.s32.totalorder %v5439_v25, %v7990_v5  ;;  %vm2720_vm13 = vcmp.eq.s32.totalorder %v5442_v26, %v7990_v5 }
 0x1c1   :  { %v1375_v16 = vadd.f32 %v1374_v56, %v1373_v7  ;;  %v1349_v38 = vadd.f32 %v1348_v12, %v1347_v17  ;;  %5089 = vmatprep.subr.msk.bf16.mxu0 %vm8160_vm1, %v5310_v27  ;;  %vm8180_vm5 = vmpackc.low %vm2700_vm4, %vm2695_vm0  ;;  %vm2805_vm0 = vcmp.eq.s32.totalorder %v5690_v44, %v7990_v5  ;;  %vm2810_vm4 = vcmp.eq.s32.totalorder %v5693_v45, %v7990_v5 }
 0x1c2   :  { %v1363_v40 = vadd.f32 %v1362_v1, %v1361_v60  ;;  %5087 = vmatpush1.bf16.msk.msra.mxu1 %vm5086_vm7, %v5310_v27  ;;  %vm8185_vm8 = vmpackc.low %vm2790_vm6, %vm2785_vm3  ;;  %vm2725_vm6 = vcmp.eq.s32.totalorder %v5482_v28, %v7990_v5  ;;  %vm2730_vm7 = vcmp.eq.s32.totalorder %v5485_v29, %v7990_v5 }
 0x1c3   :  { %v1376_v41 = vrot.slane %v1375_v16, 2  ;;  %v1350_v21 = vrot.slane %v1349_v38, 1  ;;  %3076 = vmatmul.mubr.f32.vlgmr.msra.gmra.mrb[24].mxu0 %v8193_v6  ;;  %5120 = vmatprep.subr.msk.bf16.mxu1 %vm8160_vm1, %v5310_v27  ;;  %vm8216_vm15 = vmpackc.low %vm2710_vm10, %vm2705_vm11 }
 0x1c4   :  { %v1364_v58 = vrot.slane %v1363_v40, 1  ;;  %5091 = vmatpush3.bf16.msk.msra.mxu0 %vm8180_vm5, %v5310_v27  ;;  %3081 = vmatprep.mubr.f32.mxu0 %v5206_v10  ;;  %vm8220_vm2 = vmpackc.low %vm2800_vm12, %vm2795_vm9  ;;  %vm2735_vm9 = vcmp.eq.s32.totalorder %v5508_v30, %v7990_v5  ;;  %vm2740_vm12 = vcmp.eq.s32.totalorder %v5511_v31, %v7990_v5 }
 0x1c5   :  { %v1377_v57 = vadd.f32 %v1376_v41, %v1375_v16  ;;  %v1351_v11 = vadd.f32 %v1350_v21, %v1349_v38  ;;  %3153 = vmatmul.mubr.f32.vlgmr.msra.gmra.mrb[24].mxu1 %v8193_v6  ;;  %5093 = vmatprep.subr.msk.bf16.mxu0 %vm8185_vm8, %v5310_v27  ;;  %vm8255_vm1 = vmpackc.low %vm2720_vm13, %vm2715_vm14 }
 0x1c6   :  { %v1365_v43 = vadd.f32 %v1364_v58, %v1363_v40  ;;  %5128 = vmatpush3.bf16.msk.msra.mxu1 %vm8180_vm5, %v5310_v27  ;;  %3158 = vmatprep.mubr.f32.mxu1 %v5206_v10  ;;  %vm8267_vm3 = vmpackc.low %vm2810_vm4, %vm2805_vm0  ;;  %vm2815_vm5 = vcmp.eq.s32.totalorder %v5716_v46, %v7990_v5  ;;  %vm2745_vm0 = vcmp.eq.s32.totalorder %v5534_v32, %v7990_v5 }
 0x1c7   :  { %v1378_v18 = vrot.slane %v1377_v57, 1  ;;  %v1352_v22 = vmul.f32 %v1351_v11, %v7197_v62  ;;  %3082 = vmatmul.mubr.f32.gmra.mrb[26].mxu0 %v8236_v23  ;;  %5121 = vmatprep.subr.msk.bf16.mxu1 %vm8185_vm8, %v5310_v27  ;;  %vm2820_vm8 = vcmp.eq.s32.totalorder %v5719_v47, %v7990_v5  ;;  %vm5102_vm11 = vmpackc.low %vm2730_vm7, %vm2725_vm6  ;;  %vm2750_vm4 = vcmp.eq.s32.totalorder %v5537_v33, %v7990_v5 }
 0x1c8   :  { %v1366_v3 = vmul.f32 %v1365_v43, %v7197_v62  ;;  %5095 = vmatpush3.bf16.msk.msra.mxu0 %vm8216_vm15, %v5310_v27  ;;  %3229 = vmatprep.mubr.f32.mxu0 %v5208_v20  ;;  %vm8291_vm10 = vmpackc.low %vm2820_vm8, %vm2815_vm5  ;;  %vm2755_vm5 = vcmp.eq.s32.totalorder %v5560_v34, %v7990_v5  ;;  %vm2760_vm8 = vcmp.eq.s32.totalorder %v5563_v35, %v7990_v5 }
 0x1c9   :  { %v1379_v0 = vadd.f32 %v1378_v18, %v1377_v57  ;;  %v1353_v24 = vmul.f32 1.442695, %v1352_v22  ;;  %5097 = vmatprep.subr.msk.bf16.mxu0 %vm8220_vm2, %v5310_v27  ;;  %3159 = vmatmul.mubr.f32.gmra.mrb[26].mxu1 %v8236_v23  ;;  %vm8313_vm14 = vmpackc.low %vm2740_vm12, %vm2735_vm9 }
 0x1ca   :  { %v1367_v59 = vmul.f32 1.442695, %v1366_v3  ;;  %5129 = vmatpush3.bf16.msk.msra.mxu1 %vm8216_vm15, %v5310_v27  ;;  %3234 = vmatprep.mubr.f32.mxu1 %v5206_v10  ;;  %vm2825_vm15 = vcmp.eq.s32.totalorder %v5742_v48, %v7990_v5  ;;  %vm8339_vm6 = vmpackc.low %vm2750_vm4, %vm2745_vm0 }
 0x1cb   :  { %v1380_v13 = vmul.f32 %v1379_v0, %v7197_v62  ;;  %5159 = vpow2.f32 %v1353_v24  ;;  %5122 = vmatprep.subr.msk.bf16.mxu1 %vm8220_vm2, %v5310_v27  ;;  %vm2830_vm2 = vcmp.eq.s32.totalorder %v5745_v49, %v7990_v5  ;;  %vm5114_vm9 = vmpackc.low %vm2760_vm8, %vm2755_vm5 }
 0x1cc   :  { %5161 = vpow2.f32 %v1367_v59  ;;  %5099 = vmatpush3.bf16.msk.msra.mxu0 %vm8255_vm1, %v5310_v27  ;;  %vm8317_vm13 = vmpackc.low %vm2830_vm2, %vm2825_vm15  ;;  %vm2765_vm15 = vcmp.eq.s32.totalorder %v5586_v36, %v7990_v5  ;;  %vm2770_vm2 = vcmp.eq.s32.totalorder %v5589_v37, %v7990_v5 }
 0x1cd   :  { %v1381_v26 = vmul.f32 1.442695, %v1380_v13  ;;  %5101 = vmatprep.subr.msk.bf16.mxu0 %vm8267_vm3, %v5310_v27 }
 0x1ce   :  { %5130 = vmatpush3.bf16.msk.msra.mxu1 %vm8255_vm1, %v5310_v27  ;;  %vm2835_vm1 = vcmp.eq.s32.totalorder %v5768_v50, %v7990_v5 }
 0x1cf   :  { %5163 = vpow2.f32 %v1381_v26  ;;  %5123 = vmatprep.subr.msk.bf16.mxu1 %vm8267_vm3, %v5310_v27  ;;  %vm2840_vm3 = vcmp.eq.s32.totalorder %v5771_v51, %v7990_v5 }
 0x1d0   :  { %5103 = vmatpush3.bf16.msk.msra.mxu0 %vm5102_vm11, %v5310_v27  ;;  %vm8345_vm7 = vmpackc.low %vm2840_vm3, %vm2835_vm1 }
 0x1d1   :  { %5105 = vmatprep.subr.msk.bf16.mxu0 %vm8291_vm10, %v5310_v27 }
 0x1d2   :  { %5131 = vmatpush3.bf16.msk.msra.mxu1 %vm5102_vm11, %v5310_v27  ;;  %vm2845_vm11 = vcmp.eq.s32.totalorder %v5794_v52, %v7990_v5 }
 0x1d3   :  { %5124 = vmatprep.subr.msk.bf16.mxu1 %vm8291_vm10, %v5310_v27  ;;  %vm2850_vm10 = vcmp.eq.s32.totalorder %v5797_v53, %v7990_v5 }
 0x1d4   :  { %5107 = vmatpush3.bf16.msk.msra.mxu0 %vm8313_vm14, %v5310_v27  ;;  %vm5116_vm12 = vmpackc.low %vm2850_vm10, %vm2845_vm11 }
 0x1d5   :  { %v5160_v31 = vpop.eup %5159  ;;  %5109 = vmatprep.subr.msk.bf16.mxu0 %vm8317_vm13, %v5310_v27 }
 0x1d6   :  { %v5162_v33 = vpop.eup %5161  ;;  %v1357_v44 = vadd.f32 %v5160_v31, %v8048_v9  ;;  %v1355_v45 = vmul.f32 %v5160_v31, %v8095_v4  ;;  %5132 = vmatpush3.bf16.msk.msra.mxu1 %vm8313_vm14, %v5310_v27  ;;  %vm5118_vm14 = vmpackc.low %vm2770_vm2, %vm2765_vm15 }
 0x1d7   :  { %v1369_v47 = vmul.f32 %v5162_v33, %v8109_v61  ;;  %5125 = vmatprep.subr.msk.bf16.mxu1 %vm8317_vm13, %v5310_v27 }
 0x1d8   :  { %v1371_v48 = vadd.f32 %v5162_v33, %v1357_v44  ;;  %v1356_v35 = vadd.f32 %v1355_v45, %v8079_v8  ;;  %5111 = vmatpush3.bf16.msk.msra.mxu0 %vm8339_vm6, %v5310_v27 }
 0x1d9   :  { %v5164_v34 = vpop.eup %5163  ;;  %5113 = vmatprep.subr.msk.bf16.mxu0 %vm8345_vm7, %v5310_v27 }
 0x1da   :  { %v1383_v49 = vmul.f32 %v5164_v34, %v8127_v14  ;;  %v1370_v50 = vadd.f32 %v1369_v47, %v1356_v35  ;;  %v8376_v51 = vadd.f32 %v5164_v34, %v1371_v48  ;;  %5133 = vmatpush3.bf16.msk.msra.mxu1 %vm8339_vm6, %v5310_v27 }
 0x1db   :  { %5126 = vmatprep.subr.msk.bf16.mxu1 %vm8345_vm7, %v5310_v27 }
 0x1dc   :  { %5115 = vmatpush3.bf16.msk.msra.mxu0 %vm5114_vm9, %v5310_v27  ;;  %v8385_v52 = vadd.f32 %v1383_v49, %v1370_v50 }
 0x1dd   :  { %5117 = vmatprep.subr.msk.bf16.mxu0 %vm5116_vm12, %v5310_v27 }
 0x1de   :  { %5134 = vmatpush3.bf16.msk.msra.mxu1 %vm5114_vm9, %v5310_v27 }
 0x1df   :  { %5127 = vmatprep.subr.msk.bf16.mxu1 %vm5116_vm12, %v5310_v27 }
 0x1e0   :  { %5119 = vmatpush3.bf16.msk.msra.mxu0 %vm5118_vm14, %v5310_v27 }
 0x1e2   :  { %5135 = vmatpush3.bf16.msk.msra.mxu1 %vm5118_vm14, %v5310_v27 }
 0x1e3   :  { %3230 = vmatmul.mubr.f32.vlgmr.msra.gmra.mrb[28].mxu0 %v8193_v6 }
 0x1e5   :  { %3235 = vmatmul.mubr.f32.vlgmr.msra.gmra.mrb[28].mxu1 %v8236_v23 }
 0x1f6   :  { %v1794_v36 = vpop.f32.mrb[12].mxu0  ;;  %v1871_v37 = vpop.f32.mrb[12].mxu1 }
 0x1f7   :  { %v1957_v53 = vsub.f32 %v1794_v36, %v8035_v54  ;;  %v1796_v5 = vpop.f32.mrb[13].mxu0  ;;  %v1985_v9 = vsub.f32 %v1871_v37, %v8035_v54  ;;  %v1873_v8 = vpop.f32.mrb[13].mxu1 }
 0x1f8   :  { %v1971_v4 = vsub.f32 %v1796_v5, %v8035_v54  ;;  %v1999_v61 = vsub.f32 %v1873_v8, %v8035_v54 }
 0x1f9   :  { %v1958_v7 = vmul.f32 %v1957_v53, %v1957_v53  ;;  %v1986_v55 = vmul.f32 %v1985_v9, %v1985_v9 }
 0x1fa   :  { %v1972_v14 = vmul.f32 %v1971_v4, %v1971_v4  ;;  %v2000_v27 = vmul.f32 %v1999_v61, %v1999_v61  ;;  %v1800_v17 = vpop.f32.mrb[14].mxu0  ;;  %v1877_v60 = vpop.f32.mrb[14].mxu1 }
 0x1fb   :  { %v1959_v56 = vrot.slane %v1958_v7, 4  ;;  %v1987_v12 = vrot.slane %v1986_v55, 4  ;;  %v1802_v15 = vpop.f32.mrb[15].mxu0  ;;  %v1879_v1 = vpop.f32.mrb[15].mxu1 }
 0x1fc   :  { %v1973_v16 = vrot.slane %v1972_v14, 4  ;;  %v2001_v38 = vrot.slane %v2000_v27, 4 }
 0x1fd   :  { %v1960_v39 = vadd.f32 %v1959_v56, %v1958_v7  ;;  %v1988_v40 = vadd.f32 %v1987_v12, %v1986_v55 }
 0x1fe   :  { %v1974_v41 = vadd.f32 %v1973_v16, %v1972_v14  ;;  %v2002_v63 = vadd.f32 %v2001_v38, %v2000_v27 }
 0x1ff   :  { %v1961_v21 = vrot.slane %v1960_v39, 2  ;;  %v1989_v6 = vrot.slane %v1988_v40, 2 }
 0x200   :  { %v1975_v58 = vrot.slane %v1974_v41, 2  ;;  %v2003_v57 = vrot.slane %v2002_v63, 2 }
 0x201   :  { %v1962_v10 = vadd.f32 %v1961_v21, %v1960_v39  ;;  %v1990_v11 = vadd.f32 %v1989_v6, %v1988_v40 }
 0x202   :  { %v1976_v42 = vadd.f32 %v1975_v58, %v1974_v41  ;;  %v2004_v43 = vadd.f32 %v2003_v57, %v2002_v63 }
 0x203   :  { %v1963_v18 = vrot.slane %v1962_v10, 1  ;;  %v1991_v2 = vrot.slane %v1990_v11, 1 }
 0x204   :  { %v1977_v22 = vrot.slane %v1976_v42, 1  ;;  %v2005_v23 = vrot.slane %v2004_v43, 1 }
 0x205   :  { %v1964_v3 = vadd.f32 %v1963_v18, %v1962_v10  ;;  %v1992_v0 = vadd.f32 %v1991_v2, %v1990_v11 }
 0x206   :  { %v1978_v20 = vadd.f32 %v1977_v22, %v1976_v42  ;;  %v2006_v24 = vadd.f32 %v2005_v23, %v2004_v43 }
 0x207   :  { %v1965_v19 = vmul.f32 %v1964_v3, %v7197_v62  ;;  %v1993_v59 = vmul.f32 %v1992_v0, %v7197_v62 }
 0x208   :  { %v1979_v13 = vmul.f32 %v1978_v20, %v7197_v62  ;;  %v2007_v25 = vmul.f32 %v2006_v24, %v7197_v62 }
 0x209   :  { %v1966_v26 = vmul.f32 1.442695, %v1965_v19  ;;  %v1994_v28 = vmul.f32 1.442695, %v1993_v59 }
 0x20a   :  { %v1980_v29 = vmul.f32 1.442695, %v1979_v13  ;;  %v2008_v30 = vmul.f32 1.442695, %v2007_v25 }
 0x20b   :  { %5165 = vpow2.f32 %v1966_v26 }
 0x20c   :  { %5167 = vpow2.f32 %v1980_v29 }
 0x20d   :  { %5169 = vpow2.f32 %v1994_v28 }
 0x20e   :  { %5171 = vpow2.f32 %v2008_v30 }
 0x215   :  { %v5166_v31 = vpop.eup %5165 }
 0x216   :  { %v5168_v32 = vpop.eup %5167  ;;  %v1970_v33 = vadd.f32 %v5166_v31, %v8376_v51  ;;  %v1968_v44 = vmul.f32 %v5166_v31, %v1800_v17  ;;  %v4238_v45 = vpop.f32.mrb[16].mxu0 }
 0x217   :  { %v5170_v46 = vpop.eup %5169  ;;  %v1982_v47 = vmul.f32 %v5168_v32, %v1802_v15  ;;  %v4239_v34 = vpop.f32.mrb[17].mxu0 }
 0x218   :  { %v5172_v48 = vpop.eup %5171  ;;  %v1984_v35 = vadd.f32 %v5168_v32, %v1970_v33  ;;  %v1969_v49 = vadd.f32 %v1968_v44, %v8385_v52  ;;  %v4240_v50 = vadd.f32 %v4239_v34, %v4238_v45  ;;  %v1996_v36 = vmul.f32 %v5170_v46, %v1877_v60 }
 0x219   :  { %v2010_v37 = vmul.f32 %v5172_v48, %v1879_v1 }
 0x21a   :  { %v1998_v53 = vadd.f32 %v5170_v46, %v1984_v35  ;;  %v1983_v5 = vadd.f32 %v1982_v47, %v1969_v49  ;;  %v2013_v9 = vsub.f32 %v4240_v50, %v8035_v54  ;;  %v4241_v8 = vpop.f32.mrb[18].mxu0 }
 0x21b   :  { %v4242_v4 = vpop.f32.mrb[19].mxu0 }
 0x21c   :  { %v2012_v61 = vadd.f32 %v5172_v48, %v1998_v53  ;;  %v2014_v51 = vmul.f32 %v2013_v9, %v2013_v9  ;;  %v1997_v7 = vadd.f32 %v1996_v36, %v1983_v5  ;;  %v4243_v55 = vadd.f32 %v4242_v4, %v4241_v8 }
 0x21e   :  { %v2015_v14 = vrot.slane %v2014_v51, 4  ;;  %v2011_v27 = vadd.f32 %v2010_v37, %v1997_v7 }
 0x220   :  { %v2016_v17 = vadd.f32 %v2015_v14, %v2014_v51 }
 0x222   :  { %v2017_v56 = vrot.slane %v2016_v17, 2 }
 0x224   :  { %v2018_v12 = vadd.f32 %v2017_v56, %v2016_v17 }
 0x226   :  { %v2019_v15 = vrot.slane %v2018_v12, 1 }
 0x228   :  { %v2020_v52 = vadd.f32 %v2019_v15, %v2018_v12 }
 0x22a   :  { %v2021_v60 = vmul.f32 %v2020_v52, %v7197_v62 }
 0x22c   :  { %v2022_v1 = vmul.f32 1.442695, %v2021_v60 }
 0x22e   :  { %5173 = vpow2.f32 %v2022_v1 }
 0x236   :  { %v2437_v16 = vpop.f32.mrb[16].mxu1 }
 0x237   :  { %v2600_v38 = vsub.f32 %v2437_v16, %v8035_v54  ;;  %v2439_v39 = vpop.f32.mrb[17].mxu1 }
 0x238   :  { %v5174_v40 = vpop.eup %5173  ;;  %v2614_v41 = vsub.f32 %v2439_v39, %v8035_v54 }
 0x239   :  { %v2024_v63 = vmul.f32 %v5174_v40, %v4243_v55  ;;  %v2026_v21 = vadd.f32 %v5174_v40, %v2012_v61  ;;  %v2601_v6 = vmul.f32 %v2600_v38, %v2600_v38 }
 0x23a   :  { %v2615_v58 = vmul.f32 %v2614_v41, %v2614_v41  ;;  %v2443_v57 = vpop.f32.mrb[18].mxu1 }
 0x23b   :  { %v2602_v10 = vrot.slane %v2601_v6, 4  ;;  %v2025_v11 = vadd.f32 %v2024_v63, %v2011_v27  ;;  %v2445_v42 = vpop.f32.mrb[19].mxu1 }
 0x23c   :  { %v2616_v43 = vrot.slane %v2615_v58, 4 }
 0x23d   :  { %v2603_v18 = vadd.f32 %v2602_v10, %v2601_v6 }
 0x23e   :  { %v2617_v2 = vadd.f32 %v2616_v43, %v2615_v58 }
 0x23f   :  { %v2604_v22 = vrot.slane %v2603_v18, 2 }
 0x240   :  { %v2618_v23 = vrot.slane %v2617_v2, 2 }
 0x241   :  { %v2605_v3 = vadd.f32 %v2604_v22, %v2603_v18 }
 0x242   :  { %v2619_v0 = vadd.f32 %v2618_v23, %v2617_v2 }
 0x243   :  { %v2606_v20 = vrot.slane %v2605_v3, 1 }
 0x244   :  { %v2620_v24 = vrot.slane %v2619_v0, 1 }
 0x245   :  { %v2607_v19 = vadd.f32 %v2606_v20, %v2605_v3 }
 0x246   :  { %v2621_v59 = vadd.f32 %v2620_v24, %v2619_v0 }
 0x247   :  { %v2608_v13 = vmul.f32 %v2607_v19, %v7197_v62 }
 0x248   :  { %v2622_v25 = vmul.f32 %v2621_v59, %v7197_v62 }
 0x249   :  { %v2609_v26 = vmul.f32 1.442695, %v2608_v13 }
 0x24a   :  { %v2623_v28 = vmul.f32 1.442695, %v2622_v25 }
 0x24b   :  { %5175 = vpow2.f32 %v2609_v26 }
 0x24c   :  { %5177 = vpow2.f32 %v2623_v28 }
 0x255   :  { %v5176_v29 = vpop.eup %5175 }
 0x256   :  { %v5178_v30 = vpop.eup %5177  ;;  %v2613_v31 = vadd.f32 %v5176_v29, %v2026_v21  ;;  %v2611_v32 = vmul.f32 %v5176_v29, %v2443_v57  ;;  %v2514_v33 = vpop.f32.mrb[20].mxu0 }
 0x257   :  { %v4276_v44 = vpop.f32.mrb[20].mxu1  ;;  %v2625_v45 = vmul.f32 %v5178_v30, %v2445_v42  ;;  %v2628_v46 = vsub.f32 %v2514_v33, %v8035_v54  ;;  %v2516_v47 = vpop.f32.mrb[21].mxu0 }
 0x258   :  { %v4277_v34 = vpop.f32.mrb[21].mxu1  ;;  %v2627_v48 = vadd.f32 %v5178_v30, %v2613_v31  ;;  %v2612_v35 = vadd.f32 %v2611_v32, %v2025_v11  ;;  %v2642_v49 = vsub.f32 %v2516_v47, %v8035_v54 }
 0x259   :  { %v4278_v50 = vadd.f32 %v4277_v34, %v4276_v44  ;;  %v2629_v36 = vmul.f32 %v2628_v46, %v2628_v46 }
 0x25a   :  { %v2626_v37 = vadd.f32 %v2625_v45, %v2612_v35  ;;  %v2643_v53 = vmul.f32 %v2642_v49, %v2642_v49  ;;  %v2520_v9 = vpop.f32.mrb[22].mxu0  ;;  %v4279_v8 = vpop.f32.mrb[22].mxu1 }
 0x25b   :  { %v2656_v5 = vsub.f32 %v4278_v50, %v8035_v54  ;;  %v2630_v4 = vrot.slane %v2629_v36, 4  ;;  %v2522_v61 = vpop.f32.mrb[23].mxu0  ;;  %v4280_v51 = vpop.f32.mrb[23].mxu1 }
 0x25c   :  { %v2644_v7 = vrot.slane %v2643_v53, 4  ;;  %v4281_v14 = vadd.f32 %v4280_v51, %v4279_v8 }
 0x25d   :  { %v2657_v55 = vmul.f32 %v2656_v5, %v2656_v5  ;;  %v2631_v27 = vadd.f32 %v2630_v4, %v2629_v36 }
 0x25e   :  { %v2645_v17 = vadd.f32 %v2644_v7, %v2643_v53 }
 0x25f   :  { %v2658_v56 = vrot.slane %v2657_v55, 4  ;;  %v2632_v12 = vrot.slane %v2631_v27, 2 }
 0x260   :  { %v2646_v15 = vrot.slane %v2645_v17, 2 }
 0x261   :  { %v2659_v52 = vadd.f32 %v2658_v56, %v2657_v55  ;;  %v2633_v60 = vadd.f32 %v2632_v12, %v2631_v27 }
 0x262   :  { %v2647_v1 = vadd.f32 %v2646_v15, %v2645_v17 }
 0x263   :  { %v2660_v16 = vrot.slane %v2659_v52, 2  ;;  %v2634_v38 = vrot.slane %v2633_v60, 1 }
 0x264   :  { %v2648_v39 = vrot.slane %v2647_v1, 1 }
 0x265   :  { %v2661_v40 = vadd.f32 %v2660_v16, %v2659_v52  ;;  %v2635_v41 = vadd.f32 %v2634_v38, %v2633_v60 }
 0x266   :  { %v2649_v63 = vadd.f32 %v2648_v39, %v2647_v1 }
 0x267   :  { %v2662_v21 = vrot.slane %v2661_v40, 1  ;;  %v2636_v6 = vmul.f32 %v2635_v41, %v7197_v62 }
 0x268   :  { %v2650_v58 = vmul.f32 %v2649_v63, %v7197_v62 }
 0x269   :  { %v2663_v57 = vadd.f32 %v2662_v21, %v2661_v40  ;;  %v2637_v10 = vmul.f32 1.442695, %v2636_v6 }
 0x26a   :  { %v2651_v11 = vmul.f32 1.442695, %v2650_v58 }
 0x26b   :  { %v2664_v42 = vmul.f32 %v2663_v57, %v7197_v62  ;;  %5179 = vpow2.f32 %v2637_v10 }
 0x26c   :  { %5181 = vpow2.f32 %v2651_v11 }
 0x26d   :  { %v2665_v43 = vmul.f32 1.442695, %v2664_v42 }
 0x26f   :  { %5183 = vpow2.f32 %v2665_v43 }
 0x275   :  { %v5180_v18 = vpop.eup %5179 }
 0x276   :  { %v5182_v2 = vpop.eup %5181  ;;  %v2641_v22 = vadd.f32 %v5180_v18, %v2627_v48  ;;  %v2639_v23 = vmul.f32 %v5180_v18, %v2520_v9 }
 0x277   :  { %v2653_v3 = vmul.f32 %v5182_v2, %v2522_v61 }
 0x278   :  { %v2655_v20 = vadd.f32 %v5182_v2, %v2641_v22  ;;  %v2640_v24 = vadd.f32 %v2639_v23, %v2626_v37 }
 0x279   :  { %v5184_v0 = vpop.eup %5183 }
 0x27a   :  { %v2667_v19 = vmul.f32 %v5184_v0, %v4281_v14  ;;  %v2654_v59 = vadd.f32 %v2653_v3, %v2640_v24  ;;  %v2669_v13 = vadd.f32 %v5184_v0, %v2655_v20 }
 0x27c   :  { %v8416_v25 = vadd.f32 %v2667_v19, %v2654_v59 }
 0x296   :  { %v3077_v26 = vpop.f32.mrb[24].mxu0 }
 0x297   :  { %v3240_v28 = vsub.f32 %v3077_v26, %v8035_v54  ;;  %v3079_v29 = vpop.f32.mrb[25].mxu0 }
 0x298   :  { %v3254_v30 = vsub.f32 %v3079_v29, %v8035_v54  ;;  %v3154_v31 = vpop.f32.mrb[24].mxu1 }
 0x299   :  { %v3241_v32 = vmul.f32 %v3240_v28, %v3240_v28  ;;  %v3268_v33 = vsub.f32 %v3154_v31, %v8035_v54  ;;  %v3156_v44 = vpop.f32.mrb[25].mxu1 }
 0x29a   :  { %v3255_v45 = vmul.f32 %v3254_v30, %v3254_v30  ;;  %v3282_v46 = vsub.f32 %v3156_v44, %v8035_v54  ;;  %v3083_v47 = vpop.f32.mrb[26].mxu0 }
 0x29b   :  { %v3242_v34 = vrot.slane %v3241_v32, 4  ;;  %v3269_v48 = vmul.f32 %v3268_v33, %v3268_v33  ;;  %v3085_v35 = vpop.f32.mrb[27].mxu0 }
 0x29c   :  { %v3256_v49 = vrot.slane %v3255_v45, 4  ;;  %v3283_v50 = vmul.f32 %v3282_v46, %v3282_v46  ;;  %v3160_v36 = vpop.f32.mrb[26].mxu1 }
 0x29d   :  { %v3243_v37 = vadd.f32 %v3242_v34, %v3241_v32  ;;  %v3270_v53 = vrot.slane %v3269_v48, 4  ;;  %v3162_v5 = vpop.f32.mrb[27].mxu1 }
 0x29e   :  { %v3257_v9 = vadd.f32 %v3256_v49, %v3255_v45  ;;  %v3284_v8 = vrot.slane %v3283_v50, 4 }
 0x29f   :  { %v3244_v4 = vrot.slane %v3243_v37, 2  ;;  %v3271_v61 = vadd.f32 %v3270_v53, %v3269_v48 }
 0x2a0   :  { %v3258_v51 = vrot.slane %v3257_v9, 2  ;;  %v3285_v7 = vadd.f32 %v3284_v8, %v3283_v50 }
 0x2a1   :  { %v3245_v55 = vadd.f32 %v3244_v4, %v3243_v37  ;;  %v3272_v14 = vrot.slane %v3271_v61, 2 }
 0x2a2   :  { %v3259_v27 = vadd.f32 %v3258_v51, %v3257_v9  ;;  %v3286_v17 = vrot.slane %v3285_v7, 2 }
 0x2a3   :  { %v3246_v56 = vrot.slane %v3245_v55, 1  ;;  %v3273_v12 = vadd.f32 %v3272_v14, %v3271_v61 }
 0x2a4   :  { %v3260_v15 = vrot.slane %v3259_v27, 1  ;;  %v3287_v52 = vadd.f32 %v3286_v17, %v3285_v7 }
 0x2a5   :  { %v3247_v60 = vadd.f32 %v3246_v56, %v3245_v55  ;;  %v3274_v1 = vrot.slane %v3273_v12, 1 }
 0x2a6   :  { %v3261_v16 = vadd.f32 %v3260_v15, %v3259_v27  ;;  %v3288_v38 = vrot.slane %v3287_v52, 1 }
 0x2a7   :  { %v3248_v39 = vmul.f32 %v3247_v60, %v7197_v62  ;;  %v3275_v40 = vadd.f32 %v3274_v1, %v3273_v12 }
 0x2a8   :  { %v3262_v41 = vmul.f32 %v3261_v16, %v7197_v62  ;;  %v3289_v63 = vadd.f32 %v3288_v38, %v3287_v52 }
 0x2a9   :  { %v3249_v21 = vmul.f32 1.442695, %v3248_v39  ;;  %v3276_v6 = vmul.f32 %v3275_v40, %v7197_v62 }
 0x2aa   :  { %v3263_v58 = vmul.f32 1.442695, %v3262_v41  ;;  %v3290_v57 = vmul.f32 %v3289_v63, %v7197_v62 }
 0x2ab   :  { %5185 = vpow2.f32 %v3249_v21  ;;  %v3277_v10 = vmul.f32 1.442695, %v3276_v6 }
 0x2ac   :  { %5187 = vpow2.f32 %v3263_v58  ;;  %v3291_v11 = vmul.f32 1.442695, %v3290_v57 }
 0x2ad   :  { %5189 = vpow2.f32 %v3277_v10 }
 0x2ae   :  { %5191 = vpow2.f32 %v3291_v11 }
 0x2b5   :  { %v5186_v42 = vpop.eup %5185 }
 0x2b6   :  { %v5188_v43 = vpop.eup %5187  ;;  %v3253_v18 = vadd.f32 %v5186_v42, %v2669_v13  ;;  %v3251_v2 = vmul.f32 %v5186_v42, %v3083_v47  ;;  %v4314_v22 = vpop.f32.mrb[28].mxu0 }
 0x2b7   :  { %v5190_v23 = vpop.eup %5189  ;;  %v3265_v3 = vmul.f32 %v5188_v43, %v3085_v35  ;;  %v4315_v0 = vpop.f32.mrb[29].mxu0 }
 0x2b8   :  { %v5192_v20 = vpop.eup %5191  ;;  %v3267_v24 = vadd.f32 %v5188_v43, %v3253_v18  ;;  %v3252_v19 = vadd.f32 %v3251_v2, %v8416_v25  ;;  %v4316_v59 = vadd.f32 %v4315_v0, %v4314_v22  ;;  %v3279_v26 = vmul.f32 %v5190_v23, %v3160_v36  ;;  %v4317_v28 = vpop.f32.mrb[28].mxu1 }
 0x2b9   :  { %v3293_v29 = vmul.f32 %v5192_v20, %v3162_v5  ;;  %v4318_v30 = vpop.f32.mrb[29].mxu1 }
 0x2ba   :  { %v3266_v31 = vadd.f32 %v3265_v3, %v3252_v19  ;;  %v3296_v32 = vsub.f32 %v4316_v59, %v8035_v54  ;;  %v4319_v33 = vadd.f32 %v4318_v30, %v4317_v28  ;;  %v3281_v44 = vadd.f32 %v5190_v23, %v3267_v24 }
 0x2bc   :  { %v3297_v13 = vmul.f32 %v3296_v32, %v3296_v32  ;;  %v3280_v45 = vadd.f32 %v3279_v26, %v3266_v31  ;;  %v3295_v46 = vadd.f32 %v5192_v20, %v3281_v44 }
 0x2be   :  { %v3298_v47 = vrot.slane %v3297_v13, 4  ;;  %v3294_v34 = vadd.f32 %v3293_v29, %v3280_v45 }
 0x2c0   :  { %v3299_v48 = vadd.f32 %v3298_v47, %v3297_v13 }
 0x2c2   :  { %v3300_v35 = vrot.slane %v3299_v48, 2 }
 0x2c4   :  { %v3301_v49 = vadd.f32 %v3300_v35, %v3299_v48 }
 0x2c6   :  { %v3302_v50 = vrot.slane %v3301_v49, 1 }
 0x2c8   :  { %v3303_v25 = vadd.f32 %v3302_v50, %v3301_v49 }
 0x2ca   :  { %v3304_v36 = vmul.f32 %v3303_v25, %v7197_v62 }
 0x2cc   :  { %v3305_v37 = vmul.f32 1.442695, %v3304_v36 }
 0x2ce   :  { %5193 = vpow2.f32 %v3305_v37 }
 0x2d8   :  { %v5194_v53 = vpop.eup %5193 }
 0x2d9   :  { %v3307_v5 = vmul.f32 %v5194_v53, %v4319_v33  ;;  %v3309_v9 = vadd.f32 %v5194_v53, %v3295_v46 }
 0x2db   :  { %v3308_v54 = vadd.f32 %v3307_v5, %v3294_v34  ;;  %v3310_v8 = vmax.f32 %v3309_v9, 1e-15 }
 0x2dd   :  { %5195 = vrcp.f32 %v3310_v8 }
 0x2e7   :  { %v5196_v4 = vpop.eup %5195 }
 0x2e8   :  { %v3312_v61 = vmul.f32 %v5196_v4, %v3308_v54 }
 0x2ea   :  { %3313 = vst [vmem:[#allocation9] sm:$0xf] %v3312_v61 }
 0x2eb   :  { %5286 = shalt.err (!%p5283_p0)
}
 0x2ec   :  { %s5287_s6 = scalar_lea.hbm %s8445_s4, 64 }
 0x2ed   :  { %p5288_p1 = scmp.ne.s32.totalorder %s8445_s4, %s5287_s6  ;;  %p5291_p2 = scmp.lt.u32.totalorder %s5287_s6, %s8445_s4 }
 0x2ef   :  { %p5293_p3 = pnand %p5291_p2, %p5288_p1 }
 0x2f1   :  { %5296 = shalt.err (!%p5293_p3)
}
 0x2f2   :  { %3323 = dma.vmem_to_hbm [thread:$0]  %s3321_s28, 64, %s8445_s4, [#allocation5]  }
 0x2f3   :  { %5301 = dma.done.wait [#allocation5], 64  }
 0x2f4   :  { %5302 = vsyncadd [#allocation5], 4294967232 }
 0x2f5   :  { %3327 = vsyncpa [#allocation4], 1 }
 0x2f6   :  { %3328 = vsyncpa [#allocation7], 1 }
 0x2f7   :  { %3329 = vsyncpa [#allocation5], 1 }

// kernel: tpu_custom_call.1
= control target key start
LH: loop header
LB: loop body
LE: loop exit
PB: predicated region body
PF: predicated region fallthrough
CT: control target
= control target key end

     0   :  { %10 = vsyncpa [#allocation4], 0  ;;  %s8441_s0 = inlined_call_operand.<no memory space> [shape: f32[1], index: 0, kind: input, shape index: {}]   ;;  %s8442_s1 = inlined_call_operand.hbm [shape: s32[25,128], index: 1, kind: input, shape index: {}]   ;;  %s8443_s2 = inlined_call_operand.hbm [shape: f32[8,128], index: 2, kind: input, shape index: {}]   ;;  %s8444_s3 = inlined_call_operand.hbm [shape: f32[12,256], index: 3, kind: input, shape index: {}]   ;;  %s8445_s4 = inlined_call_operand.hbm [shape: f32[4,128], index: 4, kind: output, shape index: {}]  }
   0x1   :  { %11 = vsyncpa [#allocation7], 0 }
   0x2   :  { %12 = vsyncpa [#allocation5], 0  ;;  %s5303_s15 = smov [#allocation6]   ;;  %s5304_s17 = smov [#allocation3]  }
   0x3   :  { %s33_s16 = sshll.u32 %s5303_s15, 4  ;;  %s20_s18 = sshll.u32 %s5304_s17, 4  ;;  %s34_s16 = int_to_ptr.vmem [resolvable:$true] %s33_s16  ;;  %s5337_s18 = int_to_ptr.vmem [resolvable:$true] %s20_s18 }
   0x4   :  { %s5209_s21 = scalar_lea.hbm %s8443_s2, 128 }
   0x5   :  { %p5210_p0 = scmp.ne.s32.totalorder %s8443_s2, %s5209_s21  ;;  %p5213_p1 = scmp.lt.u32.totalorder %s5209_s21, %s8443_s2 }
   0x7   :  { %p5215_p2 = pnand %p5213_p1, %p5210_p0 }
   0x9   :  { %5218 = shalt.err (!%p5215_p2)
}
   0xa   :  { %s5219_s26 = scalar_lea.vmem %s34_s16, 128  ;;  %p5224_p4 = scmp.lt.s32.totalorder %s34_s16, %s34_s16 }
   0xb   :  { %p5220_p3 = scmp.ne.s32.totalorder %s34_s16, %s5219_s26  ;;  %p5225_p5 = scmp.lt.s32.totalorder %s5219_s26, %s5219_s26 }
   0xd   :  { %p5226_p6 = por %p5225_p5, %p5224_p4 }
   0xf   :  { %p5227_p7 = pnand %p5226_p6, %p5220_p3 }
  0x11   :  { %5230 = shalt.err (!%p5227_p7)
}
  0x12   :  { %36 = dma.hbm_to_vmem [thread:$0]  %s8443_s2, 128, %s34_s16, [#allocation7]  }
  0x13   :  { %s5231_s5 = scalar_lea.hbm %s8442_s1, 512 }
  0x14   :  { %p5232_p8 = scmp.ne.s32.totalorder %s8442_s1, %s5231_s5  ;;  %p5235_p9 = scmp.lt.u32.totalorder %s5231_s5, %s8442_s1 }
  0x16   :  { %p5237_p10 = pnand %p5235_p9, %p5232_p8 }
  0x18   :  { %5240 = shalt.err (!%p5237_p10)
}
  0x19   :  { %s5241_s10 = scalar_lea.vmem %s5337_s18, 512  ;;  %p5246_p12 = scmp.lt.s32.totalorder %s5337_s18, %s5337_s18 }
  0x1a   :  { %p5242_p11 = scmp.ne.s32.totalorder %s5337_s18, %s5241_s10  ;;  %p5247_p13 = scmp.lt.s32.totalorder %s5241_s10, %s5241_s10 }
  0x1c   :  { %p5248_p0 = por %p5247_p13, %p5246_p12 }
  0x1e   :  { %p5249_p1 = pnand %p5248_p0, %p5242_p11 }
  0x20   :  { %5252 = shalt.err (!%p5249_p1)
}
  0x21   :  { %s5305_s2 = smov 128   ;;  %s5306_s11 = smov 8  }
  0x22   :  { %26 = dma.hbm_to_vmem [thread:$0]  %s8442_s1, 512, %s5337_s18, [#allocation4], %s5305_s2, %s5305_s2, %s5306_s11  }
  0x23   :  { %s5307_s14 = smov [#allocation8]   ;;  %s5253_s19 = scalar_lea.hbm %s8444_s3, 512 }
  0x24   :  { %s42_s15 = sshll.u32 %s5307_s14, 4  ;;  %p5254_p2 = scmp.ne.s32.totalorder %s8444_s3, %s5253_s19  ;;  %s43_s15 = int_to_ptr.vmem [resolvable:$true] %s42_s15 }
  0x25   :  { %p5257_p3 = scmp.lt.u32.totalorder %s5253_s19, %s8444_s3 }
  0x27   :  { %p5259_p4 = pnand %p5257_p3, %p5254_p2 }
  0x29   :  { %5262 = shalt.err (!%p5259_p4)
}
  0x2a   :  { %s5263_s24 = scalar_lea.vmem %s43_s15, 512  ;;  %p5268_p6 = scmp.lt.s32.totalorder %s43_s15, %s43_s15 }
  0x2b   :  { %p5264_p5 = scmp.ne.s32.totalorder %s43_s15, %s5263_s24  ;;  %p5269_p7 = scmp.lt.s32.totalorder %s5263_s24, %s5263_s24 }
  0x2d   :  { %p5270_p8 = por %p5269_p7, %p5268_p6 }
  0x2f   :  { %p5271_p9 = pnand %p5270_p8, %p5264_p5 }
  0x31   :  { %5274 = shalt.err (!%p5271_p9)
}
  0x32   :  { %s5308_s1 = smov 256   ;;  %s5309_s18 = smov 16  }
  0x33   :  { %48 = dma.hbm_to_vmem [thread:$0]  %s8444_s3, 512, %s43_s15, [#allocation7], %s5308_s1, %s5308_s1, %s5309_s18  }
  0x34   :  { %5297 = dma.done.wait [#allocation4], 512  }
  0x35   :  { %5298 = vsyncadd [#allocation4], 4294966784 }
  0x36   :  { %5299 = dma.done.wait [#allocation7], 640  }
  0x37   :  { %5300 = vsyncadd [#allocation7], 4294966656  ;;  %v68_v0 = vlaneseq  ;;  %v5382_v2 = vld [vmem:[#allocation3] sm:$0xff]  ;;  %v5387_v6 = vld [vmem:[#allocation8 + $0x8] sm:$0xff]  ;;  %v5310_v27 = vmov 1.0|1.0  }
  0x38   :  { %v104_v3 = vrot.slane %v5382_v2, 4  ;;  %v101_v5 = vrot.slane %v5382_v2, 1  ;;  %v5389_v7 = vld [vmem:[#allocation3 + $0x8] sm:$0xff]  ;;  %v103_v8 = vrot.slane %v5382_v2, 3  ;;  %509 = vmatprep.mubr.f32.mxu0 %v5387_v6  ;;  %v102_v10 = vrot.slane %v5382_v2, 2  ;;  %586 = vmatprep.mubr.f32.mxu1 %v5387_v6  ;;  %v65_v13 = vld [vmem:[#allocation3 + $0x10] sm:$0xff] }
  0x39   :  { %v5380_v1 = vshrl.u32 %v68_v0, 7  ;;  %v746_v11 = vrot.slane %v5389_v7, 4  ;;  %v2030_v19 = vrot.slane %v65_v13, 4  ;;  %v5857_v57 = vld [vmem:[#allocation8] sm:$0xff]  ;;  %v5873_v58 = vld [vmem:[#allocation8 + $0x18] sm:$0xf] }
  0x3a   :  { %v5887_v59 = vld [vmem:[#allocation8 + $0x10] sm:$0xf]  ;;  %v745_v60 = vrot.slane %v5389_v7, 3  ;;  %v6271_v0 = vld [vmem:[#allocation8 + $0x8] sm:$0xff]  ;;  %v6770_v13 = vld [vmem:[#allocation8] sm:$0xff] }
  0x3b   :  { %v107_v4 = vsub.s32 0, %v5380_v1  ;;  %v5398_v12 = vsub.s32 2, %v5380_v1  ;;  %v5411_v16 = vadd.s32 8, %v5380_v1  ;;  %v5419_v20 = vsub.s32 7, %v5380_v1 }
  0x3c   :  { %v5426_v22 = vadd.s32 16, %v5380_v1  ;;  %v5429_v23 = vadd.s32 24, %v5380_v1  ;;  %v5439_v25 = vadd.s32 32, %v5380_v1  ;;  %v5442_v26 = vadd.s32 40, %v5380_v1 }
  0x3d   :  { %v5392_v9 = vrot.slane %v104_v3, %v107_v4  ;;  %v5403_v14 = vrot.slane %v101_v5, %v107_v4  ;;  %v5408_v15 = vrot.slane %v746_v11, %v5398_v12  ;;  %v5414_v17 = vrot.slane %v5382_v2, %v107_v4 }
  0x3e   :  { %v5416_v18 = vrot.slane %v103_v8, %v107_v4  ;;  %v5423_v21 = vrot.slane %v102_v10, %v107_v4  ;;  %v5432_v24 = vrot.slane %v2030_v19, %v5419_v20  ;;  %v5482_v28 = vadd.s32 48, %v5380_v1 }
  0x3f   :  { %vm126_vm0 = vcmp.eq.s32.totalorder %v5380_v1, %v5403_v14  ;;  %vm131_vm1 = vcmp.eq.s32.totalorder %v5411_v16, %v5403_v14  ;;  %vm125_vm5 = vcmp.eq.s32.totalorder %v5380_v1, %v5414_v17  ;;  %vm130_vm6 = vcmp.eq.s32.totalorder %v5411_v16, %v5414_v17 }
  0x40   :  { %vm4320_vm2 = vmpackc.low %vm131_vm1, %vm126_vm0  ;;  %vm128_vm3 = vcmp.eq.s32.totalorder %v5380_v1, %v5416_v18  ;;  %vm133_vm4 = vcmp.eq.s32.totalorder %v5411_v16, %v5416_v18  ;;  %vm127_vm8 = vcmp.eq.s32.totalorder %v5380_v1, %v5423_v21  ;;  %vm132_vm9 = vcmp.eq.s32.totalorder %v5411_v16, %v5423_v21 }
  0x41   :  { %4321 = vmatprep.subr.msk.bf16.mxu0 %vm4320_vm2, %v5310_v27  ;;  %vm4384_vm7 = vmpackc.low %vm133_vm4, %vm128_vm3  ;;  %vm136_vm10 = vcmp.eq.s32.totalorder %v5426_v22, %v5403_v14  ;;  %vm141_vm11 = vcmp.eq.s32.totalorder %v5429_v23, %v5403_v14  ;;  %vm138_vm13 = vcmp.eq.s32.totalorder %v5426_v22, %v5416_v18  ;;  %vm143_vm14 = vcmp.eq.s32.totalorder %v5429_v23, %v5416_v18 }
  0x42   :  { %4385 = vmatprep.subr.msk.bf16.mxu1 %vm4384_vm7, %v5310_v27  ;;  %vm4322_vm12 = vmpackc.low %vm130_vm6, %vm125_vm5  ;;  %vm135_vm0 = vcmp.eq.s32.totalorder %v5426_v22, %v5414_v17  ;;  %vm140_vm1 = vcmp.eq.s32.totalorder %v5429_v23, %v5414_v17  ;;  %vm137_vm3 = vcmp.eq.s32.totalorder %v5426_v22, %v5423_v21  ;;  %vm142_vm4 = vcmp.eq.s32.totalorder %v5429_v23, %v5423_v21 }
  0x43   :  { %4323 = vmatpush1.bf16.msk.msra.mxu0 %vm4322_vm12, %v5310_v27  ;;  %vm4386_vm15 = vmpackc.low %vm132_vm9, %vm127_vm8  ;;  %vm146_vm6 = vcmp.eq.s32.totalorder %v5439_v25, %v5403_v14  ;;  %vm151_vm7 = vcmp.eq.s32.totalorder %v5442_v26, %v5403_v14  ;;  %v5485_v29 = vadd.s32 56, %v5380_v1  ;;  %vm148_vm9 = vcmp.eq.s32.totalorder %v5439_v25, %v5416_v18 }
  0x44   :  { %4387 = vmatpush1.bf16.msk.msra.mxu1 %vm4386_vm15, %v5310_v27  ;;  %vm4324_vm2 = vmpackc.low %vm141_vm11, %vm136_vm10  ;;  %vm153_vm10 = vcmp.eq.s32.totalorder %v5442_v26, %v5416_v18  ;;  %vm145_vm12 = vcmp.eq.s32.totalorder %v5439_v25, %v5414_v17  ;;  %vm147_vm15 = vcmp.eq.s32.totalorder %v5439_v25, %v5423_v21  ;;  %v5508_v30 = vadd.s32 64, %v5380_v1 }
  0x45   :  { %4325 = vmatprep.subr.msk.bf16.mxu0 %vm4324_vm2, %v5310_v27  ;;  %vm4388_vm5 = vmpackc.low %vm143_vm14, %vm138_vm13  ;;  %vm150_vm13 = vcmp.eq.s32.totalorder %v5442_v26, %v5414_v17  ;;  %vm156_vm2 = vcmp.eq.s32.totalorder %v5482_v28, %v5403_v14  ;;  %v5511_v31 = vadd.s32 72, %v5380_v1  ;;  %v5534_v32 = vadd.s32 80, %v5380_v1 }
  0x46   :  { %4389 = vmatprep.subr.msk.bf16.mxu1 %vm4388_vm5, %v5310_v27  ;;  %vm4326_vm8 = vmpackc.low %vm140_vm1, %vm135_vm0  ;;  %vm152_vm0 = vcmp.eq.s32.totalorder %v5442_v26, %v5423_v21  ;;  %vm158_vm5 = vcmp.eq.s32.totalorder %v5482_v28, %v5416_v18  ;;  %v5537_v33 = vadd.s32 88, %v5380_v1  ;;  %v5560_v34 = vadd.s32 96, %v5380_v1 }
  0x47   :  { %4327 = vmatpush1.bf16.msk.msra.mxu0 %vm4326_vm8, %v5310_v27  ;;  %vm4390_vm11 = vmpackc.low %vm142_vm4, %vm137_vm3  ;;  %vm161_vm3 = vcmp.eq.s32.totalorder %v5485_v29, %v5403_v14  ;;  %vm155_vm8 = vcmp.eq.s32.totalorder %v5482_v28, %v5414_v17  ;;  %v5563_v35 = vadd.s32 104, %v5380_v1  ;;  %v5586_v36 = vadd.s32 112, %v5380_v1 }
  0x48   :  { %4391 = vmatpush1.bf16.msk.msra.mxu1 %vm4390_vm11, %v5310_v27  ;;  %vm4328_vm14 = vmpackc.low %vm151_vm7, %vm146_vm6  ;;  %vm163_vm6 = vcmp.eq.s32.totalorder %v5485_v29, %v5416_v18  ;;  %vm157_vm11 = vcmp.eq.s32.totalorder %v5482_v28, %v5423_v21  ;;  %v5589_v37 = vadd.s32 120, %v5380_v1  ;;  %v5612_v38 = vadd.s32 128, %v5380_v1 }
  0x49   :  { %4329 = vmatprep.subr.msk.bf16.mxu0 %vm4328_vm14, %v5310_v27  ;;  %vm4392_vm1 = vmpackc.low %vm153_vm10, %vm148_vm9  ;;  %vm160_vm9 = vcmp.eq.s32.totalorder %v5485_v29, %v5414_v17  ;;  %vm166_vm14 = vcmp.eq.s32.totalorder %v5508_v30, %v5403_v14  ;;  %v5615_v39 = vadd.s32 136, %v5380_v1  ;;  %v5638_v40 = vadd.s32 144, %v5380_v1 }
  0x4a   :  { %4393 = vmatprep.subr.msk.bf16.mxu1 %vm4392_vm1, %v5310_v27  ;;  %vm4330_vm4 = vmpackc.low %vm150_vm13, %vm145_vm12  ;;  %vm162_vm12 = vcmp.eq.s32.totalorder %v5485_v29, %v5423_v21  ;;  %vm168_vm1 = vcmp.eq.s32.totalorder %v5508_v30, %v5416_v18  ;;  %v5641_v41 = vadd.s32 152, %v5380_v1  ;;  %v5664_v42 = vadd.s32 160, %v5380_v1 }
  0x4b   :  { %4331 = vmatpush1.bf16.msk.msra.mxu0 %vm4330_vm4, %v5310_v27  ;;  %vm4394_vm7 = vmpackc.low %vm152_vm0, %vm147_vm15  ;;  %vm171_vm15 = vcmp.eq.s32.totalorder %v5511_v31, %v5403_v14  ;;  %vm165_vm4 = vcmp.eq.s32.totalorder %v5508_v30, %v5414_v17  ;;  %v5667_v43 = vadd.s32 168, %v5380_v1  ;;  %v5690_v44 = vadd.s32 176, %v5380_v1 }
  0x4c   :  { %4395 = vmatpush1.bf16.msk.msra.mxu1 %vm4394_vm7, %v5310_v27  ;;  %vm4332_vm10 = vmpackc.low %vm161_vm3, %vm156_vm2  ;;  %vm173_vm2 = vcmp.eq.s32.totalorder %v5511_v31, %v5416_v18  ;;  %vm167_vm7 = vcmp.eq.s32.totalorder %v5508_v30, %v5423_v21  ;;  %v5693_v45 = vadd.s32 184, %v5380_v1  ;;  %v5716_v46 = vadd.s32 192, %v5380_v1 }
  0x4d   :  { %4333 = vmatprep.subr.msk.bf16.mxu0 %vm4332_vm10, %v5310_v27  ;;  %vm4396_vm13 = vmpackc.low %vm163_vm6, %vm158_vm5  ;;  %vm170_vm5 = vcmp.eq.s32.totalorder %v5511_v31, %v5414_v17  ;;  %vm176_vm10 = vcmp.eq.s32.totalorder %v5534_v32, %v5403_v14  ;;  %v5719_v47 = vadd.s32 200, %v5380_v1  ;;  %v5742_v48 = vadd.s32 208, %v5380_v1 }
  0x4e   :  { %4397 = vmatprep.subr.msk.bf16.mxu1 %vm4396_vm13, %v5310_v27  ;;  %vm4334_vm0 = vmpackc.low %vm160_vm9, %vm155_vm8  ;;  %vm172_vm8 = vcmp.eq.s32.totalorder %v5511_v31, %v5423_v21  ;;  %vm178_vm13 = vcmp.eq.s32.totalorder %v5534_v32, %v5416_v18  ;;  %v5745_v49 = vadd.s32 216, %v5380_v1  ;;  %v5768_v50 = vadd.s32 224, %v5380_v1 }
  0x4f   :  { %4335 = vmatpush1.bf16.msk.msra.mxu0 %vm4334_vm0, %v5310_v27  ;;  %vm4398_vm3 = vmpackc.low %vm162_vm12, %vm157_vm11  ;;  %vm181_vm11 = vcmp.eq.s32.totalorder %v5537_v33, %v5403_v14  ;;  %vm175_vm0 = vcmp.eq.s32.totalorder %v5534_v32, %v5414_v17  ;;  %v5771_v51 = vadd.s32 232, %v5380_v1  ;;  %v5794_v52 = vadd.s32 240, %v5380_v1 }
  0x50   :  { %4399 = vmatpush1.bf16.msk.msra.mxu1 %vm4398_vm3, %v5310_v27  ;;  %vm4336_vm6 = vmpackc.low %vm171_vm15, %vm166_vm14  ;;  %vm183_vm14 = vcmp.eq.s32.totalorder %v5537_v33, %v5416_v18  ;;  %vm177_vm3 = vcmp.eq.s32.totalorder %v5534_v32, %v5423_v21  ;;  %v5797_v53 = vadd.s32 248, %v5380_v1  ;;  %v5800_v54 = vsub.s32 5, %v5380_v1 }
  0x51   :  { %4337 = vmatprep.subr.msk.bf16.mxu0 %vm4336_vm6, %v5310_v27  ;;  %vm4400_vm9 = vmpackc.low %vm173_vm2, %vm168_vm1  ;;  %vm180_vm1 = vcmp.eq.s32.totalorder %v5537_v33, %v5414_v17  ;;  %vm186_vm6 = vcmp.eq.s32.totalorder %v5560_v34, %v5403_v14 }
  0x52   :  { %4401 = vmatprep.subr.msk.bf16.mxu1 %vm4400_vm9, %v5310_v27  ;;  %vm4338_vm12 = vmpackc.low %vm170_vm5, %vm165_vm4  ;;  %vm182_vm4 = vcmp.eq.s32.totalorder %v5537_v33, %v5423_v21  ;;  %vm188_vm9 = vcmp.eq.s32.totalorder %v5560_v34, %v5416_v18  ;;  %v5825_v55 = vrot.slane %v101_v5, %v5800_v54  ;;  %v5839_v56 = vrot.slane %v5382_v2, %v5800_v54  ;;  %v6332_v2 = vld [vmem:[#allocation3 + $0x8] sm:$0xff] }
  0x53   :  { %4339 = vmatpush1.bf16.msk.msra.mxu0 %vm4338_vm12, %v5310_v27  ;;  %vm4402_vm15 = vmpackc.low %vm172_vm8, %vm167_vm7  ;;  %vm191_vm7 = vcmp.eq.s32.totalorder %v5563_v35, %v5403_v14  ;;  %vm185_vm12 = vcmp.eq.s32.totalorder %v5560_v34, %v5414_v17  ;;  %v6012_v61 = vrot.slane %v745_v60, %v5800_v54  ;;  %v6027_v62 = vrot.slane %v102_v10, %v5800_v54 }
  0x54   :  { %4403 = vmatpush1.bf16.msk.msra.mxu1 %vm4402_vm15, %v5310_v27  ;;  %vm4340_vm2 = vmpackc.low %vm181_vm11, %vm176_vm10  ;;  %vm193_vm10 = vcmp.eq.s32.totalorder %v5563_v35, %v5416_v18  ;;  %vm187_vm15 = vcmp.eq.s32.totalorder %v5560_v34, %v5423_v21  ;;  %v6186_v63 = vrot.slane %v746_v11, %v5800_v54  ;;  %v1386_v3 = vrot.slane %v6332_v2, 1 }
  0x55   :  { %4341 = vmatprep.subr.msk.bf16.mxu0 %vm4340_vm2, %v5310_v27  ;;  %vm4404_vm5 = vmpackc.low %vm183_vm14, %vm178_vm13  ;;  %vm190_vm13 = vcmp.eq.s32.totalorder %v5563_v35, %v5414_v17  ;;  %vm196_vm2 = vcmp.eq.s32.totalorder %v5586_v36, %v5403_v14  ;;  %v1387_v4 = vrot.slane %v6332_v2, 2  ;;  %v6379_v8 = vrot.slane %v6332_v2, %v5398_v12 }
  0x56   :  { %4405 = vmatprep.subr.msk.bf16.mxu1 %vm4404_vm5, %v5310_v27  ;;  %vm4342_vm8 = vmpackc.low %vm180_vm1, %vm175_vm0  ;;  %vm192_vm0 = vcmp.eq.s32.totalorder %v5563_v35, %v5423_v21  ;;  %vm198_vm5 = vcmp.eq.s32.totalorder %v5586_v36, %v5416_v18  ;;  %v6357_v5 = vrot.slane %v1386_v3, %v5398_v12 }
  0x57   :  { %4343 = vmatpush1.bf16.msk.msra.mxu0 %vm4342_vm8, %v5310_v27  ;;  %vm4406_vm11 = vmpackc.low %vm182_vm4, %vm177_vm3  ;;  %vm201_vm3 = vcmp.eq.s32.totalorder %v5589_v37, %v5403_v14  ;;  %vm195_vm8 = vcmp.eq.s32.totalorder %v5586_v36, %v5414_v17  ;;  %v6386_v7 = vrot.slane %v1387_v4, %v5398_v12 }
  0x58   :  { %4407 = vmatpush1.bf16.msk.msra.mxu1 %vm4406_vm11, %v5310_v27  ;;  %vm4344_vm14 = vmpackc.low %vm191_vm7, %vm186_vm6  ;;  %vm203_vm6 = vcmp.eq.s32.totalorder %v5589_v37, %v5416_v18  ;;  %vm197_vm11 = vcmp.eq.s32.totalorder %v5586_v36, %v5423_v21 }
  0x59   :  { %4345 = vmatprep.subr.msk.bf16.mxu0 %vm4344_vm14, %v5310_v27  ;;  %vm4408_vm1 = vmpackc.low %vm193_vm10, %vm188_vm9  ;;  %vm200_vm9 = vcmp.eq.s32.totalorder %v5589_v37, %v5414_v17  ;;  %vm206_vm14 = vcmp.eq.s32.totalorder %v5612_v38, %v5403_v14 }
  0x5a   :  { %4409 = vmatprep.subr.msk.bf16.mxu1 %vm4408_vm1, %v5310_v27  ;;  %vm4346_vm4 = vmpackc.low %vm190_vm13, %vm185_vm12  ;;  %vm202_vm12 = vcmp.eq.s32.totalorder %v5589_v37, %v5423_v21  ;;  %vm208_vm1 = vcmp.eq.s32.totalorder %v5612_v38, %v5416_v18 }
  0x5b   :  { %4347 = vmatpush1.bf16.msk.msra.mxu0 %vm4346_vm4, %v5310_v27  ;;  %vm4410_vm7 = vmpackc.low %vm192_vm0, %vm187_vm15  ;;  %vm211_vm15 = vcmp.eq.s32.totalorder %v5615_v39, %v5403_v14  ;;  %vm205_vm4 = vcmp.eq.s32.totalorder %v5612_v38, %v5414_v17 }
  0x5c   :  { %4411 = vmatpush1.bf16.msk.msra.mxu1 %vm4410_vm7, %v5310_v27  ;;  %vm4348_vm10 = vmpackc.low %vm201_vm3, %vm196_vm2  ;;  %vm213_vm2 = vcmp.eq.s32.totalorder %v5615_v39, %v5416_v18  ;;  %vm207_vm7 = vcmp.eq.s32.totalorder %v5612_v38, %v5423_v21 }
  0x5d   :  { %4349 = vmatprep.subr.msk.bf16.mxu0 %vm4348_vm10, %v5310_v27  ;;  %vm4412_vm13 = vmpackc.low %vm203_vm6, %vm198_vm5  ;;  %vm210_vm5 = vcmp.eq.s32.totalorder %v5615_v39, %v5414_v17  ;;  %vm216_vm10 = vcmp.eq.s32.totalorder %v5638_v40, %v5403_v14 }
  0x5e   :  { %4413 = vmatprep.subr.msk.bf16.mxu1 %vm4412_vm13, %v5310_v27  ;;  %vm4350_vm0 = vmpackc.low %vm200_vm9, %vm195_vm8  ;;  %vm212_vm8 = vcmp.eq.s32.totalorder %v5615_v39, %v5423_v21  ;;  %vm218_vm13 = vcmp.eq.s32.totalorder %v5638_v40, %v5416_v18 }
  0x5f   :  { %4351 = vmatpush1.bf16.msk.msra.mxu0 %vm4350_vm0, %v5310_v27  ;;  %vm4414_vm3 = vmpackc.low %vm202_vm12, %vm197_vm11  ;;  %vm221_vm11 = vcmp.eq.s32.totalorder %v5641_v41, %v5403_v14  ;;  %vm215_vm0 = vcmp.eq.s32.totalorder %v5638_v40, %v5414_v17 }
  0x60   :  { %4415 = vmatpush1.bf16.msk.msra.mxu1 %vm4414_vm3, %v5310_v27  ;;  %vm4352_vm6 = vmpackc.low %vm211_vm15, %vm206_vm14  ;;  %vm223_vm14 = vcmp.eq.s32.totalorder %v5641_v41, %v5416_v18  ;;  %vm217_vm3 = vcmp.eq.s32.totalorder %v5638_v40, %v5423_v21 }
  0x61   :  { %4353 = vmatprep.subr.msk.bf16.mxu0 %vm4352_vm6, %v5310_v27  ;;  %vm4416_vm9 = vmpackc.low %vm213_vm2, %vm208_vm1  ;;  %vm220_vm1 = vcmp.eq.s32.totalorder %v5641_v41, %v5414_v17  ;;  %vm226_vm6 = vcmp.eq.s32.totalorder %v5664_v42, %v5403_v14 }
  0x62   :  { %4417 = vmatprep.subr.msk.bf16.mxu1 %vm4416_vm9, %v5310_v27  ;;  %vm4354_vm12 = vmpackc.low %vm210_vm5, %vm205_vm4  ;;  %vm222_vm4 = vcmp.eq.s32.totalorder %v5641_v41, %v5423_v21  ;;  %vm228_vm9 = vcmp.eq.s32.totalorder %v5664_v42, %v5416_v18 }
  0x63   :  { %4355 = vmatpush1.bf16.msk.msra.mxu0 %vm4354_vm12, %v5310_v27  ;;  %vm4418_vm15 = vmpackc.low %vm212_vm8, %vm207_vm7  ;;  %vm231_vm7 = vcmp.eq.s32.totalorder %v5667_v43, %v5403_v14  ;;  %vm225_vm12 = vcmp.eq.s32.totalorder %v5664_v42, %v5414_v17 }
  0x64   :  { %4419 = vmatpush1.bf16.msk.msra.mxu1 %vm4418_vm15, %v5310_v27  ;;  %vm4356_vm2 = vmpackc.low %vm221_vm11, %vm216_vm10  ;;  %vm233_vm10 = vcmp.eq.s32.totalorder %v5667_v43, %v5416_v18  ;;  %vm227_vm15 = vcmp.eq.s32.totalorder %v5664_v42, %v5423_v21 }
  0x65   :  { %4357 = vmatprep.subr.msk.bf16.mxu0 %vm4356_vm2, %v5310_v27  ;;  %vm4420_vm5 = vmpackc.low %vm223_vm14, %vm218_vm13  ;;  %vm230_vm13 = vcmp.eq.s32.totalorder %v5667_v43, %v5414_v17  ;;  %vm236_vm2 = vcmp.eq.s32.totalorder %v5690_v44, %v5403_v14 }
  0x66   :  { %4421 = vmatprep.subr.msk.bf16.mxu1 %vm4420_vm5, %v5310_v27  ;;  %vm4358_vm8 = vmpackc.low %vm220_vm1, %vm215_vm0  ;;  %vm232_vm0 = vcmp.eq.s32.totalorder %v5667_v43, %v5423_v21  ;;  %vm238_vm5 = vcmp.eq.s32.totalorder %v5690_v44, %v5416_v18 }
  0x67   :  { %4359 = vmatpush1.bf16.msk.msra.mxu0 %vm4358_vm8, %v5310_v27  ;;  %vm4422_vm11 = vmpackc.low %vm222_vm4, %vm217_vm3  ;;  %vm241_vm3 = vcmp.eq.s32.totalorder %v5693_v45, %v5403_v14  ;;  %vm235_vm8 = vcmp.eq.s32.totalorder %v5690_v44, %v5414_v17 }
  0x68   :  { %4423 = vmatpush1.bf16.msk.msra.mxu1 %vm4422_vm11, %v5310_v27  ;;  %vm4360_vm14 = vmpackc.low %vm231_vm7, %vm226_vm6  ;;  %vm243_vm6 = vcmp.eq.s32.totalorder %v5693_v45, %v5416_v18  ;;  %vm237_vm11 = vcmp.eq.s32.totalorder %v5690_v44, %v5423_v21 }
  0x69   :  { %4361 = vmatprep.subr.msk.bf16.mxu0 %vm4360_vm14, %v5310_v27  ;;  %vm4424_vm1 = vmpackc.low %vm233_vm10, %vm228_vm9  ;;  %vm240_vm9 = vcmp.eq.s32.totalorder %v5693_v45, %v5414_v17  ;;  %vm246_vm14 = vcmp.eq.s32.totalorder %v5716_v46, %v5403_v14 }
  0x6a   :  { %4425 = vmatprep.subr.msk.bf16.mxu1 %vm4424_vm1, %v5310_v27  ;;  %vm4362_vm4 = vmpackc.low %vm230_vm13, %vm225_vm12  ;;  %vm242_vm12 = vcmp.eq.s32.totalorder %v5693_v45, %v5423_v21  ;;  %vm248_vm1 = vcmp.eq.s32.totalorder %v5716_v46, %v5416_v18 }
  0x6b   :  { %4363 = vmatpush1.bf16.msk.msra.mxu0 %vm4362_vm4, %v5310_v27  ;;  %vm4426_vm7 = vmpackc.low %vm232_vm0, %vm227_vm15  ;;  %vm251_vm15 = vcmp.eq.s32.totalorder %v5719_v47, %v5403_v14  ;;  %vm245_vm4 = vcmp.eq.s32.totalorder %v5716_v46, %v5414_v17 }
  0x6c   :  { %4427 = vmatpush1.bf16.msk.msra.mxu1 %vm4426_vm7, %v5310_v27  ;;  %vm4364_vm10 = vmpackc.low %vm241_vm3, %vm236_vm2  ;;  %vm253_vm2 = vcmp.eq.s32.totalorder %v5719_v47, %v5416_v18  ;;  %vm247_vm7 = vcmp.eq.s32.totalorder %v5716_v46, %v5423_v21 }
  0x6d   :  { %4365 = vmatprep.subr.msk.bf16.mxu0 %vm4364_vm10, %v5310_v27  ;;  %vm4428_vm13 = vmpackc.low %vm243_vm6, %vm238_vm5  ;;  %vm250_vm5 = vcmp.eq.s32.totalorder %v5719_v47, %v5414_v17  ;;  %vm256_vm10 = vcmp.eq.s32.totalorder %v5742_v48, %v5403_v14 }
  0x6e   :  { %4429 = vmatprep.subr.msk.bf16.mxu1 %vm4428_vm13, %v5310_v27  ;;  %vm4366_vm0 = vmpackc.low %vm240_vm9, %vm235_vm8  ;;  %vm252_vm8 = vcmp.eq.s32.totalorder %v5719_v47, %v5423_v21  ;;  %vm258_vm13 = vcmp.eq.s32.totalorder %v5742_v48, %v5416_v18 }
  0x6f   :  { %4367 = vmatpush1.bf16.msk.msra.mxu0 %vm4366_vm0, %v5310_v27  ;;  %vm4430_vm3 = vmpackc.low %vm242_vm12, %vm237_vm11  ;;  %vm261_vm11 = vcmp.eq.s32.totalorder %v5745_v49, %v5403_v14  ;;  %vm255_vm0 = vcmp.eq.s32.totalorder %v5742_v48, %v5414_v17 }
  0x70   :  { %4431 = vmatpush1.bf16.msk.msra.mxu1 %vm4430_vm3, %v5310_v27  ;;  %vm4368_vm6 = vmpackc.low %vm251_vm15, %vm246_vm14  ;;  %vm263_vm14 = vcmp.eq.s32.totalorder %v5745_v49, %v5416_v18  ;;  %vm257_vm3 = vcmp.eq.s32.totalorder %v5742_v48, %v5423_v21 }
  0x71   :  { %4369 = vmatprep.subr.msk.bf16.mxu0 %vm4368_vm6, %v5310_v27  ;;  %vm4432_vm9 = vmpackc.low %vm253_vm2, %vm248_vm1  ;;  %vm260_vm1 = vcmp.eq.s32.totalorder %v5745_v49, %v5414_v17  ;;  %vm266_vm6 = vcmp.eq.s32.totalorder %v5768_v50, %v5403_v14 }
  0x72   :  { %4433 = vmatprep.subr.msk.bf16.mxu1 %vm4432_vm9, %v5310_v27  ;;  %vm4370_vm12 = vmpackc.low %vm250_vm5, %vm245_vm4  ;;  %vm262_vm4 = vcmp.eq.s32.totalorder %v5745_v49, %v5423_v21  ;;  %vm268_vm9 = vcmp.eq.s32.totalorder %v5768_v50, %v5416_v18 }
  0x73   :  { %4371 = vmatpush1.bf16.msk.msra.mxu0 %vm4370_vm12, %v5310_v27  ;;  %vm4434_vm15 = vmpackc.low %vm252_vm8, %vm247_vm7  ;;  %vm271_vm7 = vcmp.eq.s32.totalorder %v5771_v51, %v5403_v14  ;;  %vm265_vm12 = vcmp.eq.s32.totalorder %v5768_v50, %v5414_v17 }
  0x74   :  { %4435 = vmatpush1.bf16.msk.msra.mxu1 %vm4434_vm15, %v5310_v27  ;;  %vm4372_vm2 = vmpackc.low %vm261_vm11, %vm256_vm10  ;;  %vm273_vm10 = vcmp.eq.s32.totalorder %v5771_v51, %v5416_v18  ;;  %vm267_vm15 = vcmp.eq.s32.totalorder %v5768_v50, %v5423_v21 }
  0x75   :  { %4373 = vmatprep.subr.msk.bf16.mxu0 %vm4372_vm2, %v5310_v27  ;;  %vm4436_vm5 = vmpackc.low %vm263_vm14, %vm258_vm13  ;;  %vm270_vm13 = vcmp.eq.s32.totalorder %v5771_v51, %v5414_v17  ;;  %vm276_vm2 = vcmp.eq.s32.totalorder %v5794_v52, %v5403_v14 }
  0x76   :  { %4437 = vmatprep.subr.msk.bf16.mxu1 %vm4436_vm5, %v5310_v27  ;;  %vm4374_vm8 = vmpackc.low %vm260_vm1, %vm255_vm0  ;;  %vm272_vm0 = vcmp.eq.s32.totalorder %v5771_v51, %v5423_v21  ;;  %vm278_vm5 = vcmp.eq.s32.totalorder %v5794_v52, %v5416_v18 }
  0x77   :  { %4375 = vmatpush1.bf16.msk.msra.mxu0 %vm4374_vm8, %v5310_v27  ;;  %vm4438_vm11 = vmpackc.low %vm262_vm4, %vm257_vm3  ;;  %vm281_vm3 = vcmp.eq.s32.totalorder %v5797_v53, %v5403_v14  ;;  %vm275_vm8 = vcmp.eq.s32.totalorder %v5794_v52, %v5414_v17  ;;  %v6789_v14 = vld [vmem:[#allocation8 + $0x18] sm:$0xf] }
  0x78   :  { %4439 = vmatpush1.bf16.msk.msra.mxu1 %vm4438_vm11, %v5310_v27  ;;  %vm4376_vm14 = vmpackc.low %vm271_vm7, %vm266_vm6  ;;  %vm283_vm6 = vcmp.eq.s32.totalorder %v5797_v53, %v5416_v18  ;;  %vm277_vm11 = vcmp.eq.s32.totalorder %v5794_v52, %v5423_v21 }
  0x79   :  { %4377 = vmatprep.subr.msk.bf16.mxu0 %vm4376_vm14, %v5310_v27  ;;  %vm4440_vm1 = vmpackc.low %vm273_vm10, %vm268_vm9  ;;  %vm280_vm9 = vcmp.eq.s32.totalorder %v5797_v53, %v5414_v17  ;;  %vm209_vm14 = vcmp.eq.s32.totalorder %v5612_v38, %v5392_v9  ;;  %v6802_v17 = vld [vmem:[#allocation8 + $0x10] sm:$0xf] }
  0x7a   :  { %4441 = vmatprep.subr.msk.bf16.mxu1 %vm4440_vm1, %v5310_v27  ;;  %vm4378_vm4 = vmpackc.low %vm270_vm13, %vm265_vm12  ;;  %vm282_vm12 = vcmp.eq.s32.totalorder %v5797_v53, %v5423_v21  ;;  %vm768_vm1 = vcmp.eq.s32.totalorder %v5380_v1, %v5825_v55 }
  0x7b   :  { %4379 = vmatpush1.bf16.msk.msra.mxu0 %vm4378_vm4, %v5310_v27  ;;  %vm4442_vm7 = vmpackc.low %vm272_vm0, %vm267_vm15  ;;  %vm214_vm15 = vcmp.eq.s32.totalorder %v5615_v39, %v5392_v9  ;;  %vm129_vm4 = vcmp.eq.s32.totalorder %v5380_v1, %v5392_v9 }
  0x7c   :  { %4443 = vmatpush1.bf16.msk.msra.mxu1 %vm4442_vm7, %v5310_v27  ;;  %vm4380_vm10 = vmpackc.low %vm281_vm3, %vm276_vm2  ;;  %vm773_vm2 = vcmp.eq.s32.totalorder %v5411_v16, %v5825_v55  ;;  %vm767_vm7 = vcmp.eq.s32.totalorder %v5380_v1, %v5839_v56 }
  0x7d   :  { %4381 = vmatprep.subr.msk.bf16.mxu0 %vm4380_vm10, %v5310_v27  ;;  %vm4444_vm13 = vmpackc.low %vm283_vm6, %vm278_vm5  ;;  %vm134_vm5 = vcmp.eq.s32.totalorder %v5411_v16, %v5392_v9  ;;  %vm219_vm10 = vcmp.eq.s32.totalorder %v5638_v40, %v5392_v9 }
  0x7e   :  { %4445 = vmatprep.subr.msk.bf16.mxu1 %vm4444_vm13, %v5310_v27  ;;  %vm4382_vm0 = vmpackc.low %vm280_vm9, %vm275_vm8  ;;  %vm772_vm8 = vcmp.eq.s32.totalorder %v5411_v16, %v5839_v56  ;;  %vm778_vm13 = vcmp.eq.s32.totalorder %v5426_v22, %v5825_v55 }
  0x7f   :  { %4383 = vmatpush1.bf16.msk.msra.mxu0 %vm4382_vm0, %v5310_v27  ;;  %vm4446_vm3 = vmpackc.low %vm282_vm12, %vm277_vm11  ;;  %vm224_vm11 = vcmp.eq.s32.totalorder %v5641_v41, %v5392_v9  ;;  %vm139_vm0 = vcmp.eq.s32.totalorder %v5426_v22, %v5392_v9 }
  0x80   :  { %4447 = vmatpush1.bf16.msk.msra.mxu1 %vm4446_vm3, %v5310_v27  ;;  %vm4448_vm6 = vmpackc.low %vm214_vm15, %vm209_vm14  ;;  %vm783_vm14 = vcmp.eq.s32.totalorder %v5429_v23, %v5825_v55  ;;  %vm777_vm3 = vcmp.eq.s32.totalorder %v5426_v22, %v5839_v56 }
  0x81   :  { %4449 = vmatprep.subr.msk.bf16.mxu0 %vm4448_vm6, %v5310_v27  ;;  %vm4480_vm9 = vmpackc.low %vm773_vm2, %vm768_vm1  ;;  %vm144_vm1 = vcmp.eq.s32.totalorder %v5429_v23, %v5392_v9  ;;  %vm229_vm6 = vcmp.eq.s32.totalorder %v5664_v42, %v5392_v9 }
  0x82   :  { %510 = vmatmul.mubr.f32.vlgmr.msra.gmra.mrb[0].mxu0 %v5857_v57  ;;  %4481 = vmatprep.subr.msk.bf16.mxu1 %vm4480_vm9, %v5310_v27  ;;  %vm4450_vm12 = vmpackc.low %vm134_vm5, %vm129_vm4  ;;  %vm782_vm4 = vcmp.eq.s32.totalorder %v5429_v23, %v5839_v56  ;;  %vm788_vm9 = vcmp.eq.s32.totalorder %v5439_v25, %v5825_v55 }
  0x83   :  { %587 = vmatmul.mubr.f32.vlgmr.msra.gmra.mrb[0].mxu1 %v5857_v57  ;;  %4451 = vmatpush3.bf16.msk.msra.mxu0 %vm4450_vm12, %v5310_v27  ;;  %vm4482_vm15 = vmpackc.low %vm772_vm8, %vm767_vm7  ;;  %vm234_vm7 = vcmp.eq.s32.totalorder %v5667_v43, %v5392_v9  ;;  %vm149_vm12 = vcmp.eq.s32.totalorder %v5439_v25, %v5392_v9 }
  0x84   :  { %4483 = vmatpush1.bf16.msk.msra.mxu1 %vm4482_vm15, %v5310_v27  ;;  %vm4452_vm2 = vmpackc.low %vm224_vm11, %vm219_vm10  ;;  %515 = vmatprep.mubr.f32.mxu0 %v5873_v58  ;;  %vm793_vm10 = vcmp.eq.s32.totalorder %v5442_v26, %v5825_v55  ;;  %vm787_vm15 = vcmp.eq.s32.totalorder %v5439_v25, %v5839_v56 }
  0x85   :  { %4453 = vmatprep.subr.msk.bf16.mxu0 %vm4452_vm2, %v5310_v27  ;;  %vm4484_vm5 = vmpackc.low %vm783_vm14, %vm778_vm13  ;;  %592 = vmatprep.mubr.f32.mxu1 %v5873_v58  ;;  %vm154_vm13 = vcmp.eq.s32.totalorder %v5442_v26, %v5392_v9  ;;  %vm239_vm2 = vcmp.eq.s32.totalorder %v5690_v44, %v5392_v9 }
  0x86   :  { %4485 = vmatprep.subr.msk.bf16.mxu1 %vm4484_vm5, %v5310_v27  ;;  %vm4454_vm8 = vmpackc.low %vm144_vm1, %vm139_vm0  ;;  %516 = vmatmul.mubr.f32.gmra.mrb[2].mxu0 %v5887_v59  ;;  %vm792_vm0 = vcmp.eq.s32.totalorder %v5442_v26, %v5839_v56  ;;  %vm798_vm5 = vcmp.eq.s32.totalorder %v5482_v28, %v5825_v55 }
  0x87   :  { %4455 = vmatpush3.bf16.msk.msra.mxu0 %vm4454_vm8, %v5310_v27  ;;  %vm4486_vm11 = vmpackc.low %vm782_vm4, %vm777_vm3  ;;  %663 = vmatprep.mubr.f32.mxu0 %v5387_v6  ;;  %vm244_vm3 = vcmp.eq.s32.totalorder %v5693_v45, %v5392_v9  ;;  %vm159_vm8 = vcmp.eq.s32.totalorder %v5482_v28, %v5392_v9 }
  0x88   :  { %4487 = vmatpush1.bf16.msk.msra.mxu1 %vm4486_vm11, %v5310_v27  ;;  %vm4456_vm14 = vmpackc.low %vm234_vm7, %vm229_vm6  ;;  %vm803_vm6 = vcmp.eq.s32.totalorder %v5485_v29, %v5825_v55  ;;  %vm797_vm11 = vcmp.eq.s32.totalorder %v5482_v28, %v5839_v56 }
  0x89   :  { %4457 = vmatprep.subr.msk.bf16.mxu0 %vm4456_vm14, %v5310_v27  ;;  %vm4488_vm1 = vmpackc.low %vm793_vm10, %vm788_vm9  ;;  %593 = vmatmul.mubr.f32.gmra.mrb[2].mxu1 %v5887_v59  ;;  %vm164_vm9 = vcmp.eq.s32.totalorder %v5485_v29, %v5392_v9  ;;  %vm249_vm14 = vcmp.eq.s32.totalorder %v5716_v46, %v5392_v9 }
  0x8a   :  { %4489 = vmatprep.subr.msk.bf16.mxu1 %vm4488_vm1, %v5310_v27  ;;  %vm4458_vm4 = vmpackc.low %vm154_vm13, %vm149_vm12  ;;  %1151 = vmatprep.mubr.f32.mxu1 %v5387_v6  ;;  %vm802_vm12 = vcmp.eq.s32.totalorder %v5485_v29, %v5839_v56  ;;  %vm808_vm1 = vcmp.eq.s32.totalorder %v5508_v30, %v5825_v55 }
  0x8b   :  { %4459 = vmatpush3.bf16.msk.msra.mxu0 %vm4458_vm4, %v5310_v27  ;;  %vm4490_vm7 = vmpackc.low %vm792_vm0, %vm787_vm15  ;;  %vm254_vm15 = vcmp.eq.s32.totalorder %v5719_v47, %v5392_v9  ;;  %vm169_vm4 = vcmp.eq.s32.totalorder %v5508_v30, %v5392_v9 }
  0x8c   :  { %4491 = vmatpush1.bf16.msk.msra.mxu1 %vm4490_vm7, %v5310_v27  ;;  %vm4460_vm10 = vmpackc.low %vm244_vm3, %vm239_vm2  ;;  %vm813_vm2 = vcmp.eq.s32.totalorder %v5511_v31, %v5825_v55  ;;  %vm807_vm7 = vcmp.eq.s32.totalorder %v5508_v30, %v5839_v56 }
  0x8d   :  { %4461 = vmatprep.subr.msk.bf16.mxu0 %vm4460_vm10, %v5310_v27  ;;  %vm4492_vm13 = vmpackc.low %vm803_vm6, %vm798_vm5  ;;  %vm174_vm5 = vcmp.eq.s32.totalorder %v5511_v31, %v5392_v9  ;;  %vm259_vm10 = vcmp.eq.s32.totalorder %v5742_v48, %v5392_v9 }
  0x8e   :  { %4493 = vmatprep.subr.msk.bf16.mxu1 %vm4492_vm13, %v5310_v27  ;;  %vm4462_vm0 = vmpackc.low %vm164_vm9, %vm159_vm8  ;;  %vm812_vm8 = vcmp.eq.s32.totalorder %v5511_v31, %v5839_v56  ;;  %vm818_vm13 = vcmp.eq.s32.totalorder %v5534_v32, %v5825_v55 }
  0x8f   :  { %4463 = vmatpush3.bf16.msk.msra.mxu0 %vm4462_vm0, %v5310_v27  ;;  %vm4494_vm3 = vmpackc.low %vm802_vm12, %vm797_vm11  ;;  %vm264_vm11 = vcmp.eq.s32.totalorder %v5745_v49, %v5392_v9  ;;  %vm179_vm0 = vcmp.eq.s32.totalorder %v5534_v32, %v5392_v9 }
  0x90   :  { %4495 = vmatpush1.bf16.msk.msra.mxu1 %vm4494_vm3, %v5310_v27  ;;  %vm4464_vm6 = vmpackc.low %vm254_vm15, %vm249_vm14  ;;  %vm823_vm14 = vcmp.eq.s32.totalorder %v5537_v33, %v5825_v55  ;;  %vm817_vm3 = vcmp.eq.s32.totalorder %v5534_v32, %v5839_v56 }
  0x91   :  { %4465 = vmatprep.subr.msk.bf16.mxu0 %vm4464_vm6, %v5310_v27  ;;  %vm4496_vm9 = vmpackc.low %vm813_vm2, %vm808_vm1  ;;  %vm184_vm1 = vcmp.eq.s32.totalorder %v5537_v33, %v5392_v9  ;;  %vm269_vm6 = vcmp.eq.s32.totalorder %v5768_v50, %v5392_v9 }
  0x92   :  { %4497 = vmatprep.subr.msk.bf16.mxu1 %vm4496_vm9, %v5310_v27  ;;  %vm4466_vm12 = vmpackc.low %vm174_vm5, %vm169_vm4  ;;  %vm822_vm4 = vcmp.eq.s32.totalorder %v5537_v33, %v5839_v56  ;;  %vm828_vm9 = vcmp.eq.s32.totalorder %v5560_v34, %v5825_v55 }
  0x93   :  { %4467 = vmatpush3.bf16.msk.msra.mxu0 %vm4466_vm12, %v5310_v27  ;;  %vm4498_vm15 = vmpackc.low %vm812_vm8, %vm807_vm7  ;;  %vm274_vm7 = vcmp.eq.s32.totalorder %v5771_v51, %v5392_v9  ;;  %vm189_vm12 = vcmp.eq.s32.totalorder %v5560_v34, %v5392_v9 }
  0x94   :  { %4499 = vmatpush1.bf16.msk.msra.mxu1 %vm4498_vm15, %v5310_v27  ;;  %vm4468_vm2 = vmpackc.low %vm264_vm11, %vm259_vm10  ;;  %vm833_vm10 = vcmp.eq.s32.totalorder %v5563_v35, %v5825_v55  ;;  %vm827_vm15 = vcmp.eq.s32.totalorder %v5560_v34, %v5839_v56 }
  0x95   :  { %4469 = vmatprep.subr.msk.bf16.mxu0 %vm4468_vm2, %v5310_v27  ;;  %vm4500_vm5 = vmpackc.low %vm823_vm14, %vm818_vm13  ;;  %vm194_vm13 = vcmp.eq.s32.totalorder %v5563_v35, %v5392_v9  ;;  %vm279_vm2 = vcmp.eq.s32.totalorder %v5794_v52, %v5392_v9 }
  0x96   :  { %4501 = vmatprep.subr.msk.bf16.mxu1 %vm4500_vm5, %v5310_v27  ;;  %vm4470_vm8 = vmpackc.low %vm184_vm1, %vm179_vm0  ;;  %vm832_vm0 = vcmp.eq.s32.totalorder %v5563_v35, %v5839_v56  ;;  %vm838_vm5 = vcmp.eq.s32.totalorder %v5586_v36, %v5825_v55 }
  0x97   :  { %4471 = vmatpush3.bf16.msk.msra.mxu0 %vm4470_vm8, %v5310_v27  ;;  %vm4502_vm11 = vmpackc.low %vm822_vm4, %vm817_vm3  ;;  %vm284_vm3 = vcmp.eq.s32.totalorder %v5797_v53, %v5392_v9  ;;  %vm199_vm8 = vcmp.eq.s32.totalorder %v5586_v36, %v5392_v9 }
  0x98   :  { %4503 = vmatpush1.bf16.msk.msra.mxu1 %vm4502_vm11, %v5310_v27  ;;  %vm4472_vm14 = vmpackc.low %vm274_vm7, %vm269_vm6  ;;  %vm843_vm6 = vcmp.eq.s32.totalorder %v5589_v37, %v5825_v55  ;;  %vm837_vm11 = vcmp.eq.s32.totalorder %v5586_v36, %v5839_v56 }
  0x99   :  { %4473 = vmatprep.subr.msk.bf16.mxu0 %vm4472_vm14, %v5310_v27  ;;  %vm4504_vm1 = vmpackc.low %vm833_vm10, %vm828_vm9  ;;  %vm204_vm9 = vcmp.eq.s32.totalorder %v5589_v37, %v5392_v9  ;;  %vm848_vm14 = vcmp.eq.s32.totalorder %v5612_v38, %v5825_v55  ;;  %v6693_v9 = vld [vmem:[#allocation3 + $0x10] sm:$0xff] }
  0x9a   :  { %4505 = vmatprep.subr.msk.bf16.mxu1 %vm4504_vm1, %v5310_v27  ;;  %vm4474_vm4 = vmpackc.low %vm194_vm13, %vm189_vm12  ;;  %vm842_vm12 = vcmp.eq.s32.totalorder %v5589_v37, %v5839_v56  ;;  %vm770_vm1 = vcmp.eq.s32.totalorder %v5380_v1, %v6012_v61  ;;  %v2027_v10 = vrot.slane %v6693_v9, 1  ;;  %v2029_v18 = vrot.slane %v6693_v9, 3 }
  0x9b   :  { %4475 = vmatpush3.bf16.msk.msra.mxu0 %vm4474_vm4, %v5310_v27  ;;  %vm4506_vm7 = vmpackc.low %vm832_vm0, %vm827_vm15  ;;  %vm853_vm15 = vcmp.eq.s32.totalorder %v5615_v39, %v5825_v55  ;;  %vm847_vm4 = vcmp.eq.s32.totalorder %v5612_v38, %v5839_v56  ;;  %v2028_v19 = vrot.slane %v6693_v9, 2 }
  0x9c   :  { %4507 = vmatpush1.bf16.msk.msra.mxu1 %vm4506_vm7, %v5310_v27  ;;  %vm4476_vm10 = vmpackc.low %vm284_vm3, %vm279_vm2  ;;  %vm775_vm2 = vcmp.eq.s32.totalorder %v5411_v16, %v6012_v61  ;;  %vm769_vm7 = vcmp.eq.s32.totalorder %v5380_v1, %v6027_v62  ;;  %v6719_v11 = vrot.slane %v2027_v10, %v5419_v20  ;;  %v6919_v21 = vrot.slane %v2029_v18, %v5419_v20 }
  0x9d   :  { %4477 = vmatprep.subr.msk.bf16.mxu0 %vm4476_vm10, %v5310_v27  ;;  %vm4508_vm13 = vmpackc.low %vm843_vm6, %vm838_vm5  ;;  %vm852_vm5 = vcmp.eq.s32.totalorder %v5615_v39, %v5839_v56  ;;  %vm858_vm10 = vcmp.eq.s32.totalorder %v5638_v40, %v5825_v55  ;;  %v6933_v54 = vrot.slane %v2028_v19, %v5419_v20 }
  0x9e   :  { %4509 = vmatprep.subr.msk.bf16.mxu1 %vm4508_vm13, %v5310_v27  ;;  %vm4478_vm0 = vmpackc.low %vm204_vm9, %vm199_vm8  ;;  %vm774_vm8 = vcmp.eq.s32.totalorder %v5411_v16, %v6027_v62  ;;  %vm780_vm13 = vcmp.eq.s32.totalorder %v5426_v22, %v6012_v61 }
  0x9f   :  { %4479 = vmatpush3.bf16.msk.msra.mxu0 %vm4478_vm0, %v5310_v27  ;;  %vm4510_vm3 = vmpackc.low %vm842_vm12, %vm837_vm11  ;;  %vm863_vm11 = vcmp.eq.s32.totalorder %v5641_v41, %v5825_v55  ;;  %vm857_vm0 = vcmp.eq.s32.totalorder %v5638_v40, %v5839_v56 }
  0xa0   :  { %4511 = vmatpush1.bf16.msk.msra.mxu1 %vm4510_vm3, %v5310_v27  ;;  %vm4512_vm6 = vmpackc.low %vm853_vm15, %vm848_vm14  ;;  %vm785_vm14 = vcmp.eq.s32.totalorder %v5429_v23, %v6012_v61  ;;  %vm779_vm3 = vcmp.eq.s32.totalorder %v5426_v22, %v6027_v62 }
  0xa1   :  { %4513 = vmatprep.subr.msk.bf16.mxu1 %vm4512_vm6, %v5310_v27  ;;  %vm4544_vm9 = vmpackc.low %vm775_vm2, %vm770_vm1  ;;  %vm862_vm1 = vcmp.eq.s32.totalorder %v5641_v41, %v5839_v56  ;;  %vm868_vm6 = vcmp.eq.s32.totalorder %v5664_v42, %v5825_v55 }
  0xa2   :  { %664 = vmatmul.mubr.f32.vlgmr.msra.gmra.mrb[4].mxu0 %v5857_v57  ;;  %4545 = vmatprep.subr.msk.bf16.mxu0 %vm4544_vm9, %v5310_v27  ;;  %vm4514_vm12 = vmpackc.low %vm852_vm5, %vm847_vm4  ;;  %vm784_vm4 = vcmp.eq.s32.totalorder %v5429_v23, %v6027_v62  ;;  %vm790_vm9 = vcmp.eq.s32.totalorder %v5439_v25, %v6012_v61 }
  0xa3   :  { %vm4546_vm15 = vmpackc.low %vm774_vm8, %vm769_vm7  ;;  %668 = vmatprep.mubr.f32.mxu0 %v5873_v58  ;;  %vm873_vm7 = vcmp.eq.s32.totalorder %v5667_v43, %v5825_v55 }
  0xa4   :  { %4515 = vmatpush1.bf16.msk.msra.mxu1 %vm4514_vm12, %v5310_v27  ;;  %4547 = vmatpush1.bf16.msk.msra.mxu0 %vm4546_vm15, %v5310_v27  ;;  %vm4516_vm2 = vmpackc.low %vm863_vm11, %vm858_vm10  ;;  %vm795_vm10 = vcmp.eq.s32.totalorder %v5442_v26, %v6012_v61  ;;  %vm867_vm12 = vcmp.eq.s32.totalorder %v5664_v42, %v5839_v56  ;;  %vm789_vm15 = vcmp.eq.s32.totalorder %v5439_v25, %v6027_v62 }
  0xa5   :  { %4517 = vmatprep.subr.msk.bf16.mxu1 %vm4516_vm2, %v5310_v27  ;;  %vm4548_vm5 = vmpackc.low %vm785_vm14, %vm780_vm13  ;;  %vm872_vm13 = vcmp.eq.s32.totalorder %v5667_v43, %v5839_v56  ;;  %vm878_vm2 = vcmp.eq.s32.totalorder %v5690_v44, %v5825_v55 }
  0xa6   :  { %4549 = vmatprep.subr.msk.bf16.mxu0 %vm4548_vm5, %v5310_v27  ;;  %vm4518_vm8 = vmpackc.low %vm862_vm1, %vm857_vm0  ;;  %669 = vmatmul.mubr.f32.gmra.mrb[6].mxu0 %v5887_v59  ;;  %vm794_vm0 = vcmp.eq.s32.totalorder %v5442_v26, %v6027_v62  ;;  %vm800_vm5 = vcmp.eq.s32.totalorder %v5482_v28, %v6012_v61 }
  0xa7   :  { %vm4550_vm11 = vmpackc.low %vm784_vm4, %vm779_vm3  ;;  %1228 = vmatprep.mubr.f32.mxu0 %v5387_v6  ;;  %vm883_vm3 = vcmp.eq.s32.totalorder %v5693_v45, %v5825_v55  ;;  %v6367_v6 = vrot.slane %v745_v60, %v5398_v12  ;;  %v6732_v12 = vrot.slane %v6332_v2, %v5419_v20  ;;  %v7060_v20 = vld [vmem:[#allocation6] sm:$0xff] }
  0xa8   :  { %4519 = vmatpush1.bf16.msk.msra.mxu1 %vm4518_vm8, %v5310_v27  ;;  %4551 = vmatpush1.bf16.msk.msra.mxu0 %vm4550_vm11, %v5310_v27  ;;  %vm4520_vm14 = vmpackc.low %vm873_vm7, %vm868_vm6  ;;  %vm805_vm6 = vcmp.eq.s32.totalorder %v5485_v29, %v6012_v61  ;;  %vm877_vm8 = vcmp.eq.s32.totalorder %v5690_v44, %v5839_v56  ;;  %vm799_vm11 = vcmp.eq.s32.totalorder %v5482_v28, %v6027_v62 }
  0xa9   :  { %4521 = vmatprep.subr.msk.bf16.mxu1 %vm4520_vm14, %v5310_v27  ;;  %vm4552_vm1 = vmpackc.low %vm795_vm10, %vm790_vm9  ;;  %vm882_vm9 = vcmp.eq.s32.totalorder %v5693_v45, %v5839_v56  ;;  %vm888_vm14 = vcmp.eq.s32.totalorder %v5716_v46, %v5825_v55 }
  0xaa   :  { %4553 = vmatprep.subr.msk.bf16.mxu0 %vm4552_vm1, %v5310_v27  ;;  %vm4522_vm4 = vmpackc.low %vm872_vm13, %vm867_vm12  ;;  %vm804_vm12 = vcmp.eq.s32.totalorder %v5485_v29, %v6027_v62  ;;  %vm810_vm1 = vcmp.eq.s32.totalorder %v5508_v30, %v6012_v61 }
  0xab   :  { %vm4554_vm7 = vmpackc.low %vm794_vm0, %vm789_vm15  ;;  %vm893_vm15 = vcmp.eq.s32.totalorder %v5719_v47, %v5825_v55 }
  0xac   :  { %4523 = vmatpush1.bf16.msk.msra.mxu1 %vm4522_vm4, %v5310_v27  ;;  %4555 = vmatpush1.bf16.msk.msra.mxu0 %vm4554_vm7, %v5310_v27  ;;  %vm4524_vm10 = vmpackc.low %vm883_vm3, %vm878_vm2  ;;  %vm815_vm2 = vcmp.eq.s32.totalorder %v5511_v31, %v6012_v61  ;;  %vm887_vm4 = vcmp.eq.s32.totalorder %v5716_v46, %v5839_v56  ;;  %vm809_vm7 = vcmp.eq.s32.totalorder %v5508_v30, %v6027_v62 }
  0xad   :  { %4525 = vmatprep.subr.msk.bf16.mxu1 %vm4524_vm10, %v5310_v27  ;;  %vm4556_vm13 = vmpackc.low %vm805_vm6, %vm800_vm5  ;;  %vm892_vm5 = vcmp.eq.s32.totalorder %v5719_v47, %v5839_v56  ;;  %vm898_vm10 = vcmp.eq.s32.totalorder %v5742_v48, %v5825_v55 }
  0xae   :  { %4557 = vmatprep.subr.msk.bf16.mxu0 %vm4556_vm13, %v5310_v27  ;;  %vm4526_vm0 = vmpackc.low %vm882_vm9, %vm877_vm8  ;;  %vm814_vm8 = vcmp.eq.s32.totalorder %v5511_v31, %v6027_v62  ;;  %vm820_vm13 = vcmp.eq.s32.totalorder %v5534_v32, %v6012_v61 }
  0xaf   :  { %vm4558_vm3 = vmpackc.low %vm804_vm12, %vm799_vm11  ;;  %vm903_vm11 = vcmp.eq.s32.totalorder %v5745_v49, %v5825_v55 }
  0xb0   :  { %4527 = vmatpush1.bf16.msk.msra.mxu1 %vm4526_vm0, %v5310_v27  ;;  %4559 = vmatpush1.bf16.msk.msra.mxu0 %vm4558_vm3, %v5310_v27  ;;  %vm4528_vm6 = vmpackc.low %vm893_vm15, %vm888_vm14  ;;  %vm825_vm14 = vcmp.eq.s32.totalorder %v5537_v33, %v6012_v61  ;;  %vm897_vm0 = vcmp.eq.s32.totalorder %v5742_v48, %v5839_v56  ;;  %vm819_vm3 = vcmp.eq.s32.totalorder %v5534_v32, %v6027_v62 }
  0xb1   :  { %4529 = vmatprep.subr.msk.bf16.mxu1 %vm4528_vm6, %v5310_v27  ;;  %vm4560_vm9 = vmpackc.low %vm815_vm2, %vm810_vm1  ;;  %vm902_vm1 = vcmp.eq.s32.totalorder %v5745_v49, %v5839_v56  ;;  %vm908_vm6 = vcmp.eq.s32.totalorder %v5768_v50, %v5825_v55 }
  0xb2   :  { %4561 = vmatprep.subr.msk.bf16.mxu0 %vm4560_vm9, %v5310_v27  ;;  %vm4530_vm12 = vmpackc.low %vm892_vm5, %vm887_vm4  ;;  %vm824_vm4 = vcmp.eq.s32.totalorder %v5537_v33, %v6027_v62  ;;  %vm830_vm9 = vcmp.eq.s32.totalorder %v5560_v34, %v6012_v61 }
  0xb3   :  { %vm4562_vm15 = vmpackc.low %vm814_vm8, %vm809_vm7  ;;  %vm913_vm7 = vcmp.eq.s32.totalorder %v5771_v51, %v5825_v55 }
  0xb4   :  { %4531 = vmatpush1.bf16.msk.msra.mxu1 %vm4530_vm12, %v5310_v27  ;;  %4563 = vmatpush1.bf16.msk.msra.mxu0 %vm4562_vm15, %v5310_v27  ;;  %vm4532_vm2 = vmpackc.low %vm903_vm11, %vm898_vm10  ;;  %vm835_vm10 = vcmp.eq.s32.totalorder %v5563_v35, %v6012_v61  ;;  %vm907_vm12 = vcmp.eq.s32.totalorder %v5768_v50, %v5839_v56  ;;  %vm829_vm15 = vcmp.eq.s32.totalorder %v5560_v34, %v6027_v62 }
  0xb5   :  { %4533 = vmatprep.subr.msk.bf16.mxu1 %vm4532_vm2, %v5310_v27  ;;  %vm4564_vm5 = vmpackc.low %vm825_vm14, %vm820_vm13  ;;  %vm912_vm13 = vcmp.eq.s32.totalorder %v5771_v51, %v5839_v56  ;;  %vm918_vm2 = vcmp.eq.s32.totalorder %v5794_v52, %v5825_v55 }
  0xb6   :  { %4565 = vmatprep.subr.msk.bf16.mxu0 %vm4564_vm5, %v5310_v27  ;;  %vm4534_vm8 = vmpackc.low %vm902_vm1, %vm897_vm0  ;;  %vm834_vm0 = vcmp.eq.s32.totalorder %v5563_v35, %v6027_v62  ;;  %vm840_vm5 = vcmp.eq.s32.totalorder %v5586_v36, %v6012_v61 }
  0xb7   :  { %vm4566_vm11 = vmpackc.low %vm824_vm4, %vm819_vm3  ;;  %vm923_vm3 = vcmp.eq.s32.totalorder %v5797_v53, %v5825_v55 }
  0xb8   :  { %4535 = vmatpush1.bf16.msk.msra.mxu1 %vm4534_vm8, %v5310_v27  ;;  %4567 = vmatpush1.bf16.msk.msra.mxu0 %vm4566_vm11, %v5310_v27  ;;  %vm4536_vm14 = vmpackc.low %vm913_vm7, %vm908_vm6  ;;  %vm845_vm6 = vcmp.eq.s32.totalorder %v5589_v37, %v6012_v61  ;;  %vm917_vm8 = vcmp.eq.s32.totalorder %v5794_v52, %v5839_v56  ;;  %vm839_vm11 = vcmp.eq.s32.totalorder %v5586_v36, %v6027_v62 }
  0xb9   :  { %4537 = vmatprep.subr.msk.bf16.mxu1 %vm4536_vm14, %v5310_v27  ;;  %vm4568_vm1 = vmpackc.low %vm835_vm10, %vm830_vm9  ;;  %vm922_vm9 = vcmp.eq.s32.totalorder %v5797_v53, %v5839_v56  ;;  %vm850_vm14 = vcmp.eq.s32.totalorder %v5612_v38, %v6012_v61 }
  0xba   :  { %4569 = vmatprep.subr.msk.bf16.mxu0 %vm4568_vm1, %v5310_v27  ;;  %vm4538_vm4 = vmpackc.low %vm912_vm13, %vm907_vm12  ;;  %vm844_vm12 = vcmp.eq.s32.totalorder %v5589_v37, %v6027_v62  ;;  %vm851_vm1 = vcmp.eq.s32.totalorder %v5612_v38, %v6186_v63 }
  0xbb   :  { %vm4570_vm7 = vmpackc.low %vm834_vm0, %vm829_vm15  ;;  %vm855_vm15 = vcmp.eq.s32.totalorder %v5615_v39, %v6012_v61 }
  0xbc   :  { %4539 = vmatpush1.bf16.msk.msra.mxu1 %vm4538_vm4, %v5310_v27  ;;  %4571 = vmatpush1.bf16.msk.msra.mxu0 %vm4570_vm7, %v5310_v27  ;;  %vm4540_vm10 = vmpackc.low %vm923_vm3, %vm918_vm2  ;;  %vm856_vm2 = vcmp.eq.s32.totalorder %v5615_v39, %v6186_v63  ;;  %vm849_vm4 = vcmp.eq.s32.totalorder %v5612_v38, %v6027_v62  ;;  %vm771_vm7 = vcmp.eq.s32.totalorder %v5380_v1, %v6186_v63 }
  0xbd   :  { %4541 = vmatprep.subr.msk.bf16.mxu1 %vm4540_vm10, %v5310_v27  ;;  %vm4572_vm13 = vmpackc.low %vm845_vm6, %vm840_vm5  ;;  %vm854_vm5 = vcmp.eq.s32.totalorder %v5615_v39, %v6027_v62  ;;  %vm860_vm10 = vcmp.eq.s32.totalorder %v5638_v40, %v6012_v61 }
  0xbe   :  { %4573 = vmatprep.subr.msk.bf16.mxu0 %vm4572_vm13, %v5310_v27  ;;  %vm4542_vm0 = vmpackc.low %vm922_vm9, %vm917_vm8  ;;  %vm776_vm8 = vcmp.eq.s32.totalorder %v5411_v16, %v6186_v63  ;;  %vm861_vm13 = vcmp.eq.s32.totalorder %v5638_v40, %v6186_v63 }
  0xbf   :  { %vm4574_vm3 = vmpackc.low %vm844_vm12, %vm839_vm11  ;;  %vm865_vm11 = vcmp.eq.s32.totalorder %v5641_v41, %v6012_v61 }
  0xc0   :  { %4543 = vmatpush1.bf16.msk.msra.mxu1 %vm4542_vm0, %v5310_v27  ;;  %4575 = vmatpush1.bf16.msk.msra.mxu0 %vm4574_vm3, %v5310_v27  ;;  %vm4576_vm6 = vmpackc.low %vm855_vm15, %vm850_vm14  ;;  %vm866_vm14 = vcmp.eq.s32.totalorder %v5641_v41, %v6186_v63  ;;  %vm859_vm0 = vcmp.eq.s32.totalorder %v5638_v40, %v6027_v62  ;;  %vm781_vm3 = vcmp.eq.s32.totalorder %v5426_v22, %v6186_v63 }
  0xc1   :  { %4577 = vmatprep.subr.msk.bf16.mxu0 %vm4576_vm6, %v5310_v27  ;;  %vm4608_vm9 = vmpackc.low %vm856_vm2, %vm851_vm1  ;;  %vm864_vm1 = vcmp.eq.s32.totalorder %v5641_v41, %v6027_v62  ;;  %vm870_vm6 = vcmp.eq.s32.totalorder %v5664_v42, %v6012_v61 }
  0xc2   :  { %4609 = vmatprep.subr.msk.bf16.mxu1 %vm4608_vm9, %v5310_v27  ;;  %vm4578_vm12 = vmpackc.low %vm854_vm5, %vm849_vm4  ;;  %vm786_vm4 = vcmp.eq.s32.totalorder %v5429_v23, %v6186_v63  ;;  %vm871_vm9 = vcmp.eq.s32.totalorder %v5664_v42, %v6186_v63 }
  0xc3   :  { %1152 = vmatmul.mubr.f32.vlgmr.msra.gmra.mrb[4].mxu1 %v5857_v57  ;;  %vm4610_vm15 = vmpackc.low %vm776_vm8, %vm771_vm7  ;;  %vm875_vm7 = vcmp.eq.s32.totalorder %v5667_v43, %v6012_v61 }
  0xc4   :  { %4579 = vmatpush1.bf16.msk.msra.mxu0 %vm4578_vm12, %v5310_v27  ;;  %4611 = vmatpush3.bf16.msk.msra.mxu1 %vm4610_vm15, %v5310_v27  ;;  %vm4580_vm2 = vmpackc.low %vm865_vm11, %vm860_vm10  ;;  %vm876_vm10 = vcmp.eq.s32.totalorder %v5667_v43, %v6186_v63  ;;  %vm869_vm12 = vcmp.eq.s32.totalorder %v5664_v42, %v6027_v62  ;;  %vm791_vm15 = vcmp.eq.s32.totalorder %v5439_v25, %v6186_v63 }
  0xc5   :  { %4581 = vmatprep.subr.msk.bf16.mxu0 %vm4580_vm2, %v5310_v27  ;;  %vm4612_vm5 = vmpackc.low %vm866_vm14, %vm861_vm13  ;;  %1157 = vmatprep.mubr.f32.mxu1 %v5873_v58  ;;  %vm874_vm13 = vcmp.eq.s32.totalorder %v5667_v43, %v6027_v62  ;;  %vm880_vm2 = vcmp.eq.s32.totalorder %v5690_v44, %v6012_v61 }
  0xc6   :  { %4613 = vmatprep.subr.msk.bf16.mxu1 %vm4612_vm5, %v5310_v27  ;;  %vm4582_vm8 = vmpackc.low %vm864_vm1, %vm859_vm0  ;;  %vm796_vm0 = vcmp.eq.s32.totalorder %v5442_v26, %v6186_v63  ;;  %vm881_vm5 = vcmp.eq.s32.totalorder %v5690_v44, %v6186_v63 }
  0xc7   :  { %vm4614_vm11 = vmpackc.low %vm786_vm4, %vm781_vm3  ;;  %1158 = vmatmul.mubr.f32.gmra.mrb[6].mxu1 %v5887_v59  ;;  %vm885_vm3 = vcmp.eq.s32.totalorder %v5693_v45, %v6012_v61 }
  0xc8   :  { %4583 = vmatpush1.bf16.msk.msra.mxu0 %vm4582_vm8, %v5310_v27  ;;  %4615 = vmatpush3.bf16.msk.msra.mxu1 %vm4614_vm11, %v5310_v27  ;;  %vm4584_vm14 = vmpackc.low %vm875_vm7, %vm870_vm6  ;;  %vm886_vm6 = vcmp.eq.s32.totalorder %v5693_v45, %v6186_v63  ;;  %vm879_vm8 = vcmp.eq.s32.totalorder %v5690_v44, %v6027_v62  ;;  %vm801_vm11 = vcmp.eq.s32.totalorder %v5482_v28, %v6186_v63 }
  0xc9   :  { %4585 = vmatprep.subr.msk.bf16.mxu0 %vm4584_vm14, %v5310_v27  ;;  %vm4616_vm1 = vmpackc.low %vm876_vm10, %vm871_vm9  ;;  %1305 = vmatprep.mubr.f32.mxu1 %v6271_v0  ;;  %vm884_vm9 = vcmp.eq.s32.totalorder %v5693_v45, %v6027_v62  ;;  %vm890_vm14 = vcmp.eq.s32.totalorder %v5716_v46, %v6012_v61 }
  0xca   :  { %4617 = vmatprep.subr.msk.bf16.mxu1 %vm4616_vm1, %v5310_v27  ;;  %vm4586_vm4 = vmpackc.low %vm874_vm13, %vm869_vm12  ;;  %vm806_vm12 = vcmp.eq.s32.totalorder %v5485_v29, %v6186_v63  ;;  %vm891_vm1 = vcmp.eq.s32.totalorder %v5716_v46, %v6186_v63 }
  0xcb   :  { %vm4618_vm7 = vmpackc.low %vm796_vm0, %vm791_vm15  ;;  %vm895_vm15 = vcmp.eq.s32.totalorder %v5719_v47, %v6012_v61 }
  0xcc   :  { %4587 = vmatpush1.bf16.msk.msra.mxu0 %vm4586_vm4, %v5310_v27  ;;  %4619 = vmatpush3.bf16.msk.msra.mxu1 %vm4618_vm7, %v5310_v27  ;;  %vm4588_vm10 = vmpackc.low %vm885_vm3, %vm880_vm2  ;;  %vm896_vm2 = vcmp.eq.s32.totalorder %v5719_v47, %v6186_v63  ;;  %vm889_vm4 = vcmp.eq.s32.totalorder %v5716_v46, %v6027_v62  ;;  %vm811_vm7 = vcmp.eq.s32.totalorder %v5508_v30, %v6186_v63 }
  0xcd   :  { %4589 = vmatprep.subr.msk.bf16.mxu0 %vm4588_vm10, %v5310_v27  ;;  %vm4620_vm13 = vmpackc.low %vm886_vm6, %vm881_vm5  ;;  %vm894_vm5 = vcmp.eq.s32.totalorder %v5719_v47, %v6027_v62  ;;  %vm900_vm10 = vcmp.eq.s32.totalorder %v5742_v48, %v6012_v61 }
  0xce   :  { %4621 = vmatprep.subr.msk.bf16.mxu1 %vm4620_vm13, %v5310_v27  ;;  %vm4590_vm0 = vmpackc.low %vm884_vm9, %vm879_vm8  ;;  %vm816_vm8 = vcmp.eq.s32.totalorder %v5511_v31, %v6186_v63  ;;  %vm901_vm13 = vcmp.eq.s32.totalorder %v5742_v48, %v6186_v63 }
  0xcf   :  { %vm4622_vm3 = vmpackc.low %vm806_vm12, %vm801_vm11  ;;  %vm905_vm11 = vcmp.eq.s32.totalorder %v5745_v49, %v6012_v61 }
  0xd0   :  { %4591 = vmatpush1.bf16.msk.msra.mxu0 %vm4590_vm0, %v5310_v27  ;;  %4623 = vmatpush3.bf16.msk.msra.mxu1 %vm4622_vm3, %v5310_v27  ;;  %vm4592_vm6 = vmpackc.low %vm895_vm15, %vm890_vm14  ;;  %vm906_vm14 = vcmp.eq.s32.totalorder %v5745_v49, %v6186_v63  ;;  %vm899_vm0 = vcmp.eq.s32.totalorder %v5742_v48, %v6027_v62  ;;  %vm821_vm3 = vcmp.eq.s32.totalorder %v5534_v32, %v6186_v63 }
  0xd1   :  { %4593 = vmatprep.subr.msk.bf16.mxu0 %vm4592_vm6, %v5310_v27  ;;  %vm4624_vm9 = vmpackc.low %vm896_vm2, %vm891_vm1  ;;  %vm904_vm1 = vcmp.eq.s32.totalorder %v5745_v49, %v6027_v62  ;;  %vm910_vm6 = vcmp.eq.s32.totalorder %v5768_v50, %v6012_v61 }
  0xd2   :  { %4625 = vmatprep.subr.msk.bf16.mxu1 %vm4624_vm9, %v5310_v27  ;;  %vm4594_vm12 = vmpackc.low %vm894_vm5, %vm889_vm4  ;;  %vm826_vm4 = vcmp.eq.s32.totalorder %v5537_v33, %v6186_v63  ;;  %vm911_vm9 = vcmp.eq.s32.totalorder %v5768_v50, %v6186_v63 }
  0xd3   :  { %vm4626_vm15 = vmpackc.low %vm816_vm8, %vm811_vm7  ;;  %vm915_vm7 = vcmp.eq.s32.totalorder %v5771_v51, %v6012_v61 }
  0xd4   :  { %4595 = vmatpush1.bf16.msk.msra.mxu0 %vm4594_vm12, %v5310_v27  ;;  %4627 = vmatpush3.bf16.msk.msra.mxu1 %vm4626_vm15, %v5310_v27  ;;  %vm4596_vm2 = vmpackc.low %vm905_vm11, %vm900_vm10  ;;  %vm916_vm10 = vcmp.eq.s32.totalorder %v5771_v51, %v6186_v63  ;;  %vm909_vm12 = vcmp.eq.s32.totalorder %v5768_v50, %v6027_v62  ;;  %vm831_vm15 = vcmp.eq.s32.totalorder %v5560_v34, %v6186_v63 }
  0xd5   :  { %4597 = vmatprep.subr.msk.bf16.mxu0 %vm4596_vm2, %v5310_v27  ;;  %vm4628_vm5 = vmpackc.low %vm906_vm14, %vm901_vm13  ;;  %vm914_vm13 = vcmp.eq.s32.totalorder %v5771_v51, %v6027_v62  ;;  %vm920_vm2 = vcmp.eq.s32.totalorder %v5794_v52, %v6012_v61 }
  0xd6   :  { %4629 = vmatprep.subr.msk.bf16.mxu1 %vm4628_vm5, %v5310_v27  ;;  %vm4598_vm8 = vmpackc.low %vm904_vm1, %vm899_vm0  ;;  %vm836_vm0 = vcmp.eq.s32.totalorder %v5563_v35, %v6186_v63  ;;  %vm921_vm5 = vcmp.eq.s32.totalorder %v5794_v52, %v6186_v63 }
  0xd7   :  { %vm4630_vm11 = vmpackc.low %vm826_vm4, %vm821_vm3  ;;  %vm925_vm3 = vcmp.eq.s32.totalorder %v5797_v53, %v6012_v61 }
  0xd8   :  { %4599 = vmatpush1.bf16.msk.msra.mxu0 %vm4598_vm8, %v5310_v27  ;;  %4631 = vmatpush3.bf16.msk.msra.mxu1 %vm4630_vm11, %v5310_v27  ;;  %vm4600_vm14 = vmpackc.low %vm915_vm7, %vm910_vm6  ;;  %vm926_vm6 = vcmp.eq.s32.totalorder %v5797_v53, %v6186_v63  ;;  %vm919_vm8 = vcmp.eq.s32.totalorder %v5794_v52, %v6027_v62  ;;  %vm841_vm11 = vcmp.eq.s32.totalorder %v5586_v36, %v6186_v63 }
  0xd9   :  { %4601 = vmatprep.subr.msk.bf16.mxu0 %vm4600_vm14, %v5310_v27  ;;  %vm4632_vm1 = vmpackc.low %vm916_vm10, %vm911_vm9  ;;  %vm924_vm9 = vcmp.eq.s32.totalorder %v5797_v53, %v6027_v62  ;;  %vm1409_vm14 = vcmp.eq.s32.totalorder %v5380_v1, %v6357_v5 }
  0xda   :  { %4633 = vmatprep.subr.msk.bf16.mxu1 %vm4632_vm1, %v5310_v27  ;;  %vm4602_vm4 = vmpackc.low %vm914_vm13, %vm909_vm12  ;;  %vm846_vm12 = vcmp.eq.s32.totalorder %v5589_v37, %v6186_v63  ;;  %vm1411_vm1 = vcmp.eq.s32.totalorder %v5380_v1, %v6367_v6 }
  0xdb   :  { %vm4634_vm7 = vmpackc.low %vm836_vm0, %vm831_vm15  ;;  %vm1414_vm15 = vcmp.eq.s32.totalorder %v5411_v16, %v6357_v5 }
  0xdc   :  { %4603 = vmatpush1.bf16.msk.msra.mxu0 %vm4602_vm4, %v5310_v27  ;;  %4635 = vmatpush3.bf16.msk.msra.mxu1 %vm4634_vm7, %v5310_v27  ;;  %vm4604_vm10 = vmpackc.low %vm925_vm3, %vm920_vm2  ;;  %vm1416_vm2 = vcmp.eq.s32.totalorder %v5411_v16, %v6367_v6  ;;  %vm1408_vm4 = vcmp.eq.s32.totalorder %v5380_v1, %v6379_v8  ;;  %vm1410_vm7 = vcmp.eq.s32.totalorder %v5380_v1, %v6386_v7 }
  0xdd   :  { %4605 = vmatprep.subr.msk.bf16.mxu0 %vm4604_vm10, %v5310_v27  ;;  %vm4636_vm13 = vmpackc.low %vm926_vm6, %vm921_vm5  ;;  %vm1413_vm5 = vcmp.eq.s32.totalorder %v5411_v16, %v6379_v8  ;;  %vm1419_vm10 = vcmp.eq.s32.totalorder %v5426_v22, %v6357_v5 }
  0xde   :  { %4637 = vmatprep.subr.msk.bf16.mxu1 %vm4636_vm13, %v5310_v27  ;;  %vm4606_vm0 = vmpackc.low %vm924_vm9, %vm919_vm8  ;;  %vm1415_vm8 = vcmp.eq.s32.totalorder %v5411_v16, %v6386_v7  ;;  %vm1421_vm13 = vcmp.eq.s32.totalorder %v5426_v22, %v6367_v6 }
  0xdf   :  { %vm4638_vm3 = vmpackc.low %vm846_vm12, %vm841_vm11  ;;  %vm1424_vm11 = vcmp.eq.s32.totalorder %v5429_v23, %v6357_v5 }
  0xe0   :  { %4607 = vmatpush1.bf16.msk.msra.mxu0 %vm4606_vm0, %v5310_v27  ;;  %4639 = vmatpush3.bf16.msk.msra.mxu1 %vm4638_vm3, %v5310_v27  ;;  %vm4640_vm6 = vmpackc.low %vm1414_vm15, %vm1409_vm14  ;;  %vm1426_vm14 = vcmp.eq.s32.totalorder %v5429_v23, %v6367_v6  ;;  %vm1418_vm0 = vcmp.eq.s32.totalorder %v5426_v22, %v6379_v8  ;;  %vm1420_vm3 = vcmp.eq.s32.totalorder %v5426_v22, %v6386_v7 }
  0xe1   :  { %4641 = vmatprep.subr.msk.bf16.mxu0 %vm4640_vm6, %v5310_v27  ;;  %vm4704_vm9 = vmpackc.low %vm1416_vm2, %vm1411_vm1  ;;  %vm1423_vm1 = vcmp.eq.s32.totalorder %v5429_v23, %v6379_v8  ;;  %vm1429_vm6 = vcmp.eq.s32.totalorder %v5439_v25, %v6357_v5 }
  0xe2   :  { %4705 = vmatprep.subr.msk.bf16.mxu1 %vm4704_vm9, %v5310_v27  ;;  %vm4642_vm12 = vmpackc.low %vm1413_vm5, %vm1408_vm4  ;;  %vm1425_vm4 = vcmp.eq.s32.totalorder %v5429_v23, %v6386_v7  ;;  %vm1431_vm9 = vcmp.eq.s32.totalorder %v5439_v25, %v6367_v6 }
  0xe3   :  { %1229 = vmatmul.mubr.f32.vlgmr.msra.gmra.mrb[8].mxu0 %v5857_v57  ;;  %1306 = vmatmul.mubr.f32.vlgmr.msra.gmra.mrb[8].mxu1 %v5857_v57  ;;  %vm4706_vm15 = vmpackc.low %vm1415_vm8, %vm1410_vm7  ;;  %vm1434_vm7 = vcmp.eq.s32.totalorder %v5442_v26, %v6357_v5 }
  0xe4   :  { %4643 = vmatpush1.bf16.msk.msra.mxu0 %vm4642_vm12, %v5310_v27  ;;  %4707 = vmatpush1.bf16.msk.msra.mxu1 %vm4706_vm15, %v5310_v27  ;;  %vm4644_vm2 = vmpackc.low %vm1424_vm11, %vm1419_vm10  ;;  %vm1436_vm10 = vcmp.eq.s32.totalorder %v5442_v26, %v6367_v6  ;;  %vm1428_vm12 = vcmp.eq.s32.totalorder %v5439_v25, %v6379_v8  ;;  %vm1430_vm15 = vcmp.eq.s32.totalorder %v5439_v25, %v6386_v7 }
  0xe5   :  { %4645 = vmatprep.subr.msk.bf16.mxu0 %vm4644_vm2, %v5310_v27  ;;  %vm4708_vm5 = vmpackc.low %vm1426_vm14, %vm1421_vm13  ;;  %1234 = vmatprep.mubr.f32.mxu0 %v5873_v58  ;;  %vm1433_vm13 = vcmp.eq.s32.totalorder %v5442_v26, %v6379_v8  ;;  %vm1439_vm2 = vcmp.eq.s32.totalorder %v5482_v28, %v6357_v5 }
  0xe6   :  { %4709 = vmatprep.subr.msk.bf16.mxu1 %vm4708_vm5, %v5310_v27  ;;  %vm4646_vm8 = vmpackc.low %vm1423_vm1, %vm1418_vm0  ;;  %1310 = vmatprep.mubr.f32.mxu1 %v5873_v58  ;;  %vm1435_vm0 = vcmp.eq.s32.totalorder %v5442_v26, %v6386_v7  ;;  %vm1441_vm5 = vcmp.eq.s32.totalorder %v5482_v28, %v6367_v6 }
  0xe7   :  { %vm4710_vm11 = vmpackc.low %vm1425_vm4, %vm1420_vm3  ;;  %1235 = vmatmul.mubr.f32.gmra.mrb[10].mxu0 %v5887_v59  ;;  %1311 = vmatmul.mubr.f32.gmra.mrb[10].mxu1 %v5887_v59  ;;  %vm1444_vm3 = vcmp.eq.s32.totalorder %v5485_v29, %v6357_v5 }
  0xe8   :  { %4647 = vmatpush1.bf16.msk.msra.mxu0 %vm4646_vm8, %v5310_v27  ;;  %4711 = vmatpush1.bf16.msk.msra.mxu1 %vm4710_vm11, %v5310_v27  ;;  %vm4648_vm14 = vmpackc.low %vm1434_vm7, %vm1429_vm6  ;;  %vm1446_vm6 = vcmp.eq.s32.totalorder %v5485_v29, %v6367_v6  ;;  %vm1438_vm8 = vcmp.eq.s32.totalorder %v5482_v28, %v6379_v8  ;;  %vm1440_vm11 = vcmp.eq.s32.totalorder %v5482_v28, %v6386_v7 }
  0xe9   :  { %4649 = vmatprep.subr.msk.bf16.mxu0 %vm4648_vm14, %v5310_v27  ;;  %vm4712_vm1 = vmpackc.low %vm1436_vm10, %vm1431_vm9  ;;  %1792 = vmatprep.mubr.f32.mxu0 %v6271_v0  ;;  %vm1443_vm9 = vcmp.eq.s32.totalorder %v5485_v29, %v6379_v8  ;;  %vm1449_vm14 = vcmp.eq.s32.totalorder %v5508_v30, %v6357_v5 }
  0xea   :  { %4713 = vmatprep.subr.msk.bf16.mxu1 %vm4712_vm1, %v5310_v27  ;;  %vm4650_vm4 = vmpackc.low %vm1433_vm13, %vm1428_vm12  ;;  %1869 = vmatprep.mubr.f32.mxu1 %v6271_v0  ;;  %vm1445_vm12 = vcmp.eq.s32.totalorder %v5485_v29, %v6386_v7  ;;  %vm1451_vm1 = vcmp.eq.s32.totalorder %v5508_v30, %v6367_v6 }
  0xeb   :  { %vm4714_vm7 = vmpackc.low %vm1435_vm0, %vm1430_vm15  ;;  %vm1454_vm15 = vcmp.eq.s32.totalorder %v5511_v31, %v6357_v5 }
  0xec   :  { %4651 = vmatpush1.bf16.msk.msra.mxu0 %vm4650_vm4, %v5310_v27  ;;  %4715 = vmatpush1.bf16.msk.msra.mxu1 %vm4714_vm7, %v5310_v27  ;;  %vm4652_vm10 = vmpackc.low %vm1444_vm3, %vm1439_vm2  ;;  %vm1456_vm2 = vcmp.eq.s32.totalorder %v5511_v31, %v6367_v6  ;;  %vm1448_vm4 = vcmp.eq.s32.totalorder %v5508_v30, %v6379_v8  ;;  %vm1450_vm7 = vcmp.eq.s32.totalorder %v5508_v30, %v6386_v7 }
  0xed   :  { %4653 = vmatprep.subr.msk.bf16.mxu0 %vm4652_vm10, %v5310_v27  ;;  %vm4716_vm13 = vmpackc.low %vm1446_vm6, %vm1441_vm5  ;;  %vm1453_vm5 = vcmp.eq.s32.totalorder %v5511_v31, %v6379_v8  ;;  %vm1459_vm10 = vcmp.eq.s32.totalorder %v5534_v32, %v6357_v5 }
  0xee   :  { %4717 = vmatprep.subr.msk.bf16.mxu1 %vm4716_vm13, %v5310_v27  ;;  %vm4654_vm0 = vmpackc.low %vm1443_vm9, %vm1438_vm8  ;;  %vm1455_vm8 = vcmp.eq.s32.totalorder %v5511_v31, %v6386_v7  ;;  %vm1461_vm13 = vcmp.eq.s32.totalorder %v5534_v32, %v6367_v6 }
  0xef   :  { %vm4718_vm3 = vmpackc.low %vm1445_vm12, %vm1440_vm11  ;;  %vm1464_vm11 = vcmp.eq.s32.totalorder %v5537_v33, %v6357_v5 }
  0xf0   :  { %4655 = vmatpush1.bf16.msk.msra.mxu0 %vm4654_vm0, %v5310_v27  ;;  %4719 = vmatpush1.bf16.msk.msra.mxu1 %vm4718_vm3, %v5310_v27  ;;  %vm4656_vm6 = vmpackc.low %vm1454_vm15, %vm1449_vm14  ;;  %vm1466_vm14 = vcmp.eq.s32.totalorder %v5537_v33, %v6367_v6  ;;  %vm1458_vm0 = vcmp.eq.s32.totalorder %v5534_v32, %v6379_v8  ;;  %vm1460_vm3 = vcmp.eq.s32.totalorder %v5534_v32, %v6386_v7 }
  0xf1   :  { %4657 = vmatprep.subr.msk.bf16.mxu0 %vm4656_vm6, %v5310_v27  ;;  %vm4720_vm9 = vmpackc.low %vm1456_vm2, %vm1451_vm1  ;;  %vm1463_vm1 = vcmp.eq.s32.totalorder %v5537_v33, %v6379_v8  ;;  %vm1469_vm6 = vcmp.eq.s32.totalorder %v5560_v34, %v6357_v5 }
  0xf2   :  { %4721 = vmatprep.subr.msk.bf16.mxu1 %vm4720_vm9, %v5310_v27  ;;  %vm4658_vm12 = vmpackc.low %vm1453_vm5, %vm1448_vm4  ;;  %vm1465_vm4 = vcmp.eq.s32.totalorder %v5537_v33, %v6386_v7  ;;  %vm1471_vm9 = vcmp.eq.s32.totalorder %v5560_v34, %v6367_v6 }
  0xf3   :  { %vm4722_vm15 = vmpackc.low %vm1455_vm8, %vm1450_vm7  ;;  %vm1474_vm7 = vcmp.eq.s32.totalorder %v5563_v35, %v6357_v5 }
  0xf4   :  { %4659 = vmatpush1.bf16.msk.msra.mxu0 %vm4658_vm12, %v5310_v27  ;;  %4723 = vmatpush1.bf16.msk.msra.mxu1 %vm4722_vm15, %v5310_v27  ;;  %vm4660_vm2 = vmpackc.low %vm1464_vm11, %vm1459_vm10  ;;  %vm1476_vm10 = vcmp.eq.s32.totalorder %v5563_v35, %v6367_v6  ;;  %vm1468_vm12 = vcmp.eq.s32.totalorder %v5560_v34, %v6379_v8  ;;  %vm1470_vm15 = vcmp.eq.s32.totalorder %v5560_v34, %v6386_v7 }
  0xf5   :  { %4661 = vmatprep.subr.msk.bf16.mxu0 %vm4660_vm2, %v5310_v27  ;;  %vm4724_vm5 = vmpackc.low %vm1466_vm14, %vm1461_vm13  ;;  %vm1473_vm13 = vcmp.eq.s32.totalorder %v5563_v35, %v6379_v8  ;;  %vm1479_vm2 = vcmp.eq.s32.totalorder %v5586_v36, %v6357_v5 }
  0xf6   :  { %4725 = vmatprep.subr.msk.bf16.mxu1 %vm4724_vm5, %v5310_v27  ;;  %vm4662_vm8 = vmpackc.low %vm1463_vm1, %vm1458_vm0  ;;  %vm1475_vm0 = vcmp.eq.s32.totalorder %v5563_v35, %v6386_v7  ;;  %vm1481_vm5 = vcmp.eq.s32.totalorder %v5586_v36, %v6367_v6 }
  0xf7   :  { %vm4726_vm11 = vmpackc.low %vm1465_vm4, %vm1460_vm3  ;;  %vm1484_vm3 = vcmp.eq.s32.totalorder %v5589_v37, %v6357_v5 }
  0xf8   :  { %4663 = vmatpush1.bf16.msk.msra.mxu0 %vm4662_vm8, %v5310_v27  ;;  %4727 = vmatpush1.bf16.msk.msra.mxu1 %vm4726_vm11, %v5310_v27  ;;  %vm4664_vm14 = vmpackc.low %vm1474_vm7, %vm1469_vm6  ;;  %vm1486_vm6 = vcmp.eq.s32.totalorder %v5589_v37, %v6367_v6  ;;  %vm1478_vm8 = vcmp.eq.s32.totalorder %v5586_v36, %v6379_v8  ;;  %vm1480_vm11 = vcmp.eq.s32.totalorder %v5586_v36, %v6386_v7 }
  0xf9   :  { %4665 = vmatprep.subr.msk.bf16.mxu0 %vm4664_vm14, %v5310_v27  ;;  %vm4728_vm1 = vmpackc.low %vm1476_vm10, %vm1471_vm9  ;;  %vm1483_vm9 = vcmp.eq.s32.totalorder %v5589_v37, %v6379_v8  ;;  %vm1489_vm14 = vcmp.eq.s32.totalorder %v5612_v38, %v6357_v5 }
  0xfa   :  { %4729 = vmatprep.subr.msk.bf16.mxu1 %vm4728_vm1, %v5310_v27  ;;  %vm4666_vm4 = vmpackc.low %vm1473_vm13, %vm1468_vm12  ;;  %vm1485_vm12 = vcmp.eq.s32.totalorder %v5589_v37, %v6386_v7  ;;  %vm1491_vm1 = vcmp.eq.s32.totalorder %v5612_v38, %v6367_v6 }
  0xfb   :  { %vm4730_vm7 = vmpackc.low %vm1475_vm0, %vm1470_vm15  ;;  %vm1494_vm15 = vcmp.eq.s32.totalorder %v5615_v39, %v6357_v5 }
  0xfc   :  { %4667 = vmatpush1.bf16.msk.msra.mxu0 %vm4666_vm4, %v5310_v27  ;;  %4731 = vmatpush1.bf16.msk.msra.mxu1 %vm4730_vm7, %v5310_v27  ;;  %vm4668_vm10 = vmpackc.low %vm1484_vm3, %vm1479_vm2  ;;  %vm1496_vm2 = vcmp.eq.s32.totalorder %v5615_v39, %v6367_v6  ;;  %vm1488_vm4 = vcmp.eq.s32.totalorder %v5612_v38, %v6379_v8  ;;  %vm1490_vm7 = vcmp.eq.s32.totalorder %v5612_v38, %v6386_v7 }
  0xfd   :  { %4669 = vmatprep.subr.msk.bf16.mxu0 %vm4668_vm10, %v5310_v27  ;;  %vm4732_vm13 = vmpackc.low %vm1486_vm6, %vm1481_vm5  ;;  %vm1493_vm5 = vcmp.eq.s32.totalorder %v5615_v39, %v6379_v8  ;;  %vm1499_vm10 = vcmp.eq.s32.totalorder %v5638_v40, %v6357_v5 }
  0xfe   :  { %4733 = vmatprep.subr.msk.bf16.mxu1 %vm4732_vm13, %v5310_v27  ;;  %vm4670_vm0 = vmpackc.low %vm1483_vm9, %vm1478_vm8  ;;  %vm1495_vm8 = vcmp.eq.s32.totalorder %v5615_v39, %v6386_v7  ;;  %vm1501_vm13 = vcmp.eq.s32.totalorder %v5638_v40, %v6367_v6 }
  0xff   :  { %vm4734_vm3 = vmpackc.low %vm1485_vm12, %vm1480_vm11  ;;  %vm1504_vm11 = vcmp.eq.s32.totalorder %v5641_v41, %v6357_v5 }
 0x100   :  { %4671 = vmatpush1.bf16.msk.msra.mxu0 %vm4670_vm0, %v5310_v27  ;;  %4735 = vmatpush1.bf16.msk.msra.mxu1 %vm4734_vm3, %v5310_v27  ;;  %vm4672_vm6 = vmpackc.low %vm1494_vm15, %vm1489_vm14  ;;  %vm1506_vm14 = vcmp.eq.s32.totalorder %v5641_v41, %v6367_v6  ;;  %vm1498_vm0 = vcmp.eq.s32.totalorder %v5638_v40, %v6379_v8  ;;  %vm1500_vm3 = vcmp.eq.s32.totalorder %v5638_v40, %v6386_v7 }
 0x101   :  { %4673 = vmatprep.subr.msk.bf16.mxu0 %vm4672_vm6, %v5310_v27  ;;  %vm4736_vm9 = vmpackc.low %vm1496_vm2, %vm1491_vm1  ;;  %vm1503_vm1 = vcmp.eq.s32.totalorder %v5641_v41, %v6379_v8  ;;  %vm1509_vm6 = vcmp.eq.s32.totalorder %v5664_v42, %v6357_v5 }
 0x102   :  { %4737 = vmatprep.subr.msk.bf16.mxu1 %vm4736_vm9, %v5310_v27  ;;  %vm4674_vm12 = vmpackc.low %vm1493_vm5, %vm1488_vm4  ;;  %vm1505_vm4 = vcmp.eq.s32.totalorder %v5641_v41, %v6386_v7  ;;  %vm1511_vm9 = vcmp.eq.s32.totalorder %v5664_v42, %v6367_v6 }
 0x103   :  { %vm4738_vm15 = vmpackc.low %vm1495_vm8, %vm1490_vm7  ;;  %vm1514_vm7 = vcmp.eq.s32.totalorder %v5667_v43, %v6357_v5 }
 0x104   :  { %4675 = vmatpush1.bf16.msk.msra.mxu0 %vm4674_vm12, %v5310_v27  ;;  %4739 = vmatpush1.bf16.msk.msra.mxu1 %vm4738_vm15, %v5310_v27  ;;  %vm4676_vm2 = vmpackc.low %vm1504_vm11, %vm1499_vm10  ;;  %vm1516_vm10 = vcmp.eq.s32.totalorder %v5667_v43, %v6367_v6  ;;  %vm1508_vm12 = vcmp.eq.s32.totalorder %v5664_v42, %v6379_v8  ;;  %vm1510_vm15 = vcmp.eq.s32.totalorder %v5664_v42, %v6386_v7 }
 0x105   :  { %4677 = vmatprep.subr.msk.bf16.mxu0 %vm4676_vm2, %v5310_v27  ;;  %vm4740_vm5 = vmpackc.low %vm1506_vm14, %vm1501_vm13  ;;  %vm1513_vm13 = vcmp.eq.s32.totalorder %v5667_v43, %v6379_v8  ;;  %vm1519_vm2 = vcmp.eq.s32.totalorder %v5690_v44, %v6357_v5 }
 0x106   :  { %4741 = vmatprep.subr.msk.bf16.mxu1 %vm4740_vm5, %v5310_v27  ;;  %vm4678_vm8 = vmpackc.low %vm1503_vm1, %vm1498_vm0  ;;  %vm1515_vm0 = vcmp.eq.s32.totalorder %v5667_v43, %v6386_v7  ;;  %vm1521_vm5 = vcmp.eq.s32.totalorder %v5690_v44, %v6367_v6 }
 0x107   :  { %vm4742_vm11 = vmpackc.low %vm1505_vm4, %vm1500_vm3  ;;  %vm1524_vm3 = vcmp.eq.s32.totalorder %v5693_v45, %v6357_v5 }
 0x108   :  { %4679 = vmatpush1.bf16.msk.msra.mxu0 %vm4678_vm8, %v5310_v27  ;;  %4743 = vmatpush1.bf16.msk.msra.mxu1 %vm4742_vm11, %v5310_v27  ;;  %vm4680_vm14 = vmpackc.low %vm1514_vm7, %vm1509_vm6  ;;  %vm1526_vm6 = vcmp.eq.s32.totalorder %v5693_v45, %v6367_v6  ;;  %vm1518_vm8 = vcmp.eq.s32.totalorder %v5690_v44, %v6379_v8  ;;  %vm1520_vm11 = vcmp.eq.s32.totalorder %v5690_v44, %v6386_v7 }
 0x109   :  { %4681 = vmatprep.subr.msk.bf16.mxu0 %vm4680_vm14, %v5310_v27  ;;  %vm4744_vm1 = vmpackc.low %vm1516_vm10, %vm1511_vm9  ;;  %vm1523_vm9 = vcmp.eq.s32.totalorder %v5693_v45, %v6379_v8  ;;  %vm1529_vm14 = vcmp.eq.s32.totalorder %v5716_v46, %v6357_v5 }
 0x10a   :  { %4745 = vmatprep.subr.msk.bf16.mxu1 %vm4744_vm1, %v5310_v27  ;;  %vm4682_vm4 = vmpackc.low %vm1513_vm13, %vm1508_vm12  ;;  %vm1525_vm12 = vcmp.eq.s32.totalorder %v5693_v45, %v6386_v7  ;;  %vm1531_vm1 = vcmp.eq.s32.totalorder %v5716_v46, %v6367_v6 }
 0x10b   :  { %vm4746_vm7 = vmpackc.low %vm1515_vm0, %vm1510_vm15  ;;  %vm1534_vm15 = vcmp.eq.s32.totalorder %v5719_v47, %v6357_v5 }
 0x10c   :  { %4683 = vmatpush1.bf16.msk.msra.mxu0 %vm4682_vm4, %v5310_v27  ;;  %4747 = vmatpush1.bf16.msk.msra.mxu1 %vm4746_vm7, %v5310_v27  ;;  %vm4684_vm10 = vmpackc.low %vm1524_vm3, %vm1519_vm2  ;;  %vm1536_vm2 = vcmp.eq.s32.totalorder %v5719_v47, %v6367_v6  ;;  %vm1528_vm4 = vcmp.eq.s32.totalorder %v5716_v46, %v6379_v8  ;;  %vm1530_vm7 = vcmp.eq.s32.totalorder %v5716_v46, %v6386_v7 }
 0x10d   :  { %4685 = vmatprep.subr.msk.bf16.mxu0 %vm4684_vm10, %v5310_v27  ;;  %vm4748_vm13 = vmpackc.low %vm1526_vm6, %vm1521_vm5  ;;  %vm1533_vm5 = vcmp.eq.s32.totalorder %v5719_v47, %v6379_v8  ;;  %vm1539_vm10 = vcmp.eq.s32.totalorder %v5742_v48, %v6357_v5 }
 0x10e   :  { %4749 = vmatprep.subr.msk.bf16.mxu1 %vm4748_vm13, %v5310_v27  ;;  %vm4686_vm0 = vmpackc.low %vm1523_vm9, %vm1518_vm8  ;;  %vm1535_vm8 = vcmp.eq.s32.totalorder %v5719_v47, %v6386_v7  ;;  %vm1541_vm13 = vcmp.eq.s32.totalorder %v5742_v48, %v6367_v6 }
 0x10f   :  { %vm4750_vm3 = vmpackc.low %vm1525_vm12, %vm1520_vm11  ;;  %vm1544_vm11 = vcmp.eq.s32.totalorder %v5745_v49, %v6357_v5 }
 0x110   :  { %4687 = vmatpush1.bf16.msk.msra.mxu0 %vm4686_vm0, %v5310_v27  ;;  %4751 = vmatpush1.bf16.msk.msra.mxu1 %vm4750_vm3, %v5310_v27  ;;  %vm4688_vm6 = vmpackc.low %vm1534_vm15, %vm1529_vm14  ;;  %vm1546_vm14 = vcmp.eq.s32.totalorder %v5745_v49, %v6367_v6  ;;  %vm1538_vm0 = vcmp.eq.s32.totalorder %v5742_v48, %v6379_v8  ;;  %vm1540_vm3 = vcmp.eq.s32.totalorder %v5742_v48, %v6386_v7 }
 0x111   :  { %4689 = vmatprep.subr.msk.bf16.mxu0 %vm4688_vm6, %v5310_v27  ;;  %vm4752_vm9 = vmpackc.low %vm1536_vm2, %vm1531_vm1  ;;  %vm1543_vm1 = vcmp.eq.s32.totalorder %v5745_v49, %v6379_v8  ;;  %vm1549_vm6 = vcmp.eq.s32.totalorder %v5768_v50, %v6357_v5 }
 0x112   :  { %4753 = vmatprep.subr.msk.bf16.mxu1 %vm4752_vm9, %v5310_v27  ;;  %vm4690_vm12 = vmpackc.low %vm1533_vm5, %vm1528_vm4  ;;  %vm1545_vm4 = vcmp.eq.s32.totalorder %v5745_v49, %v6386_v7  ;;  %vm1551_vm9 = vcmp.eq.s32.totalorder %v5768_v50, %v6367_v6 }
 0x113   :  { %vm4754_vm15 = vmpackc.low %vm1535_vm8, %vm1530_vm7  ;;  %vm1554_vm7 = vcmp.eq.s32.totalorder %v5771_v51, %v6357_v5 }
 0x114   :  { %4691 = vmatpush1.bf16.msk.msra.mxu0 %vm4690_vm12, %v5310_v27  ;;  %4755 = vmatpush1.bf16.msk.msra.mxu1 %vm4754_vm15, %v5310_v27  ;;  %vm4692_vm2 = vmpackc.low %vm1544_vm11, %vm1539_vm10  ;;  %vm1556_vm10 = vcmp.eq.s32.totalorder %v5771_v51, %v6367_v6  ;;  %vm1548_vm12 = vcmp.eq.s32.totalorder %v5768_v50, %v6379_v8  ;;  %vm1550_vm15 = vcmp.eq.s32.totalorder %v5768_v50, %v6386_v7 }
 0x115   :  { %4693 = vmatprep.subr.msk.bf16.mxu0 %vm4692_vm2, %v5310_v27  ;;  %vm4756_vm5 = vmpackc.low %vm1546_vm14, %vm1541_vm13  ;;  %vm1553_vm13 = vcmp.eq.s32.totalorder %v5771_v51, %v6379_v8  ;;  %vm1559_vm2 = vcmp.eq.s32.totalorder %v5794_v52, %v6357_v5 }
 0x116   :  { %4757 = vmatprep.subr.msk.bf16.mxu1 %vm4756_vm5, %v5310_v27  ;;  %vm4694_vm8 = vmpackc.low %vm1543_vm1, %vm1538_vm0  ;;  %vm1555_vm0 = vcmp.eq.s32.totalorder %v5771_v51, %v6386_v7  ;;  %vm1561_vm5 = vcmp.eq.s32.totalorder %v5794_v52, %v6367_v6 }
 0x117   :  { %vm4758_vm11 = vmpackc.low %vm1545_vm4, %vm1540_vm3  ;;  %vm1564_vm3 = vcmp.eq.s32.totalorder %v5797_v53, %v6357_v5 }
 0x118   :  { %4695 = vmatpush1.bf16.msk.msra.mxu0 %vm4694_vm8, %v5310_v27  ;;  %4759 = vmatpush1.bf16.msk.msra.mxu1 %vm4758_vm11, %v5310_v27  ;;  %vm4696_vm14 = vmpackc.low %vm1554_vm7, %vm1549_vm6  ;;  %vm1566_vm6 = vcmp.eq.s32.totalorder %v5797_v53, %v6367_v6  ;;  %vm1558_vm8 = vcmp.eq.s32.totalorder %v5794_v52, %v6379_v8  ;;  %vm1560_vm11 = vcmp.eq.s32.totalorder %v5794_v52, %v6386_v7 }
 0x119   :  { %4697 = vmatprep.subr.msk.bf16.mxu0 %vm4696_vm14, %v5310_v27  ;;  %vm4760_vm1 = vmpackc.low %vm1556_vm10, %vm1551_vm9  ;;  %vm1563_vm9 = vcmp.eq.s32.totalorder %v5797_v53, %v6379_v8  ;;  %vm1492_vm14 = vcmp.eq.s32.totalorder %v5612_v38, %v5408_v15 }
 0x11a   :  { %4761 = vmatprep.subr.msk.bf16.mxu1 %vm4760_vm1, %v5310_v27  ;;  %vm4698_vm4 = vmpackc.low %vm1553_vm13, %vm1548_vm12  ;;  %vm1565_vm12 = vcmp.eq.s32.totalorder %v5797_v53, %v6386_v7  ;;  %vm2052_vm1 = vcmp.eq.s32.totalorder %v5380_v1, %v6719_v11 }
 0x11b   :  { %vm4762_vm7 = vmpackc.low %vm1555_vm0, %vm1550_vm15  ;;  %vm1497_vm15 = vcmp.eq.s32.totalorder %v5615_v39, %v5408_v15 }
 0x11c   :  { %4699 = vmatpush1.bf16.msk.msra.mxu0 %vm4698_vm4, %v5310_v27  ;;  %4763 = vmatpush1.bf16.msk.msra.mxu1 %vm4762_vm7, %v5310_v27  ;;  %vm4700_vm10 = vmpackc.low %vm1564_vm3, %vm1559_vm2  ;;  %vm2057_vm2 = vcmp.eq.s32.totalorder %v5411_v16, %v6719_v11  ;;  %vm1412_vm4 = vcmp.eq.s32.totalorder %v5380_v1, %v5408_v15  ;;  %vm2051_vm7 = vcmp.eq.s32.totalorder %v5380_v1, %v6732_v12 }
 0x11d   :  { %4701 = vmatprep.subr.msk.bf16.mxu0 %vm4700_vm10, %v5310_v27  ;;  %vm4764_vm13 = vmpackc.low %vm1566_vm6, %vm1561_vm5  ;;  %vm1417_vm5 = vcmp.eq.s32.totalorder %v5411_v16, %v5408_v15  ;;  %vm1502_vm10 = vcmp.eq.s32.totalorder %v5638_v40, %v5408_v15 }
 0x11e   :  { %4765 = vmatprep.subr.msk.bf16.mxu1 %vm4764_vm13, %v5310_v27  ;;  %vm4702_vm0 = vmpackc.low %vm1563_vm9, %vm1558_vm8  ;;  %vm2056_vm8 = vcmp.eq.s32.totalorder %v5411_v16, %v6732_v12  ;;  %vm2062_vm13 = vcmp.eq.s32.totalorder %v5426_v22, %v6719_v11 }
 0x11f   :  { %vm4766_vm3 = vmpackc.low %vm1565_vm12, %vm1560_vm11  ;;  %vm1507_vm11 = vcmp.eq.s32.totalorder %v5641_v41, %v5408_v15 }
 0x120   :  { %4703 = vmatpush1.bf16.msk.msra.mxu0 %vm4702_vm0, %v5310_v27  ;;  %4767 = vmatpush1.bf16.msk.msra.mxu1 %vm4766_vm3, %v5310_v27  ;;  %vm4768_vm6 = vmpackc.low %vm1497_vm15, %vm1492_vm14  ;;  %vm2067_vm14 = vcmp.eq.s32.totalorder %v5429_v23, %v6719_v11  ;;  %vm1422_vm0 = vcmp.eq.s32.totalorder %v5426_v22, %v5408_v15  ;;  %vm2061_vm3 = vcmp.eq.s32.totalorder %v5426_v22, %v6732_v12 }
 0x121   :  { %4769 = vmatprep.subr.msk.bf16.mxu0 %vm4768_vm6, %v5310_v27  ;;  %vm4800_vm9 = vmpackc.low %vm2057_vm2, %vm2052_vm1  ;;  %vm1427_vm1 = vcmp.eq.s32.totalorder %v5429_v23, %v5408_v15  ;;  %vm1512_vm6 = vcmp.eq.s32.totalorder %v5664_v42, %v5408_v15 }
 0x122   :  { %4801 = vmatprep.subr.msk.bf16.mxu1 %vm4800_vm9, %v5310_v27  ;;  %vm4770_vm12 = vmpackc.low %vm1417_vm5, %vm1412_vm4  ;;  %vm2066_vm4 = vcmp.eq.s32.totalorder %v5429_v23, %v6732_v12  ;;  %vm2072_vm9 = vcmp.eq.s32.totalorder %v5439_v25, %v6719_v11 }
 0x123   :  { %1793 = vmatmul.mubr.f32.vlgmr.msra.gmra.mrb[12].mxu0 %v6770_v13  ;;  %1870 = vmatmul.mubr.f32.vlgmr.msra.gmra.mrb[12].mxu1 %v6770_v13  ;;  %vm4802_vm15 = vmpackc.low %vm2056_vm8, %vm2051_vm7  ;;  %vm1517_vm7 = vcmp.eq.s32.totalorder %v5667_v43, %v5408_v15 }
 0x124   :  { %4771 = vmatpush3.bf16.msk.msra.mxu0 %vm4770_vm12, %v5310_v27  ;;  %4803 = vmatpush1.bf16.msk.msra.mxu1 %vm4802_vm15, %v5310_v27  ;;  %vm4772_vm2 = vmpackc.low %vm1507_vm11, %vm1502_vm10  ;;  %vm2077_vm10 = vcmp.eq.s32.totalorder %v5442_v26, %v6719_v11  ;;  %vm1432_vm12 = vcmp.eq.s32.totalorder %v5439_v25, %v5408_v15  ;;  %vm2071_vm15 = vcmp.eq.s32.totalorder %v5439_v25, %v6732_v12 }
 0x125   :  { %4773 = vmatprep.subr.msk.bf16.mxu0 %vm4772_vm2, %v5310_v27  ;;  %vm4804_vm5 = vmpackc.low %vm2067_vm14, %vm2062_vm13  ;;  %1798 = vmatprep.mubr.f32.mxu0 %v6789_v14  ;;  %vm1437_vm13 = vcmp.eq.s32.totalorder %v5442_v26, %v5408_v15  ;;  %vm1522_vm2 = vcmp.eq.s32.totalorder %v5690_v44, %v5408_v15 }
 0x126   :  { %4805 = vmatprep.subr.msk.bf16.mxu1 %vm4804_vm5, %v5310_v27  ;;  %vm4774_vm8 = vmpackc.low %vm1427_vm1, %vm1422_vm0  ;;  %1875 = vmatprep.mubr.f32.mxu1 %v6789_v14  ;;  %vm2076_vm0 = vcmp.eq.s32.totalorder %v5442_v26, %v6732_v12  ;;  %vm2082_vm5 = vcmp.eq.s32.totalorder %v5482_v28, %v6719_v11 }
 0x127   :  { %vm4806_vm11 = vmpackc.low %vm2066_vm4, %vm2061_vm3  ;;  %1799 = vmatmul.mubr.f32.gmra.mrb[14].mxu0 %v6802_v17  ;;  %1876 = vmatmul.mubr.f32.gmra.mrb[14].mxu1 %v6802_v17  ;;  %vm1527_vm3 = vcmp.eq.s32.totalorder %v5693_v45, %v5408_v15 }
 0x128   :  { %4775 = vmatpush3.bf16.msk.msra.mxu0 %vm4774_vm8, %v5310_v27  ;;  %4807 = vmatpush1.bf16.msk.msra.mxu1 %vm4806_vm11, %v5310_v27  ;;  %vm4776_vm14 = vmpackc.low %vm1517_vm7, %vm1512_vm6  ;;  %vm2087_vm6 = vcmp.eq.s32.totalorder %v5485_v29, %v6719_v11  ;;  %vm1442_vm8 = vcmp.eq.s32.totalorder %v5482_v28, %v5408_v15  ;;  %vm2081_vm11 = vcmp.eq.s32.totalorder %v5482_v28, %v6732_v12 }
 0x129   :  { %4777 = vmatprep.subr.msk.bf16.mxu0 %vm4776_vm14, %v5310_v27  ;;  %vm4808_vm1 = vmpackc.low %vm2077_vm10, %vm2072_vm9  ;;  %1946 = vmatprep.mubr.f32.mxu0 %v6271_v0  ;;  %vm1447_vm9 = vcmp.eq.s32.totalorder %v5485_v29, %v5408_v15  ;;  %vm1532_vm14 = vcmp.eq.s32.totalorder %v5716_v46, %v5408_v15 }
 0x12a   :  { %4809 = vmatprep.subr.msk.bf16.mxu1 %vm4808_vm1, %v5310_v27  ;;  %vm4778_vm4 = vmpackc.low %vm1437_vm13, %vm1432_vm12  ;;  %2435 = vmatprep.mubr.f32.mxu1 %v6271_v0  ;;  %vm2086_vm12 = vcmp.eq.s32.totalorder %v5485_v29, %v6732_v12  ;;  %vm2092_vm1 = vcmp.eq.s32.totalorder %v5508_v30, %v6719_v11 }
 0x12b   :  { %vm4810_vm7 = vmpackc.low %vm2076_vm0, %vm2071_vm15  ;;  %vm1537_vm15 = vcmp.eq.s32.totalorder %v5719_v47, %v5408_v15 }
 0x12c   :  { %4779 = vmatpush3.bf16.msk.msra.mxu0 %vm4778_vm4, %v5310_v27  ;;  %4811 = vmatpush1.bf16.msk.msra.mxu1 %vm4810_vm7, %v5310_v27  ;;  %vm4780_vm10 = vmpackc.low %vm1527_vm3, %vm1522_vm2  ;;  %vm2097_vm2 = vcmp.eq.s32.totalorder %v5511_v31, %v6719_v11  ;;  %vm1452_vm4 = vcmp.eq.s32.totalorder %v5508_v30, %v5408_v15  ;;  %vm2091_vm7 = vcmp.eq.s32.totalorder %v5508_v30, %v6732_v12 }
 0x12d   :  { %4781 = vmatprep.subr.msk.bf16.mxu0 %vm4780_vm10, %v5310_v27  ;;  %vm4812_vm13 = vmpackc.low %vm2087_vm6, %vm2082_vm5  ;;  %vm1457_vm5 = vcmp.eq.s32.totalorder %v5511_v31, %v5408_v15  ;;  %vm1542_vm10 = vcmp.eq.s32.totalorder %v5742_v48, %v5408_v15 }
 0x12e   :  { %4813 = vmatprep.subr.msk.bf16.mxu1 %vm4812_vm13, %v5310_v27  ;;  %vm4782_vm0 = vmpackc.low %vm1447_vm9, %vm1442_vm8  ;;  %vm2096_vm8 = vcmp.eq.s32.totalorder %v5511_v31, %v6732_v12  ;;  %vm2102_vm13 = vcmp.eq.s32.totalorder %v5534_v32, %v6719_v11 }
 0x12f   :  { %vm4814_vm3 = vmpackc.low %vm2086_vm12, %vm2081_vm11  ;;  %vm1547_vm11 = vcmp.eq.s32.totalorder %v5745_v49, %v5408_v15 }
 0x130   :  { %4783 = vmatpush3.bf16.msk.msra.mxu0 %vm4782_vm0, %v5310_v27  ;;  %4815 = vmatpush1.bf16.msk.msra.mxu1 %vm4814_vm3, %v5310_v27  ;;  %vm4784_vm6 = vmpackc.low %vm1537_vm15, %vm1532_vm14  ;;  %vm2107_vm14 = vcmp.eq.s32.totalorder %v5537_v33, %v6719_v11  ;;  %vm1462_vm0 = vcmp.eq.s32.totalorder %v5534_v32, %v5408_v15  ;;  %vm2101_vm3 = vcmp.eq.s32.totalorder %v5534_v32, %v6732_v12 }
 0x131   :  { %4785 = vmatprep.subr.msk.bf16.mxu0 %vm4784_vm6, %v5310_v27  ;;  %vm4816_vm9 = vmpackc.low %vm2097_vm2, %vm2092_vm1  ;;  %vm1467_vm1 = vcmp.eq.s32.totalorder %v5537_v33, %v5408_v15  ;;  %vm1552_vm6 = vcmp.eq.s32.totalorder %v5768_v50, %v5408_v15 }
 0x132   :  { %4817 = vmatprep.subr.msk.bf16.mxu1 %vm4816_vm9, %v5310_v27  ;;  %vm4786_vm12 = vmpackc.low %vm1457_vm5, %vm1452_vm4  ;;  %vm2106_vm4 = vcmp.eq.s32.totalorder %v5537_v33, %v6732_v12  ;;  %vm2112_vm9 = vcmp.eq.s32.totalorder %v5560_v34, %v6719_v11 }
 0x133   :  { %vm4818_vm15 = vmpackc.low %vm2096_vm8, %vm2091_vm7  ;;  %vm1557_vm7 = vcmp.eq.s32.totalorder %v5771_v51, %v5408_v15 }
 0x134   :  { %4787 = vmatpush3.bf16.msk.msra.mxu0 %vm4786_vm12, %v5310_v27  ;;  %4819 = vmatpush1.bf16.msk.msra.mxu1 %vm4818_vm15, %v5310_v27  ;;  %vm4788_vm2 = vmpackc.low %vm1547_vm11, %vm1542_vm10  ;;  %vm2117_vm10 = vcmp.eq.s32.totalorder %v5563_v35, %v6719_v11  ;;  %vm1472_vm12 = vcmp.eq.s32.totalorder %v5560_v34, %v5408_v15  ;;  %vm2111_vm15 = vcmp.eq.s32.totalorder %v5560_v34, %v6732_v12 }
 0x135   :  { %4789 = vmatprep.subr.msk.bf16.mxu0 %vm4788_vm2, %v5310_v27  ;;  %vm4820_vm5 = vmpackc.low %vm2107_vm14, %vm2102_vm13  ;;  %vm1477_vm13 = vcmp.eq.s32.totalorder %v5563_v35, %v5408_v15  ;;  %vm1562_vm2 = vcmp.eq.s32.totalorder %v5794_v52, %v5408_v15 }
 0x136   :  { %4821 = vmatprep.subr.msk.bf16.mxu1 %vm4820_vm5, %v5310_v27  ;;  %vm4790_vm8 = vmpackc.low %vm1467_vm1, %vm1462_vm0  ;;  %vm2116_vm0 = vcmp.eq.s32.totalorder %v5563_v35, %v6732_v12  ;;  %vm2122_vm5 = vcmp.eq.s32.totalorder %v5586_v36, %v6719_v11 }
 0x137   :  { %vm4822_vm11 = vmpackc.low %vm2106_vm4, %vm2101_vm3  ;;  %vm1567_vm3 = vcmp.eq.s32.totalorder %v5797_v53, %v5408_v15 }
 0x138   :  { %4791 = vmatpush3.bf16.msk.msra.mxu0 %vm4790_vm8, %v5310_v27  ;;  %4823 = vmatpush1.bf16.msk.msra.mxu1 %vm4822_vm11, %v5310_v27  ;;  %vm4792_vm14 = vmpackc.low %vm1557_vm7, %vm1552_vm6  ;;  %vm2127_vm6 = vcmp.eq.s32.totalorder %v5589_v37, %v6719_v11  ;;  %vm1482_vm8 = vcmp.eq.s32.totalorder %v5586_v36, %v5408_v15  ;;  %vm2121_vm11 = vcmp.eq.s32.totalorder %v5586_v36, %v6732_v12 }
 0x139   :  { %4793 = vmatprep.subr.msk.bf16.mxu0 %vm4792_vm14, %v5310_v27  ;;  %vm4824_vm1 = vmpackc.low %vm2117_vm10, %vm2112_vm9  ;;  %vm1487_vm9 = vcmp.eq.s32.totalorder %v5589_v37, %v5408_v15  ;;  %vm2132_vm14 = vcmp.eq.s32.totalorder %v5612_v38, %v6719_v11  ;;  %v7009_v15 = vld [vmem:[#allocation8 + $0x8] sm:$0xff] }
 0x13a   :  { %4825 = vmatprep.subr.msk.bf16.mxu1 %vm4824_vm1, %v5310_v27  ;;  %vm4794_vm4 = vmpackc.low %vm1477_vm13, %vm1472_vm12  ;;  %vm2126_vm12 = vcmp.eq.s32.totalorder %v5589_v37, %v6732_v12  ;;  %vm2054_vm1 = vcmp.eq.s32.totalorder %v5380_v1, %v6919_v21 }
 0x13b   :  { %vm4826_vm7 = vmpackc.low %vm2116_vm0, %vm2111_vm15  ;;  %vm2137_vm15 = vcmp.eq.s32.totalorder %v5615_v39, %v6719_v11 }
 0x13c   :  { %4795 = vmatpush3.bf16.msk.msra.mxu0 %vm4794_vm4, %v5310_v27  ;;  %4827 = vmatpush1.bf16.msk.msra.mxu1 %vm4826_vm7, %v5310_v27  ;;  %vm4796_vm10 = vmpackc.low %vm1567_vm3, %vm1562_vm2  ;;  %vm2059_vm2 = vcmp.eq.s32.totalorder %v5411_v16, %v6919_v21  ;;  %vm2131_vm4 = vcmp.eq.s32.totalorder %v5612_v38, %v6732_v12  ;;  %vm2053_vm7 = vcmp.eq.s32.totalorder %v5380_v1, %v6933_v54 }
 0x13d   :  { %4797 = vmatprep.subr.msk.bf16.mxu0 %vm4796_vm10, %v5310_v27  ;;  %vm4828_vm13 = vmpackc.low %vm2127_vm6, %vm2122_vm5  ;;  %vm2136_vm5 = vcmp.eq.s32.totalorder %v5615_v39, %v6732_v12  ;;  %vm2142_vm10 = vcmp.eq.s32.totalorder %v5638_v40, %v6719_v11 }
 0x13e   :  { %4829 = vmatprep.subr.msk.bf16.mxu1 %vm4828_vm13, %v5310_v27  ;;  %vm4798_vm0 = vmpackc.low %vm1487_vm9, %vm1482_vm8  ;;  %vm2058_vm8 = vcmp.eq.s32.totalorder %v5411_v16, %v6933_v54  ;;  %vm2064_vm13 = vcmp.eq.s32.totalorder %v5426_v22, %v6919_v21 }
 0x13f   :  { %vm4830_vm3 = vmpackc.low %vm2126_vm12, %vm2121_vm11  ;;  %vm2147_vm11 = vcmp.eq.s32.totalorder %v5641_v41, %v6719_v11 }
 0x140   :  { %4799 = vmatpush3.bf16.msk.msra.mxu0 %vm4798_vm0, %v5310_v27  ;;  %4831 = vmatpush1.bf16.msk.msra.mxu1 %vm4830_vm3, %v5310_v27  ;;  %vm4832_vm6 = vmpackc.low %vm2137_vm15, %vm2132_vm14  ;;  %vm2069_vm14 = vcmp.eq.s32.totalorder %v5429_v23, %v6919_v21  ;;  %vm2141_vm0 = vcmp.eq.s32.totalorder %v5638_v40, %v6732_v12  ;;  %vm2063_vm3 = vcmp.eq.s32.totalorder %v5426_v22, %v6933_v54 }
 0x141   :  { %4833 = vmatprep.subr.msk.bf16.mxu1 %vm4832_vm6, %v5310_v27  ;;  %vm4864_vm9 = vmpackc.low %vm2059_vm2, %vm2054_vm1  ;;  %vm2146_vm1 = vcmp.eq.s32.totalorder %v5641_v41, %v6732_v12  ;;  %vm2152_vm6 = vcmp.eq.s32.totalorder %v5664_v42, %v6719_v11 }
 0x142   :  { %4865 = vmatprep.subr.msk.bf16.mxu0 %vm4864_vm9, %v5310_v27  ;;  %vm4834_vm12 = vmpackc.low %vm2136_vm5, %vm2131_vm4  ;;  %vm2068_vm4 = vcmp.eq.s32.totalorder %v5429_v23, %v6933_v54  ;;  %vm2074_vm9 = vcmp.eq.s32.totalorder %v5439_v25, %v6919_v21 }
 0x143   :  { %1947 = vmatmul.mubr.f32.vlgmr.msra.gmra.mrb[16].mxu0 %v6770_v13  ;;  %vm4866_vm15 = vmpackc.low %vm2058_vm8, %vm2053_vm7  ;;  %vm2157_vm7 = vcmp.eq.s32.totalorder %v5667_v43, %v6719_v11 }
 0x144   :  { %4835 = vmatpush1.bf16.msk.msra.mxu1 %vm4834_vm12, %v5310_v27  ;;  %4867 = vmatpush1.bf16.msk.msra.mxu0 %vm4866_vm15, %v5310_v27  ;;  %vm4836_vm2 = vmpackc.low %vm2147_vm11, %vm2142_vm10  ;;  %vm2079_vm10 = vcmp.eq.s32.totalorder %v5442_v26, %v6919_v21  ;;  %vm2151_vm12 = vcmp.eq.s32.totalorder %v5664_v42, %v6732_v12  ;;  %vm2073_vm15 = vcmp.eq.s32.totalorder %v5439_v25, %v6933_v54 }
 0x145   :  { %4837 = vmatprep.subr.msk.bf16.mxu1 %vm4836_vm2, %v5310_v27  ;;  %vm4868_vm5 = vmpackc.low %vm2069_vm14, %vm2064_vm13  ;;  %1951 = vmatprep.mubr.f32.mxu0 %v6789_v14  ;;  %vm2156_vm13 = vcmp.eq.s32.totalorder %v5667_v43, %v6732_v12  ;;  %vm2162_vm2 = vcmp.eq.s32.totalorder %v5690_v44, %v6719_v11 }
 0x146   :  { %4869 = vmatprep.subr.msk.bf16.mxu0 %vm4868_vm5, %v5310_v27  ;;  %vm4838_vm8 = vmpackc.low %vm2146_vm1, %vm2141_vm0  ;;  %vm2078_vm0 = vcmp.eq.s32.totalorder %v5442_v26, %v6933_v54  ;;  %vm2084_vm5 = vcmp.eq.s32.totalorder %v5482_v28, %v6919_v21 }
 0x147   :  { %vm4870_vm11 = vmpackc.low %vm2068_vm4, %vm2063_vm3  ;;  %1952 = vmatmul.mubr.f32.gmra.mrb[18].mxu0 %v6802_v17  ;;  %vm2167_vm3 = vcmp.eq.s32.totalorder %v5693_v45, %v6719_v11 }
 0x148   :  { %4839 = vmatpush1.bf16.msk.msra.mxu1 %vm4838_vm8, %v5310_v27  ;;  %4871 = vmatpush1.bf16.msk.msra.mxu0 %vm4870_vm11, %v5310_v27  ;;  %vm4840_vm14 = vmpackc.low %vm2157_vm7, %vm2152_vm6  ;;  %vm2089_vm6 = vcmp.eq.s32.totalorder %v5485_v29, %v6919_v21  ;;  %vm2161_vm8 = vcmp.eq.s32.totalorder %v5690_v44, %v6732_v12  ;;  %vm2083_vm11 = vcmp.eq.s32.totalorder %v5482_v28, %v6933_v54 }
 0x149   :  { %4841 = vmatprep.subr.msk.bf16.mxu1 %vm4840_vm14, %v5310_v27  ;;  %vm4872_vm1 = vmpackc.low %vm2079_vm10, %vm2074_vm9  ;;  %2512 = vmatprep.mubr.f32.mxu0 %v7009_v15  ;;  %vm2166_vm9 = vcmp.eq.s32.totalorder %v5693_v45, %v6732_v12  ;;  %vm2172_vm14 = vcmp.eq.s32.totalorder %v5716_v46, %v6719_v11 }
 0x14a   :  { %4873 = vmatprep.subr.msk.bf16.mxu0 %vm4872_vm1, %v5310_v27  ;;  %vm4842_vm4 = vmpackc.low %vm2156_vm13, %vm2151_vm12  ;;  %vm2088_vm12 = vcmp.eq.s32.totalorder %v5485_v29, %v6933_v54  ;;  %vm2094_vm1 = vcmp.eq.s32.totalorder %v5508_v30, %v6919_v21 }
 0x14b   :  { %vm4874_vm7 = vmpackc.low %vm2078_vm0, %vm2073_vm15  ;;  %vm2177_vm15 = vcmp.eq.s32.totalorder %v5719_v47, %v6719_v11 }
 0x14c   :  { %4843 = vmatpush1.bf16.msk.msra.mxu1 %vm4842_vm4, %v5310_v27  ;;  %4875 = vmatpush1.bf16.msk.msra.mxu0 %vm4874_vm7, %v5310_v27  ;;  %vm4844_vm10 = vmpackc.low %vm2167_vm3, %vm2162_vm2  ;;  %vm2099_vm2 = vcmp.eq.s32.totalorder %v5511_v31, %v6919_v21  ;;  %vm2171_vm4 = vcmp.eq.s32.totalorder %v5716_v46, %v6732_v12  ;;  %vm2093_vm7 = vcmp.eq.s32.totalorder %v5508_v30, %v6933_v54 }
 0x14d   :  { %4845 = vmatprep.subr.msk.bf16.mxu1 %vm4844_vm10, %v5310_v27  ;;  %vm4876_vm13 = vmpackc.low %vm2089_vm6, %vm2084_vm5  ;;  %vm2176_vm5 = vcmp.eq.s32.totalorder %v5719_v47, %v6732_v12  ;;  %vm2182_vm10 = vcmp.eq.s32.totalorder %v5742_v48, %v6719_v11 }
 0x14e   :  { %4877 = vmatprep.subr.msk.bf16.mxu0 %vm4876_vm13, %v5310_v27  ;;  %vm4846_vm0 = vmpackc.low %vm2166_vm9, %vm2161_vm8  ;;  %vm2098_vm8 = vcmp.eq.s32.totalorder %v5511_v31, %v6933_v54  ;;  %vm2104_vm13 = vcmp.eq.s32.totalorder %v5534_v32, %v6919_v21 }
 0x14f   :  { %vm4878_vm3 = vmpackc.low %vm2088_vm12, %vm2083_vm11  ;;  %vm2187_vm11 = vcmp.eq.s32.totalorder %v5745_v49, %v6719_v11 }
 0x150   :  { %4847 = vmatpush1.bf16.msk.msra.mxu1 %vm4846_vm0, %v5310_v27  ;;  %4879 = vmatpush1.bf16.msk.msra.mxu0 %vm4878_vm3, %v5310_v27  ;;  %vm4848_vm6 = vmpackc.low %vm2177_vm15, %vm2172_vm14  ;;  %vm2109_vm14 = vcmp.eq.s32.totalorder %v5537_v33, %v6919_v21  ;;  %vm2181_vm0 = vcmp.eq.s32.totalorder %v5742_v48, %v6732_v12  ;;  %vm2103_vm3 = vcmp.eq.s32.totalorder %v5534_v32, %v6933_v54 }
 0x151   :  { %4849 = vmatprep.subr.msk.bf16.mxu1 %vm4848_vm6, %v5310_v27  ;;  %vm4880_vm9 = vmpackc.low %vm2099_vm2, %vm2094_vm1  ;;  %vm2186_vm1 = vcmp.eq.s32.totalorder %v5745_v49, %v6732_v12 }
 0x152   :  { %4881 = vmatprep.subr.msk.bf16.mxu0 %vm4880_vm9, %v5310_v27  ;;  %vm4850_vm12 = vmpackc.low %vm2176_vm5, %vm2171_vm4  ;;  %vm2108_vm4 = vcmp.eq.s32.totalorder %v5537_v33, %v6933_v54  ;;  %vm2192_vm5 = vcmp.eq.s32.totalorder %v5768_v50, %v6719_v11  ;;  %vm2119_vm9 = vcmp.eq.s32.totalorder %v5563_v35, %v6919_v21 }
 0x153   :  { %vm4882_vm15 = vmpackc.low %vm2098_vm8, %vm2093_vm7  ;;  %vm2197_vm7 = vcmp.eq.s32.totalorder %v5771_v51, %v6719_v11  ;;  %vm2114_vm8 = vcmp.eq.s32.totalorder %v5560_v34, %v6919_v21 }
 0x154   :  { %4851 = vmatpush1.bf16.msk.msra.mxu1 %vm4850_vm12, %v5310_v27  ;;  %4883 = vmatpush1.bf16.msk.msra.mxu0 %vm4882_vm15, %v5310_v27  ;;  %vm4852_vm2 = vmpackc.low %vm2187_vm11, %vm2182_vm10  ;;  %vm2191_vm10 = vcmp.eq.s32.totalorder %v5768_v50, %v6732_v12  ;;  %vm2196_vm12 = vcmp.eq.s32.totalorder %v5771_v51, %v6732_v12 }
 0x155   :  { %v511_v55 = vpop.f32.mrb[0].mxu0  ;;  %4853 = vmatprep.subr.msk.bf16.mxu1 %vm4852_vm2, %v5310_v27  ;;  %vm4884_vm6 = vmpackc.low %vm2109_vm14, %vm2104_vm13  ;;  %vm2113_vm13 = vcmp.eq.s32.totalorder %v5560_v34, %v6933_v54  ;;  %vm2118_vm14 = vcmp.eq.s32.totalorder %v5563_v35, %v6933_v54 }
 0x156   :  { %v674_v56 = vsub.f32 %v511_v55, %v7060_v20  ;;  %v513_v57 = vpop.f32.mrb[1].mxu0  ;;  %4885 = vmatprep.subr.msk.bf16.mxu0 %vm4884_vm6, %v5310_v27  ;;  %vm4854_vm11 = vmpackc.low %vm2186_vm1, %vm2181_vm0  ;;  %v588_v58 = vpop.f32.mrb[0].mxu1  ;;  %vm2202_vm0 = vcmp.eq.s32.totalorder %v5794_v52, %v6719_v11  ;;  %vm2207_vm1 = vcmp.eq.s32.totalorder %v5797_v53, %v6719_v11  ;;  %vm2129_vm6 = vcmp.eq.s32.totalorder %v5589_v37, %v6919_v21 }
 0x157   :  { %v689_v59 = vsub.f32 %v513_v57, %v7060_v20  ;;  %vm4886_vm15 = vmpackc.low %vm2108_vm4, %vm2103_vm3  ;;  %v703_v60 = vsub.f32 %v588_v58, %v7060_v20  ;;  %v590_v61 = vpop.f32.mrb[1].mxu1  ;;  %vm2124_vm3 = vcmp.eq.s32.totalorder %v5586_v36, %v6919_v21 }
 0x158   :  { %v675_v62 = vmul.f32 %v674_v56, %v674_v56  ;;  %4855 = vmatpush1.bf16.msk.msra.mxu1 %vm4854_vm11, %v5310_v27  ;;  %4887 = vmatpush1.bf16.msk.msra.mxu0 %vm4886_vm15, %v5310_v27  ;;  %v717_v63 = vsub.f32 %v590_v61, %v7060_v20  ;;  %vm4856_vm2 = vmpackc.low %vm2197_vm7, %vm2192_vm5  ;;  %vm2201_vm5 = vcmp.eq.s32.totalorder %v5794_v52, %v6732_v12 }
 0x159   :  { %v690_v0 = vmul.f32 %v689_v59, %v689_v59  ;;  %v704_v2 = vmul.f32 %v703_v60, %v703_v60  ;;  %4857 = vmatprep.subr.msk.bf16.mxu1 %vm4856_vm2, %v5310_v27  ;;  %vm4888_vm4 = vmpackc.low %vm2119_vm9, %vm2114_vm8  ;;  %v7131_v3 = vpop.f32.mrb[2].mxu0  ;;  %vm2206_vm8 = vcmp.eq.s32.totalorder %v5797_v53, %v6732_v12  ;;  %vm2123_vm9 = vcmp.eq.s32.totalorder %v5586_v36, %v6933_v54 }
 0x15a   :  { %v676_v4 = vrot.slane %v675_v62, 4  ;;  %v718_v5 = vmul.f32 %v717_v63, %v717_v63  ;;  %4889 = vmatprep.subr.msk.bf16.mxu0 %vm4888_vm4, %v5310_v27  ;;  %vm4858_vm7 = vmpackc.low %vm2196_vm12, %vm2191_vm10  ;;  %v7144_v6 = vpop.f32.mrb[3].mxu0  ;;  %vm2128_vm10 = vcmp.eq.s32.totalorder %v5589_v37, %v6933_v54  ;;  %vm2134_vm12 = vcmp.eq.s32.totalorder %v5612_v38, %v6919_v21 }
 0x15b   :  { %v691_v8 = vrot.slane %v690_v0, 4  ;;  %v705_v7 = vrot.slane %v704_v2, 4  ;;  %vm4890_vm11 = vmpackc.low %vm2118_vm14, %vm2113_vm13  ;;  %vm2139_vm13 = vcmp.eq.s32.totalorder %v5615_v39, %v6919_v21  ;;  %vm2133_vm14 = vcmp.eq.s32.totalorder %v5612_v38, %v6933_v54 }
 0x15c   :  { %v677_v55 = vadd.f32 %v676_v4, %v675_v62  ;;  %v719_v56 = vrot.slane %v718_v5, 4  ;;  %4859 = vmatpush1.bf16.msk.msra.mxu1 %vm4858_vm7, %v5310_v27  ;;  %4891 = vmatpush1.bf16.msk.msra.mxu0 %vm4890_vm11, %v5310_v27  ;;  %vm4860_vm15 = vmpackc.low %vm2207_vm1, %vm2202_vm0  ;;  %v7168_v57 = vpop.f32.mrb[2].mxu1  ;;  %vm2138_vm0 = vcmp.eq.s32.totalorder %v5615_v39, %v6933_v54  ;;  %vm2135_vm1 = vcmp.eq.s32.totalorder %v5612_v38, %v5432_v24 }
 0x15d   :  { %v692_v58 = vadd.f32 %v691_v8, %v690_v0  ;;  %v706_v59 = vadd.f32 %v705_v7, %v704_v2  ;;  %4861 = vmatprep.subr.msk.bf16.mxu1 %vm4860_vm15, %v5310_v27  ;;  %vm4892_vm2 = vmpackc.low %vm2129_vm6, %vm2124_vm3  ;;  %v7181_v11 = vpop.f32.mrb[3].mxu1  ;;  %vm2140_vm3 = vcmp.eq.s32.totalorder %v5615_v39, %v5432_v24  ;;  %vm2055_vm6 = vcmp.eq.s32.totalorder %v5380_v1, %v5432_v24 }
 0x15e   :  { %v678_v60 = vrot.slane %v677_v55, 2  ;;  %v720_v61 = vadd.f32 %v719_v56, %v718_v5  ;;  %4893 = vmatprep.subr.msk.bf16.mxu0 %vm4892_vm2, %v5310_v27  ;;  %vm4862_vm4 = vmpackc.low %vm2206_vm8, %vm2201_vm5  ;;  %v7197_v62 = vstv %s8441_s0  ;;  %vm2060_vm7 = vcmp.eq.s32.totalorder %v5411_v16, %v5432_v24  ;;  %s5311_s0 = smov [#allocation9]  }
 0x15f   :  { %v693_v63 = vrot.slane %v692_v58, 2  ;;  %v707_v0 = vrot.slane %v706_v59, 2  ;;  %vm4894_vm5 = vmpackc.low %vm2128_vm10, %vm2123_vm9  ;;  %vm2144_vm11 = vcmp.eq.s32.totalorder %v5638_v40, %v6919_v21  ;;  %vm2149_vm9 = vcmp.eq.s32.totalorder %v5641_v41, %v6919_v21  ;;  %s3320_s28 = sshll.u32 %s5311_s0, 4  ;;  %s3321_s28 = int_to_ptr.vmem [resolvable:$true] %s3320_s28 }
 0x160   :  { %v679_v12 = vadd.f32 %v678_v60, %v677_v55  ;;  %v721_v2 = vrot.slane %v720_v61, 2  ;;  %4863 = vmatpush1.bf16.msk.msra.mxu1 %vm4862_vm4, %v5310_v27  ;;  %4895 = vmatpush1.bf16.msk.msra.mxu0 %vm4894_vm5, %v5310_v27  ;;  %vm4896_vm8 = vmpackc.low %vm2139_vm13, %vm2134_vm12  ;;  %vm2143_vm12 = vcmp.eq.s32.totalorder %v5638_v40, %v6933_v54  ;;  %vm2148_vm15 = vcmp.eq.s32.totalorder %v5641_v41, %v6933_v54  ;;  %s5275_s29 = scalar_lea.vmem %s3321_s28, 64  ;;  %p5280_p11 = scmp.lt.s32.totalorder %s3321_s28, %s3321_s28 }
 0x161   :  { %v694_v4 = vadd.f32 %v693_v63, %v692_v58  ;;  %v708_v5 = vadd.f32 %v707_v0, %v706_v59  ;;  %4897 = vmatprep.subr.msk.bf16.mxu0 %vm4896_vm8, %v5310_v27  ;;  %vm7226_vm10 = vmpackc.low %vm2138_vm0, %vm2133_vm14  ;;  %vm2145_vm14 = vcmp.eq.s32.totalorder %v5638_v40, %v5432_v24  ;;  %vm2150_vm2 = vcmp.eq.s32.totalorder %v5641_v41, %v5432_v24  ;;  %p5276_p10 = scmp.ne.s32.totalorder %s3321_s28, %s5275_s29  ;;  %p5281_p12 = scmp.lt.s32.totalorder %s5275_s29, %s5275_s29 }
 0x162   :  { %v680_v7 = vrot.slane %v679_v12, 1  ;;  %v722_v55 = vadd.f32 %v721_v2, %v720_v61  ;;  %vm4928_vm13 = vmpackc.low %vm2140_vm3, %vm2135_vm1  ;;  %vm2065_vm1 = vcmp.eq.s32.totalorder %v5426_v22, %v5432_v24  ;;  %vm2070_vm4 = vcmp.eq.s32.totalorder %v5429_v23, %v5432_v24 }
 0x163   :  { %v695_v56 = vrot.slane %v694_v4, 1  ;;  %v709_v58 = vrot.slane %v708_v5, 1  ;;  %2436 = vmatmul.mubr.f32.vlgmr.msra.gmra.mrb[16].mxu1 %v6770_v13  ;;  %4929 = vmatprep.subr.msk.bf16.mxu1 %vm4928_vm13, %v5310_v27  ;;  %vm4930_vm0 = vmpackc.low %vm2060_vm7, %vm2055_vm6  ;;  %vm2154_vm6 = vcmp.eq.s32.totalorder %v5664_v42, %v6919_v21  ;;  %vm2159_vm5 = vcmp.eq.s32.totalorder %v5667_v43, %v6919_v21  ;;  %p5282_p13 = por %p5281_p12, %p5280_p11 }
 0x164   :  { %v681_v59 = vadd.f32 %v680_v7, %v679_v12  ;;  %v723_v60 = vrot.slane %v722_v55, 1  ;;  %4899 = vmatpush1.bf16.msk.msra.mxu0 %vm7226_vm10, %v5310_v27  ;;  %4931 = vmatpush3.bf16.msk.msra.mxu1 %vm4930_vm0, %v5310_v27  ;;  %vm4900_vm3 = vmpackc.low %vm2149_vm9, %vm2144_vm11  ;;  %vm2153_vm8 = vcmp.eq.s32.totalorder %v5664_v42, %v6933_v54  ;;  %vm2158_vm9 = vcmp.eq.s32.totalorder %v5667_v43, %v6933_v54 }
 0x165   :  { %v696_v61 = vadd.f32 %v695_v56, %v694_v4  ;;  %v710_v63 = vadd.f32 %v709_v58, %v708_v5  ;;  %4901 = vmatprep.subr.msk.bf16.mxu0 %vm4900_vm3, %v5310_v27  ;;  %vm7277_vm7 = vmpackc.low %vm2148_vm15, %vm2143_vm12  ;;  %2441 = vmatprep.mubr.f32.mxu1 %v6789_v14  ;;  %vm2155_vm10 = vcmp.eq.s32.totalorder %v5664_v42, %v5432_v24  ;;  %p5283_p0 = pnand %p5282_p13, %p5276_p10 }
 0x166   :  { %v683_v12 = vmul.f32 %v7197_v62, %v681_v59  ;;  %v724_v2 = vadd.f32 %v723_v60, %v722_v55  ;;  %vm4932_vm11 = vmpackc.low %vm2150_vm2, %vm2145_vm14  ;;  %vm2160_vm15 = vcmp.eq.s32.totalorder %v5667_v43, %v5432_v24  ;;  %vm2075_vm14 = vcmp.eq.s32.totalorder %v5439_v25, %v5432_v24 }
 0x167   :  { %v697_v4 = vmul.f32 %v696_v61, %v7197_v62  ;;  %v711_v5 = vmul.f32 %v710_v63, %v7197_v62  ;;  %4933 = vmatprep.subr.msk.bf16.mxu1 %vm4932_vm11, %v5310_v27  ;;  %vm4934_vm12 = vmpackc.low %vm2070_vm4, %vm2065_vm1  ;;  %2442 = vmatmul.mubr.f32.gmra.mrb[18].mxu1 %v6802_v17  ;;  %vm2080_vm2 = vcmp.eq.s32.totalorder %v5442_v26, %v5432_v24  ;;  %v7380_v59 = vsub.s32 4, %v5380_v1 }
 0x168   :  { %v684_v8 = vmul.f32 1.442695, %v683_v12  ;;  %v725_v7 = vmul.f32 %v724_v2, %v7197_v62  ;;  %4903 = vmatpush1.bf16.msk.msra.mxu0 %vm7277_vm7, %v5310_v27  ;;  %4935 = vmatpush3.bf16.msk.msra.mxu1 %vm4934_vm12, %v5310_v27  ;;  %vm4904_vm13 = vmpackc.low %vm2159_vm5, %vm2154_vm6  ;;  %vm2164_vm1 = vcmp.eq.s32.totalorder %v5690_v44, %v6919_v21  ;;  %vm2169_vm4 = vcmp.eq.s32.totalorder %v5693_v45, %v6919_v21 }
 0x169   :  { %v698_v55 = vmul.f32 1.442695, %v697_v4  ;;  %v712_v56 = vmul.f32 1.442695, %v711_v5  ;;  %4905 = vmatprep.subr.msk.bf16.mxu0 %vm4904_vm13, %v5310_v27  ;;  %vm4906_vm0 = vmpackc.low %vm2158_vm9, %vm2153_vm8  ;;  %2589 = vmatprep.mubr.f32.mxu1 %v7009_v15  ;;  %vm2163_vm6 = vcmp.eq.s32.totalorder %v5690_v44, %v6933_v54  ;;  %vm2168_vm5 = vcmp.eq.s32.totalorder %v5693_v45, %v6933_v54 }
 0x16a   :  { %5145 = vpow2.f32 %v684_v8  ;;  %v726_v58 = vmul.f32 1.442695, %v725_v7  ;;  %vm4936_vm3 = vmpackc.low %vm2160_vm15, %vm2155_vm10  ;;  %vm2165_vm8 = vcmp.eq.s32.totalorder %v5690_v44, %v5432_v24  ;;  %vm2170_vm11 = vcmp.eq.s32.totalorder %v5693_v45, %v5432_v24 }
 0x16b   :  { %5147 = vpow2.f32 %v698_v55  ;;  %4937 = vmatprep.subr.msk.bf16.mxu1 %vm4936_vm3, %v5310_v27  ;;  %vm4938_vm7 = vmpackc.low %vm2080_vm2, %vm2075_vm14  ;;  %vm2085_vm10 = vcmp.eq.s32.totalorder %v5482_v28, %v5432_v24  ;;  %vm2090_vm12 = vcmp.eq.s32.totalorder %v5485_v29, %v5432_v24  ;;  %vm2174_vm13 = vcmp.eq.s32.totalorder %v5716_v46, %v6919_v21 }
 0x16c   :  { %5149 = vpow2.f32 %v712_v56  ;;  %4907 = vmatpush1.bf16.msk.msra.mxu0 %vm4906_vm0, %v5310_v27  ;;  %4939 = vmatpush3.bf16.msk.msra.mxu1 %vm4938_vm7, %v5310_v27  ;;  %vm4908_vm9 = vmpackc.low %vm2169_vm4, %vm2164_vm1  ;;  %vm2179_vm14 = vcmp.eq.s32.totalorder %v5719_v47, %v6919_v21  ;;  %vm2173_vm0 = vcmp.eq.s32.totalorder %v5716_v46, %v6933_v54  ;;  %vm2178_vm1 = vcmp.eq.s32.totalorder %v5719_v47, %v6933_v54 }
 0x16d   :  { %5151 = vpow2.f32 %v726_v58  ;;  %4909 = vmatprep.subr.msk.bf16.mxu0 %vm4908_vm9, %v5310_v27  ;;  %vm4910_vm15 = vmpackc.low %vm2168_vm5, %vm2163_vm6  ;;  %vm2175_vm3 = vcmp.eq.s32.totalorder %v5716_v46, %v5432_v24  ;;  %vm2180_vm6 = vcmp.eq.s32.totalorder %v5719_v47, %v5432_v24  ;;  %vm2095_vm7 = vcmp.eq.s32.totalorder %v5508_v30, %v5432_v24 }
 0x16e   :  { %vm4940_vm2 = vmpackc.low %vm2170_vm11, %vm2165_vm8  ;;  %vm2100_vm8 = vcmp.eq.s32.totalorder %v5511_v31, %v5432_v24  ;;  %vm2184_vm9 = vcmp.eq.s32.totalorder %v5742_v48, %v6919_v21  ;;  %v7404_v60 = vrot.slane %v6693_v9, %v7380_v59  ;;  %v7409_v61 = vrot.slane %v2027_v10, %v7380_v59 }
 0x16f   :  { %4941 = vmatprep.subr.msk.bf16.mxu1 %vm4940_vm2, %v5310_v27  ;;  %vm4942_vm4 = vmpackc.low %vm2090_vm12, %vm2085_vm10  ;;  %vm2189_vm10 = vcmp.eq.s32.totalorder %v5745_v49, %v6919_v21  ;;  %vm2185_vm2 = vcmp.eq.s32.totalorder %v5742_v48, %v5432_v24 }
 0x170   :  { %4911 = vmatpush1.bf16.msk.msra.mxu0 %vm4910_vm15, %v5310_v27  ;;  %4943 = vmatpush3.bf16.msk.msra.mxu1 %vm4942_vm4, %v5310_v27  ;;  %vm4912_vm5 = vmpackc.low %vm2179_vm14, %vm2174_vm13  ;;  %vm2183_vm15 = vcmp.eq.s32.totalorder %v5742_v48, %v6933_v54  ;;  %vm2188_vm13 = vcmp.eq.s32.totalorder %v5745_v49, %v6933_v54  ;;  %vm2105_vm4 = vcmp.eq.s32.totalorder %v5534_v32, %v5432_v24 }
 0x171   :  { %4913 = vmatprep.subr.msk.bf16.mxu0 %vm4912_vm5, %v5310_v27  ;;  %vm4914_vm11 = vmpackc.low %vm2178_vm1, %vm2173_vm0  ;;  %vm2190_vm0 = vcmp.eq.s32.totalorder %v5745_v49, %v5432_v24 }
 0x172   :  { %vm4944_vm12 = vmpackc.low %vm2180_vm6, %vm2175_vm3  ;;  %vm2110_vm3 = vcmp.eq.s32.totalorder %v5537_v33, %v5432_v24  ;;  %vm2194_vm6 = vcmp.eq.s32.totalorder %v5768_v50, %v6919_v21 }
 0x173   :  { %4945 = vmatprep.subr.msk.bf16.mxu1 %vm4944_vm12, %v5310_v27  ;;  %vm4946_vm14 = vmpackc.low %vm2100_vm8, %vm2095_vm7  ;;  %vm2199_vm7 = vcmp.eq.s32.totalorder %v5771_v51, %v6919_v21  ;;  %vm2193_vm8 = vcmp.eq.s32.totalorder %v5768_v50, %v6933_v54  ;;  %vm2200_vm12 = vcmp.eq.s32.totalorder %v5771_v51, %v5432_v24 }
 0x174   :  { %v5146_v63 = vpop.eup %5145  ;;  %4915 = vmatpush1.bf16.msk.msra.mxu0 %vm4914_vm11, %v5310_v27  ;;  %4947 = vmatpush3.bf16.msk.msra.mxu1 %vm4946_vm14, %v5310_v27  ;;  %vm4916_vm1 = vmpackc.low %vm2189_vm10, %vm2184_vm9  ;;  %vm2198_vm11 = vcmp.eq.s32.totalorder %v5771_v51, %v6933_v54  ;;  %vm2195_vm10 = vcmp.eq.s32.totalorder %v5768_v50, %v5432_v24  ;;  %vm2120_vm14 = vcmp.eq.s32.totalorder %v5563_v35, %v5432_v24 }
 0x175   :  { %v5148_v10 = vpop.eup %5147  ;;  %v686_v0 = vmul.f32 %v5146_v63, %v7131_v3  ;;  %v4162_v12 = vpop.f32.mrb[4].mxu0  ;;  %4917 = vmatprep.subr.msk.bf16.mxu0 %vm4916_vm1, %v5310_v27  ;;  %vm7432_vm5 = vmpackc.low %vm2188_vm13, %vm2183_vm15  ;;  %vm2115_vm13 = vcmp.eq.s32.totalorder %v5560_v34, %v5432_v24  ;;  %vm2204_vm1 = vcmp.eq.s32.totalorder %v5794_v52, %v6919_v21 }
 0x176   :  { %v5150_v3 = vpop.eup %5149  ;;  %v702_v4 = vadd.f32 %v5148_v10, %v5146_v63  ;;  %v700_v5 = vmul.f32 %v5148_v10, %v7144_v6  ;;  %v4163_v8 = vpop.f32.mrb[5].mxu0  ;;  %vm4948_vm9 = vmpackc.low %vm2190_vm0, %vm2185_vm2  ;;  %v7479_v63 = vrot.slane %v2029_v18, %v7380_v59 }
 0x177   :  { %v5152_v7 = vpop.eup %5151  ;;  %v4164_v55 = vadd.f32 %v4163_v8, %v4162_v12  ;;  %v714_v56 = vmul.f32 %v5150_v3, %v7168_v57  ;;  %4949 = vmatprep.subr.msk.bf16.mxu1 %vm4948_vm9, %v5310_v27  ;;  %vm4950_vm15 = vmpackc.low %vm2110_vm3, %vm2105_vm4  ;;  %vm2209_vm4 = vcmp.eq.s32.totalorder %v5797_v53, %v6919_v21  ;;  %v7552_v21 = vrot.slane %v2028_v19, %v7380_v59 }
 0x178   :  { %v716_v6 = vadd.f32 %v5150_v3, %v702_v4  ;;  %v701_v58 = vadd.f32 %v700_v5, %v686_v0  ;;  %4919 = vmatpush1.bf16.msk.msra.mxu0 %vm7432_vm5, %v5310_v27  ;;  %4951 = vmatpush3.bf16.msk.msra.mxu1 %vm4950_vm15, %v5310_v27  ;;  %v728_v57 = vmul.f32 %v5152_v7, %v7181_v11  ;;  %vm4920_vm2 = vmpackc.low %vm2199_vm7, %vm2194_vm6 }
 0x179   :  { %v731_v10 = vsub.f32 %v4164_v55, %v7060_v20  ;;  %4921 = vmatprep.subr.msk.bf16.mxu0 %vm4920_vm2, %v5310_v27  ;;  %vm7489_vm0 = vmpackc.low %vm2198_vm11, %vm2193_vm8  ;;  %v4165_v18 = vpop.f32.mrb[6].mxu0  ;;  %vm2203_vm6 = vcmp.eq.s32.totalorder %v5794_v52, %v6933_v54  ;;  %vm2208_vm5 = vcmp.eq.s32.totalorder %v5797_v53, %v6933_v54  ;;  %vm2205_vm8 = vcmp.eq.s32.totalorder %v5794_v52, %v5432_v24 }
 0x17a   :  { %v7497_v0 = vadd.f32 %v5152_v7, %v716_v6  ;;  %v715_v12 = vadd.f32 %v714_v56, %v701_v58  ;;  %vm4952_vm3 = vmpackc.low %vm2200_vm12, %vm2195_vm10  ;;  %v4166_v2 = vpop.f32.mrb[7].mxu0  ;;  %vm2210_vm11 = vcmp.eq.s32.totalorder %v5797_v53, %v5432_v24  ;;  %vm2125_vm10 = vcmp.eq.s32.totalorder %v5586_v36, %v5432_v24 }
 0x17b   :  { %v732_v3 = vmul.f32 %v731_v10, %v731_v10  ;;  %4953 = vmatprep.subr.msk.bf16.mxu1 %vm4952_vm3, %v5310_v27  ;;  %vm4954_vm7 = vmpackc.low %vm2120_vm14, %vm2115_vm13  ;;  %v7520_v4 = vadd.f32 %v4166_v2, %v4165_v18  ;;  %vm2130_vm12 = vcmp.eq.s32.totalorder %v5589_v37, %v5432_v24  ;;  %vm2692_vm13 = vcmp.eq.s32.totalorder %v5380_v1, %v7409_v61 }
 0x17c   :  { %v7522_v5 = vadd.f32 %v728_v57, %v715_v12  ;;  %4923 = vmatpush1.bf16.msk.msra.mxu0 %vm7489_vm0, %v5310_v27  ;;  %4955 = vmatpush3.bf16.msk.msra.mxu1 %vm4954_vm7, %v5310_v27  ;;  %vm4924_vm9 = vmpackc.low %vm2209_vm4, %vm2204_vm1  ;;  %vm2697_vm14 = vcmp.eq.s32.totalorder %v5411_v16, %v7409_v61  ;;  %vm2691_vm0 = vcmp.eq.s32.totalorder %v5380_v1, %v7404_v60 }
 0x17d   :  { %v733_v8 = vrot.slane %v732_v3, 4  ;;  %4925 = vmatprep.subr.msk.bf16.mxu0 %vm4924_vm9, %v5310_v27  ;;  %vm4926_vm15 = vmpackc.low %vm2208_vm5, %vm2203_vm6  ;;  %vm2696_vm1 = vcmp.eq.s32.totalorder %v5411_v16, %v7404_v60  ;;  %vm2702_vm3 = vcmp.eq.s32.totalorder %v5426_v22, %v7409_v61  ;;  %vm2707_vm6 = vcmp.eq.s32.totalorder %v5429_v23, %v7409_v61 }
 0x17e   :  { %vm4956_vm2 = vmpackc.low %vm2210_vm11, %vm2205_vm8  ;;  %vm2694_vm7 = vcmp.eq.s32.totalorder %v5380_v1, %v7479_v63  ;;  %vm2699_vm8 = vcmp.eq.s32.totalorder %v5411_v16, %v7479_v63  ;;  %vm2701_vm9 = vcmp.eq.s32.totalorder %v5426_v22, %v7404_v60 }
 0x17f   :  { %v734_v54 = vadd.f32 %v733_v8, %v732_v3  ;;  %4957 = vmatprep.subr.msk.bf16.mxu1 %vm4956_vm2, %v5310_v27  ;;  %vm4958_vm4 = vmpackc.low %vm2130_vm12, %vm2125_vm10  ;;  %vm2706_vm10 = vcmp.eq.s32.totalorder %v5429_v23, %v7404_v60  ;;  %vm2712_vm2 = vcmp.eq.s32.totalorder %v5439_v25, %v7409_v61 }
 0x180   :  { %4927 = vmatpush1.bf16.msk.msra.mxu0 %vm4926_vm15, %v5310_v27  ;;  %4959 = vmatpush3.bf16.msk.msra.mxu1 %vm4958_vm4, %v5310_v27  ;;  %vm4960_vm5 = vmpackc.low %vm2697_vm14, %vm2692_vm13  ;;  %vm2693_vm15 = vcmp.eq.s32.totalorder %v5380_v1, %v7552_v21  ;;  %vm2698_vm13 = vcmp.eq.s32.totalorder %v5411_v16, %v7552_v21  ;;  %vm2704_vm4 = vcmp.eq.s32.totalorder %v5426_v22, %v7479_v63 }
 0x181   :  { %v735_v24 = vrot.slane %v734_v54, 2  ;;  %4961 = vmatprep.subr.msk.bf16.mxu0 %vm4960_vm5, %v5310_v27  ;;  %vm4962_vm11 = vmpackc.low %vm2696_vm1, %vm2691_vm0  ;;  %vm2717_vm0 = vcmp.eq.s32.totalorder %v5442_v26, %v7409_v61  ;;  %vm2711_vm5 = vcmp.eq.s32.totalorder %v5439_v25, %v7404_v60 }
 0x182   :  { %vm4964_vm12 = vmpackc.low %vm2707_vm6, %vm2702_vm3  ;;  %vm2709_vm3 = vcmp.eq.s32.totalorder %v5429_v23, %v7479_v63 }
 0x183   :  { %v736_v9 = vadd.f32 %v735_v24, %v734_v54  ;;  %2513 = vmatmul.mubr.f32.vlgmr.msra.gmra.mrb[20].mxu0 %v6770_v13  ;;  %2590 = vmatmul.mubr.f32.vlgmr.msra.gmra.mrb[20].mxu1 %v6770_v13  ;;  %vm5024_vm14 = vmpackc.low %vm2699_vm8, %vm2694_vm7  ;;  %vm2716_vm7 = vcmp.eq.s32.totalorder %v5442_v26, %v7404_v60 }
 0x184   :  { %4963 = vmatpush1.bf16.msk.msra.mxu0 %vm4962_vm11, %v5310_v27  ;;  %5025 = vmatprep.subr.msk.bf16.mxu1 %vm5024_vm14, %v5310_v27  ;;  %vm7589_vm1 = vmpackc.low %vm2706_vm10, %vm2701_vm9  ;;  %vm2703_vm11 = vcmp.eq.s32.totalorder %v5426_v22, %v7552_v21  ;;  %vm2708_vm9 = vcmp.eq.s32.totalorder %v5429_v23, %v7552_v21  ;;  %vm2714_vm14 = vcmp.eq.s32.totalorder %v5439_v25, %v7479_v63 }
 0x185   :  { %v737_v13 = vrot.slane %v736_v9, 1  ;;  %4965 = vmatprep.subr.msk.bf16.mxu0 %vm4964_vm12, %v5310_v27  ;;  %vm5026_vm6 = vmpackc.low %vm2698_vm13, %vm2693_vm15  ;;  %2518 = vmatprep.mubr.f32.mxu0 %v6789_v14  ;;  %vm2722_vm12 = vcmp.eq.s32.totalorder %v5482_v28, %v7409_v61  ;;  %vm2727_vm15 = vcmp.eq.s32.totalorder %v5485_v29, %v7409_v61 }
 0x186   :  { %5027 = vmatpush1.bf16.msk.msra.mxu1 %vm5026_vm6, %v5310_v27  ;;  %vm7607_vm8 = vmpackc.low %vm2717_vm0, %vm2712_vm2  ;;  %2594 = vmatprep.mubr.f32.mxu1 %v6789_v14  ;;  %vm2719_vm2 = vcmp.eq.s32.totalorder %v5442_v26, %v7479_v63  ;;  %vm2713_vm6 = vcmp.eq.s32.totalorder %v5439_v25, %v7552_v21 }
 0x187   :  { %v738_v55 = vadd.f32 %v737_v13, %v736_v9  ;;  %vm5028_vm10 = vmpackc.low %vm2709_vm3, %vm2704_vm4  ;;  %2519 = vmatmul.mubr.f32.gmra.mrb[22].mxu0 %v6802_v17  ;;  %2595 = vmatmul.mubr.f32.gmra.mrb[22].mxu1 %v6802_v17  ;;  %vm2726_vm4 = vcmp.eq.s32.totalorder %v5485_v29, %v7404_v60 }
 0x188   :  { %4967 = vmatpush1.bf16.msk.msra.mxu0 %vm7589_vm1, %v5310_v27  ;;  %5029 = vmatprep.subr.msk.bf16.mxu1 %vm5028_vm10, %v5310_v27  ;;  %vm7632_vm13 = vmpackc.low %vm2716_vm7, %vm2711_vm5  ;;  %vm2721_vm1 = vcmp.eq.s32.totalorder %v5482_v28, %v7404_v60  ;;  %vm2718_vm5 = vcmp.eq.s32.totalorder %v5442_v26, %v7552_v21  ;;  %vm2724_vm10 = vcmp.eq.s32.totalorder %v5482_v28, %v7479_v63 }
 0x189   :  { %v739_v17 = vmul.f32 %v738_v55, %v7197_v62  ;;  %4969 = vmatprep.subr.msk.bf16.mxu0 %vm7607_vm8, %v5310_v27  ;;  %vm5030_vm0 = vmpackc.low %vm2708_vm9, %vm2703_vm11  ;;  %3075 = vmatprep.mubr.f32.mxu0 %v7009_v15  ;;  %vm2732_vm8 = vcmp.eq.s32.totalorder %v5508_v30, %v7409_v61  ;;  %vm2737_vm11 = vcmp.eq.s32.totalorder %v5511_v31, %v7409_v61 }
 0x18a   :  { %5031 = vmatpush1.bf16.msk.msra.mxu1 %vm5030_vm0, %v5310_v27  ;;  %vm4972_vm3 = vmpackc.low %vm2727_vm15, %vm2722_vm12  ;;  %3152 = vmatprep.mubr.f32.mxu1 %v7009_v15  ;;  %vm2729_vm12 = vcmp.eq.s32.totalorder %v5485_v29, %v7479_v63  ;;  %vm2723_vm0 = vcmp.eq.s32.totalorder %v5482_v28, %v7552_v21 }
 0x18b   :  { %v740_v56 = vmul.f32 1.442695, %v739_v17  ;;  %vm5032_vm7 = vmpackc.low %vm2719_vm2, %vm2714_vm14  ;;  %vm2731_vm14 = vcmp.eq.s32.totalorder %v5508_v30, %v7404_v60  ;;  %vm2736_vm2 = vcmp.eq.s32.totalorder %v5511_v31, %v7404_v60 }
 0x18c   :  { %4971 = vmatpush1.bf16.msk.msra.mxu0 %vm7632_vm13, %v5310_v27  ;;  %5033 = vmatprep.subr.msk.bf16.mxu1 %vm5032_vm7, %v5310_v27  ;;  %vm4974_vm9 = vmpackc.low %vm2726_vm4, %vm2721_vm1  ;;  %vm2728_vm1 = vcmp.eq.s32.totalorder %v5485_v29, %v7552_v21  ;;  %vm2734_vm7 = vcmp.eq.s32.totalorder %v5508_v30, %v7479_v63 }
 0x18d   :  { %5153 = vpow2.f32 %v740_v56  ;;  %4973 = vmatprep.subr.msk.bf16.mxu0 %vm4972_vm3, %v5310_v27  ;;  %vm5034_vm15 = vmpackc.low %vm2718_vm5, %vm2713_vm6  ;;  %vm2742_vm3 = vcmp.eq.s32.totalorder %v5534_v32, %v7409_v61  ;;  %vm2747_vm6 = vcmp.eq.s32.totalorder %v5537_v33, %v7409_v61 }
 0x18e   :  { %5035 = vmatpush1.bf16.msk.msra.mxu1 %vm5034_vm15, %v5310_v27  ;;  %vm4976_vm13 = vmpackc.low %vm2737_vm11, %vm2732_vm8  ;;  %vm2739_vm8 = vcmp.eq.s32.totalorder %v5511_v31, %v7479_v63  ;;  %vm2733_vm15 = vcmp.eq.s32.totalorder %v5508_v30, %v7552_v21 }
 0x18f   :  { %vm5036_vm4 = vmpackc.low %vm2729_vm12, %vm2724_vm10  ;;  %vm2741_vm10 = vcmp.eq.s32.totalorder %v5534_v32, %v7404_v60  ;;  %vm2746_vm12 = vcmp.eq.s32.totalorder %v5537_v33, %v7404_v60 }
 0x190   :  { %4975 = vmatpush1.bf16.msk.msra.mxu0 %vm4974_vm9, %v5310_v27  ;;  %5037 = vmatprep.subr.msk.bf16.mxu1 %vm5036_vm4, %v5310_v27  ;;  %vm4978_vm5 = vmpackc.low %vm2736_vm2, %vm2731_vm14  ;;  %vm2738_vm14 = vcmp.eq.s32.totalorder %v5511_v31, %v7552_v21  ;;  %vm2744_vm4 = vcmp.eq.s32.totalorder %v5534_v32, %v7479_v63 }
 0x191   :  { %4977 = vmatprep.subr.msk.bf16.mxu0 %vm4976_vm13, %v5310_v27  ;;  %vm5038_vm11 = vmpackc.low %vm2728_vm1, %vm2723_vm0  ;;  %vm2752_vm13 = vcmp.eq.s32.totalorder %v5560_v34, %v7409_v61  ;;  %vm2757_vm0 = vcmp.eq.s32.totalorder %v5563_v35, %v7409_v61 }
 0x192   :  { %5039 = vmatpush1.bf16.msk.msra.mxu1 %vm5038_vm11, %v5310_v27  ;;  %vm4980_vm9 = vmpackc.low %vm2747_vm6, %vm2742_vm3  ;;  %vm2749_vm3 = vcmp.eq.s32.totalorder %v5537_v33, %v7479_v63  ;;  %vm2743_vm11 = vcmp.eq.s32.totalorder %v5534_v32, %v7552_v21 }
 0x193   :  { %vm5040_vm2 = vmpackc.low %vm2739_vm8, %vm2734_vm7  ;;  %vm2751_vm7 = vcmp.eq.s32.totalorder %v5560_v34, %v7404_v60 }
 0x194   :  { %4979 = vmatpush1.bf16.msk.msra.mxu0 %vm4978_vm5, %v5310_v27  ;;  %5041 = vmatprep.subr.msk.bf16.mxu1 %vm5040_vm2, %v5310_v27  ;;  %vm7715_vm1 = vmpackc.low %vm2746_vm12, %vm2741_vm10  ;;  %vm2756_vm5 = vcmp.eq.s32.totalorder %v5563_v35, %v7404_v60  ;;  %vm2748_vm10 = vcmp.eq.s32.totalorder %v5537_v33, %v7552_v21  ;;  %vm2762_vm12 = vcmp.eq.s32.totalorder %v5586_v36, %v7409_v61 }
 0x195   :  { %4981 = vmatprep.subr.msk.bf16.mxu0 %vm4980_vm9, %v5310_v27  ;;  %vm5042_vm6 = vmpackc.low %vm2738_vm14, %vm2733_vm15  ;;  %vm2767_vm15 = vcmp.eq.s32.totalorder %v5589_v37, %v7409_v61  ;;  %vm2754_vm14 = vcmp.eq.s32.totalorder %v5560_v34, %v7479_v63  ;;  %vm2759_vm2 = vcmp.eq.s32.totalorder %v5563_v35, %v7479_v63 }
 0x196   :  { %v1153_v6 = vpop.f32.mrb[4].mxu1  ;;  %5043 = vmatpush1.bf16.msk.msra.mxu1 %vm5042_vm6, %v5310_v27  ;;  %vm7729_vm8 = vmpackc.low %vm2757_vm0, %vm2752_vm13  ;;  %vm2753_vm6 = vcmp.eq.s32.totalorder %v5560_v34, %v7552_v21 }
 0x197   :  { %v5154_v57 = vpop.eup %5153  ;;  %v1316_v10 = vsub.f32 %v1153_v6, %v7060_v20  ;;  %v1155_v11 = vpop.f32.mrb[5].mxu1  ;;  %vm5044_vm9 = vmpackc.low %vm2749_vm3, %vm2744_vm4  ;;  %vm2766_vm4 = vcmp.eq.s32.totalorder %v5589_v37, %v7404_v60 }
 0x198   :  { %v742_v18 = vmul.f32 %v5154_v57, %v7520_v4  ;;  %v7751_v12 = vadd.f32 %v5154_v57, %v7497_v0  ;;  %v1330_v2 = vsub.f32 %v1155_v11, %v7060_v20  ;;  %4983 = vmatpush1.bf16.msk.msra.mxu0 %vm7715_vm1, %v5310_v27  ;;  %5045 = vmatprep.subr.msk.bf16.mxu1 %vm5044_vm9, %v5310_v27  ;;  %vm7764_vm13 = vmpackc.low %vm2756_vm5, %vm2751_vm7  ;;  %v66_v4 = vld [vmem:[#allocation3 + $0x18] sm:$0x1] }
 0x199   :  { %v1317_v0 = vmul.f32 %v1316_v10, %v1316_v10  ;;  %4985 = vmatprep.subr.msk.bf16.mxu0 %vm7729_vm8, %v5310_v27  ;;  %vm5046_vm0 = vmpackc.low %vm2748_vm10, %vm2743_vm11  ;;  %vm2761_vm1 = vcmp.eq.s32.totalorder %v5586_v36, %v7404_v60  ;;  %vm2758_vm7 = vcmp.eq.s32.totalorder %v5563_v35, %v7552_v21  ;;  %vm2772_vm8 = vcmp.eq.s32.totalorder %v5612_v38, %v7409_v61 }
 0x19a   :  { %v1331_v20 = vmul.f32 %v1330_v2, %v1330_v2  ;;  %5047 = vmatpush1.bf16.msk.msra.mxu1 %vm5046_vm0, %v5310_v27  ;;  %vm7788_vm3 = vmpackc.low %vm2767_vm15, %vm2762_vm12  ;;  %v7797_v8 = vadd.f32 %v742_v18, %v7522_v5  ;;  %v7799_v54 = vpop.f32.mrb[6].mxu1  ;;  %vm2777_vm11 = vcmp.eq.s32.totalorder %v5615_v39, %v7409_v61  ;;  %vm2764_vm12 = vcmp.eq.s32.totalorder %v5586_v36, %v7479_v63 }
 0x19b   :  { %v1318_v24 = vrot.slane %v1317_v0, 4  ;;  %vm5048_vm5 = vmpackc.low %vm2759_vm2, %vm2754_vm14  ;;  %v7811_v9 = vpop.f32.mrb[7].mxu1  ;;  %vm2769_vm9 = vcmp.eq.s32.totalorder %v5589_v37, %v7479_v63  ;;  %vm2771_vm14 = vcmp.eq.s32.totalorder %v5612_v38, %v7404_v60  ;;  %vm2776_vm2 = vcmp.eq.s32.totalorder %v5615_v39, %v7404_v60 }
 0x19c   :  { %v1332_v5 = vrot.slane %v1331_v20, 4  ;;  %4987 = vmatpush1.bf16.msk.msra.mxu0 %vm7764_vm13, %v5310_v27  ;;  %5049 = vmatprep.subr.msk.bf16.mxu1 %vm5048_vm5, %v5310_v27  ;;  %vm7823_vm10 = vmpackc.low %vm2766_vm4, %vm2761_vm1  ;;  %vm2763_vm0 = vcmp.eq.s32.totalorder %v5586_v36, %v7552_v21  ;;  %vm2768_vm1 = vcmp.eq.s32.totalorder %v5589_v37, %v7552_v21  ;;  %vm2774_vm5 = vcmp.eq.s32.totalorder %v5612_v38, %v7479_v63 }
 0x19d   :  { %v1319_v13 = vadd.f32 %v1318_v24, %v1317_v0  ;;  %4989 = vmatprep.subr.msk.bf16.mxu0 %vm7788_vm3, %v5310_v27  ;;  %vm5050_vm15 = vmpackc.low %vm2758_vm7, %vm2753_vm6  ;;  %vm2782_vm3 = vcmp.eq.s32.totalorder %v5638_v40, %v7409_v61  ;;  %vm2787_vm6 = vcmp.eq.s32.totalorder %v5641_v41, %v7409_v61  ;;  %v2670_v24 = vrot.slane %v66_v4, 4 }
 0x19e   :  { %v1333_v7 = vadd.f32 %v1332_v5, %v1331_v20  ;;  %5051 = vmatpush1.bf16.msk.msra.mxu1 %vm5050_vm15, %v5310_v27  ;;  %vm4992_vm13 = vmpackc.low %vm2777_vm11, %vm2772_vm8  ;;  %vm2779_vm8 = vcmp.eq.s32.totalorder %v5615_v39, %v7479_v63  ;;  %vm2773_vm15 = vcmp.eq.s32.totalorder %v5612_v38, %v7552_v21 }
 0x19f   :  { %v1320_v55 = vrot.slane %v1319_v13, 2  ;;  %vm5052_vm4 = vmpackc.low %vm2769_vm9, %vm2764_vm12  ;;  %vm2781_vm12 = vcmp.eq.s32.totalorder %v5638_v40, %v7404_v60  ;;  %v7990_v5 = vrot.slane %v2670_v24, %v7380_v59 }
 0x1a0   :  { %v1334_v14 = vrot.slane %v1333_v7, 2  ;;  %4991 = vmatpush1.bf16.msk.msra.mxu0 %vm7823_vm10, %v5310_v27  ;;  %5053 = vmatprep.subr.msk.bf16.mxu1 %vm5052_vm4, %v5310_v27  ;;  %vm7863_vm7 = vmpackc.low %vm2776_vm2, %vm2771_vm14  ;;  %vm2786_vm10 = vcmp.eq.s32.totalorder %v5641_v41, %v7404_v60  ;;  %vm2778_vm14 = vcmp.eq.s32.totalorder %v5615_v39, %v7552_v21  ;;  %vm2784_vm4 = vcmp.eq.s32.totalorder %v5638_v40, %v7479_v63 }
 0x1a1   :  { %v1321_v56 = vadd.f32 %v1320_v55, %v1319_v13  ;;  %4993 = vmatprep.subr.msk.bf16.mxu0 %vm4992_vm13, %v5310_v27  ;;  %vm5054_vm11 = vmpackc.low %vm2768_vm1, %vm2763_vm0  ;;  %vm2792_vm13 = vcmp.eq.s32.totalorder %v5664_v42, %v7409_v61  ;;  %vm2797_vm0 = vcmp.eq.s32.totalorder %v5667_v43, %v7409_v61 }
 0x1a2   :  { %v1335_v15 = vadd.f32 %v1334_v14, %v1333_v7  ;;  %5055 = vmatpush1.bf16.msk.msra.mxu1 %vm5054_vm11, %v5310_v27  ;;  %vm4996_vm9 = vmpackc.low %vm2787_vm6, %vm2782_vm3  ;;  %vm2789_vm3 = vcmp.eq.s32.totalorder %v5641_v41, %v7479_v63  ;;  %vm2783_vm11 = vcmp.eq.s32.totalorder %v5638_v40, %v7552_v21 }
 0x1a3   :  { %v1322_v6 = vrot.slane %v1321_v56, 1  ;;  %vm5056_vm2 = vmpackc.low %vm2779_vm8, %vm2774_vm5  ;;  %vm2791_vm5 = vcmp.eq.s32.totalorder %v5664_v42, %v7404_v60 }
 0x1a4   :  { %v1336_v58 = vrot.slane %v1335_v15, 1  ;;  %4995 = vmatpush1.bf16.msk.msra.mxu0 %vm7863_vm7, %v5310_v27  ;;  %5057 = vmatprep.subr.msk.bf16.mxu1 %vm5056_vm2, %v5310_v27  ;;  %vm7892_vm1 = vmpackc.low %vm2786_vm10, %vm2781_vm12  ;;  %vm2796_vm7 = vcmp.eq.s32.totalorder %v5667_v43, %v7404_v60  ;;  %vm2788_vm12 = vcmp.eq.s32.totalorder %v5641_v41, %v7552_v21  ;;  %vm2794_vm2 = vcmp.eq.s32.totalorder %v5664_v42, %v7479_v63 }
 0x1a5   :  { %v1323_v10 = vadd.f32 %v1322_v6, %v1321_v56  ;;  %4997 = vmatprep.subr.msk.bf16.mxu0 %vm4996_vm9, %v5310_v27  ;;  %vm5058_vm6 = vmpackc.low %vm2778_vm14, %vm2773_vm15  ;;  %vm2802_vm9 = vcmp.eq.s32.totalorder %v5690_v44, %v7409_v61  ;;  %vm2807_vm15 = vcmp.eq.s32.totalorder %v5693_v45, %v7409_v61 }
 0x1a6   :  { %v1337_v11 = vadd.f32 %v1336_v58, %v1335_v15  ;;  %5059 = vmatpush1.bf16.msk.msra.mxu1 %vm5058_vm6, %v5310_v27  ;;  %vm5000_vm8 = vmpackc.low %vm2797_vm0, %vm2792_vm13  ;;  %vm2799_vm13 = vcmp.eq.s32.totalorder %v5667_v43, %v7479_v63  ;;  %vm2793_vm6 = vcmp.eq.s32.totalorder %v5664_v42, %v7552_v21 }
 0x1a7   :  { %v1324_v18 = vmul.f32 %v1323_v10, %v7197_v62  ;;  %vm5060_vm10 = vmpackc.low %vm2789_vm3, %vm2784_vm4  ;;  %vm2801_vm4 = vcmp.eq.s32.totalorder %v5690_v44, %v7404_v60 }
 0x1a8   :  { %v1338_v2 = vmul.f32 %v1337_v11, %v7197_v62  ;;  %4999 = vmatpush1.bf16.msk.msra.mxu0 %vm7892_vm1, %v5310_v27  ;;  %5061 = vmatprep.subr.msk.bf16.mxu1 %vm5060_vm10, %v5310_v27  ;;  %vm7923_vm14 = vmpackc.low %vm2796_vm7, %vm2791_vm5  ;;  %vm2806_vm1 = vcmp.eq.s32.totalorder %v5693_v45, %v7404_v60  ;;  %vm2798_vm5 = vcmp.eq.s32.totalorder %v5667_v43, %v7552_v21 }
 0x1a9   :  { %v1325_v0 = vmul.f32 1.442695, %v1324_v18  ;;  %5001 = vmatprep.subr.msk.bf16.mxu0 %vm5000_vm8, %v5310_v27  ;;  %vm5062_vm0 = vmpackc.low %vm2788_vm12, %vm2783_vm11  ;;  %vm2812_vm8 = vcmp.eq.s32.totalorder %v5716_v46, %v7409_v61  ;;  %vm2817_vm11 = vcmp.eq.s32.totalorder %v5719_v47, %v7409_v61  ;;  %vm2804_vm10 = vcmp.eq.s32.totalorder %v5690_v44, %v7479_v63 }
 0x1aa   :  { %v1339_v20 = vmul.f32 1.442695, %v1338_v2  ;;  %5063 = vmatpush1.bf16.msk.msra.mxu1 %vm5062_vm0, %v5310_v27  ;;  %vm5004_vm3 = vmpackc.low %vm2807_vm15, %vm2802_vm9  ;;  %vm2809_vm9 = vcmp.eq.s32.totalorder %v5693_v45, %v7479_v63  ;;  %vm2803_vm0 = vcmp.eq.s32.totalorder %v5690_v44, %v7552_v21 }
 0x1ab   :  { %5155 = vpow2.f32 %v1325_v0  ;;  %vm5064_vm7 = vmpackc.low %vm2799_vm13, %vm2794_vm2  ;;  %vm2811_vm2 = vcmp.eq.s32.totalorder %v5716_v46, %v7404_v60 }
 0x1ac   :  { %5157 = vpow2.f32 %v1339_v20  ;;  %5003 = vmatpush1.bf16.msk.msra.mxu0 %vm7923_vm14, %v5310_v27  ;;  %5065 = vmatprep.subr.msk.bf16.mxu1 %vm5064_vm7, %v5310_v27  ;;  %vm5006_vm12 = vmpackc.low %vm2806_vm1, %vm2801_vm4  ;;  %vm2816_vm14 = vcmp.eq.s32.totalorder %v5719_v47, %v7404_v60  ;;  %vm2808_vm4 = vcmp.eq.s32.totalorder %v5693_v45, %v7552_v21  ;;  %vm2814_vm7 = vcmp.eq.s32.totalorder %v5716_v46, %v7479_v63  ;;  %v5208_v20 = vld [vmem:[#allocation8 + $0x8] sm:$0xff] }
 0x1ad   :  { %5005 = vmatprep.subr.msk.bf16.mxu0 %vm5004_vm3, %v5310_v27  ;;  %vm5066_vm15 = vmpackc.low %vm2798_vm5, %vm2793_vm6  ;;  %vm2822_vm3 = vcmp.eq.s32.totalorder %v5742_v48, %v7409_v61  ;;  %vm2827_vm6 = vcmp.eq.s32.totalorder %v5745_v49, %v7409_v61 }
 0x1ae   :  { %5067 = vmatpush1.bf16.msk.msra.mxu1 %vm5066_vm15, %v5310_v27  ;;  %vm5008_vm13 = vmpackc.low %vm2817_vm11, %vm2812_vm8  ;;  %vm2819_vm8 = vcmp.eq.s32.totalorder %v5719_v47, %v7479_v63  ;;  %vm2813_vm15 = vcmp.eq.s32.totalorder %v5716_v46, %v7552_v21 }
 0x1af   :  { %vm5068_vm1 = vmpackc.low %vm2809_vm9, %vm2804_vm10  ;;  %vm2821_vm10 = vcmp.eq.s32.totalorder %v5742_v48, %v7404_v60  ;;  %vm2826_vm9 = vcmp.eq.s32.totalorder %v5745_v49, %v7404_v60 }
 0x1b0   :  { %5007 = vmatpush1.bf16.msk.msra.mxu0 %vm5006_vm12, %v5310_v27  ;;  %5069 = vmatprep.subr.msk.bf16.mxu1 %vm5068_vm1, %v5310_v27  ;;  %vm5010_vm5 = vmpackc.low %vm2816_vm14, %vm2811_vm2  ;;  %vm2818_vm2 = vcmp.eq.s32.totalorder %v5719_v47, %v7552_v21  ;;  %vm2824_vm1 = vcmp.eq.s32.totalorder %v5742_v48, %v7479_v63 }
 0x1b1   :  { %5009 = vmatprep.subr.msk.bf16.mxu0 %vm5008_vm13, %v5310_v27  ;;  %vm5070_vm11 = vmpackc.low %vm2808_vm4, %vm2803_vm0  ;;  %vm2832_vm13 = vcmp.eq.s32.totalorder %v5768_v50, %v7409_v61  ;;  %vm2837_vm0 = vcmp.eq.s32.totalorder %v5771_v51, %v7409_v61 }
 0x1b2   :  { %5071 = vmatpush1.bf16.msk.msra.mxu1 %vm5070_vm11, %v5310_v27  ;;  %vm5012_vm12 = vmpackc.low %vm2827_vm6, %vm2822_vm3  ;;  %vm2829_vm3 = vcmp.eq.s32.totalorder %v5745_v49, %v7479_v63  ;;  %vm2831_vm6 = vcmp.eq.s32.totalorder %v5768_v50, %v7404_v60  ;;  %vm2828_vm11 = vcmp.eq.s32.totalorder %v5745_v49, %v7552_v21 }
 0x1b3   :  { %vm5072_vm14 = vmpackc.low %vm2819_vm8, %vm2814_vm7  ;;  %vm2823_vm8 = vcmp.eq.s32.totalorder %v5742_v48, %v7552_v21 }
 0x1b4   :  { %5011 = vmatpush1.bf16.msk.msra.mxu0 %vm5010_vm5, %v5310_v27  ;;  %5073 = vmatprep.subr.msk.bf16.mxu1 %vm5072_vm14, %v5310_v27  ;;  %vm7998_vm4 = vmpackc.low %vm2826_vm9, %vm2821_vm10  ;;  %vm2836_vm5 = vcmp.eq.s32.totalorder %v5771_v51, %v7404_v60  ;;  %vm2842_vm10 = vcmp.eq.s32.totalorder %v5794_v52, %v7409_v61  ;;  %vm2839_vm14 = vcmp.eq.s32.totalorder %v5771_v51, %v7479_v63 }
 0x1b5   :  { %v5156_v59 = vpop.eup %5155  ;;  %5013 = vmatprep.subr.msk.bf16.mxu0 %vm5012_vm12, %v5310_v27  ;;  %vm5074_vm7 = vmpackc.low %vm2818_vm2, %vm2813_vm15  ;;  %vm2847_vm12 = vcmp.eq.s32.totalorder %v5797_v53, %v7409_v61  ;;  %vm2834_vm15 = vcmp.eq.s32.totalorder %v5768_v50, %v7479_v63 }
 0x1b6   :  { %v5158_v13 = vpop.eup %5157  ;;  %v1329_v7 = vadd.f32 %v5156_v59, %v7751_v12  ;;  %v1327_v55 = vmul.f32 %v5156_v59, %v7799_v54  ;;  %v1230_v14 = vpop.f32.mrb[8].mxu0  ;;  %5075 = vmatpush1.bf16.msk.msra.mxu1 %vm5074_vm7, %v5310_v27  ;;  %vm8026_vm9 = vmpackc.low %vm2837_vm0, %vm2832_vm13  ;;  %v8035_v54 = vld [vmem:[#allocation6] sm:$0xff]  ;;  %vm2841_vm13 = vcmp.eq.s32.totalorder %v5794_v52, %v7404_v60  ;;  %vm2838_vm7 = vcmp.eq.s32.totalorder %v5771_v51, %v7552_v21 }
 0x1b7   :  { %v4200_v17 = vpop.f32.mrb[8].mxu1  ;;  %v1341_v12 = vmul.f32 %v5158_v13, %v7811_v9  ;;  %v1344_v15 = vsub.f32 %v1230_v14, %v8035_v54  ;;  %v1232_v6 = vpop.f32.mrb[9].mxu0  ;;  %vm5076_vm2 = vmpackc.low %vm2829_vm3, %vm2824_vm1  ;;  %vm2846_vm1 = vcmp.eq.s32.totalorder %v5797_v53, %v7404_v60  ;;  %vm2833_vm3 = vcmp.eq.s32.totalorder %v5768_v50, %v7552_v21 }
 0x1b8   :  { %v4201_v58 = vpop.f32.mrb[9].mxu1  ;;  %v8048_v9 = vadd.f32 %v5158_v13, %v1329_v7  ;;  %v1328_v57 = vadd.f32 %v1327_v55, %v7797_v8  ;;  %v1358_v10 = vsub.f32 %v1232_v6, %v8035_v54  ;;  %5015 = vmatpush1.bf16.msk.msra.mxu0 %vm7998_vm4, %v5310_v27  ;;  %vm8061_vm0 = vmpackc.low %vm2836_vm5, %vm2831_vm6  ;;  %5077 = vmatprep.subr.msk.bf16.mxu1 %vm5076_vm2, %v5310_v27  ;;  %v8193_v6 = vld [vmem:[#allocation8] sm:$0xff] }
 0x1b9   :  { %v4202_v11 = vadd.f32 %v4201_v58, %v4200_v17  ;;  %v1345_v2 = vmul.f32 %v1344_v15, %v1344_v15  ;;  %5017 = vmatprep.subr.msk.bf16.mxu0 %vm8026_vm9, %v5310_v27  ;;  %vm5078_vm4 = vmpackc.low %vm2828_vm11, %vm2823_vm8  ;;  %vm2844_vm8 = vcmp.eq.s32.totalorder %v5794_v52, %v7479_v63  ;;  %vm2849_vm11 = vcmp.eq.s32.totalorder %v5797_v53, %v7479_v63 }
 0x1ba   :  { %v8079_v8 = vadd.f32 %v1341_v12, %v1328_v57  ;;  %v1359_v3 = vmul.f32 %v1358_v10, %v1358_v10  ;;  %5079 = vmatpush1.bf16.msk.msra.mxu1 %vm5078_vm4, %v5310_v27  ;;  %vm8089_vm6 = vmpackc.low %vm2847_vm12, %vm2842_vm10  ;;  %v8095_v4 = vpop.f32.mrb[10].mxu0  ;;  %v4203_v24 = vpop.f32.mrb[10].mxu1  ;;  %vm2775_vm10 = vcmp.eq.s32.totalorder %v5612_v38, %v7990_v5  ;;  %vm2780_vm12 = vcmp.eq.s32.totalorder %v5615_v39, %v7990_v5  ;;  %v5206_v10 = vld [vmem:[#allocation8 + $0x18] sm:$0xf] }
 0x1bb   :  { %v1372_v0 = vsub.f32 %v4202_v11, %v8035_v54  ;;  %v1346_v19 = vrot.slane %v1345_v2, 4  ;;  %vm5080_vm5 = vmpackc.low %vm2839_vm14, %vm2834_vm15  ;;  %v8109_v61 = vpop.f32.mrb[11].mxu0  ;;  %v4204_v59 = vpop.f32.mrb[11].mxu1  ;;  %vm2843_vm2 = vcmp.eq.s32.totalorder %v5794_v52, %v7552_v21  ;;  %vm2848_vm14 = vcmp.eq.s32.totalorder %v5797_v53, %v7552_v21 }
 0x1bc   :  { %v1360_v13 = vrot.slane %v1359_v3, 4  ;;  %5019 = vmatpush1.bf16.msk.msra.mxu0 %vm8061_vm0, %v5310_v27  ;;  %5081 = vmatprep.subr.msk.bf16.mxu1 %vm5080_vm5, %v5310_v27  ;;  %vm8121_vm9 = vmpackc.low %vm2846_vm1, %vm2841_vm13  ;;  %v8127_v14 = vadd.f32 %v4204_v59, %v4203_v24  ;;  %vm2695_vm0 = vcmp.eq.s32.totalorder %v5380_v1, %v7990_v5  ;;  %vm2700_vm4 = vcmp.eq.s32.totalorder %v5411_v16, %v7990_v5 }
 0x1bd   :  { %v1373_v7 = vmul.f32 %v1372_v0, %v1372_v0  ;;  %v1347_v17 = vadd.f32 %v1346_v19, %v1345_v2  ;;  %5021 = vmatprep.subr.msk.bf16.mxu0 %vm8089_vm6, %v5310_v27  ;;  %vm5082_vm15 = vmpackc.low %vm2838_vm7, %vm2833_vm3  ;;  %vm2785_vm3 = vcmp.eq.s32.totalorder %v5638_v40, %v7990_v5  ;;  %vm2790_vm6 = vcmp.eq.s32.totalorder %v5641_v41, %v7990_v5 }
 0x1be   :  { %v1361_v60 = vadd.f32 %v1360_v13, %v1359_v3  ;;  %5083 = vmatpush1.bf16.msk.msra.mxu1 %vm5082_vm15, %v5310_v27  ;;  %vm5084_vm13 = vmpackc.low %vm2849_vm11, %vm2844_vm8  ;;  %vm2705_vm11 = vcmp.eq.s32.totalorder %v5426_v22, %v7990_v5 }
 0x1bf   :  { %v1374_v56 = vrot.slane %v1373_v7, 4  ;;  %v1348_v12 = vrot.slane %v1347_v17, 2  ;;  %5085 = vmatprep.subr.msk.bf16.mxu1 %vm5084_vm13, %v5310_v27  ;;  %vm8160_vm1 = vmpackc.low %vm2780_vm12, %vm2775_vm10  ;;  %vm2710_vm10 = vcmp.eq.s32.totalorder %v5429_v23, %v7990_v5  ;;  %vm2800_vm12 = vcmp.eq.s32.totalorder %v5667_v43, %v7990_v5  ;;  %v8236_v23 = vld [vmem:[#allocation8 + $0x10] sm:$0xf] }
 0x1c0   :  { %v1362_v1 = vrot.slane %v1361_v60, 2  ;;  %5023 = vmatpush1.bf16.msk.msra.mxu0 %vm8121_vm9, %v5310_v27  ;;  %vm5086_vm7 = vmpackc.low %vm2848_vm14, %vm2843_vm2  ;;  %vm2795_vm9 = vcmp.eq.s32.totalorder %v5664_v42, %v7990_v5  ;;  %vm2715_vm14 = vcmp.eq.s32.totalorder %v5439_v25, %v7990_v5  ;;  %vm2720_vm13 = vcmp.eq.s32.totalorder %v5442_v26, %v7990_v5 }
 0x1c1   :  { %v1375_v16 = vadd.f32 %v1374_v56, %v1373_v7  ;;  %v1349_v38 = vadd.f32 %v1348_v12, %v1347_v17  ;;  %5089 = vmatprep.subr.msk.bf16.mxu0 %vm8160_vm1, %v5310_v27  ;;  %vm8180_vm5 = vmpackc.low %vm2700_vm4, %vm2695_vm0  ;;  %vm2805_vm0 = vcmp.eq.s32.totalorder %v5690_v44, %v7990_v5  ;;  %vm2810_vm4 = vcmp.eq.s32.totalorder %v5693_v45, %v7990_v5 }
 0x1c2   :  { %v1363_v40 = vadd.f32 %v1362_v1, %v1361_v60  ;;  %5087 = vmatpush1.bf16.msk.msra.mxu1 %vm5086_vm7, %v5310_v27  ;;  %vm8185_vm8 = vmpackc.low %vm2790_vm6, %vm2785_vm3  ;;  %vm2725_vm6 = vcmp.eq.s32.totalorder %v5482_v28, %v7990_v5  ;;  %vm2730_vm7 = vcmp.eq.s32.totalorder %v5485_v29, %v7990_v5 }
 0x1c3   :  { %v1376_v41 = vrot.slane %v1375_v16, 2  ;;  %v1350_v21 = vrot.slane %v1349_v38, 1  ;;  %3076 = vmatmul.mubr.f32.vlgmr.msra.gmra.mrb[24].mxu0 %v8193_v6  ;;  %5120 = vmatprep.subr.msk.bf16.mxu1 %vm8160_vm1, %v5310_v27  ;;  %vm8216_vm15 = vmpackc.low %vm2710_vm10, %vm2705_vm11 }
 0x1c4   :  { %v1364_v58 = vrot.slane %v1363_v40, 1  ;;  %5091 = vmatpush3.bf16.msk.msra.mxu0 %vm8180_vm5, %v5310_v27  ;;  %3081 = vmatprep.mubr.f32.mxu0 %v5206_v10  ;;  %vm8220_vm2 = vmpackc.low %vm2800_vm12, %vm2795_vm9  ;;  %vm2735_vm9 = vcmp.eq.s32.totalorder %v5508_v30, %v7990_v5  ;;  %vm2740_vm12 = vcmp.eq.s32.totalorder %v5511_v31, %v7990_v5 }
 0x1c5   :  { %v1377_v57 = vadd.f32 %v1376_v41, %v1375_v16  ;;  %v1351_v11 = vadd.f32 %v1350_v21, %v1349_v38  ;;  %3153 = vmatmul.mubr.f32.vlgmr.msra.gmra.mrb[24].mxu1 %v8193_v6  ;;  %5093 = vmatprep.subr.msk.bf16.mxu0 %vm8185_vm8, %v5310_v27  ;;  %vm8255_vm1 = vmpackc.low %vm2720_vm13, %vm2715_vm14 }
 0x1c6   :  { %v1365_v43 = vadd.f32 %v1364_v58, %v1363_v40  ;;  %5128 = vmatpush3.bf16.msk.msra.mxu1 %vm8180_vm5, %v5310_v27  ;;  %3158 = vmatprep.mubr.f32.mxu1 %v5206_v10  ;;  %vm8267_vm3 = vmpackc.low %vm2810_vm4, %vm2805_vm0  ;;  %vm2815_vm5 = vcmp.eq.s32.totalorder %v5716_v46, %v7990_v5  ;;  %vm2745_vm0 = vcmp.eq.s32.totalorder %v5534_v32, %v7990_v5 }
 0x1c7   :  { %v1378_v18 = vrot.slane %v1377_v57, 1  ;;  %v1352_v22 = vmul.f32 %v1351_v11, %v7197_v62  ;;  %3082 = vmatmul.mubr.f32.gmra.mrb[26].mxu0 %v8236_v23  ;;  %5121 = vmatprep.subr.msk.bf16.mxu1 %vm8185_vm8, %v5310_v27  ;;  %vm2820_vm8 = vcmp.eq.s32.totalorder %v5719_v47, %v7990_v5  ;;  %vm5102_vm11 = vmpackc.low %vm2730_vm7, %vm2725_vm6  ;;  %vm2750_vm4 = vcmp.eq.s32.totalorder %v5537_v33, %v7990_v5 }
 0x1c8   :  { %v1366_v3 = vmul.f32 %v1365_v43, %v7197_v62  ;;  %5095 = vmatpush3.bf16.msk.msra.mxu0 %vm8216_vm15, %v5310_v27  ;;  %3229 = vmatprep.mubr.f32.mxu0 %v5208_v20  ;;  %vm8291_vm10 = vmpackc.low %vm2820_vm8, %vm2815_vm5  ;;  %vm2755_vm5 = vcmp.eq.s32.totalorder %v5560_v34, %v7990_v5  ;;  %vm2760_vm8 = vcmp.eq.s32.totalorder %v5563_v35, %v7990_v5 }
 0x1c9   :  { %v1379_v0 = vadd.f32 %v1378_v18, %v1377_v57  ;;  %v1353_v24 = vmul.f32 1.442695, %v1352_v22  ;;  %5097 = vmatprep.subr.msk.bf16.mxu0 %vm8220_vm2, %v5310_v27  ;;  %3159 = vmatmul.mubr.f32.gmra.mrb[26].mxu1 %v8236_v23  ;;  %vm8313_vm14 = vmpackc.low %vm2740_vm12, %vm2735_vm9 }
 0x1ca   :  { %v1367_v59 = vmul.f32 1.442695, %v1366_v3  ;;  %5129 = vmatpush3.bf16.msk.msra.mxu1 %vm8216_vm15, %v5310_v27  ;;  %3234 = vmatprep.mubr.f32.mxu1 %v5206_v10  ;;  %vm2825_vm15 = vcmp.eq.s32.totalorder %v5742_v48, %v7990_v5  ;;  %vm8339_vm6 = vmpackc.low %vm2750_vm4, %vm2745_vm0 }
 0x1cb   :  { %v1380_v13 = vmul.f32 %v1379_v0, %v7197_v62  ;;  %5159 = vpow2.f32 %v1353_v24  ;;  %5122 = vmatprep.subr.msk.bf16.mxu1 %vm8220_vm2, %v5310_v27  ;;  %vm2830_vm2 = vcmp.eq.s32.totalorder %v5745_v49, %v7990_v5  ;;  %vm5114_vm9 = vmpackc.low %vm2760_vm8, %vm2755_vm5 }
 0x1cc   :  { %5161 = vpow2.f32 %v1367_v59  ;;  %5099 = vmatpush3.bf16.msk.msra.mxu0 %vm8255_vm1, %v5310_v27  ;;  %vm8317_vm13 = vmpackc.low %vm2830_vm2, %vm2825_vm15  ;;  %vm2765_vm15 = vcmp.eq.s32.totalorder %v5586_v36, %v7990_v5  ;;  %vm2770_vm2 = vcmp.eq.s32.totalorder %v5589_v37, %v7990_v5 }
 0x1cd   :  { %v1381_v26 = vmul.f32 1.442695, %v1380_v13  ;;  %5101 = vmatprep.subr.msk.bf16.mxu0 %vm8267_vm3, %v5310_v27 }
 0x1ce   :  { %5130 = vmatpush3.bf16.msk.msra.mxu1 %vm8255_vm1, %v5310_v27  ;;  %vm2835_vm1 = vcmp.eq.s32.totalorder %v5768_v50, %v7990_v5 }
 0x1cf   :  { %5163 = vpow2.f32 %v1381_v26  ;;  %5123 = vmatprep.subr.msk.bf16.mxu1 %vm8267_vm3, %v5310_v27  ;;  %vm2840_vm3 = vcmp.eq.s32.totalorder %v5771_v51, %v7990_v5 }
 0x1d0   :  { %5103 = vmatpush3.bf16.msk.msra.mxu0 %vm5102_vm11, %v5310_v27  ;;  %vm8345_vm7 = vmpackc.low %vm2840_vm3, %vm2835_vm1 }
 0x1d1   :  { %5105 = vmatprep.subr.msk.bf16.mxu0 %vm8291_vm10, %v5310_v27 }
 0x1d2   :  { %5131 = vmatpush3.bf16.msk.msra.mxu1 %vm5102_vm11, %v5310_v27  ;;  %vm2845_vm11 = vcmp.eq.s32.totalorder %v5794_v52, %v7990_v5 }
 0x1d3   :  { %5124 = vmatprep.subr.msk.bf16.mxu1 %vm8291_vm10, %v5310_v27  ;;  %vm2850_vm10 = vcmp.eq.s32.totalorder %v5797_v53, %v7990_v5 }
 0x1d4   :  { %5107 = vmatpush3.bf16.msk.msra.mxu0 %vm8313_vm14, %v5310_v27  ;;  %vm5116_vm12 = vmpackc.low %vm2850_vm10, %vm2845_vm11 }
 0x1d5   :  { %v5160_v31 = vpop.eup %5159  ;;  %5109 = vmatprep.subr.msk.bf16.mxu0 %vm8317_vm13, %v5310_v27 }
 0x1d6   :  { %v5162_v33 = vpop.eup %5161  ;;  %v1357_v44 = vadd.f32 %v5160_v31, %v8048_v9  ;;  %v1355_v45 = vmul.f32 %v5160_v31, %v8095_v4  ;;  %5132 = vmatpush3.bf16.msk.msra.mxu1 %vm8313_vm14, %v5310_v27  ;;  %vm5118_vm14 = vmpackc.low %vm2770_vm2, %vm2765_vm15 }
 0x1d7   :  { %v1369_v47 = vmul.f32 %v5162_v33, %v8109_v61  ;;  %5125 = vmatprep.subr.msk.bf16.mxu1 %vm8317_vm13, %v5310_v27 }
 0x1d8   :  { %v1371_v48 = vadd.f32 %v5162_v33, %v1357_v44  ;;  %v1356_v35 = vadd.f32 %v1355_v45, %v8079_v8  ;;  %5111 = vmatpush3.bf16.msk.msra.mxu0 %vm8339_vm6, %v5310_v27 }
 0x1d9   :  { %v5164_v34 = vpop.eup %5163  ;;  %5113 = vmatprep.subr.msk.bf16.mxu0 %vm8345_vm7, %v5310_v27 }
 0x1da   :  { %v1383_v49 = vmul.f32 %v5164_v34, %v8127_v14  ;;  %v1370_v50 = vadd.f32 %v1369_v47, %v1356_v35  ;;  %v8376_v51 = vadd.f32 %v5164_v34, %v1371_v48  ;;  %5133 = vmatpush3.bf16.msk.msra.mxu1 %vm8339_vm6, %v5310_v27 }
 0x1db   :  { %5126 = vmatprep.subr.msk.bf16.mxu1 %vm8345_vm7, %v5310_v27 }
 0x1dc   :  { %5115 = vmatpush3.bf16.msk.msra.mxu0 %vm5114_vm9, %v5310_v27  ;;  %v8385_v52 = vadd.f32 %v1383_v49, %v1370_v50 }
 0x1dd   :  { %5117 = vmatprep.subr.msk.bf16.mxu0 %vm5116_vm12, %v5310_v27 }
 0x1de   :  { %5134 = vmatpush3.bf16.msk.msra.mxu1 %vm5114_vm9, %v5310_v27 }
 0x1df   :  { %5127 = vmatprep.subr.msk.bf16.mxu1 %vm5116_vm12, %v5310_v27 }
 0x1e0   :  { %5119 = vmatpush3.bf16.msk.msra.mxu0 %vm5118_vm14, %v5310_v27 }
 0x1e2   :  { %5135 = vmatpush3.bf16.msk.msra.mxu1 %vm5118_vm14, %v5310_v27 }
 0x1e3   :  { %3230 = vmatmul.mubr.f32.vlgmr.msra.gmra.mrb[28].mxu0 %v8193_v6 }
 0x1e5   :  { %3235 = vmatmul.mubr.f32.vlgmr.msra.gmra.mrb[28].mxu1 %v8236_v23 }
 0x1f6   :  { %v1794_v36 = vpop.f32.mrb[12].mxu0  ;;  %v1871_v37 = vpop.f32.mrb[12].mxu1 }
 0x1f7   :  { %v1957_v53 = vsub.f32 %v1794_v36, %v8035_v54  ;;  %v1796_v5 = vpop.f32.mrb[13].mxu0  ;;  %v1985_v9 = vsub.f32 %v1871_v37, %v8035_v54  ;;  %v1873_v8 = vpop.f32.mrb[13].mxu1 }
 0x1f8   :  { %v1971_v4 = vsub.f32 %v1796_v5, %v8035_v54  ;;  %v1999_v61 = vsub.f32 %v1873_v8, %v8035_v54 }
 0x1f9   :  { %v1958_v7 = vmul.f32 %v1957_v53, %v1957_v53  ;;  %v1986_v55 = vmul.f32 %v1985_v9, %v1985_v9 }
 0x1fa   :  { %v1972_v14 = vmul.f32 %v1971_v4, %v1971_v4  ;;  %v2000_v27 = vmul.f32 %v1999_v61, %v1999_v61  ;;  %v1800_v17 = vpop.f32.mrb[14].mxu0  ;;  %v1877_v60 = vpop.f32.mrb[14].mxu1 }
 0x1fb   :  { %v1959_v56 = vrot.slane %v1958_v7, 4  ;;  %v1987_v12 = vrot.slane %v1986_v55, 4  ;;  %v1802_v15 = vpop.f32.mrb[15].mxu0  ;;  %v1879_v1 = vpop.f32.mrb[15].mxu1 }
 0x1fc   :  { %v1973_v16 = vrot.slane %v1972_v14, 4  ;;  %v2001_v38 = vrot.slane %v2000_v27, 4 }
 0x1fd   :  { %v1960_v39 = vadd.f32 %v1959_v56, %v1958_v7  ;;  %v1988_v40 = vadd.f32 %v1987_v12, %v1986_v55 }
 0x1fe   :  { %v1974_v41 = vadd.f32 %v1973_v16, %v1972_v14  ;;  %v2002_v63 = vadd.f32 %v2001_v38, %v2000_v27 }
 0x1ff   :  { %v1961_v21 = vrot.slane %v1960_v39, 2  ;;  %v1989_v6 = vrot.slane %v1988_v40, 2 }
 0x200   :  { %v1975_v58 = vrot.slane %v1974_v41, 2  ;;  %v2003_v57 = vrot.slane %v2002_v63, 2 }
 0x201   :  { %v1962_v10 = vadd.f32 %v1961_v21, %v1960_v39  ;;  %v1990_v11 = vadd.f32 %v1989_v6, %v1988_v40 }
 0x202   :  { %v1976_v42 = vadd.f32 %v1975_v58, %v1974_v41  ;;  %v2004_v43 = vadd.f32 %v2003_v57, %v2002_v63 }
 0x203   :  { %v1963_v18 = vrot.slane %v1962_v10, 1  ;;  %v1991_v2 = vrot.slane %v1990_v11, 1 }
 0x204   :  { %v1977_v22 = vrot.slane %v1976_v42, 1  ;;  %v2005_v23 = vrot.slane %v2004_v43, 1 }
 0x205   :  { %v1964_v3 = vadd.f32 %v1963_v18, %v1962_v10  ;;  %v1992_v0 = vadd.f32 %v1991_v2, %v1990_v11 }
 0x206   :  { %v1978_v20 = vadd.f32 %v1977_v22, %v1976_v42  ;;  %v2006_v24 = vadd.f32 %v2005_v23, %v2004_v43 }
 0x207   :  { %v1965_v19 = vmul.f32 %v1964_v3, %v7197_v62  ;;  %v1993_v59 = vmul.f32 %v1992_v0, %v7197_v62 }
 0x208   :  { %v1979_v13 = vmul.f32 %v1978_v20, %v7197_v62  ;;  %v2007_v25 = vmul.f32 %v2006_v24, %v7197_v62 }
 0x209   :  { %v1966_v26 = vmul.f32 1.442695, %v1965_v19  ;;  %v1994_v28 = vmul.f32 1.442695, %v1993_v59 }
 0x20a   :  { %v1980_v29 = vmul.f32 1.442695, %v1979_v13  ;;  %v2008_v30 = vmul.f32 1.442695, %v2007_v25 }
 0x20b   :  { %5165 = vpow2.f32 %v1966_v26 }
 0x20c   :  { %5167 = vpow2.f32 %v1980_v29 }
 0x20d   :  { %5169 = vpow2.f32 %v1994_v28 }
 0x20e   :  { %5171 = vpow2.f32 %v2008_v30 }
 0x215   :  { %v5166_v31 = vpop.eup %5165 }
 0x216   :  { %v5168_v32 = vpop.eup %5167  ;;  %v1970_v33 = vadd.f32 %v5166_v31, %v8376_v51  ;;  %v1968_v44 = vmul.f32 %v5166_v31, %v1800_v17  ;;  %v4238_v45 = vpop.f32.mrb[16].mxu0 }
 0x217   :  { %v5170_v46 = vpop.eup %5169  ;;  %v1982_v47 = vmul.f32 %v5168_v32, %v1802_v15  ;;  %v4239_v34 = vpop.f32.mrb[17].mxu0 }
 0x218   :  { %v5172_v48 = vpop.eup %5171  ;;  %v1984_v35 = vadd.f32 %v5168_v32, %v1970_v33  ;;  %v1969_v49 = vadd.f32 %v1968_v44, %v8385_v52  ;;  %v4240_v50 = vadd.f32 %v4239_v34, %v4238_v45  ;;  %v1996_v36 = vmul.f32 %v5170_v46, %v1877_v60 }
 0x219   :  { %v2010_v37 = vmul.f32 %v5172_v48, %v1879_v1 }
 0x21a   :  { %v1998_v53 = vadd.f32 %v5170_v46, %v1984_v35  ;;  %v1983_v5 = vadd.f32 %v1982_v47, %v1969_v49  ;;  %v2013_v9 = vsub.f32 %v4240_v50, %v8035_v54  ;;  %v4241_v8 = vpop.f32.mrb[18].mxu0 }
 0x21b   :  { %v4242_v4 = vpop.f32.mrb[19].mxu0 }
 0x21c   :  { %v2012_v61 = vadd.f32 %v5172_v48, %v1998_v53  ;;  %v2014_v51 = vmul.f32 %v2013_v9, %v2013_v9  ;;  %v1997_v7 = vadd.f32 %v1996_v36, %v1983_v5  ;;  %v4243_v55 = vadd.f32 %v4242_v4, %v4241_v8 }
 0x21e   :  { %v2015_v14 = vrot.slane %v2014_v51, 4  ;;  %v2011_v27 = vadd.f32 %v2010_v37, %v1997_v7 }
 0x220   :  { %v2016_v17 = vadd.f32 %v2015_v14, %v2014_v51 }
 0x222   :  { %v2017_v56 = vrot.slane %v2016_v17, 2 }
 0x224   :  { %v2018_v12 = vadd.f32 %v2017_v56, %v2016_v17 }
 0x226   :  { %v2019_v15 = vrot.slane %v2018_v12, 1 }
 0x228   :  { %v2020_v52 = vadd.f32 %v2019_v15, %v2018_v12 }
 0x22a   :  { %v2021_v60 = vmul.f32 %v2020_v52, %v7197_v62 }
 0x22c   :  { %v2022_v1 = vmul.f32 1.442695, %v2021_v60 }
 0x22e   :  { %5173 = vpow2.f32 %v2022_v1 }
 0x236   :  { %v2437_v16 = vpop.f32.mrb[16].mxu1 }
 0x237   :  { %v2600_v38 = vsub.f32 %v2437_v16, %v8035_v54  ;;  %v2439_v39 = vpop.f32.mrb[17].mxu1 }
 0x238   :  { %v5174_v40 = vpop.eup %5173  ;;  %v2614_v41 = vsub.f32 %v2439_v39, %v8035_v54 }
 0x239   :  { %v2024_v63 = vmul.f32 %v5174_v40, %v4243_v55  ;;  %v2026_v21 = vadd.f32 %v5174_v40, %v2012_v61  ;;  %v2601_v6 = vmul.f32 %v2600_v38, %v2600_v38 }
 0x23a   :  { %v2615_v58 = vmul.f32 %v2614_v41, %v2614_v41  ;;  %v2443_v57 = vpop.f32.mrb[18].mxu1 }
 0x23b   :  { %v2602_v10 = vrot.slane %v2601_v6, 4  ;;  %v2025_v11 = vadd.f32 %v2024_v63, %v2011_v27  ;;  %v2445_v42 = vpop.f32.mrb[19].mxu1 }
 0x23c   :  { %v2616_v43 = vrot.slane %v2615_v58, 4 }
 0x23d   :  { %v2603_v18 = vadd.f32 %v2602_v10, %v2601_v6 }
 0x23e   :  { %v2617_v2 = vadd.f32 %v2616_v43, %v2615_v58 }
 0x23f   :  { %v2604_v22 = vrot.slane %v2603_v18, 2 }
 0x240   :  { %v2618_v23 = vrot.slane %v2617_v2, 2 }
 0x241   :  { %v2605_v3 = vadd.f32 %v2604_v22, %v2603_v18 }
 0x242   :  { %v2619_v0 = vadd.f32 %v2618_v23, %v2617_v2 }
 0x243   :  { %v2606_v20 = vrot.slane %v2605_v3, 1 }
 0x244   :  { %v2620_v24 = vrot.slane %v2619_v0, 1 }
 0x245   :  { %v2607_v19 = vadd.f32 %v2606_v20, %v2605_v3 }
 0x246   :  { %v2621_v59 = vadd.f32 %v2620_v24, %v2619_v0 }
 0x247   :  { %v2608_v13 = vmul.f32 %v2607_v19, %v7197_v62 }
 0x248   :  { %v2622_v25 = vmul.f32 %v2621_v59, %v7197_v62 }
 0x249   :  { %v2609_v26 = vmul.f32 1.442695, %v2608_v13 }
 0x24a   :  { %v2623_v28 = vmul.f32 1.442695, %v2622_v25 }
 0x24b   :  { %5175 = vpow2.f32 %v2609_v26 }
 0x24c   :  { %5177 = vpow2.f32 %v2623_v28 }
 0x255   :  { %v5176_v29 = vpop.eup %5175 }
 0x256   :  { %v5178_v30 = vpop.eup %5177  ;;  %v2613_v31 = vadd.f32 %v5176_v29, %v2026_v21  ;;  %v2611_v32 = vmul.f32 %v5176_v29, %v2443_v57  ;;  %v2514_v33 = vpop.f32.mrb[20].mxu0 }
 0x257   :  { %v4276_v44 = vpop.f32.mrb[20].mxu1  ;;  %v2625_v45 = vmul.f32 %v5178_v30, %v2445_v42  ;;  %v2628_v46 = vsub.f32 %v2514_v33, %v8035_v54  ;;  %v2516_v47 = vpop.f32.mrb[21].mxu0 }
 0x258   :  { %v4277_v34 = vpop.f32.mrb[21].mxu1  ;;  %v2627_v48 = vadd.f32 %v5178_v30, %v2613_v31  ;;  %v2612_v35 = vadd.f32 %v2611_v32, %v2025_v11  ;;  %v2642_v49 = vsub.f32 %v2516_v47, %v8035_v54 }
 0x259   :  { %v4278_v50 = vadd.f32 %v4277_v34, %v4276_v44  ;;  %v2629_v36 = vmul.f32 %v2628_v46, %v2628_v46 }
 0x25a   :  { %v2626_v37 = vadd.f32 %v2625_v45, %v2612_v35  ;;  %v2643_v53 = vmul.f32 %v2642_v49, %v2642_v49  ;;  %v2520_v9 = vpop.f32.mrb[22].mxu0  ;;  %v4279_v8 = vpop.f32.mrb[22].mxu1 }
 0x25b   :  { %v2656_v5 = vsub.f32 %v4278_v50, %v8035_v54  ;;  %v2630_v4 = vrot.slane %v2629_v36, 4  ;;  %v2522_v61 = vpop.f32.mrb[23].mxu0  ;;  %v4280_v51 = vpop.f32.mrb[23].mxu1 }
 0x25c   :  { %v2644_v7 = vrot.slane %v2643_v53, 4  ;;  %v4281_v14 = vadd.f32 %v4280_v51, %v4279_v8 }
 0x25d   :  { %v2657_v55 = vmul.f32 %v2656_v5, %v2656_v5  ;;  %v2631_v27 = vadd.f32 %v2630_v4, %v2629_v36 }
 0x25e   :  { %v2645_v17 = vadd.f32 %v2644_v7, %v2643_v53 }
 0x25f   :  { %v2658_v56 = vrot.slane %v2657_v55, 4  ;;  %v2632_v12 = vrot.slane %v2631_v27, 2 }
 0x260   :  { %v2646_v15 = vrot.slane %v2645_v17, 2 }
 0x261   :  { %v2659_v52 = vadd.f32 %v2658_v56, %v2657_v55  ;;  %v2633_v60 = vadd.f32 %v2632_v12, %v2631_v27 }
 0x262   :  { %v2647_v1 = vadd.f32 %v2646_v15, %v2645_v17 }
 0x263   :  { %v2660_v16 = vrot.slane %v2659_v52, 2  ;;  %v2634_v38 = vrot.slane %v2633_v60, 1 }
 0x264   :  { %v2648_v39 = vrot.slane %v2647_v1, 1 }
 0x265   :  { %v2661_v40 = vadd.f32 %v2660_v16, %v2659_v52  ;;  %v2635_v41 = vadd.f32 %v2634_v38, %v2633_v60 }
 0x266   :  { %v2649_v63 = vadd.f32 %v2648_v39, %v2647_v1 }
 0x267   :  { %v2662_v21 = vrot.slane %v2661_v40, 1  ;;  %v2636_v6 = vmul.f32 %v2635_v41, %v7197_v62 }
 0x268   :  { %v2650_v58 = vmul.f32 %v2649_v63, %v7197_v62 }
 0x269   :  { %v2663_v57 = vadd.f32 %v2662_v21, %v2661_v40  ;;  %v2637_v10 = vmul.f32 1.442695, %v2636_v6 }
 0x26a   :  { %v2651_v11 = vmul.f32 1.442695, %v2650_v58 }
 0x26b   :  { %v2664_v42 = vmul.f32 %v2663_v57, %v7197_v62  ;;  %5179 = vpow2.f32 %v2637_v10 }
 0x26c   :  { %5181 = vpow2.f32 %v2651_v11 }
 0x26d   :  { %v2665_v43 = vmul.f32 1.442695, %v2664_v42 }
 0x26f   :  { %5183 = vpow2.f32 %v2665_v43 }
 0x275   :  { %v5180_v18 = vpop.eup %5179 }
 0x276   :  { %v5182_v2 = vpop.eup %5181  ;;  %v2641_v22 = vadd.f32 %v5180_v18, %v2627_v48  ;;  %v2639_v23 = vmul.f32 %v5180_v18, %v2520_v9 }
 0x277   :  { %v2653_v3 = vmul.f32 %v5182_v2, %v2522_v61 }
 0x278   :  { %v2655_v20 = vadd.f32 %v5182_v2, %v2641_v22  ;;  %v2640_v24 = vadd.f32 %v2639_v23, %v2626_v37 }
 0x279   :  { %v5184_v0 = vpop.eup %5183 }
 0x27a   :  { %v2667_v19 = vmul.f32 %v5184_v0, %v4281_v14  ;;  %v2654_v59 = vadd.f32 %v2653_v3, %v2640_v24  ;;  %v2669_v13 = vadd.f32 %v5184_v0, %v2655_v20 }
 0x27c   :  { %v8416_v25 = vadd.f32 %v2667_v19, %v2654_v59 }
 0x296   :  { %v3077_v26 = vpop.f32.mrb[24].mxu0 }
 0x297   :  { %v3240_v28 = vsub.f32 %v3077_v26, %v8035_v54  ;;  %v3079_v29 = vpop.f32.mrb[25].mxu0 }
 0x298   :  { %v3254_v30 = vsub.f32 %v3079_v29, %v8035_v54  ;;  %v3154_v31 = vpop.f32.mrb[24].mxu1 }
 0x299   :  { %v3241_v32 = vmul.f32 %v3240_v28, %v3240_v28  ;;  %v3268_v33 = vsub.f32 %v3154_v31, %v8035_v54  ;;  %v3156_v44 = vpop.f32.mrb[25].mxu1 }
 0x29a   :  { %v3255_v45 = vmul.f32 %v3254_v30, %v3254_v30  ;;  %v3282_v46 = vsub.f32 %v3156_v44, %v8035_v54  ;;  %v3083_v47 = vpop.f32.mrb[26].mxu0 }
 0x29b   :  { %v3242_v34 = vrot.slane %v3241_v32, 4  ;;  %v3269_v48 = vmul.f32 %v3268_v33, %v3268_v33  ;;  %v3085_v35 = vpop.f32.mrb[27].mxu0 }
 0x29c   :  { %v3256_v49 = vrot.slane %v3255_v45, 4  ;;  %v3283_v50 = vmul.f32 %v3282_v46, %v3282_v46  ;;  %v3160_v36 = vpop.f32.mrb[26].mxu1 }
 0x29d   :  { %v3243_v37 = vadd.f32 %v3242_v34, %v3241_v32  ;;  %v3270_v53 = vrot.slane %v3269_v48, 4  ;;  %v3162_v5 = vpop.f32.mrb[27].mxu1 }
 0x29e   :  { %v3257_v9 = vadd.f32 %v3256_v49, %v3255_v45  ;;  %v3284_v8 = vrot.slane %v3283_v50, 4 }
 0x29f   :  { %v3244_v4 = vrot.slane %v3243_v37, 2  ;;  %v3271_v61 = vadd.f32 %v3270_v53, %v3269_v48 }
 0x2a0   :  { %v3258_v51 = vrot.slane %v3257_v9, 2  ;;  %v3285_v7 = vadd.f32 %v3284_v8, %v3283_v50 }
 0x2a1   :  { %v3245_v55 = vadd.f32 %v3244_v4, %v3243_v37  ;;  %v3272_v14 = vrot.slane %v3271_v61, 2 }
 0x2a2   :  { %v3259_v27 = vadd.f32 %v3258_v51, %v3257_v9  ;;  %v3286_v17 = vrot.slane %v3285_v7, 2 }
 0x2a3   :  { %v3246_v56 = vrot.slane %v3245_v55, 1  ;;  %v3273_v12 = vadd.f32 %v3272_v14, %v3271_v61 }
 0x2a4   :  { %v3260_v15 = vrot.slane %v3259_v27, 1  ;;  %v3287_v52 = vadd.f32 %v3286_v17, %v3285_v7 }
 0x2a5   :  { %v3247_v60 = vadd.f32 %v3246_v56, %v3245_v55  ;;  %v3274_v1 = vrot.slane %v3273_v12, 1 }
 0x2a6   :  { %v3261_v16 = vadd.f32 %v3260_v15, %v3259_v27  ;;  %v3288_v38 = vrot.slane %v3287_v52, 1 }
 0x2a7   :  { %v3248_v39 = vmul.f32 %v3247_v60, %v7197_v62  ;;  %v3275_v40 = vadd.f32 %v3274_v1, %v3273_v12 }
 0x2a8   :  { %v3262_v41 = vmul.f32 %v3261_v16, %v7197_v62  ;;  %v3289_v63 = vadd.f32 %v3288_v38, %v3287_v52 }
 0x2a9   :  { %v3249_v21 = vmul.f32 1.442695, %v3248_v39  ;;  %v3276_v6 = vmul.f32 %v3275_v40, %v7197_v62 }
 0x2aa   :  { %v3263_v58 = vmul.f32 1.442695, %v3262_v41  ;;  %v3290_v57 = vmul.f32 %v3289_v63, %v7197_v62 }
 0x2ab   :  { %5185 = vpow2.f32 %v3249_v21  ;;  %v3277_v10 = vmul.f32 1.442695, %v3276_v6 }
 0x2ac   :  { %5187 = vpow2.f32 %v3263_v58  ;;  %v3291_v11 = vmul.f32 1.442695, %v3290_v57 }
 0x2ad   :  { %5189 = vpow2.f32 %v3277_v10 }
 0x2ae   :  { %5191 = vpow2.f32 %v3291_v11 }
 0x2b5   :  { %v5186_v42 = vpop.eup %5185 }
 0x2b6   :  { %v5188_v43 = vpop.eup %5187  ;;  %v3253_v18 = vadd.f32 %v5186_v42, %v2669_v13  ;;  %v3251_v2 = vmul.f32 %v5186_v42, %v3083_v47  ;;  %v4314_v22 = vpop.f32.mrb[28].mxu0 }
 0x2b7   :  { %v5190_v23 = vpop.eup %5189  ;;  %v3265_v3 = vmul.f32 %v5188_v43, %v3085_v35  ;;  %v4315_v0 = vpop.f32.mrb[29].mxu0 }
 0x2b8   :  { %v5192_v20 = vpop.eup %5191  ;;  %v3267_v24 = vadd.f32 %v5188_v43, %v3253_v18  ;;  %v3252_v19 = vadd.f32 %v3251_v2, %v8416_v25  ;;  %v4316_v59 = vadd.f32 %v4315_v0, %v4314_v22  ;;  %v3279_v26 = vmul.f32 %v5190_v23, %v3160_v36  ;;  %v4317_v28 = vpop.f32.mrb[28].mxu1 }
 0x2b9   :  { %v3293_v29 = vmul.f32 %v5192_v20, %v3162_v5  ;;  %v4318_v30 = vpop.f32.mrb[29].mxu1 }
 0x2ba   :  { %v3266_v31 = vadd.f32 %v3265_v3, %v3252_v19  ;;  %v3296_v32 = vsub.f32 %v4316_v59, %v8035_v54  ;;  %v4319_v33 = vadd.f32 %v4318_v30, %v4317_v28  ;;  %v3281_v44 = vadd.f32 %v5190_v23, %v3267_v24 }
 0x2bc   :  { %v3297_v13 = vmul.f32 %v3296_v32, %v3296_v32  ;;  %v3280_v45 = vadd.f32 %v3279_v26, %v3266_v31  ;;  %v3295_v46 = vadd.f32 %v5192_v20, %v3281_v44 }
 0x2be   :  { %v3298_v47 = vrot.slane %v3297_v13, 4  ;;  %v3294_v34 = vadd.f32 %v3293_v29, %v3280_v45 }
 0x2c0   :  { %v3299_v48 = vadd.f32 %v3298_v47, %v3297_v13 }
 0x2c2   :  { %v3300_v35 = vrot.slane %v3299_v48, 2 }
 0x2c4   :  { %v3301_v49 = vadd.f32 %v3300_v35, %v3299_v48 }
 0x2c6   :  { %v3302_v50 = vrot.slane %v3301_v49, 1 }
 0x2c8   :  { %v3303_v25 = vadd.f32 %v3302_v50, %v3301_v49 }
 0x2ca   :  { %v3304_v36 = vmul.f32 %v3303_v25, %v7197_v62 }
 0x2cc   :  { %v3305_v37 = vmul.f32 1.442695, %v3304_v36 }
 0x2ce   :  { %5193 = vpow2.f32 %v3305_v37 }
 0x2d8   :  { %v5194_v53 = vpop.eup %5193 }
 0x2d9   :  { %v3307_v5 = vmul.f32 %v5194_v53, %v4319_v33  ;;  %v3309_v9 = vadd.f32 %v5194_v53, %v3295_v46 }
 0x2db   :  { %v3308_v54 = vadd.f32 %v3307_v5, %v3294_v34  ;;  %v3310_v8 = vmax.f32 %v3309_v9, 1e-15 }
 0x2dd   :  { %5195 = vrcp.f32 %v3310_v8 }
 0x2e7   :  { %v5196_v4 = vpop.eup %5195 }
 0x2e8   :  { %v3312_v61 = vmul.f32 %v5196_v4, %v3308_v54 }
 0x2ea   :  { %3313 = vst [vmem:[#allocation9] sm:$0xf] %v3312_v61 }
 0x2eb   :  { %5286 = shalt.err (!%p5283_p0)
}
 0x2ec   :  { %s5287_s6 = scalar_lea.hbm %s8445_s4, 64 }
 0x2ed   :  { %p5288_p1 = scmp.ne.s32.totalorder %s8445_s4, %s5287_s6  ;;  %p5291_p2 = scmp.lt.u32.totalorder %s5287_s6, %s8445_s4 }
 0x2ef   :  { %p5293_p3 = pnand %p5291_p2, %p5288_p1 }
 0x2f1   :  { %5296 = shalt.err (!%p5293_p3)
}
 0x2f2   :  { %3323 = dma.vmem_to_hbm [thread:$0]  %s3321_s28, 64, %s8445_s4, [#allocation5]  }
 0x2f3   :  { %5301 = dma.done.wait [#allocation5], 64  }
 0x2f4   :  { %5302 = vsyncadd [#allocation5], 4294967232 }
 0x2f5   :  { %3327 = vsyncpa [#allocation4], 1 }
 0x2f6   :  { %3328 = vsyncpa [#allocation7], 1 }
 0x2f7   :  { %3329 = vsyncpa [#allocation5], 1 }

</bundles_post_ra>
